<compile_context>
chip_gen: v7x
topology: tpu7x:2x2x1
jax: 0.10.0
libtpu: 0.0.40
codegen_flags: <defaults>
</compile_context>

<pallas_src>
import numpy as np
import jax
import jax.numpy as jnp
from jax.experimental import pallas as pl
from jax.experimental.pallas import tpu as pltpu

_LEAK = 0.2      # LeakyReLU negative slope (fixed by the module)
_LANES = 128     # TPU lane width


# --------------------------------------------------------------------------
# In-kernel helpers
# --------------------------------------------------------------------------
def _fill_padded(hp_ref, h):
    """Write h:(H, W, C) into the interior of hp_ref:(H+2, W+2, C) (bf16) and
    zero the four 1-pixel halo strips.  One dense interior store + 4 thin
    strip stores; no full-buffer zero fill, no cross-step scratch state."""
    H, W, C = h.shape
    zrow = jnp.zeros((1, W + 2, C), hp_ref.dtype)
    zcol = jnp.zeros((H, 1, C), hp_ref.dtype)
    hp_ref[0:1, :, :] = zrow                       # top halo row
    hp_ref[H + 1:H + 2, :, :] = zrow               # bottom halo row
    hp_ref[1:H + 1, 0:1, :] = zcol                 # left halo col
    hp_ref[1:H + 1, W + 1:W + 2, :] = zcol         # right halo col
    hp_ref[1:H + 1, 1:W + 1, :] = h.astype(hp_ref.dtype)   # bf16 cast here


def _conv3x3_leaky(hp_ref, h, w_ref, b_ref):
    """3x3 'same' conv + bias + LeakyReLU(0.2).

    h:      (H, W, C)     f32 activation value.
    hp_ref: (H+2, W+2, C) bf16 VMEM scratch (zero-haloed working copy).
    w_ref:  (9*C, N)      bf16 tap-major weight matrix.
    b_ref:  (1, N)        f32 bias row.
    Returns (H*W, N) f32.
    """
    H, W, C = h.shape
    N = w_ref.shape[1]
    _fill_padded(hp_ref, h)

    # Tap (dy, dx) of output pixel (y, x) is padded activation (y+dy, x+dx)
    # == input pixel (y+dy-1, x+dx-1).  9 tap *loads* -> 9 accumulated MXU
    # matmuls with f32 accumulation (K = C each).
    acc = jnp.zeros((H * W, N), jnp.float32)
    for dy in range(3):
        for dx in range(3):
            k = dy * 3 + dx
            tap = hp_ref[dy:dy + H, dx:dx + W, :].reshape(H * W, C)
            acc = acc + jnp.dot(tap, w_ref[k * C:(k + 1) * C, :],
                                preferred_element_type=jnp.float32)
    acc = acc + b_ref[...]                    # f32 epilogue
    return jnp.maximum(acc, _LEAK * acc)      # leaky relu: one VALU max


def _conv_leaky_kernel(x_ref, w1_ref, b1_ref, w2_ref, b2_ref, o_ref,
                       hp1_ref, hp2_ref):
    H, W = x_ref.shape[1], x_ref.shape[2]
    cmid = w1_ref.shape[1]
    cout = o_ref.shape[1]

    h1 = _conv3x3_leaky(hp1_ref, x_ref[0], w1_ref, b1_ref)          # (H*W, Cmid)
    h2 = _conv3x3_leaky(hp2_ref, h1.reshape(H, W, cmid),
                        w2_ref, b2_ref)                             # (H*W, Coutp)

    # On-chip transpose (both dims tile-aligned: H*W mult of 128, Coutp=128),
    # drop the padded channels BEFORE the HBM store -> lane-dense NCHW output
    # (Cout, H*W) with no zero lanes written and no wrapper transpose pass.
    h2t = h2.T                                                      # (Coutp, H*W)
    o_ref[0] = h2t[:cout, :].astype(o_ref.dtype)


# --------------------------------------------------------------------------
# Wrapper
# --------------------------------------------------------------------------
def _round_up(n, m):
    return (n + m - 1) // m * m


def _pack_conv(w_oihw, b, n_pad, mxu_dtype):
    """PyTorch (Cout, Cin, 3, 3) weight -> tap-major (9*Cin, n_pad) bf16
    matrix and a (1, n_pad) f32 bias row."""
    cout, cin = int(w_oihw.shape[0]), int(w_oihw.shape[1])
    w = jnp.transpose(w_oihw, (2, 3, 1, 0)).reshape(9 * cin, cout)  # (ky,kx,ci) x co
    b = b.reshape(1, cout)
    if n_pad > cout:
        w = jnp.pad(w, ((0, 0), (0, n_pad - cout)))
        b = jnp.pad(b, ((0, 0), (0, n_pad - cout)))
    return w.astype(mxu_dtype), b.astype(jnp.float32)


def conv_leaky_forward(params, x_nchw, *, mxu_dtype=jnp.bfloat16):
    """ConvLeaky forward.  x_nchw: (B, Cin, H, W) f32 -> (B, Cout, H, W) f32."""
    w1, b1 = params["conv1"]
    w2, b2 = params["conv2"]
    B, Cin, H, W = x_nchw.shape
    Cmid, Cout = int(w1.shape[0]), int(w2.shape[0])
    Coutp = _round_up(Cout, _LANES)        # pad conv2's N so the in-kernel
                                           # transpose is fully tile-aligned
                                           # (padding is dropped pre-store)

    w1p, b1p = _pack_conv(w1, b1, Cmid, mxu_dtype)
    w2p, b2p = _pack_conv(w2, b2, Coutp, mxu_dtype)

    x = jnp.transpose(x_nchw, (0, 2, 3, 1))          # NHWC in: channels on lanes

    out = pl.pallas_call(
        _conv_leaky_kernel,
        out_shape=jax.ShapeDtypeStruct((B, Cout, H * W), jnp.float32),
        grid=(B,),
        in_specs=[
            pl.BlockSpec((1, H, W, Cin), lambda b: (b, 0, 0, 0)),
            pl.BlockSpec((9 * Cin, Cmid), lambda b: (0, 0)),
            pl.BlockSpec((1, Cmid), lambda b: (0, 0)),
            pl.BlockSpec((9 * Cmid, Coutp), lambda b: (0, 0)),
            pl.BlockSpec((1, Coutp), lambda b: (0, 0)),
        ],
        out_specs=pl.BlockSpec((1, Cout, H * W), lambda b: (b, 0, 0)),
        scratch_shapes=[
            pltpu.VMEM((H + 2, W + 2, Cin), mxu_dtype),    # padded x (bf16)
            pltpu.VMEM((H + 2, W + 2, Cmid), mxu_dtype),   # padded h1 (bf16)
        ],
        compiler_params=pltpu.CompilerParams(
            dimension_semantics=("parallel",),
            vmem_limit_bytes=32 * 1024 * 1024,   # << usage here; raise with row tiling
        ),
    )(x, w1p, b1p, w2p, b2p)

    # Kernel already wrote NCHW with flattened spatial: free reshape only.
    return out.reshape(B, Cout, H, W)


# --------------------------------------------------------------------------
# Deterministic synthetic params (PyTorch Conv2d layout + default init)
# --------------------------------------------------------------------------
def init_conv_leaky_params(key, in_dim, out_dim):
    def one(k, cin, cout):
        kw, kb = jax.random.split(k)
        bound = 1.0 / np.sqrt(cin * 9)
        w = jax.random.uniform(kw, (cout, cin, 3, 3), jnp.float32, -bound, bound)
        b = jax.random.uniform(kb, (cout,), jnp.float32, -bound, bound)
        return w, b
    k1, k2 = jax.random.split(key)
    return {"conv1": one(k1, in_dim, out_dim),
            "conv2": one(k2, out_dim, out_dim)}


def conv_leaky_reference(params, x_nchw):
    """Pure-JAX (XLA) f32 reference matching the PyTorch module."""
    dn = ("NCHW", "OIHW", "NCHW")
    def conv(h, w, b):
        y = jax.lax.conv_general_dilated(h, w, (1, 1), ((1, 1), (1, 1)),
                                         dimension_numbers=dn)
        return y + b.reshape(1, -1, 1, 1)
    h = conv(x_nchw, *params["conv1"])
    h = jnp.maximum(h, _LEAK * h)
    h = conv(h, *params["conv2"])
    return jnp.maximum(h, _LEAK * h)


# --------------------------------------------------------------------------
if __name__ == "__main__":
    batch, in_dim, out_dim, height, width = 2, 4, 64, 16, 16

    key = jax.random.PRNGKey(0)
    params = init_conv_leaky_params(key, in_dim, out_dim)
    x = jax.random.normal(jax.random.fold_in(key, 123),
                          (batch, in_dim, height, width), jnp.float32)

    out = conv_leaky_forward(params, x)
    jax.block_until_ready(out)
    assert out.shape == (batch, out_dim, height, width)

    # Loose tolerance: kernel uses bf16 MXU operands with f32 accumulation.
    ref = conv_leaky_reference(params, x)
    np.testing.assert_allclose(np.asarray(out), np.asarray(ref),
                               rtol=2e-2, atol=2e-2)
    print("KERNEL_OK")
</pallas_src>

<mosaic_0001>
module attributes {stable_mosaic.version = 11 : i64} {
  func.func @_conv_leaky_kernel(%arg0: i32, %arg1: memref<1x16x16x4xf32, #tpu.memory_space<vmem>>, %arg2: memref<36x64xbf16, #tpu.memory_space<vmem>>, %arg3: memref<1x64xf32, #tpu.memory_space<vmem>>, %arg4: memref<576x128xbf16, #tpu.memory_space<vmem>>, %arg5: memref<1x128xf32, #tpu.memory_space<vmem>>, %arg6: memref<1x64x256xf32, #tpu.memory_space<vmem>>, %arg7: memref<18x18x4xbf16, #tpu.memory_space<vmem>>, %arg8: memref<18x18x64xbf16, #tpu.memory_space<vmem>>) attributes {dimension_semantics = [#tpu.dimension_semantics<parallel>], iteration_bounds = array<i64: 2>, scalar_prefetch = 0 : i64, scratch_operands = 2 : i64, tpu.core_type = #tpu.core_type<tc>, window_params = [{transform_indices = @transform_0, window_bounds = array<i64: 1, 16, 16, 4>}, {pipeline_mode = #tpu.pipeline_mode<synchronous>, transform_indices = @transform_1, window_bounds = array<i64: 36, 64>}, {pipeline_mode = #tpu.pipeline_mode<synchronous>, transform_indices = @transform_2, window_bounds = array<i64: 1, 64>}, {pipeline_mode = #tpu.pipeline_mode<synchronous>, transform_indices = @transform_3, window_bounds = array<i64: 576, 128>}, {pipeline_mode = #tpu.pipeline_mode<synchronous>, transform_indices = @transform_4, window_bounds = array<i64: 1, 128>}, {transform_indices = @transform_5, window_bounds = array<i64: 1, 64, 256>}]} {
    %c0 = arith.constant 0 : index
    %c0_0 = arith.constant 0 : index
    %c0_1 = arith.constant 0 : index
    %c0_2 = arith.constant 0 : index
    %0 = vector.load %arg1[%c0, %c0_0, %c0_1, %c0_2] : memref<1x16x16x4xf32, #tpu.memory_space<vmem>>, vector<1x16x16x4xf32>
    %1 = vector.shape_cast %0 : vector<1x16x16x4xf32> to vector<16x16x4xf32>
    %cst = arith.constant 0.000000e+00 : bf16
    %2 = vector.broadcast %cst : bf16 to vector<1x18x4xbf16>
    %cst_3 = arith.constant 0.000000e+00 : bf16
    %3 = vector.broadcast %cst_3 : bf16 to vector<16x1x4xbf16>
    %c0_4 = arith.constant 0 : index
    %c0_5 = arith.constant 0 : index
    %c0_6 = arith.constant 0 : index
    %4 = vector.load %arg7[%c0_4, %c0_5, %c0_6] : memref<18x18x4xbf16, #tpu.memory_space<vmem>>, vector<1x18x4xbf16>
    tpu.vector_store %arg7[%c0_4, %c0_5, %c0_6], %2 {strides = array<i32>} : memref<18x18x4xbf16, #tpu.memory_space<vmem>>, vector<1x18x4xbf16>,
    %c17 = arith.constant 17 : index
    %c0_7 = arith.constant 0 : index
    %c0_8 = arith.constant 0 : index
    %5 = vector.load %arg7[%c17, %c0_7, %c0_8] : memref<18x18x4xbf16, #tpu.memory_space<vmem>>, vector<1x18x4xbf16>
    tpu.vector_store %arg7[%c17, %c0_7, %c0_8], %2 {strides = array<i32>} : memref<18x18x4xbf16, #tpu.memory_space<vmem>>, vector<1x18x4xbf16>,
    %c1 = arith.constant 1 : index
    %c0_9 = arith.constant 0 : index
    %c0_10 = arith.constant 0 : index
    %6 = vector.load %arg7[%c1, %c0_9, %c0_10] : memref<18x18x4xbf16, #tpu.memory_space<vmem>>, vector<16x1x4xbf16>
    tpu.vector_store %arg7[%c1, %c0_9, %c0_10], %3 {strides = array<i32>} : memref<18x18x4xbf16, #tpu.memory_space<vmem>>, vector<16x1x4xbf16>,
    %c1_11 = arith.constant 1 : index
    %c17_12 = arith.constant 17 : index
    %c0_13 = arith.constant 0 : index
    %7 = vector.load %arg7[%c1_11, %c17_12, %c0_13] : memref<18x18x4xbf16, #tpu.memory_space<vmem>>, vector<16x1x4xbf16>
    tpu.vector_store %arg7[%c1_11, %c17_12, %c0_13], %3 {strides = array<i32>} : memref<18x18x4xbf16, #tpu.memory_space<vmem>>, vector<16x1x4xbf16>,
    %8 = arith.truncf %1 : vector<16x16x4xf32> to vector<16x16x4xbf16>
    %c1_14 = arith.constant 1 : index
    %c1_15 = arith.constant 1 : index
    %c0_16 = arith.constant 0 : index
    %9 = vector.load %arg7[%c1_14, %c1_15, %c0_16] : memref<18x18x4xbf16, #tpu.memory_space<vmem>>, vector<16x16x4xbf16>
    tpu.vector_store %arg7[%c1_14, %c1_15, %c0_16], %8 {strides = array<i32>} : memref<18x18x4xbf16, #tpu.memory_space<vmem>>, vector<16x16x4xbf16>,
    %cst_17 = arith.constant 0.000000e+00 : f32
    %10 = vector.broadcast %cst_17 : f32 to vector<256x64xf32>
    %c0_18 = arith.constant 0 : index
    %c0_19 = arith.constant 0 : index
    %c0_20 = arith.constant 0 : index
    %11 = vector.load %arg7[%c0_18, %c0_19, %c0_20] : memref<18x18x4xbf16, #tpu.memory_space<vmem>>, vector<16x16x4xbf16>
    %12 = vector.shape_cast %11 : vector<16x16x4xbf16> to vector<256x4xbf16>
    %c0_21 = arith.constant 0 : index
    %c0_22 = arith.constant 0 : index
    %13 = vector.load %arg2[%c0_21, %c0_22] : memref<36x64xbf16, #tpu.memory_space<vmem>>, vector<4x64xbf16>
    %cst_23 = arith.constant dense<0.000000e+00> : vector<256x64xf32>
    %14 = tpu.matmul %12, %13, %cst_23 {dimension_numbers = #tpu.dot_dimension_numbers<[1], [0], [0], [1], [0, 0, 1, 1], [], []>} : vector<256x4xbf16>, vector<4x64xbf16>, vector<256x64xf32> -> vector<256x64xf32>
    %15 = arith.addf %10, %14 : vector<256x64xf32>
    %c0_24 = arith.constant 0 : index
    %c1_25 = arith.constant 1 : index
    %c0_26 = arith.constant 0 : index
    %16 = vector.load %arg7[%c0_24, %c1_25, %c0_26] : memref<18x18x4xbf16, #tpu.memory_space<vmem>>, vector<16x16x4xbf16>
    %17 = vector.shape_cast %16 : vector<16x16x4xbf16> to vector<256x4xbf16>
    %c4 = arith.constant 4 : index
    %c0_27 = arith.constant 0 : index
    %18 = vector.load %arg2[%c4, %c0_27] : memref<36x64xbf16, #tpu.memory_space<vmem>>, vector<4x64xbf16>
    %cst_28 = arith.constant dense<0.000000e+00> : vector<256x64xf32>
    %19 = tpu.matmul %17, %18, %cst_28 {dimension_numbers = #tpu.dot_dimension_numbers<[1], [0], [0], [1], [0, 0, 1, 1], [], []>} : vector<256x4xbf16>, vector<4x64xbf16>, vector<256x64xf32> -> vector<256x64xf32>
    %20 = arith.addf %15, %19 : vector<256x64xf32>
    %c0_29 = arith.constant 0 : index
    %c2 = arith.constant 2 : index
    %c0_30 = arith.constant 0 : index
    %21 = vector.load %arg7[%c0_29, %c2, %c0_30] : memref<18x18x4xbf16, #tpu.memory_space<vmem>>, vector<16x16x4xbf16>
    %22 = vector.shape_cast %21 : vector<16x16x4xbf16> to vector<256x4xbf16>
    %c8 = arith.constant 8 : index
    %c0_31 = arith.constant 0 : index
    %23 = vector.load %arg2[%c8, %c0_31] : memref<36x64xbf16, #tpu.memory_space<vmem>>, vector<4x64xbf16>
    %cst_32 = arith.constant dense<0.000000e+00> : vector<256x64xf32>
    %24 = tpu.matmul %22, %23, %cst_32 {dimension_numbers = #tpu.dot_dimension_numbers<[1], [0], [0], [1], [0, 0, 1, 1], [], []>} : vector<256x4xbf16>, vector<4x64xbf16>, vector<256x64xf32> -> vector<256x64xf32>
    %25 = arith.addf %20, %24 : vector<256x64xf32>
    %c1_33 = arith.constant 1 : index
    %c0_34 = arith.constant 0 : index
    %c0_35 = arith.constant 0 : index
    %26 = vector.load %arg7[%c1_33, %c0_34, %c0_35] : memref<18x18x4xbf16, #tpu.memory_space<vmem>>, vector<16x16x4xbf16>
    %27 = vector.shape_cast %26 : vector<16x16x4xbf16> to vector<256x4xbf16>
    %c12 = arith.constant 12 : index
    %c0_36 = arith.constant 0 : index
    %28 = vector.load %arg2[%c12, %c0_36] : memref<36x64xbf16, #tpu.memory_space<vmem>>, vector<4x64xbf16>
    %cst_37 = arith.constant dense<0.000000e+00> : vector<256x64xf32>
    %29 = tpu.matmul %27, %28, %cst_37 {dimension_numbers = #tpu.dot_dimension_numbers<[1], [0], [0], [1], [0, 0, 1, 1], [], []>} : vector<256x4xbf16>, vector<4x64xbf16>, vector<256x64xf32> -> vector<256x64xf32>
    %30 = arith.addf %25, %29 : vector<256x64xf32>
    %c1_38 = arith.constant 1 : index
    %c1_39 = arith.constant 1 : index
    %c0_40 = arith.constant 0 : index
    %31 = vector.load %arg7[%c1_38, %c1_39, %c0_40] : memref<18x18x4xbf16, #tpu.memory_space<vmem>>, vector<16x16x4xbf16>
    %32 = vector.shape_cast %31 : vector<16x16x4xbf16> to vector<256x4xbf16>
    %c16 = arith.constant 16 : index
    %c0_41 = arith.constant 0 : index
    %33 = vector.load %arg2[%c16, %c0_41] : memref<36x64xbf16, #tpu.memory_space<vmem>>, vector<4x64xbf16>
    %cst_42 = arith.constant dense<0.000000e+00> : vector<256x64xf32>
    %34 = tpu.matmul %32, %33, %cst_42 {dimension_numbers = #tpu.dot_dimension_numbers<[1], [0], [0], [1], [0, 0, 1, 1], [], []>} : vector<256x4xbf16>, vector<4x64xbf16>, vector<256x64xf32> -> vector<256x64xf32>
    %35 = arith.addf %30, %34 : vector<256x64xf32>
    %c1_43 = arith.constant 1 : index
    %c2_44 = arith.constant 2 : index
    %c0_45 = arith.constant 0 : index
    %36 = vector.load %arg7[%c1_43, %c2_44, %c0_45] : memref<18x18x4xbf16, #tpu.memory_space<vmem>>, vector<16x16x4xbf16>
    %37 = vector.shape_cast %36 : vector<16x16x4xbf16> to vector<256x4xbf16>
    %c20 = arith.constant 20 : index
    %c0_46 = arith.constant 0 : index
    %38 = vector.load %arg2[%c20, %c0_46] : memref<36x64xbf16, #tpu.memory_space<vmem>>, vector<4x64xbf16>
    %cst_47 = arith.constant dense<0.000000e+00> : vector<256x64xf32>
    %39 = tpu.matmul %37, %38, %cst_47 {dimension_numbers = #tpu.dot_dimension_numbers<[1], [0], [0], [1], [0, 0, 1, 1], [], []>} : vector<256x4xbf16>, vector<4x64xbf16>, vector<256x64xf32> -> vector<256x64xf32>
    %40 = arith.addf %35, %39 : vector<256x64xf32>
    %c2_48 = arith.constant 2 : index
    %c0_49 = arith.constant 0 : index
    %c0_50 = arith.constant 0 : index
    %41 = vector.load %arg7[%c2_48, %c0_49, %c0_50] : memref<18x18x4xbf16, #tpu.memory_space<vmem>>, vector<16x16x4xbf16>
    %42 = vector.shape_cast %41 : vector<16x16x4xbf16> to vector<256x4xbf16>
    %c24 = arith.constant 24 : index
    %c0_51 = arith.constant 0 : index
    %43 = vector.load %arg2[%c24, %c0_51] : memref<36x64xbf16, #tpu.memory_space<vmem>>, vector<4x64xbf16>
    %cst_52 = arith.constant dense<0.000000e+00> : vector<256x64xf32>
    %44 = tpu.matmul %42, %43, %cst_52 {dimension_numbers = #tpu.dot_dimension_numbers<[1], [0], [0], [1], [0, 0, 1, 1], [], []>} : vector<256x4xbf16>, vector<4x64xbf16>, vector<256x64xf32> -> vector<256x64xf32>
    %45 = arith.addf %40, %44 : vector<256x64xf32>
    %c2_53 = arith.constant 2 : index
    %c1_54 = arith.constant 1 : index
    %c0_55 = arith.constant 0 : index
    %46 = vector.load %arg7[%c2_53, %c1_54, %c0_55] : memref<18x18x4xbf16, #tpu.memory_space<vmem>>, vector<16x16x4xbf16>
    %47 = vector.shape_cast %46 : vector<16x16x4xbf16> to vector<256x4xbf16>
    %c28 = arith.constant 28 : index
    %c0_56 = arith.constant 0 : index
    %48 = vector.load %arg2[%c28, %c0_56] : memref<36x64xbf16, #tpu.memory_space<vmem>>, vector<4x64xbf16>
    %cst_57 = arith.constant dense<0.000000e+00> : vector<256x64xf32>
    %49 = tpu.matmul %47, %48, %cst_57 {dimension_numbers = #tpu.dot_dimension_numbers<[1], [0], [0], [1], [0, 0, 1, 1], [], []>} : vector<256x4xbf16>, vector<4x64xbf16>, vector<256x64xf32> -> vector<256x64xf32>
    %50 = arith.addf %45, %49 : vector<256x64xf32>
    %c2_58 = arith.constant 2 : index
    %c2_59 = arith.constant 2 : index
    %c0_60 = arith.constant 0 : index
    %51 = vector.load %arg7[%c2_58, %c2_59, %c0_60] : memref<18x18x4xbf16, #tpu.memory_space<vmem>>, vector<16x16x4xbf16>
    %52 = vector.shape_cast %51 : vector<16x16x4xbf16> to vector<256x4xbf16>
    %c32 = arith.constant 32 : index
    %c0_61 = arith.constant 0 : index
    %53 = vector.load %arg2[%c32, %c0_61] : memref<36x64xbf16, #tpu.memory_space<vmem>>, vector<4x64xbf16>
    %cst_62 = arith.constant dense<0.000000e+00> : vector<256x64xf32>
    %54 = tpu.matmul %52, %53, %cst_62 {dimension_numbers = #tpu.dot_dimension_numbers<[1], [0], [0], [1], [0, 0, 1, 1], [], []>} : vector<256x4xbf16>, vector<4x64xbf16>, vector<256x64xf32> -> vector<256x64xf32>
    %55 = arith.addf %50, %54 : vector<256x64xf32>
    %c0_63 = arith.constant 0 : index
    %c0_64 = arith.constant 0 : index
    %56 = vector.load %arg3[%c0_63, %c0_64] : memref<1x64xf32, #tpu.memory_space<vmem>>, vector<1x64xf32>
    %57 = vector.broadcast %56 : vector<1x64xf32> to vector<256x64xf32>
    %58 = arith.addf %55, %57 : vector<256x64xf32>
    %cst_65 = arith.constant 2.000000e-01 : f32
    %59 = vector.broadcast %cst_65 : f32 to vector<256x64xf32>
    %60 = arith.mulf %59, %58 : vector<256x64xf32>
    %61 = arith.maximumf %58, %60 : vector<256x64xf32>
    %62 = vector.shape_cast %61 : vector<256x64xf32> to vector<16x16x64xf32>
    %cst_66 = arith.constant 0.000000e+00 : bf16
    %63 = vector.broadcast %cst_66 : bf16 to vector<1x18x64xbf16>
    %cst_67 = arith.constant 0.000000e+00 : bf16
    %64 = vector.broadcast %cst_67 : bf16 to vector<16x1x64xbf16>
    %c0_68 = arith.constant 0 : index
    %c0_69 = arith.constant 0 : index
    %c0_70 = arith.constant 0 : index
    %65 = vector.load %arg8[%c0_68, %c0_69, %c0_70] : memref<18x18x64xbf16, #tpu.memory_space<vmem>>, vector<1x18x64xbf16>
    tpu.vector_store %arg8[%c0_68, %c0_69, %c0_70], %63 {strides = array<i32>} : memref<18x18x64xbf16, #tpu.memory_space<vmem>>, vector<1x18x64xbf16>,
    %c17_71 = arith.constant 17 : index
    %c0_72 = arith.constant 0 : index
    %c0_73 = arith.constant 0 : index
    %66 = vector.load %arg8[%c17_71, %c0_72, %c0_73] : memref<18x18x64xbf16, #tpu.memory_space<vmem>>, vector<1x18x64xbf16>
    tpu.vector_store %arg8[%c17_71, %c0_72, %c0_73], %63 {strides = array<i32>} : memref<18x18x64xbf16, #tpu.memory_space<vmem>>, vector<1x18x64xbf16>,
    %c1_74 = arith.constant 1 : index
    %c0_75 = arith.constant 0 : index
    %c0_76 = arith.constant 0 : index
    %67 = vector.load %arg8[%c1_74, %c0_75, %c0_76] : memref<18x18x64xbf16, #tpu.memory_space<vmem>>, vector<16x1x64xbf16>
    tpu.vector_store %arg8[%c1_74, %c0_75, %c0_76], %64 {strides = array<i32>} : memref<18x18x64xbf16, #tpu.memory_space<vmem>>, vector<16x1x64xbf16>,
    %c1_77 = arith.constant 1 : index
    %c17_78 = arith.constant 17 : index
    %c0_79 = arith.constant 0 : index
    %68 = vector.load %arg8[%c1_77, %c17_78, %c0_79] : memref<18x18x64xbf16, #tpu.memory_space<vmem>>, vector<16x1x64xbf16>
    tpu.vector_store %arg8[%c1_77, %c17_78, %c0_79], %64 {strides = array<i32>} : memref<18x18x64xbf16, #tpu.memory_space<vmem>>, vector<16x1x64xbf16>,
    %69 = arith.truncf %62 : vector<16x16x64xf32> to vector<16x16x64xbf16>
    %c1_80 = arith.constant 1 : index
    %c1_81 = arith.constant 1 : index
    %c0_82 = arith.constant 0 : index
    %70 = vector.load %arg8[%c1_80, %c1_81, %c0_82] : memref<18x18x64xbf16, #tpu.memory_space<vmem>>, vector<16x16x64xbf16>
    tpu.vector_store %arg8[%c1_80, %c1_81, %c0_82], %69 {strides = array<i32>} : memref<18x18x64xbf16, #tpu.memory_space<vmem>>, vector<16x16x64xbf16>,
    %cst_83 = arith.constant 0.000000e+00 : f32
    %71 = vector.broadcast %cst_83 : f32 to vector<256x128xf32>
    %c0_84 = arith.constant 0 : index
    %c0_85 = arith.constant 0 : index
    %c0_86 = arith.constant 0 : index
    %72 = vector.load %arg8[%c0_84, %c0_85, %c0_86] : memref<18x18x64xbf16, #tpu.memory_space<vmem>>, vector<16x16x64xbf16>
    %73 = vector.shape_cast %72 : vector<16x16x64xbf16> to vector<256x64xbf16>
    %c0_87 = arith.constant 0 : index
    %c0_88 = arith.constant 0 : index
    %74 = vector.load %arg4[%c0_87, %c0_88] : memref<576x128xbf16, #tpu.memory_space<vmem>>, vector<64x128xbf16>
    %cst_89 = arith.constant dense<0.000000e+00> : vector<256x128xf32>
    %75 = tpu.matmul %73, %74, %cst_89 {dimension_numbers = #tpu.dot_dimension_numbers<[1], [0], [0], [1], [0, 0, 1, 1], [], []>} : vector<256x64xbf16>, vector<64x128xbf16>, vector<256x128xf32> -> vector<256x128xf32>
    %76 = arith.addf %71, %75 : vector<256x128xf32>
    %c0_90 = arith.constant 0 : index
    %c1_91 = arith.constant 1 : index
    %c0_92 = arith.constant 0 : index
    %77 = vector.load %arg8[%c0_90, %c1_91, %c0_92] : memref<18x18x64xbf16, #tpu.memory_space<vmem>>, vector<16x16x64xbf16>
    %78 = vector.shape_cast %77 : vector<16x16x64xbf16> to vector<256x64xbf16>
    %c64 = arith.constant 64 : index
    %c0_93 = arith.constant 0 : index
    %79 = vector.load %arg4[%c64, %c0_93] : memref<576x128xbf16, #tpu.memory_space<vmem>>, vector<64x128xbf16>
    %cst_94 = arith.constant dense<0.000000e+00> : vector<256x128xf32>
    %80 = tpu.matmul %78, %79, %cst_94 {dimension_numbers = #tpu.dot_dimension_numbers<[1], [0], [0], [1], [0, 0, 1, 1], [], []>} : vector<256x64xbf16>, vector<64x128xbf16>, vector<256x128xf32> -> vector<256x128xf32>
    %81 = arith.addf %76, %80 : vector<256x128xf32>
    %c0_95 = arith.constant 0 : index
    %c2_96 = arith.constant 2 : index
    %c0_97 = arith.constant 0 : index
    %82 = vector.load %arg8[%c0_95, %c2_96, %c0_97] : memref<18x18x64xbf16, #tpu.memory_space<vmem>>, vector<16x16x64xbf16>
    %83 = vector.shape_cast %82 : vector<16x16x64xbf16> to vector<256x64xbf16>
    %c128 = arith.constant 128 : index
    %c0_98 = arith.constant 0 : index
    %84 = vector.load %arg4[%c128, %c0_98] : memref<576x128xbf16, #tpu.memory_space<vmem>>, vector<64x128xbf16>
    %cst_99 = arith.constant dense<0.000000e+00> : vector<256x128xf32>
    %85 = tpu.matmul %83, %84, %cst_99 {dimension_numbers = #tpu.dot_dimension_numbers<[1], [0], [0], [1], [0, 0, 1, 1], [], []>} : vector<256x64xbf16>, vector<64x128xbf16>, vector<256x128xf32> -> vector<256x128xf32>
    %86 = arith.addf %81, %85 : vector<256x128xf32>
    %c1_100 = arith.constant 1 : index
    %c0_101 = arith.constant 0 : index
    %c0_102 = arith.constant 0 : index
    %87 = vector.load %arg8[%c1_100, %c0_101, %c0_102] : memref<18x18x64xbf16, #tpu.memory_space<vmem>>, vector<16x16x64xbf16>
    %88 = vector.shape_cast %87 : vector<16x16x64xbf16> to vector<256x64xbf16>
    %c192 = arith.constant 192 : index
    %c0_103 = arith.constant 0 : index
    %89 = vector.load %arg4[%c192, %c0_103] : memref<576x128xbf16, #tpu.memory_space<vmem>>, vector<64x128xbf16>
    %cst_104 = arith.constant dense<0.000000e+00> : vector<256x128xf32>
    %90 = tpu.matmul %88, %89, %cst_104 {dimension_numbers = #tpu.dot_dimension_numbers<[1], [0], [0], [1], [0, 0, 1, 1], [], []>} : vector<256x64xbf16>, vector<64x128xbf16>, vector<256x128xf32> -> vector<256x128xf32>
    %91 = arith.addf %86, %90 : vector<256x128xf32>
    %c1_105 = arith.constant 1 : index
    %c1_106 = arith.constant 1 : index
    %c0_107 = arith.constant 0 : index
    %92 = vector.load %arg8[%c1_105, %c1_106, %c0_107] : memref<18x18x64xbf16, #tpu.memory_space<vmem>>, vector<16x16x64xbf16>
    %93 = vector.shape_cast %92 : vector<16x16x64xbf16> to vector<256x64xbf16>
    %c256 = arith.constant 256 : index
    %c0_108 = arith.constant 0 : index
    %94 = vector.load %arg4[%c256, %c0_108] : memref<576x128xbf16, #tpu.memory_space<vmem>>, vector<64x128xbf16>
    %cst_109 = arith.constant dense<0.000000e+00> : vector<256x128xf32>
    %95 = tpu.matmul %93, %94, %cst_109 {dimension_numbers = #tpu.dot_dimension_numbers<[1], [0], [0], [1], [0, 0, 1, 1], [], []>} : vector<256x64xbf16>, vector<64x128xbf16>, vector<256x128xf32> -> vector<256x128xf32>
    %96 = arith.addf %91, %95 : vector<256x128xf32>
    %c1_110 = arith.constant 1 : index
    %c2_111 = arith.constant 2 : index
    %c0_112 = arith.constant 0 : index
    %97 = vector.load %arg8[%c1_110, %c2_111, %c0_112] : memref<18x18x64xbf16, #tpu.memory_space<vmem>>, vector<16x16x64xbf16>
    %98 = vector.shape_cast %97 : vector<16x16x64xbf16> to vector<256x64xbf16>
    %c320 = arith.constant 320 : index
    %c0_113 = arith.constant 0 : index
    %99 = vector.load %arg4[%c320, %c0_113] : memref<576x128xbf16, #tpu.memory_space<vmem>>, vector<64x128xbf16>
    %cst_114 = arith.constant dense<0.000000e+00> : vector<256x128xf32>
    %100 = tpu.matmul %98, %99, %cst_114 {dimension_numbers = #tpu.dot_dimension_numbers<[1], [0], [0], [1], [0, 0, 1, 1], [], []>} : vector<256x64xbf16>, vector<64x128xbf16>, vector<256x128xf32> -> vector<256x128xf32>
    %101 = arith.addf %96, %100 : vector<256x128xf32>
    %c2_115 = arith.constant 2 : index
    %c0_116 = arith.constant 0 : index
    %c0_117 = arith.constant 0 : index
    %102 = vector.load %arg8[%c2_115, %c0_116, %c0_117] : memref<18x18x64xbf16, #tpu.memory_space<vmem>>, vector<16x16x64xbf16>
    %103 = vector.shape_cast %102 : vector<16x16x64xbf16> to vector<256x64xbf16>
    %c384 = arith.constant 384 : index
    %c0_118 = arith.constant 0 : index
    %104 = vector.load %arg4[%c384, %c0_118] : memref<576x128xbf16, #tpu.memory_space<vmem>>, vector<64x128xbf16>
    %cst_119 = arith.constant dense<0.000000e+00> : vector<256x128xf32>
    %105 = tpu.matmul %103, %104, %cst_119 {dimension_numbers = #tpu.dot_dimension_numbers<[1], [0], [0], [1], [0, 0, 1, 1], [], []>} : vector<256x64xbf16>, vector<64x128xbf16>, vector<256x128xf32> -> vector<256x128xf32>
    %106 = arith.addf %101, %105 : vector<256x128xf32>
    %c2_120 = arith.constant 2 : index
    %c1_121 = arith.constant 1 : index
    %c0_122 = arith.constant 0 : index
    %107 = vector.load %arg8[%c2_120, %c1_121, %c0_122] : memref<18x18x64xbf16, #tpu.memory_space<vmem>>, vector<16x16x64xbf16>
    %108 = vector.shape_cast %107 : vector<16x16x64xbf16> to vector<256x64xbf16>
    %c448 = arith.constant 448 : index
    %c0_123 = arith.constant 0 : index
    %109 = vector.load %arg4[%c448, %c0_123] : memref<576x128xbf16, #tpu.memory_space<vmem>>, vector<64x128xbf16>
    %cst_124 = arith.constant dense<0.000000e+00> : vector<256x128xf32>
    %110 = tpu.matmul %108, %109, %cst_124 {dimension_numbers = #tpu.dot_dimension_numbers<[1], [0], [0], [1], [0, 0, 1, 1], [], []>} : vector<256x64xbf16>, vector<64x128xbf16>, vector<256x128xf32> -> vector<256x128xf32>
    %111 = arith.addf %106, %110 : vector<256x128xf32>
    %c2_125 = arith.constant 2 : index
    %c2_126 = arith.constant 2 : index
    %c0_127 = arith.constant 0 : index
    %112 = vector.load %arg8[%c2_125, %c2_126, %c0_127] : memref<18x18x64xbf16, #tpu.memory_space<vmem>>, vector<16x16x64xbf16>
    %113 = vector.shape_cast %112 : vector<16x16x64xbf16> to vector<256x64xbf16>
    %c512 = arith.constant 512 : index
    %c0_128 = arith.constant 0 : index
    %114 = vector.load %arg4[%c512, %c0_128] : memref<576x128xbf16, #tpu.memory_space<vmem>>, vector<64x128xbf16>
    %cst_129 = arith.constant dense<0.000000e+00> : vector<256x128xf32>
    %115 = tpu.matmul %113, %114, %cst_129 {dimension_numbers = #tpu.dot_dimension_numbers<[1], [0], [0], [1], [0, 0, 1, 1], [], []>} : vector<256x64xbf16>, vector<64x128xbf16>, vector<256x128xf32> -> vector<256x128xf32>
    %116 = arith.addf %111, %115 : vector<256x128xf32>
    %c0_130 = arith.constant 0 : index
    %c0_131 = arith.constant 0 : index
    %117 = vector.load %arg5[%c0_130, %c0_131] : memref<1x128xf32, #tpu.memory_space<vmem>>, vector<1x128xf32>
    %118 = vector.broadcast %117 : vector<1x128xf32> to vector<256x128xf32>
    %119 = arith.addf %116, %118 : vector<256x128xf32>
    %cst_132 = arith.constant 2.000000e-01 : f32
    %120 = vector.broadcast %cst_132 : f32 to vector<256x128xf32>
    %121 = arith.mulf %120, %119 : vector<256x128xf32>
    %122 = arith.maximumf %119, %121 : vector<256x128xf32>
    %123 = tpu.transpose %122, [1, 0] : vector<256x128xf32> -> vector<128x256xf32>
    %124 = vector.extract_strided_slice %123 {offsets = [0, 0], sizes = [64, 256], strides = [1, 1]} : vector<128x256xf32> to vector<64x256xf32>
    %c0_133 = arith.constant 0 : index
    %c0_134 = arith.constant 0 : index
    %c0_135 = arith.constant 0 : index
    %125 = vector.load %arg6[%c0_133, %c0_134, %c0_135] : memref<1x64x256xf32, #tpu.memory_space<vmem>>, vector<1x64x256xf32>
    %126 = vector.shape_cast %125 : vector<1x64x256xf32> to vector<64x256xf32>
    %127 = vector.shape_cast %124 : vector<64x256xf32> to vector<1x64x256xf32>
    tpu.vector_store %arg6[%c0_133, %c0_134, %c0_135], %127 {strides = array<i32>} : memref<1x64x256xf32, #tpu.memory_space<vmem>>, vector<1x64x256xf32>,
    return
  }
  func.func @transform_0(%arg0: i32) -> (i32, i32, i32, i32) {
    %c0_i32 = arith.constant 0 : i32
    %c0_i32_0 = arith.constant 0 : i32
    %c0_i32_1 = arith.constant 0 : i32
    %c0_i32_2 = arith.constant 0 : i32
    return %arg0, %c0_i32, %c0_i32_0, %c0_i32_1 : i32, i32, i32, i32
  }
  func.func @transform_1(%arg0: i32) -> (i32, i32) {
    %c0_i32 = arith.constant 0 : i32
    %c0_i32_0 = arith.constant 0 : i32
    %c0_i32_1 = arith.constant 0 : i32
    return %c0_i32, %c0_i32_0 : i32, i32
  }
  func.func @transform_2(%arg0: i32) -> (i32, i32) {
    %c0_i32 = arith.constant 0 : i32
    %c0_i32_0 = arith.constant 0 : i32
    %c0_i32_1 = arith.constant 0 : i32
    return %c0_i32, %c0_i32_0 : i32, i32
  }
  func.func @transform_3(%arg0: i32) -> (i32, i32) {
    %c0_i32 = arith.constant 0 : i32
    %c0_i32_0 = arith.constant 0 : i32
    %c0_i32_1 = arith.constant 0 : i32
    return %c0_i32, %c0_i32_0 : i32, i32
  }
  func.func @transform_4(%arg0: i32) -> (i32, i32) {
    %c0_i32 = arith.constant 0 : i32
    %c0_i32_0 = arith.constant 0 : i32
    %c0_i32_1 = arith.constant 0 : i32
    return %c0_i32, %c0_i32_0 : i32, i32
  }
  func.func @transform_5(%arg0: i32) -> (i32, i32, i32) {
    %c0_i32 = arith.constant 0 : i32
    %c0_i32_0 = arith.constant 0 : i32
    %c0_i32_1 = arith.constant 0 : i32
    return %arg0, %c0_i32, %c0_i32_0 : i32, i32, i32
  }
}

</mosaic_0001>

<bundles_post_ra>
// kernel: tpu_custom_call.1
= control target key start
LH: loop header
LB: loop body
LE: loop exit
PB: predicated region body
PF: predicated region fallthrough
CT: control target
= control target key end

     0   :  { %10 = vsyncpa [#allocation5], 0  ;;  %s17757_s0 = inlined_call_operand.vmem [shape: f32[2,16,16,4], index: 0, kind: input, shape index: {}]   ;;  %s17758_s1 = inlined_call_operand.vmem [shape: bf16[36,64], index: 1, kind: input, shape index: {}]   ;;  %s17759_s2 = inlined_call_operand.vmem [shape: f32[1,64], index: 2, kind: input, shape index: {}]   ;;  %s17760_s3 = inlined_call_operand.vmem [shape: bf16[576,128], index: 3, kind: input, shape index: {}]   ;;  %s17761_s4 = inlined_call_operand.vmem [shape: f32[1,128], index: 4, kind: input, shape index: {}]   ;;  %s17762_s5 = inlined_call_operand.hbm [shape: f32[2,64,256], index: 5, kind: output, shape index: {}]  }
   0x1   :  { %12 = vsyncpa [#allocation5 + $0x1], 0  ;;  %s13953_s18 = smov 0   ;;  %s13955_s19 = smov 0  }
   0x2   :  { %s13957_s20 = smov 0   ;;  %s13959_s21 = smov 0  }
   0x3 LB: > { %s13974_s22 = sadd.s32 4294967295, %s13917_s21   ;;  %s11261_s23 = sadd.s32 4294967294, %s13917_s21   ;;  %s13917_s21 = sphi %s13959_s21, %s18137_s21   ;;  %s13913_s20 = sphi %s13957_s20, %s18136_s20   ;;  %s13909_s19 = sphi %s13955_s19, %s18135_s19   ;;  %s13905_s18 = sphi %s13953_s18, %s18134_s18  }
   0x4   : > { %s13978_s24 = sadd.s32 1, %s13917_s21   ;;  %s135_s25 = sadd.s32 1, %s13913_s20 }
   0x5   : > { %s132_s26 = ssub.s32 %s13917_s21, %s13978_s24  ;;  %p145_p0 = scmp.ne.s32.totalorder %s13913_s20, %s13909_s19 }
   0x6   : > { %p133_p1 = scmp.eq.s32.totalorder %s132_s26, 0  ;;  %p146_p2 = scmp.eq.s32.totalorder %s13974_s22, 1 }
   0x7   : > { %p151_p3 = scmp.ne.s32.totalorder %s13909_s19, %s13905_s18  ;;  %p152_p4 = scmp.eq.s32.totalorder %s11261_s23, 1 }
   0x8   : > { %s13989_s27 = scalar_select %p133_p1, %s13913_s20, %s135_s25  }
   0x9   : > { %p13991_p5 = por %p146_p2, %p145_p0  ;;  %p13995_p6 = por %p152_p4, %p151_p3 }
   0xa   : > { %p11264_p7 = scmp.ge.s32.totalorder %s13917_s21, 1  ;;  %p190_p8 = scmp.lt.s32.totalorder %s13917_s21, 3 }
   0xc   : > { %p191_p9 = pnand %p11264_p7, %p190_p8 }
   0xe   : > { %194 = sbr.rel (%p191_p9) target bundleno = 1885 (0x75d), region = 40 }
  0x15   : > { %v13679_v0 = vld [vmem:[%s17758_s1] ss:$0 sps:$4 sm:$0xcc]   ;;  %vm1437_vm0 = vcmask 1041408   ;;  %vm256_vm1 = vcmask 27648   ;;  %vm259_vm2 = vcmask 24576  }
  0x16   : > { %vm267_vm3 = vsmask.f32 256  ;;  %p218_p10 = scmp.lt.s32.totalorder %s13974_s22, 1  ;;  %v1387_v1 = vrot.slane %v13679_v0, 2  ;;  %v17763_v2 = vmov 0   ;;  %vm5568_vm7 = vcmask 519168  }
  0x17   : > { %257 = vst.msk [vmem:[#allocation2] sm:$0xf] %vm256_vm1, %v17763_v2  ;;  %258 = vst.msk [vmem:[#allocation2 + $0x4] sm:$0xf] %vm256_vm1, %v17763_v2  ;;  %vm317_vm5 = vsmask.f32 7938 }
  0x18   : > { %260 = vst.msk [vmem:[#allocation2 + $0x8] sm:$0x1] %vm259_vm2, %v17763_v2  ;;  %vm14011_vm4 = vmand %vm259_vm2, %vm267_vm3  ;;  %v14028_v5 = vld [vmem:[%s17758_s1] sm:$0x3]  ;;  %s219_s9 = scalar_select %p218_p10, %s13974_s22, 1  ;;  %13628 = vmatprep.subr.msk.bf16.mxu0 %vm1437_vm0, %v1387_v1  ;;  %v1439_v6 = vsel %vm1437_vm0, %v1387_v1, 0 }
  0x19   : > { %262 = vst.msk [vmem:[#allocation2 + $0xcc] sm:$0xf] %vm256_vm1, %v17763_v2  ;;  %263 = vst.msk [vmem:[#allocation2 + $0xd0] sm:$0xf] %vm256_vm1, %v17763_v2  ;;  %v269_v7 = vld [vmem:[#allocation2 + $0xc] sm:$0x1]  ;;  %12451 = vmatpush3.bf16.msra.mxu0 %v1439_v6 }
  0x1a   : > { %264 = vst.msk [vmem:[#allocation2 + $0xd4] sm:$0x1] %vm259_vm2, %v17763_v2  ;;  %vm14021_vm6 = vmand %vm259_vm2, %vm317_vm5  ;;  %v319_v8 = vld [vmem:[#allocation2 + $0x14] sm:$0x1]  ;;  %s12051_s10 = sshll.u32 %s219_s9, 8  ;;  %v270_v9 = vsel %vm14011_vm4, 0, %v269_v7  ;;  %13629 = vmatprep.subr.msk.bf16.mxu0 %vm1437_vm0, %v14028_v5 }
  0x1b   : > { %5569 = vst.msk [vmem:[#allocation3] sm:$0xf] %vm5568_vm7, %v17763_v2  ;;  %5570 = vst.msk [vmem:[#allocation3 + $0x4] sm:$0xf] %vm5568_vm7, %v17763_v2  ;;  %v320_v10 = vsel %vm14021_vm6, 0, %v319_v8  ;;  %s14052_s13 = scalar_lea.vmem %s17757_s0, %s12051_s10  ;;  %vm1388_vm11 = vcmask 31744  }
  0x1c   : > { %5574 = vst.msk [vmem:[#allocation3 + $0xcc] sm:$0xf] %vm5568_vm7, %v17763_v2  ;;  %5575 = vst.msk [vmem:[#allocation3 + $0xd0] sm:$0xf] %vm5568_vm7, %v17763_v2  ;;  %vm948_vm8 = vsmask.f32 3328 }
  0x1d   : > { %271 = vst [vmem:[#allocation2 + $0xc] sm:$0x1] %v270_v9  ;;  %321 = vst [vmem:[#allocation2 + $0x14] sm:$0x1] %v320_v10  ;;  %v272_v11 = vld [vmem:[#allocation2 + $0x18] sm:$0x1] }
  0x1e   : > { %v322_v12 = vld [vmem:[#allocation2 + $0x20] sm:$0x1]  ;;  %vm949_vm9 = vsmask.f32 7440  ;;  %v225_v14 = vld [vmem:[%s14052_s13 + $0x8] sm:$0xff]  ;;  %v273_v15 = vsel %vm14011_vm4, 0, %v272_v11  ;;  %vm14067_vm12 = vmand %vm256_vm1, %vm317_vm5 }
  0x1f   : > { %v224_v13 = vld [vmem:[%s14052_s13] sm:$0xff]  ;;  %v323_v16 = vsel %vm14021_vm6, 0, %v322_v12  ;;  %vm463_vm10 = vsmask.f32 4368  ;;  %v226_v18 = vld [vmem:[%s14052_s13 + $0x10] sm:$0xff]  ;;  %v227_v19 = vld [vmem:[%s14052_s13 + $0x18] sm:$0xff]  ;;  %v12053_v24 = vpack.c.bf16 %v225_v14, %v225_v14 }
  0x20   : > { %v12052_v17 = vpack.c.bf16 %v224_v13, %v224_v13  ;;  %274 = vst [vmem:[#allocation2 + $0x18] sm:$0x1] %v273_v15  ;;  %324 = vst [vmem:[#allocation2 + $0x20] sm:$0x1] %v323_v16  ;;  %v228_v20 = vld [vmem:[%s14052_s13 + $0x20] sm:$0xff]  ;;  %v12054_v25 = vpack.c.bf16 %v226_v18, %v226_v18  ;;  %v12055_v26 = vpack.c.bf16 %v227_v19, %v227_v19  ;;  %v17877_v57 = vmov 0 }
  0x21   : > { %v899_v21 = vld [vmem:[#allocation2] sm:$0xf]  ;;  %v900_v22 = vld [vmem:[#allocation2 + $0x4] sm:$0xf]  ;;  %v932_v23 = vld [vmem:[#allocation2 + $0x8] sm:$0x1]  ;;  %v14063_v34 = vpack.c.bf16 %v228_v20, %v228_v20 }
  0x22   : > { %v952_v27 = vshrl.u32 %v899_v21, 16  ;;  %v955_v28 = vshll.u32 %v899_v21, 16  ;;  %v961_v29 = vshll.u32 %v900_v22, 16  ;;  %v965_v30 = vshrl.u32 %v900_v22, 16  ;;  %vm14073_vm13 = vmor %vm948_vm8, %vm949_vm9  ;;  %v275_v54 = vld [vmem:[#allocation2 + $0x24] sm:$0x1] }
  0x23   : > { %v971_v31 = vshll.u32 %v932_v23, 16  ;;  %v466_v32 = vshrl.u32 %v12052_v17, 16  ;;  %v469_v33 = vshll.u32 %v12052_v17, 16  ;;  %v474_v41 = vshrl.u32 %v12053_v24, 16  ;;  %vm14079_vm14 = vmor %vm267_vm3, %vm463_vm10  ;;  %v325_v6 = vld [vmem:[#allocation2 + $0x2c] sm:$0x1] }
  0x24   : > { %v954_v35 = vrot.slane %v952_v27, 4  ;;  %v957_v36 = vrot.slane %v955_v28, 5  ;;  %v963_v37 = vrot.slane %v961_v29, 5  ;;  %v967_v38 = vrot.slane %v965_v30, 4  ;;  %v787_v46 = vld [vmem:[#allocation2 + $0xc] sm:$0xf] }
  0x25   : > { %v973_v39 = vrot.slane %v971_v31, 5  ;;  %v468_v40 = vrot.slane %v466_v32, 7  ;;  %v477_v42 = vshll.u32 %v12053_v24, 16  ;;  %v483_v47 = vshrl.u32 %v12054_v25, 16  ;;  %v791_v58 = vld [vmem:[#allocation2 + $0x14] sm:$0x1] }
  0x26   : > { %v958_v44 = vor.u32 %v957_v36, %v954_v35  ;;  %v968_v45 = vor.u32 %v967_v38, %v963_v37  ;;  %v486_v48 = vshll.u32 %v12054_v25, 16  ;;  %v476_v52 = vrot.slane %v474_v41, 7  ;;  %v229_v11 = vld [vmem:[%s14052_s13 + $0x28] sm:$0xff]  ;;  %v230_v12 = vld [vmem:[%s14052_s13 + $0x30] sm:$0xff]  ;;  %v328_v19 = vld [vmem:[#allocation2 + $0x38] sm:$0x1] }
  0x27   : > { %v471_v50 = vor.u32 %v469_v33, %v468_v40  ;;  %v472_v51 = vrot.slane %v468_v40, 4  ;;  %v491_v53 = vshrl.u32 %v12055_v26, 16  ;;  %v17878_v57 = vsel %vm14079_vm14, 4294967295, %v17877_v57  ;;  %v794_v1 = vld [vmem:[#allocation2 + $0x18] sm:$0xf]  ;;  %s215_s12 = sand.u32 1, %s13909_s19  }
  0x28   : > { %v959_v55 = vrot.slane %v958_v44, 4  ;;  %v969_v56 = vrot.slane %v968_v45, 4  ;;  %17879 = vst [vmem:[#allocation7_spill] sm:$0xff] %v17878_v57  ;;  %v485_v59 = vrot.slane %v483_v47, 7  ;;  %v494_v60 = vshll.u32 %v12055_v26, 16  ;;  %v231_v24 = vld [vmem:[%s14052_s13 + $0x38] sm:$0xff] }
  0x29   : > { %v479_v61 = vor.u32 %v477_v42, %v476_v52  ;;  %v481_v62 = vrot.slane %v476_v52, 4  ;;  %v788_v63 = vsel %vm14067_vm12, %v471_v50, %v787_v46  ;;  %v493_v0 = vrot.slane %v491_v53, 7  ;;  %v798_v17 = vld [vmem:[#allocation2 + $0x20] sm:$0x1]  ;;  %v278_v18 = vld [vmem:[#allocation2 + $0x30] sm:$0x1] }
  0x2a   : > { %v964_v7 = vsel %vm14073_vm13, %v959_v55, %v963_v37  ;;  %v974_v8 = vsel %vm14073_vm13, %v969_v56, %v973_v39  ;;  %789 = vst [vmem:[#allocation2 + $0xc] sm:$0xf] %v788_v63  ;;  %v488_v9 = vor.u32 %v486_v48, %v485_v59  ;;  %v489_v10 = vrot.slane %v485_v59, 4  ;;  %v281_v29 = vld [vmem:[#allocation2 + $0x3c] sm:$0x1]  ;;  %v232_v53 = vld [vmem:[%s14052_s13 + $0x40] sm:$0xff] }
  0x2b   : > { %v11300_v13 = vcombine.low %v964_v7, %v974_v8  ;;  %v480_v14 = vsel %vm14079_vm14, %v472_v51, %v479_v61  ;;  %v792_v15 = vsel %vm14011_vm4, %v481_v62, %v791_v58  ;;  %v496_v16 = vor.u32 %v494_v60, %v493_v0  ;;  %v331_v30 = vld [vmem:[#allocation2 + $0x44] sm:$0x1]  ;;  %s12116_s15 = sshll.u32 %s13974_s22, 11  ;;  %s17716_s26 = scalar_lea.sflag [#allocation5], %s215_s12 }
  0x2c   : > { %790 = vst.msk [vmem:[#allocation2 + $0x10] sm:$0xf] %vm256_vm1, %v480_v14  ;;  %793 = vst [vmem:[#allocation2 + $0x14] sm:$0x1] %v792_v15  ;;  %v498_v20 = vrot.slane %v493_v0, 4  ;;  %v795_v21 = vsel %vm14067_vm12, %v488_v9, %v794_v1  ;;  %v276_v22 = vsel %vm14011_vm4, 0, %v275_v54  ;;  %v12057_v26 = vpack.c.bf16 %v229_v11, %v229_v11  ;;  %s17709_s25 = scalar_lea.hbm %s17762_s5, %s12116_s15 }
  0x2d   : > { %v326_v23 = vsel %vm14021_vm6, 0, %v325_v6  ;;  %12452 = vmatprep.mubr.msk.bf16.mxu0 %vm1388_vm11, %v11300_v13  ;;  %v497_v25 = vsel %vm14079_vm14, %v489_v10, %v496_v16  ;;  %796 = vst [vmem:[#allocation2 + $0x18] sm:$0xf] %v795_v21  ;;  %277 = vst [vmem:[#allocation2 + $0x24] sm:$0x1] %v276_v22  ;;  %v500_v27 = vshrl.u32 %v14063_v34, 16  ;;  %v14115_v35 = vpack.c.bf16 %v230_v12, %v230_v12 }
  0x2e   : > { %327 = vst [vmem:[#allocation2 + $0x2c] sm:$0x1] %v326_v23  ;;  %v503_v28 = vshll.u32 %v14063_v34, 16  ;;  %797 = vst.msk [vmem:[#allocation2 + $0x1c] sm:$0xf] %vm256_vm1, %v497_v25  ;;  %v799_v31 = vsel %vm14011_vm4, %v498_v20, %v798_v17  ;;  %v279_v32 = vsel %vm14011_vm4, 0, %v278_v18  ;;  %v14117_v34 = vpack.c.bf16 %v231_v24, %v231_v24 }
  0x2f   : > { %v329_v33 = vsel %vm14021_vm6, 0, %v328_v19  ;;  %800 = vst [vmem:[#allocation2 + $0x20] sm:$0x1] %v799_v31  ;;  %v502_v36 = vrot.slane %v500_v27, 7  ;;  %v508_v37 = vshrl.u32 %v12057_v26, 16  ;;  %v511_v38 = vshll.u32 %v12057_v26, 16 }
  0x30   : > { %280 = vst [vmem:[#allocation2 + $0x30] sm:$0x1] %v279_v32  ;;  %330 = vst [vmem:[#allocation2 + $0x38] sm:$0x1] %v329_v33  ;;  %v517_v39 = vshrl.u32 %v14115_v35, 16  ;;  %v282_v40 = vsel %vm14011_vm4, 0, %v281_v29  ;;  %v14134_v9 = vpack.c.bf16 %v232_v53, %v232_v53 }
  0x31   : > { %v332_v41 = vsel %vm14021_vm6, 0, %v331_v30  ;;  %v901_v42 = vld [vmem:[#allocation2 + $0xc] sm:$0xf]  ;;  %v14126_v44 = vsel %vm1437_vm0, %v14028_v5, 0  ;;  %v510_v45 = vrot.slane %v508_v37, 7  ;;  %v520_v46 = vshll.u32 %v14115_v35, 16 }
  0x32   : > { %v525_v47 = vshrl.u32 %v14117_v34, 16  ;;  %283 = vst [vmem:[#allocation2 + $0x3c] sm:$0x1] %v282_v40  ;;  %333 = vst [vmem:[#allocation2 + $0x44] sm:$0x1] %v332_v41  ;;  %v976_v48 = vshrl.u32 %v901_v42, 16  ;;  %v505_v56 = vor.u32 %v503_v28, %v502_v36 }
  0x33   : > { %v979_v50 = vshll.u32 %v901_v42, 16  ;;  %v506_v51 = vrot.slane %v502_v36, 4  ;;  %v14130_v52 = vrot.slane %v517_v39, 7  ;;  %v902_v54 = vld [vmem:[#allocation2 + $0x10] sm:$0xf]  ;;  %v513_v58 = vor.u32 %v511_v38, %v510_v45  ;;  %v233_v35 = vld [vmem:[%s14052_s13 + $0x48] sm:$0xff] }
  0x34   : > { %v933_v55 = vld [vmem:[#allocation2 + $0x14] sm:$0x1]  ;;  %v515_v59 = vrot.slane %v510_v45, 4  ;;  %v528_v5 = vshll.u32 %v14117_v34, 16  ;;  %v978_v60 = vrot.slane %v976_v48, 4  ;;  %v985_v62 = vshll.u32 %v902_v54, 16 }
  0x35   : > { %v981_v61 = vrot.slane %v979_v50, 5  ;;  %v989_v63 = vshrl.u32 %v902_v54, 16  ;;  %v903_v0 = vld [vmem:[#allocation2 + $0x18] sm:$0xf]  ;;  %v995_v1 = vshll.u32 %v933_v55, 16  ;;  %v527_v8 = vrot.slane %v525_v47, 7 }
  0x36   : > { %v904_v6 = vld [vmem:[#allocation2 + $0x1c] sm:$0xf]  ;;  %v1000_v7 = vshrl.u32 %v903_v0, 16  ;;  %v987_v11 = vrot.slane %v985_v62, 5  ;;  %v934_v13 = vld [vmem:[#allocation2 + $0x20] sm:$0x1]  ;;  %v514_v27 = vsel %vm14079_vm14, %v506_v51, %v513_v58  ;;  %v522_v38 = vor.u32 %v520_v46, %v14130_v52 }
  0x37   : > { %v982_v10 = vor.u32 %v981_v61, %v978_v60  ;;  %v991_v12 = vrot.slane %v989_v63, 4  ;;  %v1003_v14 = vshll.u32 %v903_v0, 16  ;;  %v997_v15 = vrot.slane %v995_v1, 5  ;;  %v801_v19 = vld [vmem:[#allocation2 + $0x24] sm:$0xf]  ;;  %v234_v58 = vld [vmem:[%s14052_s13 + $0x50] sm:$0xff] }
  0x38   : > { %v1002_v16 = vrot.slane %v1000_v7, 4  ;;  %v1009_v17 = vshll.u32 %v904_v6, 16  ;;  %v1013_v18 = vshrl.u32 %v904_v6, 16  ;;  %v1019_v23 = vshll.u32 %v934_v13, 16  ;;  %v805_v24 = vld [vmem:[#allocation2 + $0x2c] sm:$0x1] }
  0x39   : > { %v983_v20 = vrot.slane %v982_v10, 4  ;;  %v992_v21 = vor.u32 %v991_v12, %v987_v11  ;;  %v1005_v22 = vrot.slane %v1003_v14, 5  ;;  %v802_v28 = vsel %vm14067_vm12, %v505_v56, %v801_v19  ;;  %804 = vst.msk [vmem:[#allocation2 + $0x28] sm:$0xf] %vm256_vm1, %v514_v27  ;;  %v808_v33 = vld [vmem:[#allocation2 + $0x30] sm:$0xf] }
  0x3a   : > { %v1011_v25 = vrot.slane %v1009_v17, 5  ;;  %v1015_v26 = vrot.slane %v1013_v18, 4  ;;  %v1021_v32 = vrot.slane %v1019_v23, 5  ;;  %803 = vst [vmem:[#allocation2 + $0x24] sm:$0xf] %v802_v28  ;;  %v806_v37 = vsel %vm14011_vm4, %v515_v59, %v805_v24  ;;  %v235_v59 = vld [vmem:[%s14052_s13 + $0x58] sm:$0xff] }
  0x3b   : > { %v988_v29 = vsel %vm14073_vm13, %v983_v20, %v987_v11  ;;  %v993_v30 = vrot.slane %v992_v21, 4  ;;  %v1006_v31 = vor.u32 %v1005_v22, %v1002_v16  ;;  %v523_v34 = vrot.slane %v14130_v52, 4  ;;  %v812_v39 = vld [vmem:[#allocation2 + $0x38] sm:$0x1]  ;;  %807 = vst [vmem:[#allocation2 + $0x2c] sm:$0x1] %v806_v37 }
  0x3c   : > { %v1016_v36 = vor.u32 %v1015_v26, %v1011_v25  ;;  %v530_v42 = vor.u32 %v528_v5, %v527_v8  ;;  %v532_v45 = vrot.slane %v527_v8, 4  ;;  %v809_v50 = vsel %vm14067_vm12, %v522_v38, %v808_v33  ;;  %v284_v53 = vld [vmem:[#allocation2 + $0x48] sm:$0x1]  ;;  %v334_v46 = vld [vmem:[#allocation2 + $0x50] sm:$0x1]  ;;  %s13920_s22 = smov [#allocation4]  }
  0x3d   : > { %v998_v40 = vsel %vm14073_vm13, %v993_v30, %v997_v15  ;;  %v1007_v41 = vrot.slane %v1006_v31, 4  ;;  %v12061_v51 = vpack.c.bf16 %v233_v35, %v233_v35  ;;  %810 = vst [vmem:[#allocation2 + $0x30] sm:$0xf] %v809_v50  ;;  %v534_v56 = vshrl.u32 %v14134_v9, 16  ;;  %v287_v5 = vld [vmem:[#allocation2 + $0x54] sm:$0x1] }
  0x3e   : > { %v11301_v47 = vcombine.low %v988_v29, %v998_v40  ;;  %v1017_v48 = vrot.slane %v1016_v36, 4  ;;  %v531_v54 = vsel %vm14079_vm14, %v523_v34, %v530_v42  ;;  %v813_v55 = vsel %vm14011_vm4, %v532_v45, %v812_v39  ;;  %v815_v6 = vld [vmem:[#allocation2 + $0x3c] sm:$0xf]  ;;  %v819_v18 = vld [vmem:[#allocation2 + $0x44] sm:$0x1]  ;;  %s13859_s6 = sshll.u32 %s13920_s22, 4  ;;  %s13860_s6 = int_to_ptr.vmem [resolvable:$false] %s13859_s6 }
  0x3f   : > { %v1012_v52 = vsel %vm14073_vm13, %v1007_v41, %v1011_v25  ;;  %811 = vst.msk [vmem:[#allocation2 + $0x34] sm:$0xf] %vm256_vm1, %v531_v54  ;;  %814 = vst [vmem:[#allocation2 + $0x38] sm:$0x1] %v813_v55  ;;  %v537_v61 = vshll.u32 %v14134_v9, 16  ;;  %v542_v62 = vshrl.u32 %v12061_v51, 16  ;;  %v14171_v13 = vpack.c.bf16 %v234_v58, %v234_v58 }
  0x40   : > { %12453 = vmatmul.mubr.msk.bf16.vlgmr.msra.gmra.mrb[0].mxu0 %vm1388_vm11, %v11301_v47  ;;  %v1022_v60 = vsel %vm14073_vm13, %v1017_v48, %v1021_v32  ;;  %v545_v63 = vshll.u32 %v12061_v51, 16  ;;  %v536_v1 = vrot.slane %v534_v56, 7  ;;  %v285_v7 = vsel %vm14011_vm4, 0, %v284_v53  ;;  %v906_v11 = vld [vmem:[#allocation2 + $0x28] sm:$0xf]  ;;  %v236_v51 = vld [vmem:[%s14052_s13 + $0x60] sm:$0xff] }
  0x41   : > { %12485 = vmatpush3.bf16.msra.mxu0 %v14126_v44  ;;  %v11302_v0 = vcombine.low %v1012_v52, %v1022_v60  ;;  %v335_v8 = vsel %vm14021_vm6, 0, %v334_v46  ;;  %v905_v10 = vld [vmem:[#allocation2 + $0x24] sm:$0xf]  ;;  %v544_v12 = vrot.slane %v542_v62, 7  ;;  %286 = vst [vmem:[#allocation2 + $0x48] sm:$0x1] %v285_v7  ;;  %v14173_v9 = vpack.c.bf16 %v235_v59, %v235_v59 }
  0x42   : > { %336 = vst [vmem:[#allocation2 + $0x50] sm:$0x1] %v335_v8  ;;  %v288_v44 = vsel %vm14011_vm4, 0, %v287_v5  ;;  %v1024_v14 = vshrl.u32 %v905_v10, 16  ;;  %v1027_v15 = vshll.u32 %v905_v10, 16  ;;  %v1033_v16 = vshll.u32 %v906_v11, 16 }
  0x43   : > { %12456 = vmatprep.mubr.msk.bf16.mxu0 %vm1388_vm11, %v11302_v0  ;;  %v1037_v17 = vshrl.u32 %v906_v11, 16  ;;  %289 = vst [vmem:[#allocation2 + $0x54] sm:$0x1] %v288_v44  ;;  %v935_v19 = vld [vmem:[#allocation2 + $0x2c] sm:$0x1]  ;;  %v539_v20 = vor.u32 %v537_v61, %v536_v1  ;;  %v540_v21 = vrot.slane %v536_v1, 4  ;;  %v547_v22 = vor.u32 %v545_v63, %v544_v12 }
  0x44   : > { %v549_v23 = vrot.slane %v544_v12, 4  ;;  %v1026_v24 = vrot.slane %v1024_v14, 4  ;;  %v1029_v25 = vrot.slane %v1027_v15, 5  ;;  %v1035_v26 = vrot.slane %v1033_v16, 5  ;;  %v907_v29 = vld [vmem:[#allocation2 + $0x30] sm:$0xf] }
  0x45   : > { %v1039_v27 = vrot.slane %v1037_v17, 4  ;;  %v1043_v28 = vshll.u32 %v935_v19, 16  ;;  %v548_v30 = vsel %vm14079_vm14, %v540_v21, %v547_v22  ;;  %v816_v31 = vsel %vm14067_vm12, %v539_v20, %v815_v6  ;;  %v337_v55 = vld [vmem:[#allocation2 + $0x5c] sm:$0x1]  ;;  %v237_v60 = vld [vmem:[%s14052_s13 + $0x68] sm:$0xff]  ;;  %s13861_s7 = scalar_lea.vmem %s13860_s6, 4096 }
  0x46   : > { %v820_v32 = vsel %vm14011_vm4, %v549_v23, %v819_v18  ;;  %v1030_v33 = vor.u32 %v1029_v25, %v1026_v24  ;;  %v908_v36 = vld [vmem:[#allocation2 + $0x34] sm:$0xf]  ;;  %v936_v37 = vld [vmem:[#allocation2 + $0x38] sm:$0x1]  ;;  %v1048_v38 = vshrl.u32 %v907_v29, 16  ;;  %v1051_v34 = vshll.u32 %v907_v29, 16 }
  0x47   : > { %v1040_v35 = vor.u32 %v1039_v27, %v1035_v26  ;;  %817 = vst [vmem:[#allocation2 + $0x3c] sm:$0xf] %v816_v31  ;;  %818 = vst.msk [vmem:[#allocation2 + $0x40] sm:$0xf] %vm256_vm1, %v548_v30  ;;  %v1045_v39 = vrot.slane %v1043_v28, 5  ;;  %v1057_v40 = vshll.u32 %v908_v36, 16  ;;  %v12064_v10 = vpack.c.bf16 %v236_v51, %v236_v51 }
  0x48   : > { %821 = vst [vmem:[#allocation2 + $0x44] sm:$0x1] %v820_v32  ;;  %v1061_v41 = vshrl.u32 %v908_v36, 16  ;;  %v1067_v42 = vshll.u32 %v936_v37, 16  ;;  %v1031_v45 = vrot.slane %v1030_v33, 4  ;;  %v1050_v48 = vrot.slane %v1048_v38, 4 }
  0x49   : > { %v1041_v47 = vrot.slane %v1040_v35, 4  ;;  %v1053_v50 = vrot.slane %v1051_v34, 5  ;;  %v1059_v53 = vrot.slane %v1057_v40, 5  ;;  %v551_v54 = vshrl.u32 %v14171_v13, 16  ;;  %v2057_v61 = vld [vmem:[%s17758_s1 + $0x4] sm:$0x3] }
  0x4a   : > { %v1063_v46 = vrot.slane %v1061_v41, 4  ;;  %v1069_v52 = vrot.slane %v1067_v42, 5  ;;  %v1036_v56 = vsel %vm14073_vm13, %v1031_v45, %v1035_v26  ;;  %v554_v5 = vshll.u32 %v14171_v13, 16  ;;  %13630 = vmatprep.subr.msk.bf16.mxu0 %vm1437_vm0, %v2057_v61  ;;  %v822_v15 = vld [vmem:[#allocation2 + $0x48] sm:$0xf]  ;;  %v238_v37 = vld [vmem:[%s14052_s13 + $0x70] sm:$0xff] }
  0x4b   : > { %v1046_v58 = vsel %vm14073_vm13, %v1041_v47, %v1045_v39  ;;  %v1054_v59 = vor.u32 %v1053_v50, %v1050_v48  ;;  %v553_v0 = vrot.slane %v551_v54, 7  ;;  %v559_v1 = vshrl.u32 %v14173_v9, 16  ;;  %v826_v21 = vld [vmem:[#allocation2 + $0x50] sm:$0x1]  ;;  %v290_v26 = vld [vmem:[#allocation2 + $0x60] sm:$0x1] }
  0x4c   : > { %v11303_v62 = vcombine.low %v1036_v56, %v1046_v58  ;;  %v1064_v63 = vor.u32 %v1063_v46, %v1059_v53  ;;  %v562_v7 = vshll.u32 %v14173_v9, 16  ;;  %v338_v8 = vsel %vm14021_vm6, 0, %v337_v55  ;;  %v340_v31 = vld [vmem:[#allocation2 + $0x68] sm:$0x1]  ;;  %v829_v48 = vld [vmem:[#allocation2 + $0x54] sm:$0xf] }
  0x4d   : > { %v1055_v6 = vrot.slane %v1054_v59, 4  ;;  %v556_v44 = vor.u32 %v554_v5, %v553_v0  ;;  %v557_v14 = vrot.slane %v553_v0, 4  ;;  %339 = vst [vmem:[#allocation2 + $0x5c] sm:$0x1] %v338_v8  ;;  %v12065_v16 = vpack.c.bf16 %v237_v60, %v237_v60  ;;  %v239_v50 = vld [vmem:[%s14052_s13 + $0x78] sm:$0xff]  ;;  %v240_v5 = vld [vmem:[%s14052_s13 + $0x80] sm:$0xff] }
  0x4e   : > { %12457 = vmatmul.mubr.msk.bf16.gmra.mrb[4].mxu0 %vm1388_vm11, %v11303_v62  ;;  %v1065_v11 = vrot.slane %v1064_v63, 4  ;;  %v909_v12 = vld [vmem:[#allocation2 + $0x3c] sm:$0xf]  ;;  %v910_v13 = vld [vmem:[#allocation2 + $0x40] sm:$0xf]  ;;  %v561_v25 = vrot.slane %v559_v1, 7  ;;  %v12066_v59 = vpack.c.bf16 %v238_v37, %v238_v37  ;;  %v12067_v1 = vpack.c.bf16 %v239_v50, %v239_v50 }
  0x4f   : > { %v1060_v17 = vsel %vm14073_vm13, %v1055_v6, %v1059_v53  ;;  %v937_v18 = vld [vmem:[#allocation2 + $0x44] sm:$0x1]  ;;  %v1072_v19 = vshrl.u32 %v909_v12, 16  ;;  %v1075_v9 = vshll.u32 %v909_v12, 16  ;;  %v1081_v20 = vshll.u32 %v910_v13, 16  ;;  %v241_v6 = vld [vmem:[%s14052_s13 + $0x88] sm:$0xff] }
  0x50   : > { %v1070_v22 = vsel %vm14073_vm13, %v1065_v11, %v1069_v52  ;;  %v1085_v23 = vshrl.u32 %v910_v13, 16  ;;  %v1091_v24 = vshll.u32 %v937_v18, 16  ;;  %v564_v35 = vor.u32 %v562_v7, %v561_v25  ;;  %v293_v60 = vld [vmem:[#allocation2 + $0x6c] sm:$0x1]  ;;  %v343_v61 = vld [vmem:[#allocation2 + $0x74] sm:$0x1] }
  0x51   : > { %v11304_v27 = vcombine.low %v1060_v17, %v1070_v22  ;;  %v1074_v28 = vrot.slane %v1072_v19, 4  ;;  %v1077_v29 = vrot.slane %v1075_v9, 5  ;;  %v1083_v30 = vrot.slane %v1081_v20, 5 }
  0x52   : > { %v1087_v32 = vrot.slane %v1085_v23, 4  ;;  %v1093_v33 = vrot.slane %v1091_v24, 5  ;;  %v566_v36 = vrot.slane %v561_v25, 4  ;;  %v823_v34 = vsel %vm14067_vm12, %v556_v44, %v822_v15 }
  0x53   : > { %12460 = vmatprep.mubr.msk.bf16.mxu0 %vm1388_vm11, %v11304_v27  ;;  %v1078_v38 = vor.u32 %v1077_v29, %v1074_v28  ;;  %v568_v39 = vshrl.u32 %v12064_v10, 16  ;;  %v571_v40 = vshll.u32 %v12064_v10, 16  ;;  %v565_v42 = vsel %vm14079_vm14, %v557_v14, %v564_v35  ;;  %824 = vst [vmem:[#allocation2 + $0x48] sm:$0xf] %v823_v34 }
  0x54   : > { %v1088_v41 = vor.u32 %v1087_v32, %v1083_v30  ;;  %v827_v45 = vsel %vm14011_vm4, %v566_v36, %v826_v21  ;;  %v576_v47 = vshrl.u32 %v12065_v16, 16  ;;  %825 = vst.msk [vmem:[#allocation2 + $0x4c] sm:$0xf] %vm256_vm1, %v565_v42  ;;  %v579_v46 = vshll.u32 %v12065_v16, 16  ;;  %v833_v52 = vld [vmem:[#allocation2 + $0x5c] sm:$0x1] }
  0x55   : > { %v1079_v51 = vrot.slane %v1078_v38, 4  ;;  %828 = vst [vmem:[#allocation2 + $0x50] sm:$0x1] %v827_v45  ;;  %v570_v53 = vrot.slane %v568_v39, 7  ;;  %v291_v54 = vsel %vm14011_vm4, 0, %v290_v26  ;;  %v341_v58 = vsel %vm14021_vm6, 0, %v340_v31 }
  0x56   : > { %v1089_v55 = vrot.slane %v1088_v41, 4  ;;  %v578_v56 = vrot.slane %v576_v47, 7  ;;  %292 = vst [vmem:[#allocation2 + $0x60] sm:$0x1] %v291_v54  ;;  %342 = vst [vmem:[#allocation2 + $0x68] sm:$0x1] %v341_v58  ;;  %v12068_v22 = vpack.c.bf16 %v240_v5, %v240_v5  ;;  %v14238_v28 = vpack.c.bf16 %v241_v6, %v241_v6 }
  0x57   : > { %v1084_v62 = vsel %vm14073_vm13, %v1079_v51, %v1083_v30  ;;  %v573_v63 = vor.u32 %v571_v40, %v570_v53  ;;  %v574_v0 = vrot.slane %v570_v53, 4  ;;  %v585_v11 = vshrl.u32 %v12066_v59, 16  ;;  %v242_v39 = vld [vmem:[%s14052_s13 + $0x90] sm:$0xff]  ;;  %v243_v47 = vld [vmem:[%s14052_s13 + $0x98] sm:$0xff] }
  0x58   : > { %v1094_v7 = vsel %vm14073_vm13, %v1089_v55, %v1093_v33  ;;  %v581_v8 = vor.u32 %v579_v46, %v578_v56  ;;  %v583_v10 = vrot.slane %v578_v56, 4  ;;  %v588_v44 = vshll.u32 %v12066_v59, 16 }
  0x59   : > { %v11305_v12 = vcombine.low %v1084_v62, %v1094_v7  ;;  %v830_v13 = vsel %vm14067_vm12, %v573_v63, %v829_v48  ;;  %v593_v14 = vshrl.u32 %v12067_v1, 16  ;;  %v587_v17 = vrot.slane %v585_v11, 7  ;;  %v296_v7 = vld [vmem:[#allocation2 + $0x78] sm:$0x1] }
  0x5a   : > { %v582_v15 = vsel %vm14079_vm14, %v574_v0, %v581_v8  ;;  %831 = vst [vmem:[#allocation2 + $0x54] sm:$0xf] %v830_v13  ;;  %v834_v16 = vsel %vm14011_vm4, %v583_v10, %v833_v52  ;;  %v596_v18 = vshll.u32 %v12067_v1, 16  ;;  %v911_v19 = vld [vmem:[#allocation2 + $0x48] sm:$0xf]  ;;  %v294_v20 = vsel %vm14011_vm4, 0, %v293_v60 }
  0x5b   : > { %12461 = vmatmul.mubr.msk.bf16.gmra.mrb[8].mxu0 %vm1388_vm11, %v11305_v12  ;;  %832 = vst.msk [vmem:[#allocation2 + $0x58] sm:$0xf] %vm256_vm1, %v582_v15  ;;  %835 = vst [vmem:[#allocation2 + $0x5c] sm:$0x1] %v834_v16  ;;  %v595_v9 = vrot.slane %v593_v14, 7  ;;  %v344_v21 = vsel %vm14021_vm6, 0, %v343_v61  ;;  %v590_v27 = vor.u32 %v588_v44, %v587_v17  ;;  %v14251_v61 = vpack.c.bf16 %v242_v39, %v242_v39 }
  0x5c   : > { %v912_v23 = vld [vmem:[#allocation2 + $0x4c] sm:$0xf]  ;;  %v938_v24 = vld [vmem:[#allocation2 + $0x50] sm:$0x1]  ;;  %v1096_v25 = vshrl.u32 %v911_v19, 16  ;;  %v1099_v26 = vshll.u32 %v911_v19, 16  ;;  %v14253_v62 = vpack.c.bf16 %v243_v47, %v243_v47 }
  0x5d   : > { %295 = vst [vmem:[#allocation2 + $0x6c] sm:$0x1] %v294_v20  ;;  %345 = vst [vmem:[#allocation2 + $0x74] sm:$0x1] %v344_v21  ;;  %v1105_v29 = vshll.u32 %v912_v23, 16  ;;  %v1109_v30 = vshrl.u32 %v912_v23, 16  ;;  %v598_v37 = vor.u32 %v596_v18, %v595_v9 }
  0x5e   : > { %v1115_v31 = vshll.u32 %v938_v24, 16  ;;  %v591_v32 = vrot.slane %v587_v17, 4  ;;  %v836_v33 = vld [vmem:[#allocation2 + $0x60] sm:$0xf]  ;;  %v1098_v35 = vrot.slane %v1096_v25, 4  ;;  %v1101_v36 = vrot.slane %v1099_v26, 5 }
  0x5f   : > { %v600_v38 = vrot.slane %v595_v9, 4  ;;  %v840_v34 = vld [vmem:[#allocation2 + $0x68] sm:$0x1]  ;;  %v1107_v40 = vrot.slane %v1105_v29, 5  ;;  %v1111_v41 = vrot.slane %v1109_v30, 4  ;;  %v837_v45 = vsel %vm14067_vm12, %v590_v27, %v836_v33  ;;  %v244_v17 = vld [vmem:[%s14052_s13 + $0xa0] sm:$0xff] }
  0x60   : > { %v1117_v42 = vrot.slane %v1115_v31, 5  ;;  %v1102_v48 = vor.u32 %v1101_v36, %v1098_v35  ;;  %v599_v50 = vsel %vm14079_vm14, %v591_v32, %v598_v37  ;;  %838 = vst [vmem:[#allocation2 + $0x60] sm:$0xf] %v837_v45  ;;  %v602_v53 = vshrl.u32 %v12068_v22, 16  ;;  %v346_v31 = vld [vmem:[#allocation2 + $0x80] sm:$0x1] }
  0x61   : > { %v841_v51 = vsel %vm14011_vm4, %v600_v38, %v840_v34  ;;  %v1112_v46 = vor.u32 %v1111_v41, %v1107_v40  ;;  %v913_v52 = vld [vmem:[#allocation2 + $0x54] sm:$0xf]  ;;  %839 = vst.msk [vmem:[#allocation2 + $0x64] sm:$0xf] %vm256_vm1, %v599_v50  ;;  %v605_v54 = vshll.u32 %v12068_v22, 16  ;;  %v610_v55 = vshrl.u32 %v14238_v28, 16 }
  0x62   : > { %842 = vst [vmem:[#allocation2 + $0x68] sm:$0x1] %v841_v51  ;;  %v613_v56 = vshll.u32 %v14238_v28, 16  ;;  %v1103_v58 = vrot.slane %v1102_v48, 4  ;;  %v914_v59 = vld [vmem:[#allocation2 + $0x58] sm:$0xf]  ;;  %v14265_v32 = vpack.c.bf16 %v244_v17, %v244_v17 }
  0x63   : > { %v939_v5 = vld [vmem:[#allocation2 + $0x5c] sm:$0x1]  ;;  %v1120_v60 = vshrl.u32 %v913_v52, 16  ;;  %v1113_v63 = vrot.slane %v1112_v46, 4  ;;  %v1123_v0 = vshll.u32 %v913_v52, 16  ;;  %v1129_v1 = vshll.u32 %v914_v59, 16 }
  0x64   : > { %v1133_v6 = vshrl.u32 %v914_v59, 16  ;;  %v1108_v8 = vsel %vm14073_vm13, %v1103_v58, %v1107_v40  ;;  %v1139_v11 = vshll.u32 %v939_v5, 16  ;;  %v604_v12 = vrot.slane %v602_v53, 7  ;;  %v843_v13 = vld [vmem:[#allocation2 + $0x6c] sm:$0xf] }
  0x65   : > { %v1122_v10 = vrot.slane %v1120_v60, 4  ;;  %v1118_v44 = vsel %vm14073_vm13, %v1113_v63, %v1117_v42  ;;  %v1125_v14 = vrot.slane %v1123_v0, 5  ;;  %v1131_v15 = vrot.slane %v1129_v1, 5  ;;  %v847_v41 = vld [vmem:[#allocation2 + $0x74] sm:$0x1]  ;;  %v245_v5 = vld [vmem:[%s14052_s13 + $0xa8] sm:$0xff] }
  0x66   : > { %v1135_v16 = vrot.slane %v1133_v6, 4  ;;  %v11306_v18 = vcombine.low %v1108_v8, %v1118_v44  ;;  %v1141_v19 = vrot.slane %v1139_v11, 5  ;;  %v607_v9 = vor.u32 %v605_v54, %v604_v12  ;;  %v299_v42 = vld [vmem:[#allocation2 + $0x84] sm:$0x1]  ;;  %v349_v51 = vld [vmem:[#allocation2 + $0x8c] sm:$0x1] }
  0x67   : > { %v608_v20 = vrot.slane %v604_v12, 4  ;;  %v1126_v21 = vor.u32 %v1125_v14, %v1122_v10  ;;  %v915_v23 = vld [vmem:[#allocation2 + $0x60] sm:$0xf]  ;;  %v612_v24 = vrot.slane %v610_v55, 7  ;;  %v297_v25 = vsel %vm14011_vm4, 0, %v296_v7 }
  0x68   : > { %v1136_v22 = vor.u32 %v1135_v16, %v1131_v15  ;;  %12464 = vmatprep.mubr.msk.bf16.mxu0 %vm1388_vm11, %v11306_v18  ;;  %v916_v26 = vld [vmem:[#allocation2 + $0x64] sm:$0xf]  ;;  %v1144_v28 = vshrl.u32 %v915_v23, 16  ;;  %v1147_v29 = vshll.u32 %v915_v23, 16  ;;  %v844_v30 = vsel %vm14067_vm12, %v607_v9, %v843_v13  ;;  %298 = vst [vmem:[#allocation2 + $0x78] sm:$0x1] %v297_v25 }
  0x69   : > { %v940_v27 = vld [vmem:[#allocation2 + $0x68] sm:$0x1]  ;;  %v1127_v33 = vrot.slane %v1126_v21, 4  ;;  %v1153_v36 = vshll.u32 %v916_v26, 16  ;;  %v1157_v37 = vshrl.u32 %v916_v26, 16  ;;  %v615_v40 = vor.u32 %v613_v56, %v612_v24 }
  0x6a   : > { %v1137_v35 = vrot.slane %v1136_v22, 4  ;;  %845 = vst [vmem:[#allocation2 + $0x6c] sm:$0xf] %v844_v30  ;;  %v1146_v38 = vrot.slane %v1144_v28, 4  ;;  %v1149_v34 = vrot.slane %v1147_v29, 5  ;;  %v1163_v39 = vshll.u32 %v940_v27, 16 }
  0x6b   : > { %v1132_v45 = vsel %vm14073_vm13, %v1127_v33, %v1131_v15  ;;  %v1155_v48 = vrot.slane %v1153_v36, 5  ;;  %v1159_v50 = vrot.slane %v1157_v37, 4  ;;  %v616_v54 = vsel %vm14079_vm14, %v608_v20, %v615_v40  ;;  %v302_v18 = vld [vmem:[#allocation2 + $0x90] sm:$0x1]  ;;  %v352_v22 = vld [vmem:[#allocation2 + $0x98] sm:$0x1] }
  0x6c   : > { %v1142_v47 = vsel %vm14073_vm13, %v1137_v35, %v1141_v19  ;;  %v1150_v46 = vor.u32 %v1149_v34, %v1146_v38  ;;  %v1165_v52 = vrot.slane %v1163_v39, 5  ;;  %v617_v56 = vrot.slane %v612_v24, 4  ;;  %846 = vst.msk [vmem:[#allocation2 + $0x70] sm:$0xf] %vm256_vm1, %v616_v54  ;;  %v246_v40 = vld [vmem:[%s14052_s13 + $0xb0] sm:$0xff] }
  0x6d   : > { %v11307_v53 = vcombine.low %v1132_v45, %v1142_v47  ;;  %v1160_v55 = vor.u32 %v1159_v50, %v1155_v48  ;;  %v347_v58 = vsel %vm14021_vm6, 0, %v346_v31  ;;  %v619_v59 = vshrl.u32 %v14251_v61, 16 }
  0x6e   : > { %v1151_v60 = vrot.slane %v1150_v46, 4  ;;  %348 = vst [vmem:[#allocation2 + $0x80] sm:$0x1] %v347_v58  ;;  %v622_v63 = vshll.u32 %v14251_v61, 16  ;;  %v627_v0 = vshrl.u32 %v14253_v62, 16  ;;  %v630_v1 = vshll.u32 %v14253_v62, 16 }
  0x6f   : > { %12465 = vmatmul.mubr.msk.bf16.gmra.mrb[12].mxu0 %vm1388_vm11, %v11307_v53  ;;  %v1161_v6 = vrot.slane %v1160_v55, 4  ;;  %v848_v7 = vsel %vm14011_vm4, %v617_v56, %v847_v41  ;;  %v621_v8 = vrot.slane %v619_v59, 7  ;;  %v300_v10 = vsel %vm14011_vm4, 0, %v299_v42  ;;  %v850_v61 = vld [vmem:[#allocation2 + $0x78] sm:$0xf] }
  0x70   : > { %v1156_v11 = vsel %vm14073_vm13, %v1151_v60, %v1155_v48  ;;  %849 = vst [vmem:[#allocation2 + $0x74] sm:$0x1] %v848_v7  ;;  %v629_v13 = vrot.slane %v627_v0, 7  ;;  %301 = vst [vmem:[#allocation2 + $0x84] sm:$0x1] %v300_v10  ;;  %v350_v62 = vsel %vm14021_vm6, 0, %v349_v51  ;;  %v12073_v44 = vpack.c.bf16 %v245_v5, %v245_v5 }
  0x71   : > { %v14288_v12 = vld [vmem:[#allocation2 + $0x6c] sm:$0xf]  ;;  %v1166_v14 = vsel %vm14073_vm13, %v1161_v6, %v1165_v52  ;;  %v624_v17 = vor.u32 %v622_v63, %v621_v8  ;;  %351 = vst [vmem:[#allocation2 + $0x8c] sm:$0x1] %v350_v62  ;;  %v625_v9 = vrot.slane %v621_v8, 4  ;;  %v636_v26 = vshrl.u32 %v14265_v32, 16 }
  0x72   : > { %v1168_v15 = vshrl.u32 %v14288_v12, 16  ;;  %v1171_v16 = vshll.u32 %v14288_v12, 16  ;;  %v11308_v19 = vcombine.low %v1156_v11, %v1166_v14  ;;  %v632_v20 = vor.u32 %v630_v1, %v629_v13  ;;  %v305_v42 = vld [vmem:[#allocation2 + $0x9c] sm:$0x1] }
  0x73   : > { %v634_v21 = vrot.slane %v629_v13, 4  ;;  %v851_v25 = vsel %vm14067_vm12, %v624_v17, %v850_v61  ;;  %v14300_v27 = vld [vmem:[#allocation2 + $0x70] sm:$0xf]  ;;  %v639_v29 = vshll.u32 %v14265_v32, 16  ;;  %v644_v30 = vshrl.u32 %v12073_v44, 16  ;;  %v247_v53 = vld [vmem:[%s14052_s13 + $0xb8] sm:$0xff] }
  0x74   : > { %v1170_v23 = vrot.slane %v1168_v15, 4  ;;  %v1173_v24 = vrot.slane %v1171_v16, 5  ;;  %12468 = vmatprep.mubr.msk.bf16.mxu0 %vm1388_vm11, %v11308_v19  ;;  %v633_v28 = vsel %vm14079_vm14, %v625_v9, %v632_v20  ;;  %852 = vst [vmem:[#allocation2 + $0x78] sm:$0xf] %v851_v25  ;;  %v647_v31 = vshll.u32 %v12073_v44, 16 }
  0x75   : > { %v1177_v35 = vshll.u32 %v14300_v27, 16  ;;  %v1181_v36 = vshrl.u32 %v14300_v27, 16  ;;  %853 = vst.msk [vmem:[#allocation2 + $0x7c] sm:$0xf] %vm256_vm1, %v633_v28  ;;  %v854_v37 = vld [vmem:[#allocation2 + $0x80] sm:$0x1]  ;;  %v12074_v63 = vpack.c.bf16 %v246_v40, %v246_v40  ;;  %v12075_v7 = vpack.c.bf16 %v247_v53, %v247_v53 }
  0x76   : > { %v1174_v33 = vor.u32 %v1173_v24, %v1170_v23  ;;  %v638_v38 = vrot.slane %v636_v26, 7  ;;  %v855_v34 = vsel %vm14011_vm4, %v634_v21, %v854_v37  ;;  %v646_v39 = vrot.slane %v644_v30, 7  ;;  %v355_v17 = vld [vmem:[#allocation2 + $0xa4] sm:$0x1] }
  0x77   : > { %v303_v32 = vsel %vm14011_vm4, 0, %v302_v18  ;;  %v353_v41 = vsel %vm14021_vm6, 0, %v352_v22  ;;  %v941_v45 = vld [vmem:[#allocation2 + $0x74] sm:$0x1]  ;;  %v1179_v48 = vrot.slane %v1177_v35, 5  ;;  %v1183_v50 = vrot.slane %v1181_v36, 4 }
  0x78   : > { %v1175_v47 = vrot.slane %v1174_v33, 4  ;;  %856 = vst [vmem:[#allocation2 + $0x80] sm:$0x1] %v855_v34  ;;  %v641_v51 = vor.u32 %v639_v29, %v638_v38  ;;  %304 = vst [vmem:[#allocation2 + $0x90] sm:$0x1] %v303_v32  ;;  %v1187_v46 = vshll.u32 %v941_v45, 16  ;;  %v649_v54 = vor.u32 %v647_v31, %v646_v39 }
  0x79   : > { %354 = vst [vmem:[#allocation2 + $0x98] sm:$0x1] %v353_v41  ;;  %v642_v52 = vrot.slane %v638_v38, 4  ;;  %v651_v55 = vrot.slane %v646_v39, 4  ;;  %v857_v56 = vld [vmem:[#allocation2 + $0x84] sm:$0xf]  ;;  %v1184_v59 = vor.u32 %v1183_v50, %v1179_v48 }
  0x7a   : > { %v1180_v58 = vsel %vm14073_vm13, %v1175_v47, %v1179_v48  ;;  %v858_v5 = vsel %vm14067_vm12, %v641_v51, %v857_v56  ;;  %v861_v60 = vld [vmem:[#allocation2 + $0x8c] sm:$0x1]  ;;  %v1189_v0 = vrot.slane %v1187_v46, 5  ;;  %v653_v11 = vshrl.u32 %v12074_v63, 16  ;;  %v248_v41 = vld [vmem:[%s14052_s13 + $0xc0] sm:$0xff] }
  0x7b   : > { %v650_v1 = vsel %vm14079_vm14, %v642_v52, %v649_v54  ;;  %859 = vst [vmem:[#allocation2 + $0x84] sm:$0xf] %v858_v5  ;;  %v862_v6 = vsel %vm14011_vm4, %v651_v55, %v861_v60  ;;  %v1185_v8 = vrot.slane %v1184_v59, 4  ;;  %v14324_v10 = vld [vmem:[#allocation2 + $0x78] sm:$0xf]  ;;  %v656_v13 = vshll.u32 %v12074_v63, 16 }
  0x7c   : > { %860 = vst.msk [vmem:[#allocation2 + $0x88] sm:$0xf] %vm256_vm1, %v650_v1  ;;  %863 = vst [vmem:[#allocation2 + $0x8c] sm:$0x1] %v862_v6  ;;  %v306_v61 = vsel %vm14011_vm4, 0, %v305_v42  ;;  %v1192_v44 = vshrl.u32 %v14324_v10, 16 }
  0x7d   : > { %v14329_v62 = vld [vmem:[#allocation2 + $0x7c] sm:$0xf]  ;;  %v1195_v14 = vshll.u32 %v14324_v10, 16  ;;  %v661_v15 = vshrl.u32 %v12075_v7, 16  ;;  %v664_v16 = vshll.u32 %v12075_v7, 16  ;;  %v1190_v18 = vsel %vm14073_vm13, %v1185_v8, %v1189_v0  ;;  %v249_v42 = vld [vmem:[%s14052_s13 + $0xc8] sm:$0xff] }
  0x7e   : > { %307 = vst [vmem:[#allocation2 + $0x9c] sm:$0x1] %v306_v61  ;;  %v1201_v19 = vshll.u32 %v14329_v62, 16  ;;  %v1205_v9 = vshrl.u32 %v14329_v62, 16  ;;  %v655_v20 = vrot.slane %v653_v11, 7  ;;  %v11309_v21 = vcombine.low %v1180_v58, %v1190_v18  ;;  %v250_v1 = vld [vmem:[%s14052_s13 + $0xd0] sm:$0xff] }
  0x7f   : > { %v14337_v22 = vld [vmem:[#allocation2 + $0x80] sm:$0x1]  ;;  %v1194_v23 = vrot.slane %v1192_v44, 4  ;;  %v1197_v24 = vrot.slane %v1195_v14, 5  ;;  %v663_v25 = vrot.slane %v661_v15, 7  ;;  %v356_v45 = vsel %vm14021_vm6, 0, %v355_v17 }
  0x80   : > { %v1203_v26 = vrot.slane %v1201_v19, 5  ;;  %v1207_v28 = vrot.slane %v1205_v9, 4  ;;  %v1211_v29 = vshll.u32 %v14337_v22, 16  ;;  %v658_v30 = vor.u32 %v656_v13, %v655_v20  ;;  %v864_v31 = vld [vmem:[#allocation2 + $0x90] sm:$0xf]  ;;  %12469 = vmatmul.mubr.msk.bf16.gmra.mrb[16].mxu0 %vm1388_vm11, %v11309_v21  ;;  %v251_v6 = vld [vmem:[%s14052_s13 + $0xd8] sm:$0xff] }
  0x81   : > { %v1198_v33 = vor.u32 %v1197_v24, %v1194_v23  ;;  %v659_v35 = vrot.slane %v655_v20, 4  ;;  %v666_v36 = vor.u32 %v664_v16, %v663_v25  ;;  %v668_v37 = vrot.slane %v663_v25, 4  ;;  %v868_v38 = vld [vmem:[#allocation2 + $0x98] sm:$0x1]  ;;  %357 = vst [vmem:[#allocation2 + $0xa4] sm:$0x1] %v356_v45 }
  0x82   : > { %v1208_v34 = vor.u32 %v1207_v28, %v1203_v26  ;;  %v1213_v39 = vrot.slane %v1211_v29, 5  ;;  %v14341_v40 = vld [vmem:[#allocation2 + $0x84] sm:$0xf]  ;;  %v865_v32 = vsel %vm14067_vm12, %v658_v30, %v864_v31  ;;  %v308_v52 = vld [vmem:[#allocation2 + $0xa8] sm:$0x1]  ;;  %v12076_v0 = vpack.c.bf16 %v248_v41, %v248_v41 }
  0x83   : > { %v1199_v47 = vrot.slane %v1198_v33, 4  ;;  %v14349_v48 = vld [vmem:[#allocation2 + $0x88] sm:$0xf]  ;;  %v14351_v50 = vld [vmem:[#allocation2 + $0x8c] sm:$0x1]  ;;  %v1216_v51 = vshrl.u32 %v14341_v40, 16  ;;  %v667_v53 = vsel %vm14079_vm14, %v659_v35, %v666_v36  ;;  %v869_v46 = vsel %vm14011_vm4, %v668_v37, %v868_v38 }
  0x84   : > { %866 = vst [vmem:[#allocation2 + $0x90] sm:$0xf] %v865_v32  ;;  %v1209_v54 = vrot.slane %v1208_v34, 4  ;;  %v1219_v55 = vshll.u32 %v14341_v40, 16  ;;  %v1225_v56 = vshll.u32 %v14349_v48, 16  ;;  %v1229_v58 = vshrl.u32 %v14349_v48, 16 }
  0x85   : > { %867 = vst.msk [vmem:[#allocation2 + $0x94] sm:$0xf] %vm256_vm1, %v667_v53  ;;  %870 = vst [vmem:[#allocation2 + $0x98] sm:$0x1] %v869_v46  ;;  %v358_v59 = vld [vmem:[#allocation2 + $0xb0] sm:$0x1]  ;;  %v1204_v5 = vsel %vm14073_vm13, %v1199_v47, %v1203_v26  ;;  %v12077_v15 = vpack.c.bf16 %v249_v42, %v249_v42  ;;  %v12078_v29 = vpack.c.bf16 %v250_v1, %v250_v1 }
  0x86   : > { %v1218_v60 = vrot.slane %v1216_v51, 4  ;;  %v1235_v63 = vshll.u32 %v14351_v50, 16  ;;  %v1214_v7 = vsel %vm14073_vm13, %v1209_v54, %v1213_v39  ;;  %v1221_v8 = vrot.slane %v1219_v55, 5  ;;  %v252_v61 = vld [vmem:[%s14052_s13 + $0xe0] sm:$0xff]  ;;  %v871_v42 = vld [vmem:[#allocation2 + $0x9c] sm:$0xf] }
  0x87   : > { %v1227_v11 = vrot.slane %v1225_v56, 5  ;;  %v1231_v13 = vrot.slane %v1229_v58, 4  ;;  %v11310_v44 = vcombine.low %v1204_v5, %v1214_v7  ;;  %v670_v16 = vshrl.u32 %v12076_v0, 16 }
  0x88   : > { %v1237_v14 = vrot.slane %v1235_v63, 5  ;;  %v1222_v17 = vor.u32 %v1221_v8, %v1218_v60  ;;  %v673_v19 = vshll.u32 %v12076_v0, 16  ;;  %v309_v9 = vsel %vm14011_vm4, 0, %v308_v52  ;;  %v875_v46 = vld [vmem:[#allocation2 + $0xa4] sm:$0x1]  ;;  %v253_v8 = vld [vmem:[%s14052_s13 + $0xe8] sm:$0xff] }
  0x89   : > { %v1232_v18 = vor.u32 %v1231_v13, %v1227_v11  ;;  %12472 = vmatprep.mubr.msk.bf16.mxu0 %vm1388_vm11, %v11310_v44  ;;  %v672_v20 = vrot.slane %v670_v16, 7  ;;  %v678_v21 = vshrl.u32 %v12077_v15, 16  ;;  %v681_v23 = vshll.u32 %v12077_v15, 16  ;;  %310 = vst [vmem:[#allocation2 + $0xa8] sm:$0x1] %v309_v9 }
  0x8a   : > { %v359_v24 = vsel %vm14021_vm6, 0, %v358_v59  ;;  %v1223_v25 = vrot.slane %v1222_v17, 4  ;;  %v12079_v30 = vpack.c.bf16 %v251_v6, %v251_v6  ;;  %v14383_v38 = vpack.c.bf16 %v252_v61, %v252_v61  ;;  %v311_v52 = vld [vmem:[#allocation2 + $0xb4] sm:$0x1] }
  0x8b   : > { %v1233_v26 = vrot.slane %v1232_v18, 4  ;;  %v14375_v28 = vld [vmem:[#allocation2 + $0x90] sm:$0xf]  ;;  %360 = vst [vmem:[#allocation2 + $0xb0] sm:$0x1] %v359_v24  ;;  %v675_v37 = vor.u32 %v673_v19, %v672_v20  ;;  %v676_v56 = vrot.slane %v672_v20, 4 }
  0x8c   : > { %v14377_v31 = vld [vmem:[#allocation2 + $0x94] sm:$0xf]  ;;  %v14379_v33 = vld [vmem:[#allocation2 + $0x98] sm:$0x1]  ;;  %v1240_v35 = vshrl.u32 %v14375_v28, 16  ;;  %v1243_v36 = vshll.u32 %v14375_v28, 16  ;;  %v1228_v34 = vsel %vm14073_vm13, %v1223_v25, %v1227_v11 }
  0x8d   : > { %v1238_v39 = vsel %vm14073_vm13, %v1233_v26, %v1237_v14  ;;  %v1249_v32 = vshll.u32 %v14377_v31, 16  ;;  %v1253_v41 = vshrl.u32 %v14377_v31, 16  ;;  %v1259_v53 = vshll.u32 %v14379_v33, 16  ;;  %v361_v14 = vld [vmem:[#allocation2 + $0xbc] sm:$0x1] }
  0x8e   : > { %v11311_v45 = vcombine.low %v1228_v34, %v1238_v39  ;;  %v1242_v47 = vrot.slane %v1240_v35, 4  ;;  %v1245_v51 = vrot.slane %v1243_v36, 5  ;;  %v680_v58 = vrot.slane %v678_v21, 7 }
  0x8f   : > { %v1251_v54 = vrot.slane %v1249_v32, 5  ;;  %v1255_v55 = vrot.slane %v1253_v41, 4  ;;  %v1261_v5 = vrot.slane %v1259_v53, 5  ;;  %v872_v60 = vsel %vm14067_vm12, %v675_v37, %v871_v42 }
  0x90   : > { %12473 = vmatmul.mubr.msk.bf16.gmra.mrb[20].mxu0 %vm1388_vm11, %v11311_v45  ;;  %v1246_v59 = vor.u32 %v1245_v51, %v1242_v47  ;;  %v687_v63 = vshrl.u32 %v12078_v29, 16  ;;  %v683_v1 = vor.u32 %v681_v23, %v680_v58  ;;  %v685_v6 = vrot.slane %v680_v58, 4  ;;  %873 = vst [vmem:[#allocation2 + $0x9c] sm:$0xf] %v872_v60  ;;  %v878_v18 = vld [vmem:[#allocation2 + $0xa8] sm:$0xf] }
  0x91   : > { %v1256_v0 = vor.u32 %v1255_v55, %v1251_v54  ;;  %v690_v7 = vshll.u32 %v12078_v29, 16  ;;  %v695_v61 = vshrl.u32 %v12079_v30, 16  ;;  %v698_v44 = vshll.u32 %v12079_v30, 16 }
  0x92   : > { %v1247_v11 = vrot.slane %v1246_v59, 4  ;;  %v689_v13 = vrot.slane %v687_v63, 7  ;;  %v684_v16 = vsel %vm14079_vm14, %v676_v56, %v683_v1  ;;  %v876_v17 = vsel %vm14011_vm4, %v685_v6, %v875_v46  ;;  %v882_v19 = vld [vmem:[#allocation2 + $0xb0] sm:$0x1] }
  0x93   : > { %v1257_v15 = vrot.slane %v1256_v0, 4  ;;  %v312_v9 = vsel %vm14011_vm4, 0, %v311_v52  ;;  %874 = vst.msk [vmem:[#allocation2 + $0xa0] sm:$0xf] %vm256_vm1, %v684_v16  ;;  %877 = vst [vmem:[#allocation2 + $0xa4] sm:$0x1] %v876_v17  ;;  %v12081_v29 = vpack.c.bf16 %v253_v8, %v253_v8 }
  0x94   : > { %v1252_v20 = vsel %vm14073_vm13, %v1247_v11, %v1251_v54  ;;  %v692_v21 = vor.u32 %v690_v7, %v689_v13  ;;  %v693_v23 = vrot.slane %v689_v13, 4  ;;  %v697_v24 = vrot.slane %v695_v61, 7  ;;  %313 = vst [vmem:[#allocation2 + $0xb4] sm:$0x1] %v312_v9 }
  0x95   : > { %v1262_v25 = vsel %vm14073_vm13, %v1257_v15, %v1261_v5  ;;  %v362_v26 = vsel %vm14021_vm6, 0, %v361_v14  ;;  %v704_v30 = vshrl.u32 %v14383_v38, 16  ;;  %v707_v32 = vshll.u32 %v14383_v38, 16 }
  0x96   : > { %v11312_v35 = vcombine.low %v1252_v20, %v1262_v25  ;;  %v700_v36 = vor.u32 %v698_v44, %v697_v24  ;;  %v702_v37 = vrot.slane %v697_v24, 4  ;;  %v879_v34 = vsel %vm14067_vm12, %v692_v21, %v878_v18  ;;  %363 = vst [vmem:[#allocation2 + $0xbc] sm:$0x1] %v362_v26 }
  0x97   : > { %880 = vst [vmem:[#allocation2 + $0xa8] sm:$0xf] %v879_v34  ;;  %v706_v39 = vrot.slane %v704_v30, 7  ;;  %v712_v41 = vshrl.u32 %v12081_v29, 16  ;;  %v715_v42 = vshll.u32 %v12081_v29, 16  ;;  %vm1942_vm15 = vcmask 1042432  }
  0x98   : > { %12476 = vmatprep.mubr.msk.bf16.mxu0 %vm1388_vm11, %v11312_v35  ;;  %v14414_v45 = vld [vmem:[#allocation2 + $0x9c] sm:$0xf]  ;;  %v701_v47 = vsel %vm14079_vm14, %v693_v23, %v700_v36  ;;  %v883_v51 = vsel %vm14011_vm4, %v702_v37, %v882_v19  ;;  %v11343_v36 = vcombine.low %v14324_v10, %v14329_v62  ;;  %vm1943_vm2 = vcmask 1046532  }
  0x99   : > { %v1264_v53 = vshrl.u32 %v14414_v45, 16  ;;  %v1267_v46 = vshll.u32 %v14414_v45, 16  ;;  %881 = vst.msk [vmem:[#allocation2 + $0xac] sm:$0xf] %vm256_vm1, %v701_v47  ;;  %884 = vst [vmem:[#allocation2 + $0xb0] sm:$0x1] %v883_v51  ;;  %v709_v38 = vor.u32 %v707_v32, %v706_v39  ;;  %v11345_v32 = vcombine.low %v14375_v28, %v14377_v31 }
  0x9a   : > { %v710_v52 = vrot.slane %v706_v39, 4  ;;  %v714_v54 = vrot.slane %v712_v41, 7  ;;  %v14423_v55 = vld [vmem:[#allocation2 + $0xa0] sm:$0xf]  ;;  %v14425_v56 = vld [vmem:[#allocation2 + $0xa4] sm:$0x1]  ;;  %v11344_v39 = vcombine.low %v14341_v40, %v14349_v48  ;;  %vm14509_vm8 = vmor %vm1942_vm15, %vm1943_vm2 }
  0x9b   : > { %v1266_v58 = vrot.slane %v1264_v53, 4  ;;  %v1269_v59 = vrot.slane %v1267_v46, 5  ;;  %v1273_v5 = vshll.u32 %v14423_v55, 16  ;;  %v1277_v60 = vshrl.u32 %v14423_v55, 16  ;;  %v885_v1 = vld [vmem:[#allocation2 + $0xb4] sm:$0xf] }
  0x9c   : > { %v1283_v63 = vshll.u32 %v14425_v56, 16  ;;  %v717_v0 = vor.u32 %v715_v42, %v714_v54  ;;  %v719_v7 = vrot.slane %v714_v54, 4  ;;  %v886_v8 = vsel %vm14067_vm12, %v709_v38, %v885_v1 }
  0x9d   : > { %v1270_v6 = vor.u32 %v1269_v59, %v1266_v58  ;;  %v889_v11 = vld [vmem:[#allocation2 + $0xbc] sm:$0x1]  ;;  %v1275_v13 = vrot.slane %v1273_v5, 5  ;;  %v1279_v61 = vrot.slane %v1277_v60, 4  ;;  %887 = vst [vmem:[#allocation2 + $0xb4] sm:$0xf] %v886_v8  ;;  %v11346_v47 = vcombine.low %v14414_v45, %v14423_v55 }
  0x9e   : > { %v1285_v44 = vrot.slane %v1283_v63, 5  ;;  %v14432_v14 = vld [vmem:[#allocation2 + $0xa8] sm:$0xf]  ;;  %v718_v15 = vsel %vm14079_vm14, %v710_v52, %v717_v0  ;;  %v890_v19 = vsel %vm14011_vm4, %v719_v7, %v889_v11  ;;  %v13813_v45 = vld [vmem:[#allocation2 + $0x14] sm:$0x1] }
  0x9f   : > { %v1271_v16 = vrot.slane %v1270_v6, 4  ;;  %v1288_v17 = vshrl.u32 %v14432_v14, 16  ;;  %v1291_v18 = vshll.u32 %v14432_v14, 16  ;;  %888 = vst.msk [vmem:[#allocation2 + $0xb8] sm:$0xf] %vm256_vm1, %v718_v15  ;;  %v1280_v9 = vor.u32 %v1279_v61, %v1275_v13 }
  0xa0   : > { %v14441_v20 = vld [vmem:[#allocation2 + $0xac] sm:$0xf]  ;;  %v14443_v21 = vld [vmem:[#allocation2 + $0xb0] sm:$0x1]  ;;  %891 = vst [vmem:[#allocation2 + $0xbc] sm:$0x1] %v890_v19 }
  0xa1   : > { %v1276_v23 = vsel %vm14073_vm13, %v1271_v16, %v1275_v13  ;;  %v1290_v24 = vrot.slane %v1288_v17, 4  ;;  %v1293_v25 = vrot.slane %v1291_v18, 5  ;;  %v1297_v26 = vshll.u32 %v14441_v20, 16 }
  0xa2   : > { %v1281_v29 = vrot.slane %v1280_v9, 4  ;;  %v1301_v30 = vshrl.u32 %v14441_v20, 16  ;;  %v1307_v35 = vshll.u32 %v14443_v21, 16  ;;  %v11347_v38 = vcombine.low %v14432_v14, %v14441_v20  ;;  %v13814_v14 = vld [vmem:[#allocation2 + $0x20] sm:$0x1] }
  0xa3   : > { %v1294_v37 = vor.u32 %v1293_v25, %v1290_v24  ;;  %v1299_v34 = vrot.slane %v1297_v26, 5  ;;  %v13793_v26 = vld [vmem:[#allocation2] sm:$0xf] }
  0xa4   : > { %v1286_v41 = vsel %vm14073_vm13, %v1281_v29, %v1285_v44  ;;  %v1303_v42 = vrot.slane %v1301_v30, 4  ;;  %v14460_v46 = vld [vmem:[#allocation2 + $0xb4] sm:$0xf]  ;;  %v1309_v54 = vrot.slane %v1307_v35, 5  ;;  %v14485_v29 = vld [vmem:[#allocation2 + $0x4] sm:$0xf] }
  0xa5   : > { %v11313_v51 = vcombine.low %v1276_v23, %v1286_v41  ;;  %v1295_v53 = vrot.slane %v1294_v37, 4  ;;  %v1312_v59 = vshrl.u32 %v14460_v46, 16  ;;  %v1315_v5 = vshll.u32 %v14460_v46, 16  ;;  %v14493_v37 = vld [vmem:[%s17758_s1 + $0x4] ss:$0 sps:$4 sm:$0xcc]  }
  0xa6   : > { %v1304_v52 = vor.u32 %v1303_v42, %v1299_v34  ;;  %v14464_v58 = vld [vmem:[#allocation2 + $0xb8] sm:$0xf]  ;;  %v11333_v30 = vcombine.low %v13793_v26, %v14485_v29  ;;  %v14495_v41 = vld [vmem:[#allocation2 + $0x10] sm:$0xf]  ;;  %v14526_v26 = vld [vmem:[#allocation2 + $0x34] sm:$0xf] }
  0xa7   : > { %12477 = vmatmul.mubr.msk.bf16.gmra.mrb[24].mxu0 %vm1388_vm11, %v11313_v51  ;;  %v1300_v60 = vsel %vm14073_vm13, %v1295_v53, %v1299_v34  ;;  %v14471_v63 = vld [vmem:[#allocation2 + $0xbc] sm:$0x1]  ;;  %v1321_v0 = vshll.u32 %v14464_v58, 16  ;;  %v1325_v1 = vshrl.u32 %v14464_v58, 16  ;;  %v11348_v6 = vcombine.low %v14460_v46, %v14464_v58  ;;  %v13795_v34 = vld [vmem:[#allocation2 + $0xc] sm:$0xf] }
  0xa8   : > { %v1305_v7 = vrot.slane %v1304_v52, 4  ;;  %v1314_v8 = vrot.slane %v1312_v59, 4  ;;  %v1317_v11 = vrot.slane %v1315_v5, 5  ;;  %v1331_v13 = vshll.u32 %v14471_v63, 16  ;;  %v13797_v51 = vld [vmem:[#allocation2 + $0x18] sm:$0xf] }
  0xa9   : > { %v1323_v61 = vrot.slane %v1321_v0, 5  ;;  %v1327_v44 = vrot.slane %v1325_v1, 4  ;;  %v11334_v42 = vcombine.low %v13795_v34, %v14495_v41  ;;  %v14498_v53 = vld [vmem:[#allocation2 + $0x1c] sm:$0xf]  ;;  %v13799_v59 = vld [vmem:[%s17758_s1 + $0x4] sm:$0x3] }
  0xaa   : > { %v1310_v15 = vsel %vm14073_vm13, %v1305_v7, %v1309_v54  ;;  %v1318_v16 = vor.u32 %v1317_v11, %v1314_v8  ;;  %v1333_v19 = vrot.slane %v1331_v13, 5  ;;  %v11335_v52 = vcombine.low %v13797_v51, %v14498_v53  ;;  %v1904_v54 = vld [vmem:[#allocation2 + $0x78] sm:$0xe]  ;;  %v1905_v7 = vld [vmem:[#allocation2 + $0x84] sm:$0xe] }
  0xab   : > { %v11314_v17 = vcombine.low %v1300_v60, %v1310_v15  ;;  %v1328_v18 = vor.u32 %v1327_v44, %v1323_v61  ;;  %v2155_v5 = vsel %vm1437_vm0, %v13799_v59, 0  ;;  %v2466_v60 = vrot.slane %v14493_v37, 2  ;;  %v1906_v8 = vld [vmem:[#allocation2 + $0x90] sm:$0xe]  ;;  %v1907_v13 = vld [vmem:[#allocation2 + $0x9c] sm:$0xe] }
  0xac   : > { %v1319_v9 = vrot.slane %v1318_v16, 4  ;;  %v11375_v0 = vrot.slane %v1904_v54, 9  ;;  %v2017_v1 = vrot.slane %v14329_v62, 5  ;;  %v2020_v15 = vrot.slane %v14337_v22, 5  ;;  %v1908_v16 = vld [vmem:[#allocation2 + $0xa8] sm:$0xe] }
  0xad   : > { %12480 = vmatprep.mubr.msk.bf16.mxu0 %vm1388_vm11, %v11314_v17  ;;  %v1329_v23 = vrot.slane %v1328_v18, 4  ;;  %v13800_v17 = vld [vmem:[#allocation2 + $0x24] sm:$0xf]  ;;  %v14521_v18 = vld [vmem:[#allocation2 + $0x28] sm:$0xf]  ;;  %v11377_v22 = vrot.slane %v1906_v8, 9 }
  0xae   : > { %v1324_v24 = vsel %vm14073_vm13, %v1319_v9, %v1323_v61  ;;  %v14518_v61 = vsel %vm14509_vm8, %v11375_v0, %v2017_v1  ;;  %v2019_v44 = vrot.slane %v2017_v1, 4  ;;  %v11376_v9 = vrot.slane %v1905_v7, 9  ;;  %v1909_v54 = vld [vmem:[#allocation2 + $0xb4] sm:$0xe] }
  0xaf   : > { %v1334_v25 = vsel %vm14073_vm13, %v1329_v23, %v1333_v19  ;;  %v11336_v19 = vcombine.low %v13800_v17, %v14521_v18  ;;  %v2024_v23 = vrot.slane %v14349_v48, 5  ;;  %v2031_v34 = vrot.slane %v14377_v31, 5  ;;  %v13812_v48 = vld [vmem:[#allocation2 + $0x8] sm:$0x1] }
  0xb0   : > { %v11315_v35 = vcombine.low %v1324_v24, %v1334_v25  ;;  %v2027_v24 = vrot.slane %v14351_v50, 5  ;;  %v13802_v25 = vld [vmem:[#allocation2 + $0x30] sm:$0xf]  ;;  %v11378_v0 = vrot.slane %v1907_v13, 9  ;;  %v2038_v1 = vrot.slane %v14423_v55, 5 }
  0xb1   : > { %v14538_v51 = vsel %vm14509_vm8, %v11376_v9, %v2024_v23  ;;  %v2026_v50 = vrot.slane %v2024_v23, 4  ;;  %v14543_v59 = vsel %vm14509_vm8, %v11377_v22, %v2031_v34  ;;  %v2041_v8 = vrot.slane %v14425_v56, 5 }
  0xb2   : > { %12481 = vmatmul.mubr.msk.bf16.gmra.mrb[28].mxu0 %vm1388_vm11, %v11315_v35  ;;  %v14531_v35 = vsel %vm14509_vm8, %v2019_v44, %v2020_v15  ;;  %v11379_v44 = vrot.slane %v1908_v16, 9  ;;  %v14562_v17 = vsel %vm14509_vm8, %v11378_v0, %v2038_v1  ;;  %v2048_v23 = vrot.slane %v14443_v21, 5  ;;  %v13806_v0 = vld [vmem:[#allocation2 + $0x48] sm:$0xf] }
  0xb3   : > { %12486 = vmatprep.mubr.msk.bf16.mxu0 %vm1388_vm11, %v11333_v30  ;;  %v11337_v30 = vcombine.low %v13802_v25, %v14526_v26  ;;  %v14549_v7 = vsel %vm14509_vm8, %v2026_v50, %v2027_v24  ;;  %v11380_v25 = vrot.slane %v1909_v54, 9  ;;  %v2055_v22 = vrot.slane %v14471_v63, 5  ;;  %v14577_v50 = vld [vmem:[#allocation2 + $0x40] sm:$0xf] }
  0xb4   : > { %v11392_v15 = vcombine.low %v14538_v51, %v14549_v7  ;;  %v1947_v10 = vrot.slane %v14485_v29, 5  ;;  %v1957_v55 = vrot.slane %v13813_v45, 5  ;;  %v1975_v46 = vrot.slane %v14526_v26, 5 }
  0xba   : > { %12487 = vmatmul.mubr.msk.bf16.vlgmr.msra.gmra.mrb[0].mxu0 %vm1388_vm11, %v11334_v42  ;;  %v11391_v42 = vcombine.low %v14518_v61, %v14531_v35  ;;  %v13682_v35 = vld [vmem:[#allocation2 + $0xc] sm:$0xff]  }
  0xbb   : > { %12519 = vmatpush3.bf16.msra.mxu0 %v2155_v5  ;;  %12490 = vmatprep.mubr.msk.bf16.mxu0 %vm1388_vm11, %v11335_v52  ;;  %v2034_v52 = vrot.slane %v14379_v33, 5  ;;  %v2033_v5 = vrot.slane %v2031_v34, 4  ;;  %v2045_v33 = vrot.slane %v14441_v20, 5  ;;  %v13804_v34 = vld [vmem:[#allocation2 + $0x3c] sm:$0xf]  ;;  %v1964_v20 = vrot.slane %v13814_v14, 5 }
  0xbc   : > { %13631 = vmatprep.subr.msk.bf16.mxu0 %vm1437_vm0, %v2466_v60  ;;  %v13818_v14 = vld [vmem:[#allocation2 + $0x50] sm:$0x1] }
  0xbd   : > { %v14558_v13 = vsel %vm14509_vm8, %v2033_v5, %v2034_v52  ;;  %v14568_v16 = vsel %vm14509_vm8, %v11379_v44, %v2045_v33  ;;  %v2047_v9 = vrot.slane %v2045_v33, 4  ;;  %v11338_v52 = vcombine.low %v13804_v34, %v14577_v50  ;;  %v13810_v34 = vld [vmem:[#allocation2 + $0x60] sm:$0xf] }
  0xbe   : > { %v11393_v56 = vcombine.low %v14543_v59, %v14558_v13  ;;  %v14750_v59 = vld [vmem:[%s17758_s1 + $0x8] ss:$0 sps:$4 sm:$0xcc]  }
  0xbf   : > { %v14584_v21 = vsel %vm14509_vm8, %v2047_v9, %v2048_v23  ;;  %v13808_v9 = vld [vmem:[#allocation2 + $0x54] sm:$0xf]  ;;  %v14603_v23 = vld [vmem:[#allocation2 + $0x58] sm:$0xf]  ;;  %v13684_v13 = vld [vmem:[#allocation2 + $0x24] sm:$0xff]  }
  0xc0   : > { %v11395_v63 = vcombine.low %v14568_v16, %v14584_v21  ;;  %v14758_v16 = vld [vmem:[#allocation2 + $0x34] sm:$0xf] }
  0xc1   : > { %v3523_v3 = vrot.slane %v14758_v16, 5 }
  0xc2   : > { %12491 = vmatmul.mubr.msk.bf16.gmra.mrb[4].mxu0 %vm1388_vm11, %v11336_v19  ;;  %v2040_v19 = vrot.slane %v2038_v1, 4  ;;  %v14586_v1 = vld [vmem:[#allocation2 + $0x4c] sm:$0xf] }
  0xc3   : > { %12494 = vmatprep.mubr.msk.bf16.mxu0 %vm1388_vm11, %v11337_v30  ;;  %v2052_v30 = vrot.slane %v14464_v58, 5  ;;  %v11339_v54 = vcombine.low %v13806_v0, %v14586_v1  ;;  %v314_v0 = vld [vmem:[#allocation2 + $0xc0] sm:$0x1]  ;;  %v1898_v58 = vld [vmem:[#allocation2 + $0x30] sm:$0xe] }
  0xc4   : > { %v14573_v24 = vsel %vm14509_vm8, %v2040_v19, %v2041_v8  ;;  %v1949_v19 = vrot.slane %v1947_v10, 4 }
  0xc5   : > { %v11394_v5 = vcombine.low %v14562_v17, %v14573_v24  ;;  %v14593_v8 = vsel %vm14509_vm8, %v11380_v25, %v2052_v30  ;;  %v2054_v44 = vrot.slane %v2052_v30, 4  ;;  %v11340_v25 = vcombine.low %v13808_v9, %v14603_v23  ;;  %v14606_v30 = vld [vmem:[#allocation2 + $0x64] sm:$0xf]  ;;  %v14761_v24 = vld [vmem:[#allocation2 + $0x38] sm:$0x1] }
  0xc6   : > { %v315_v9 = vsel %vm14011_vm4, 0, %v314_v0  ;;  %v1894_v0 = vld [vmem:[#allocation2] sm:$0xe] }
  0xc7   : > { %v14597_v33 = vsel %vm14509_vm8, %v2054_v44, %v2055_v22  ;;  %v11341_v22 = vcombine.low %v13810_v34, %v14606_v30  ;;  %v255_v44 = vld [vmem:[%s14052_s13 + $0xf8] sm:$0xff]  ;;  %316 = vst [vmem:[#allocation2 + $0xc0] sm:$0x1] %v315_v9  ;;  %v11365_v2 = vrot.slane %v1894_v0, 9 }
  0xc8   : > { %v12083_v34 = vpack.c.bf16 %v255_v44, %v255_v44 }
  0xc9   : > { %v1948_v29 = vsel %vm14509_vm8, %v11365_v2, %v1947_v10 }
  0xca   : > { %12495 = vmatmul.mubr.msk.bf16.gmra.mrb[8].mxu0 %vm1388_vm11, %v11338_v52  ;;  %v11342_v52 = vcombine.low %v14288_v12, %v14300_v27  ;;  %v729_v27 = vshrl.u32 %v12083_v34, 16 }
  0xcb   : > { %12498 = vmatprep.mubr.msk.bf16.mxu0 %vm1388_vm11, %v11339_v54  ;;  %v254_v54 = vld [vmem:[%s14052_s13 + $0xf0] sm:$0xff]  ;;  %s11265_s13 = sshll.u32 %s215_s12, 7 }
  0xcc   : > { %s17687_s14 = scalar_lea.vmem [#allocation4], %s11265_s13 }
  0xcd   : > { %s11199_s16 = sshll.u32 %s17687_s14, 4  ;;  %s17711_s16 = int_to_ptr.vmem [resolvable:$true] %s11199_s16 }
  0xce   : > { %v892_v9 = vld [vmem:[#allocation2 + $0xc0] sm:$0xf]  ;;  %s13855_s30 = scalar_lea.vmem %s17711_s16, 2048  ;;  %p13862_p0 = scmp.lt.s32.totalorder %s17711_s16, %s13860_s6 }
  0xcf   : > { %p13856_p11 = scmp.ne.s32.totalorder %s17711_s16, %s13855_s30  ;;  %p13863_p1 = scmp.lt.s32.totalorder %s13861_s7, %s13855_s30 }
  0xd1   : > { %p13857_p12 = pnand %p13856_p11, %p13991_p5  ;;  %p13864_p2 = por %p13863_p1, %p13862_p0 }
  0xd2   : > { %12499 = vmatmul.mubr.msk.bf16.gmra.mrb[12].mxu0 %vm1388_vm11, %v11340_v25  ;;  %v12082_v25 = vpack.c.bf16 %v254_v54, %v254_v54 }
  0xd3   : > { %12502 = vmatprep.mubr.msk.bf16.mxu0 %vm1388_vm11, %v11341_v22  ;;  %v14631_v22 = vrot.slane %v729_v27, 7  ;;  %p13858_p13 = pneg %p13857_p12 }
  0xd4   : > { %v721_v12 = vshrl.u32 %v12082_v25, 16 }
  0xd5   : > { %v736_v51 = vrot.slane %v14631_v22, 4  ;;  %p13865_p3 = pnand %p13864_p2, %p13858_p13 }
  0xd6   : > { %v723_v62 = vrot.slane %v721_v12, 7  ;;  %v1961_v12 = vrot.slane %v14498_v53, 5  ;;  %v1968_v53 = vrot.slane %v14521_v18, 5  ;;  %v2516_v18 = vsel %vm1437_vm0, %v2466_v60, 0 }
  0xd7   : > { %v1982_v60 = vrot.slane %v14577_v50, 5 }
  0xd8   : > { %v727_v44 = vrot.slane %v723_v62, 4 }
  0xda   : > { %12503 = vmatmul.mubr.msk.bf16.gmra.mrb[16].mxu0 %vm1388_vm11, %v11342_v52  ;;  %v732_v52 = vshll.u32 %v12083_v34, 16  ;;  %v1896_v34 = vld [vmem:[#allocation2 + $0x18] sm:$0xe] }
  0xdb   : > { %12506 = vmatprep.mubr.msk.bf16.mxu0 %vm1388_vm11, %v11343_v36  ;;  %v724_v36 = vshll.u32 %v12082_v25, 16  ;;  %v1895_v25 = vld [vmem:[#allocation2 + $0xc] sm:$0xe] }
  0xdc   : > { %v734_v40 = vor.u32 %v732_v52, %v14631_v22  ;;  %v11366_v27 = vrot.slane %v1895_v25, 9  ;;  %v1897_v52 = vld [vmem:[#allocation2 + $0x24] sm:$0xe]  ;;  %v1899_v25 = vld [vmem:[#allocation2 + $0x3c] sm:$0xe] }
  0xdd   : > { %v726_v54 = vor.u32 %v724_v36, %v723_v62  ;;  %v11367_v62 = vrot.slane %v1896_v34, 9  ;;  %v1963_v36 = vrot.slane %v1961_v12, 4  ;;  %v1989_v34 = vrot.slane %v14586_v1, 5 }
  0xde   : > { %v735_v28 = vsel %vm14079_vm14, %v727_v44, %v734_v40  ;;  %v1970_v44 = vrot.slane %v1968_v53, 4  ;;  %v13815_v40 = vld [vmem:[#allocation2 + $0x2c] sm:$0x1] }
  0xdf   : > { %v893_v31 = vsel %vm14067_vm12, %v726_v54, %v892_v9  ;;  %895 = vst.msk [vmem:[#allocation2 + $0xc4] sm:$0xf] %vm256_vm1, %v735_v28  ;;  %v1965_v10 = vsel %vm14509_vm8, %v1963_v36, %v1964_v20  ;;  %v11368_v54 = vrot.slane %v1897_v52, 9  ;;  %v1977_v9 = vrot.slane %v1975_v46, 4  ;;  %v13816_v28 = vld [vmem:[#allocation2 + $0x38] sm:$0x1] }
  0xe0   : > { %894 = vst [vmem:[#allocation2 + $0xc0] sm:$0xf] %v893_v31  ;;  %v1978_v31 = vrot.slane %v13816_v28, 5  ;;  %v1991_v36 = vrot.slane %v1989_v34, 4  ;;  %v1992_v20 = vrot.slane %v13818_v14, 5  ;;  %v2003_v52 = vrot.slane %v14606_v30, 5 }
  0xe1   : > { %v1969_v26 = vsel %vm14509_vm8, %v11368_v54, %v1968_v53  ;;  %v13821_v28 = vld [vmem:[#allocation2 + $0x70] sm:$0xf] }
  0xe2   : > { %12507 = vmatmul.mubr.msk.bf16.gmra.mrb[20].mxu0 %vm1388_vm11, %v11344_v39  ;;  %v1950_v39 = vrot.slane %v13812_v48, 5  ;;  %v1971_v48 = vrot.slane %v13815_v40, 5  ;;  %v14781_v14 = vld [vmem:[#allocation2 + $0x50] sm:$0x1] }
  0xe3   : > { %12510 = vmatprep.mubr.msk.bf16.mxu0 %vm1388_vm11, %v11345_v32  ;;  %v1954_v32 = vrot.slane %v14495_v41, 5 }
  0xe4   : > { %v1951_v43 = vsel %vm14509_vm8, %v1949_v19, %v1950_v39  ;;  %v1962_v19 = vsel %vm14509_vm8, %v11367_v62, %v1961_v12  ;;  %v11369_v39 = vrot.slane %v1898_v58, 9  ;;  %v1972_v37 = vsel %vm14509_vm8, %v1970_v44, %v1971_v48  ;;  %v1900_v12 = vld [vmem:[#allocation2 + $0x48] sm:$0xe]  ;;  %v13819_v44 = vld [vmem:[#allocation2 + $0x5c] sm:$0x1] }
  0xe5   : > { %v1956_v41 = vrot.slane %v1954_v32, 4  ;;  %v1955_v2 = vsel %vm14509_vm8, %v11366_v27, %v1954_v32  ;;  %v11383_v0 = vcombine.low %v1962_v19, %v1965_v10  ;;  %v14674_v32 = vld [vmem:[%s17758_s1 + $0x8] sm:$0x3]  ;;  %v11384_v45 = vcombine.low %v1969_v26, %v1972_v37  ;;  %v1901_v10 = vld [vmem:[#allocation2 + $0x54] sm:$0xe] }
  0xe6   : > { %v1984_v27 = vrot.slane %v1982_v60, 4  ;;  %v11371_v50 = vrot.slane %v1900_v12, 9  ;;  %v1993_v19 = vsel %vm14509_vm8, %v1991_v36, %v1992_v20  ;;  %v1999_v40 = vrot.slane %v13819_v44, 5  ;;  %v13822_v12 = vld [vmem:[#allocation2 + $0x74] sm:$0x1] }
  0xe7   : > { %v3241_v17 = vsel %vm1437_vm0, %v14674_v32, 0  ;;  %v14779_v36 = vld [vmem:[#allocation2 + $0x4c] sm:$0xf]  ;;  %v3441_v20 = vld [vmem:[#allocation2 + $0x48] sm:$0xe] }
  0xe8   : > { %v1990_v53 = vsel %vm14509_vm8, %v11371_v50, %v1989_v34 }
  0xea   : > { %12511 = vmatmul.mubr.msk.bf16.gmra.mrb[24].mxu0 %vm1388_vm11, %v11346_v47  ;;  %v11381_v47 = vcombine.low %v1948_v29, %v1951_v43  ;;  %v1976_v29 = vsel %vm14509_vm8, %v11369_v39, %v1975_v46  ;;  %v1979_v43 = vsel %vm14509_vm8, %v1977_v9, %v1978_v31  ;;  %v1902_v46 = vld [vmem:[#allocation2 + $0x60] sm:$0xe]  ;;  %v13820_v39 = vld [vmem:[#allocation2 + $0x68] sm:$0x1]  ;;  %v2010_v31 = vrot.slane %v13821_v28, 5 }
  0xeb   : > { %12514 = vmatprep.mubr.msk.bf16.mxu0 %vm1388_vm11, %v11347_v38  ;;  %v1958_v38 = vsel %vm14509_vm8, %v1956_v41, %v1957_v55  ;;  %v11385_v55 = vcombine.low %v1976_v29, %v1979_v43  ;;  %v13817_v41 = vld [vmem:[#allocation2 + $0x44] sm:$0x1]  ;;  %v11373_v48 = vrot.slane %v1902_v46, 9  ;;  %v13688_v46 = vld [vmem:[#allocation2 + $0x54] sm:$0xff]  }
  0xec   : > { %v1985_v62 = vrot.slane %v13817_v41, 5  ;;  %v2012_v34 = vrot.slane %v2010_v31, 4  ;;  %v364_v41 = vld [vmem:[#allocation2 + $0xc8] sm:$0x1] }
  0xed   : > { %v2004_v26 = vsel %vm14509_vm8, %v11373_v48, %v2003_v52  ;;  %v365_v61 = vsel %vm14021_vm6, 0, %v364_v41  ;;  %vm15831_vm6 = vmand %vm5568_vm7, %vm317_vm5 }
  0xee   : > { %366 = vst [vmem:[#allocation2 + $0xc8] sm:$0x1] %v365_v61  ;;  %v2845_v61 = vshrl.u32 %v14758_v16, 16 }
  0xf2   : > { %12515 = vmatmul.mubr.msk.bf16.gmra.mrb[28].mxu0 %vm1388_vm11, %v11348_v6  ;;  %v11382_v6 = vcombine.low %v1955_v2, %v1958_v38  ;;  %v1986_v2 = vsel %vm14509_vm8, %v1984_v27, %v1985_v62  ;;  %v1996_v38 = vrot.slane %v14603_v23, 5  ;;  %v2006_v23 = vrot.slane %v13820_v39, 5  ;;  %v14803_v39 = vld [vmem:[#allocation2 + $0x68] sm:$0x1] }
  0xf3   : > { %12520 = vmatprep.mubr.msk.bf16.mxu0 %vm1388_vm11, %v11381_v47  ;;  %v11370_v47 = vrot.slane %v1899_v25, 9 }
  0xf4   : > { %v1998_v54 = vrot.slane %v1996_v38, 4 }
  0xf5   : > { %v1983_v1 = vsel %vm14509_vm8, %v11370_v47, %v1982_v60  ;;  %v1903_v60 = vld [vmem:[#allocation2 + $0x6c] sm:$0xe]  ;;  %v896_v7 = vld [vmem:[#allocation2 + $0xc8] sm:$0x1] }
  0xf6   : > { %v11386_v58 = vcombine.low %v1983_v1, %v1986_v2  ;;  %v2000_v30 = vsel %vm14509_vm8, %v1998_v54, %v1999_v40  ;;  %v11374_v25 = vrot.slane %v1903_v60, 9  ;;  %v897_v4 = vsel %vm14011_vm4, %v736_v51, %v896_v7  ;;  %v2717_v7 = vld [vmem:[#allocation2 + $0x24] sm:$0xf] }
  0xf7   : > { %898 = vst [vmem:[#allocation2 + $0xc8] sm:$0x1] %v897_v4  ;;  %v3537_v1 = vrot.slane %v14779_v36, 5  ;;  %v3540_v2 = vrot.slane %v14781_v14, 5 }
  0xfa   : > { %12521 = vmatmul.mubr.msk.bf16.vlgmr.msra.gmra.mrb[0].mxu0 %vm1388_vm11, %v11382_v6  ;;  %v11387_v6 = vcombine.low %v1990_v53, %v1993_v19  ;;  %v3539_v53 = vrot.slane %v3537_v1, 4  ;;  %v13687_v19 = vld [vmem:[#allocation2 + $0x48] sm:$0xff]  }
  0xfb   : > { %12553 = vmatpush3.bf16.msra.mxu0 %v2516_v18  ;;  %12524 = vmatprep.mubr.msk.bf16.mxu0 %vm1388_vm11, %v11383_v0  ;;  %v11372_v0 = vrot.slane %v1901_v10, 9  ;;  %v2005_v18 = vrot.slane %v2003_v52, 4  ;;  %v2711_v10 = vld [vmem:[#allocation2 + $0xc] sm:$0xf] }
  0xfc   : > { %13632 = vmatprep.subr.msk.bf16.mxu0 %vm1437_vm0, %v14674_v32  ;;  %v13686_v32 = vld [vmem:[#allocation2 + $0x3c] sm:$0xff]   ;;  %v2760_v54 = vshrl.u32 %v2711_v10, 16  ;;  %v2763_v44 = vshll.u32 %v2711_v10, 16 }
  0xfd   : > { %v1997_v9 = vsel %vm14509_vm8, %v11372_v0, %v1996_v38  ;;  %v2007_v37 = vsel %vm14509_vm8, %v2005_v18, %v2006_v23  ;;  %v11483_v38 = vrot.slane %v3441_v20, 9  ;;  %v14801_v18 = vld [vmem:[#allocation2 + $0x64] sm:$0xf]  ;;  %v3443_v23 = vld [vmem:[#allocation2 + $0x60] sm:$0xe]  ;;  %v2808_v20 = vshrl.u32 %v2717_v7, 16 }
  0xfe   : > { %v11388_v29 = vcombine.low %v1997_v9, %v2000_v30  ;;  %v11389_v43 = vcombine.low %v2004_v26, %v2007_v37  ;;  %v3551_v9 = vrot.slane %v14801_v18, 5  ;;  %v3554_v30 = vrot.slane %v14803_v39, 5  ;;  %v2714_v26 = vld [vmem:[#allocation2 + $0x18] sm:$0xf]  ;;  %v14808_v37 = vld [vmem:[#allocation2 + $0x1c] sm:$0xf] }
  0xff   : > { %v14788_v52 = vsel %vm14509_vm8, %v11483_v38, %v3537_v1  ;;  %v11485_v28 = vrot.slane %v3443_v23, 9  ;;  %v2787_v41 = vshll.u32 %v2714_v26, 16  ;;  %v2793_v51 = vshll.u32 %v14808_v37, 16  ;;  %v13692_v23 = vld [vmem:[#allocation2 + $0x84] sm:$0xff]  }
 0x100   : > { %17885 = vst [vmem:[#allocation10_spill] sm:$0xff] %v14788_v52  ;;  %v3553_v60 = vrot.slane %v3551_v9, 4  ;;  %v14983_v52 = vld [vmem:[#allocation2 + $0x58] sm:$0xf] }
 0x101   : > { %v14842_v38 = vrot.slane %v2793_v51, 5  ;;  %v3446_v51 = vld [vmem:[#allocation2 + $0x84] sm:$0xe] }
 0x102   : > { %12525 = vmatmul.mubr.msk.bf16.gmra.mrb[4].mxu0 %vm1388_vm11, %v11384_v45  ;;  %v2013_v45 = vrot.slane %v13822_v12, 5 }
 0x103   : > { %12528 = vmatprep.mubr.msk.bf16.mxu0 %vm1388_vm11, %v11385_v55  ;;  %v2011_v55 = vsel %vm14509_vm8, %v11374_v25, %v2010_v31  ;;  %v2762_v31 = vrot.slane %v2760_v54, 4  ;;  %v2765_v25 = vrot.slane %v2763_v44, 5 }
 0x104   : > { %v2014_v47 = vsel %vm14509_vm8, %v2012_v34, %v2013_v45  ;;  %v14816_v45 = vsel %vm14509_vm8, %v11485_v28, %v3551_v9  ;;  %v2811_v9 = vshll.u32 %v2717_v7, 16 }
 0x105   : > { %v11390_v27 = vcombine.low %v2011_v55, %v2014_v47  ;;  %17887 = vst [vmem:[#allocation12_spill] sm:$0xff] %v14816_v45  ;;  %v13690_v55 = vld [vmem:[#allocation2 + $0x6c] sm:$0xff]   ;;  %v14820_v47 = vsel %vm14509_vm8, %v3553_v60, %v3554_v30 }
 0x106   : > { %17888 = vst [vmem:[#allocation13_spill] sm:$0xff] %v14820_v47 }
 0x10a   : > { %12529 = vmatmul.mubr.msk.bf16.gmra.mrb[8].mxu0 %vm1388_vm11, %v11386_v58  ;;  %v14790_v58 = vld [vmem:[#allocation2 + $0x10] sm:$0xf] }
 0x10b   : > { %12532 = vmatprep.mubr.msk.bf16.mxu0 %vm1388_vm11, %v11387_v6  ;;  %v14794_v6 = vsel %vm14509_vm8, %v3539_v53, %v3540_v2  ;;  %v2769_v40 = vshll.u32 %v14790_v58, 16  ;;  %v2773_v48 = vshrl.u32 %v14790_v58, 16 }
 0x10c   : > { %17886 = vst [vmem:[#allocation11_spill] sm:$0xff] %v14794_v6 }
 0x10d   : > { %v14812_v34 = vrot.slane %v2769_v40, 5  ;;  %v2775_v12 = vrot.slane %v2773_v48, 4 }
 0x10f   : > { %v2776_v4 = vor.u32 %v2775_v12, %v14812_v34  ;;  %v14865_v12 = vld [vmem:[#allocation2 + $0x88] sm:$0xf] }
 0x110   : > { %v3572_v7 = vrot.slane %v14865_v12, 5 }
 0x111   : > { %v14847_v44 = vrot.slane %v2776_v4, 4  ;;  %v2813_v4 = vrot.slane %v2811_v9, 5  ;;  %v14885_v9 = vld [vmem:[#allocation2 + $0x2c] sm:$0x1] }
 0x112   : > { %12533 = vmatmul.mubr.msk.bf16.gmra.mrb[12].mxu0 %vm1388_vm11, %v11388_v29  ;;  %v13689_v29 = vld [vmem:[#allocation2 + $0x60] sm:$0xff]  }
 0x113   : > { %12536 = vmatprep.mubr.msk.bf16.mxu0 %vm1388_vm11, %v11389_v43  ;;  %v14810_v43 = vld [vmem:[#allocation2 + $0x14] sm:$0x1] }
 0x11a   : > { %12537 = vmatmul.mubr.msk.bf16.gmra.mrb[16].mxu0 %vm1388_vm11, %v11390_v27  ;;  %v2784_v27 = vshrl.u32 %v2714_v26, 16  ;;  %v14861_v26 = vrot.slane %v2808_v20, 4 }
 0x11b   : > { %12540 = vmatprep.mubr.msk.bf16.mxu0 %vm1388_vm11, %v11391_v42  ;;  %v17882_v42 = vcombine.low %v14593_v8, %v14597_v33  ;;  %v3525_v8 = vrot.slane %v3523_v3, 4  ;;  %v13685_v33 = vld [vmem:[#allocation2 + $0x30] sm:$0xff]  }
 0x122   : > { %12541 = vmatmul.mubr.msk.bf16.gmra.mrb[20].mxu0 %vm1388_vm11, %v11392_v15  ;;  %v13683_v15 = vld [vmem:[#allocation2 + $0x18] sm:$0xff]  }
 0x123   : > { %12544 = vmatprep.mubr.msk.bf16.mxu0 %vm1388_vm11, %v11393_v56  ;;  %v17765_v56 = vrot.slane %v14750_v59, 2 }
 0x12a   : > { %12545 = vmatmul.mubr.msk.bf16.gmra.mrb[24].mxu0 %vm1388_vm11, %v11394_v5  ;;  %v3439_v5 = vld [vmem:[#allocation2 + $0x30] sm:$0xe] }
 0x12b   : > { %12548 = vmatprep.mubr.msk.bf16.mxu0 %vm1388_vm11, %v11395_v63  ;;  %v11481_v21 = vrot.slane %v3439_v5, 9  ;;  %v3526_v63 = vrot.slane %v14761_v24, 5  ;;  %v14833_v5 = vld [vmem:[#allocation2 + $0x80] sm:$0x1] }
 0x12d   : > { %v14770_v22 = vsel %vm14509_vm8, %v11481_v21, %v3523_v3  ;;  %v14774_v62 = vsel %vm14509_vm8, %v3525_v8, %v3526_v63  ;;  %v3445_v3 = vld [vmem:[#allocation2 + $0x78] sm:$0xe]  ;;  %v3568_v63 = vrot.slane %v14833_v5, 5  ;;  %v2786_v8 = vrot.slane %v2784_v27, 4  ;;  %v14869_v27 = vld [vmem:[#allocation2 + $0x94] sm:$0xf] }
 0x12e   : > { %17883 = vst [vmem:[#allocation8_spill] sm:$0xff] %v14770_v22  ;;  %17884 = vst [vmem:[#allocation9_spill] sm:$0xff] %v14774_v62  ;;  %v11487_v1 = vrot.slane %v3445_v3, 9  ;;  %v3447_v3 = vld [vmem:[#allocation2 + $0x90] sm:$0xe]  ;;  %v2889_v22 = vshll.u32 %v14779_v36, 16 }
 0x132   : > { %12549 = vmatmul.mubr.msk.bf16.gmra.mrb[28].mxu0 %vm1388_vm11, %v17882_v42  ;;  %v14825_v42 = vld [vmem:[#allocation2 + $0x20] sm:$0x1] }
 0x133   : > { %12554 = vmatprep.mubr.msk.bf16.mxu0 %vm1388_vm11, %v13682_v35  ;;  %v2779_v35 = vshll.u32 %v14810_v43, 16  ;;  %v2803_v53 = vshll.u32 %v14825_v42, 16 }
 0x135   : > { %v14840_v2 = vrot.slane %v2779_v35, 5  ;;  %v14872_v35 = vld [vmem:[#allocation2 + $0x98] sm:$0x1] }
 0x13a   : > { %12555 = vmatmul.mubr.msk.bf16.vlgmr.msra.gmra.mrb[0].mxu0 %vm1388_vm11, %v13683_v15  ;;  %v2766_v15 = vor.u32 %v2765_v25, %v2762_v31 }
 0x13b   : > { %12587 = vmatpush3.bf16.msra.mxu0 %v3241_v17  ;;  %12558 = vmatprep.mubr.msk.bf16.mxu0 %vm1388_vm11, %v13684_v13  ;;  %v2797_v13 = vshrl.u32 %v14808_v37, 16  ;;  %v14831_v17 = vld [vmem:[#allocation2 + $0x7c] sm:$0xf] }
 0x13c   : > { %13633 = vmatprep.subr.msk.bf16.mxu0 %vm1437_vm0, %v17765_v56  ;;  %v3565_v21 = vrot.slane %v14831_v17, 5  ;;  %v14845_v54 = vrot.slane %v2766_v15, 4  ;;  %v13695_v56 = vld [vmem:[#allocation2 + $0xa8] sm:$0xff]  }
 0x13d   : > { %v14849_v40 = vrot.slane %v2797_v13, 4  ;;  %v11488_v13 = vrot.slane %v3446_v51, 9  ;;  %v2841_v51 = vshll.u32 %v14758_v16, 16 }
 0x13e   : > { %v3567_v10 = vrot.slane %v3565_v21, 4  ;;  %v14853_v48 = vsel %vm14509_vm8, %v11487_v1, %v3565_v21  ;;  %v3579_v21 = vrot.slane %v14869_v27, 5  ;;  %v2772_v16 = vsel %vm14073_vm13, %v14845_v54, %v14812_v34 }
 0x13f   : > { %17889 = vst [vmem:[#allocation14_spill] sm:$0xff] %v14853_v48  ;;  %v2782_v34 = vsel %vm14073_vm13, %v14847_v44, %v14840_v2  ;;  %v14964_v48 = vld [vmem:[#allocation2 + $0xb8] sm:$0xf] }
 0x140   : > { %v14859_v31 = vsel %vm14509_vm8, %v3567_v10, %v3568_v63  ;;  %v3582_v63 = vrot.slane %v14872_v35, 5  ;;  %v3581_v25 = vrot.slane %v3579_v21, 4 }
 0x141   : > { %17890 = vst [vmem:[#allocation15_spill] sm:$0xff] %v14859_v31 }
 0x142   : > { %12559 = vmatmul.mubr.msk.bf16.gmra.mrb[4].mxu0 %vm1388_vm11, %v13685_v33  ;;  %v2789_v33 = vrot.slane %v2787_v41, 5 }
 0x143   : > { %12562 = vmatprep.mubr.msk.bf16.mxu0 %vm1388_vm11, %v13686_v32  ;;  %v14838_v32 = vld [vmem:[#allocation2 + $0x28] sm:$0xf] }
 0x144   : > { %v2817_v30 = vshll.u32 %v14838_v32, 16  ;;  %v2821_v28 = vshrl.u32 %v14838_v32, 16  ;;  %v2790_v41 = vor.u32 %v2789_v33, %v2786_v8  ;;  %v3574_v8 = vrot.slane %v3572_v7, 4 }
 0x145   : > { %v11489_v33 = vrot.slane %v3447_v3, 9  ;;  %v2800_v3 = vor.u32 %v14849_v40, %v14842_v38  ;;  %v14926_v40 = vrot.slane %v2841_v51, 5 }
 0x146   : > { %v14879_v20 = vrot.slane %v2817_v30, 5  ;;  %v2823_v1 = vrot.slane %v2821_v28, 4 }
 0x147   : > { %v14895_v28 = vsel %vm14509_vm8, %v11489_v33, %v3579_v21  ;;  %v2723_v21 = vld [vmem:[#allocation2 + $0x3c] sm:$0xf]  ;;  %v14935_v50 = vrot.slane %v2800_v3, 4 }
 0x148   : > { %17893 = vst [vmem:[#allocation18_spill] sm:$0xff] %v14895_v28  ;;  %v2824_v33 = vor.u32 %v2823_v1, %v14879_v20  ;;  %v2859_v1 = vshll.u32 %v2723_v21, 16 }
 0x14a   : > { %12563 = vmatmul.mubr.msk.bf16.gmra.mrb[8].mxu0 %vm1388_vm11, %v13687_v19  ;;  %v2720_v19 = vld [vmem:[#allocation2 + $0x30] sm:$0xf]  ;;  %v14941_v51 = vrot.slane %v2824_v33, 4 }
 0x14b   : > { %12566 = vmatprep.mubr.msk.bf16.mxu0 %vm1388_vm11, %v13688_v46  ;;  %v13691_v46 = vld [vmem:[#allocation2 + $0x78] sm:$0xff]   ;;  %v2832_v60 = vshrl.u32 %v2720_v19, 16 }
 0x152   : > { %12567 = vmatmul.mubr.msk.bf16.gmra.mrb[12].mxu0 %vm1388_vm11, %v13689_v29  ;;  %v2835_v29 = vshll.u32 %v2720_v19, 16  ;;  %v2834_v19 = vrot.slane %v2832_v60, 4  ;;  %v13694_v60 = vld [vmem:[#allocation2 + $0x9c] sm:$0xff]  }
 0x153   : > { %12570 = vmatprep.mubr.msk.bf16.mxu0 %vm1388_vm11, %v13690_v55  ;;  %v14867_v55 = vld [vmem:[#allocation2 + $0x8c] sm:$0x1] }
 0x154   : > { %v3575_v15 = vrot.slane %v14867_v55, 5  ;;  %v2837_v10 = vrot.slane %v2835_v29, 5  ;;  %v14897_v29 = vrot.slane %v2803_v53, 5  ;;  %v3449_v53 = vld [vmem:[#allocation2 + $0xa8] sm:$0xe] }
 0x156   : > { %v14891_v30 = vsel %vm14509_vm8, %v3574_v8, %v3575_v15  ;;  %v14909_v15 = vrot.slane %v2790_v41, 4  ;;  %v2814_v8 = vor.u32 %v2813_v4, %v14861_v26  ;;  %v2838_v54 = vor.u32 %v2837_v10, %v2834_v19  ;;  %v14928_v26 = vld [vmem:[#allocation2 + $0xac] sm:$0xf]  ;;  %v14930_v4 = vld [vmem:[#allocation2 + $0xb0] sm:$0x1] }
 0x157   : > { %17892 = vst [vmem:[#allocation17_spill] sm:$0xff] %v14891_v30  ;;  %v2847_v41 = vrot.slane %v2845_v61, 4  ;;  %v3596_v0 = vrot.slane %v14930_v4, 5  ;;  %v2726_v61 = vld [vmem:[#allocation2 + $0x48] sm:$0xf]  ;;  %v11491_v19 = vrot.slane %v3449_v53, 9 }
 0x158   : > { %v14939_v10 = vrot.slane %v2814_v8, 4  ;;  %v14945_v57 = vrot.slane %v2838_v54, 4  ;;  %v13696_v30 = vld [vmem:[#allocation2 + $0xb4] sm:$0xff]   ;;  %v2861_v8 = vrot.slane %v2859_v1, 5  ;;  %v11446_v1 = vcombine.low %v2772_v16, %v2782_v34 }
 0x15a   : > { %12571 = vmatmul.mubr.msk.bf16.gmra.mrb[16].mxu0 %vm1388_vm11, %v13691_v46  ;;  %v14883_v46 = vsel %vm14509_vm8, %v11488_v13, %v3572_v7  ;;  %v14903_v13 = vsel %vm14509_vm8, %v3581_v25, %v3582_v63  ;;  %v2827_v25 = vshll.u32 %v14885_v9, 16  ;;  %v2851_v63 = vshll.u32 %v14761_v24, 16  ;;  %v14919_v7 = vld [vmem:[#allocation2 + $0x40] sm:$0xf] }
 0x15b   : > { %12574 = vmatprep.mubr.msk.bf16.mxu0 %vm1388_vm11, %v13692_v23  ;;  %17891 = vst [vmem:[#allocation16_spill] sm:$0xff] %v14883_v46  ;;  %v13693_v23 = vld [vmem:[#allocation2 + $0x90] sm:$0xff]   ;;  %17894 = vst [vmem:[#allocation19_spill] sm:$0xff] %v14903_v13  ;;  %v2856_v24 = vshrl.u32 %v2723_v21, 16  ;;  %v2865_v2 = vshll.u32 %v14919_v7, 16  ;;  %v2869_v44 = vshrl.u32 %v14919_v7, 16  ;;  %v2848_v13 = vor.u32 %v2847_v41, %v14926_v40 }
 0x15c   : > { %v14948_v3 = vrot.slane %v2851_v63, 5  ;;  %v2880_v46 = vshrl.u32 %v2726_v61, 16  ;;  %v2883_v41 = vshll.u32 %v2726_v61, 16  ;;  %v3600_v61 = vrot.slane %v14964_v48, 5 }
 0x15d   : > { %v2858_v53 = vrot.slane %v2856_v24, 4  ;;  %v14960_v54 = vrot.slane %v2865_v2, 5  ;;  %v2871_v31 = vrot.slane %v2869_v44, 4  ;;  %v14968_v24 = vld [vmem:[#allocation2 + $0xc4] sm:$0xf] }
 0x15e   : > { %v14975_v2 = vld [vmem:[#allocation2 + $0xc8] sm:$0x1]  ;;  %v3450_v44 = vld [vmem:[#allocation2 + $0xb4] sm:$0xe]  ;;  %v2882_v45 = vrot.slane %v2880_v46, 4  ;;  %v2885_v6 = vrot.slane %v2883_v41, 5 }
 0x15f   : > { %v11492_v63 = vrot.slane %v3450_v44, 9  ;;  %v3610_v16 = vrot.slane %v14975_v2, 5  ;;  %v2862_v34 = vor.u32 %v2861_v8, %v2858_v53  ;;  %v13697_v44 = vld [vmem:[#allocation2 + $0xc0] sm:$0xff]   ;;  %v2872_v62 = vor.u32 %v2871_v31, %v14960_v54 }
 0x160   : > { %v2893_v8 = vshrl.u32 %v14779_v36, 16  ;;  %v2806_v36 = vsel %vm14073_vm13, %v14935_v50, %v14897_v29 }
 0x161   : > { %v2863_v29 = vrot.slane %v2862_v34, 4 }
 0x162   : > { %12575 = vmatmul.mubr.msk.bf16.gmra.mrb[20].mxu0 %vm1388_vm11, %v13693_v23  ;;  %v3593_v23 = vrot.slane %v14928_v26, 5 }
 0x163   : > { %12578 = vmatprep.mubr.msk.bf16.mxu0 %vm1388_vm11, %v13694_v60  ;;  %v14943_v60 = vrot.slane %v2827_v25, 5  ;;  %v14958_v25 = vld [vmem:[#allocation2 + $0x44] sm:$0x1]  ;;  %v2868_v34 = vsel %vm14073_vm13, %v2863_v29, %v14960_v54  ;;  %v15062_v29 = vld [vmem:[%s17758_s1 + $0xc] sm:$0x3] }
 0x164   : > { %v3595_v21 = vrot.slane %v3593_v23, 4  ;;  %v14952_v28 = vsel %vm14509_vm8, %v11491_v19, %v3593_v23  ;;  %v14966_v23 = vld [vmem:[#allocation2 + $0xbc] sm:$0x1] }
 0x165   : > { %17895 = vst [vmem:[#allocation20_spill] sm:$0xff] %v14952_v28  ;;  %v3603_v19 = vrot.slane %v14966_v23, 5  ;;  %v2875_v28 = vshll.u32 %v14958_v25, 16 }
 0x166   : > { %v14956_v33 = vsel %vm14509_vm8, %v3595_v21, %v3596_v0  ;;  %v2796_v0 = vsel %vm14073_vm13, %v14909_v15, %v14842_v38  ;;  %v2849_v21 = vrot.slane %v2848_v13, 4  ;;  %v2729_v38 = vld [vmem:[#allocation2 + $0x54] sm:$0xf]  ;;  %v3602_v15 = vrot.slane %v3600_v61, 4 }
 0x167   : > { %17896 = vst [vmem:[#allocation21_spill] sm:$0xff] %v14956_v33  ;;  %v3451_v33 = vld [vmem:[#allocation2 + $0xc0] sm:$0xe]  ;;  %v2907_v31 = vshll.u32 %v2729_v38, 16 }
 0x168   : > { %v11493_v47 = vrot.slane %v3451_v33, 9  ;;  %v14993_v53 = vsel %vm14509_vm8, %v3602_v15, %v3603_v19  ;;  %v2904_v33 = vshrl.u32 %v2729_v38, 16  ;;  %v2917_v19 = vshrl.u32 %v14983_v52, 16 }
 0x169   : > { %v2854_v50 = vsel %vm14073_vm13, %v2849_v21, %v14948_v3  ;;  %v2877_v38 = vrot.slane %v2875_v28, 5  ;;  %v15031_v15 = vrot.slane %v2889_v22, 5  ;;  %v11447_v28 = vcombine.low %v2796_v0, %v2806_v36 }
 0x16a   : > { %12579 = vmatmul.mubr.msk.bf16.gmra.mrb[24].mxu0 %vm1388_vm11, %v13695_v56  ;;  %v3607_v56 = vrot.slane %v14968_v24, 5  ;;  %v2906_v41 = vrot.slane %v2904_v33, 4  ;;  %v17898_v22 = vrot.slane %v14750_v59, 2 }
 0x16b   : > { %12582 = vmatprep.mubr.msk.bf16.mxu0 %vm1388_vm11, %v13696_v30  ;;  %v14987_v30 = vsel %vm14509_vm8, %v11492_v63, %v3600_v61  ;;  %v2913_v61 = vshll.u32 %v14983_v52, 16 }
 0x16c   : > { %v3609_v13 = vrot.slane %v3607_v56, 4  ;;  %v14997_v46 = vsel %vm14509_vm8, %v11493_v47, %v3607_v56  ;;  %v2820_v47 = vsel %vm14073_vm13, %v14939_v10, %v14879_v20  ;;  %v2830_v56 = vsel %vm14073_vm13, %v14941_v51, %v14943_v60  ;;  %v2732_v20 = vld [vmem:[#allocation2 + $0x60] sm:$0xf] }
 0x16d   : > { %v2873_v10 = vrot.slane %v2872_v62, 4  ;;  %v2895_v51 = vrot.slane %v2893_v8, 4  ;;  %v2899_v60 = vshll.u32 %v14781_v14, 16  ;;  %v2928_v3 = vshrl.u32 %v2732_v20, 16 }
 0x16e   : > { %v15004_v63 = vsel %vm14509_vm8, %v3609_v13, %v3610_v16  ;;  %v2844_v16 = vsel %vm14073_vm13, %v14945_v57, %v14926_v40  ;;  %v2886_v13 = vor.u32 %v2885_v6, %v2882_v45  ;;  %v2909_v57 = vrot.slane %v2907_v31, 5 }
 0x16f   : > { %17897 = vst [vmem:[#allocation22_spill] sm:$0xff] %v15004_v63  ;;  %v15034_v40 = vrot.slane %v2913_v61, 5  ;;  %v15036_v63 = vld [vmem:[#allocation2 + $0x5c] sm:$0x1]  ;;  %v2931_v21 = vshll.u32 %v2732_v20, 16  ;;  %v2937_v6 = vshll.u32 %v14801_v18, 16  ;;  %v11449_v14 = vcombine.low %v2844_v16, %v2854_v50 }
 0x170   : > { %v2941_v45 = vshrl.u32 %v14801_v18, 16  ;;  %v3714_v62 = vsel %vm1437_vm0, %v17898_v22, 0  ;;  %v15046_v8 = vrot.slane %v2886_v13, 4  ;;  %v2896_v33 = vor.u32 %v2895_v51, %v15031_v15  ;;  %v2735_v61 = vld [vmem:[#allocation2 + $0x6c] sm:$0xf] }
 0x171   : > { %v15049_v31 = vrot.slane %v2899_v60, 5  ;;  %v2878_v59 = vsel %vm14073_vm13, %v2873_v10, %v2877_v38  ;;  %v2910_v18 = vor.u32 %v2909_v57, %v2906_v41  ;;  %v2923_v36 = vshll.u32 %v15036_v63, 16 }
 0x172   : > { %12583 = vmatmul.mubr.msk.bf16.gmra.mrb[28].mxu0 %vm1388_vm11, %v13697_v44  ;;  %v2919_v44 = vrot.slane %v2917_v19, 4  ;;  %v15051_v19 = vld [vmem:[#allocation2 + $0x70] sm:$0xf]  ;;  %v2933_v54 = vrot.slane %v2931_v21, 5  ;;  %v15057_v16 = vrot.slane %v2937_v6, 5  ;;  %v2943_v50 = vrot.slane %v2941_v45, 4 }
 0x173   : > { %12588 = vmatprep.mubr.msk.bf16.mxu0 %vm1388_vm11, %v11446_v1  ;;  %v11448_v1 = vcombine.low %v2820_v47, %v2830_v56  ;;  %v2738_v47 = vld [vmem:[#allocation2 + $0x78] sm:$0xf]  ;;  %v2930_v56 = vrot.slane %v2928_v3, 4  ;;  %v2952_v13 = vshrl.u32 %v2735_v61, 16  ;;  %v2955_v38 = vshll.u32 %v2735_v61, 16 }
 0x174   : > { %v2920_v0 = vor.u32 %v2919_v44, %v15034_v40  ;;  %v2961_v41 = vshll.u32 %v15051_v19, 16  ;;  %v2965_v20 = vshrl.u32 %v15051_v19, 16  ;;  %v11450_v10 = vcombine.low %v2868_v34, %v2878_v59 }
 0x175   : > { %v2897_v51 = vrot.slane %v2896_v33, 4  ;;  %v2976_v60 = vshrl.u32 %v2738_v47, 16  ;;  %v2979_v57 = vshll.u32 %v2738_v47, 16  ;;  %v2911_v44 = vrot.slane %v2910_v18, 4 }
 0x176   : > { %v2925_v3 = vrot.slane %v2923_v36, 5  ;;  %v2985_v21 = vshll.u32 %v14831_v17, 16  ;;  %v2989_v6 = vshrl.u32 %v14831_v17, 16  ;;  %v2921_v45 = vrot.slane %v2920_v0, 4  ;;  %v15083_v0 = vld [vmem:[#allocation2 + $0x74] sm:$0x1] }
 0x177   : > { %v2944_v22 = vor.u32 %v2943_v50, %v15057_v16  ;;  %v2954_v34 = vrot.slane %v2952_v13, 4  ;;  %v2957_v33 = vrot.slane %v2955_v38, 5  ;;  %v15074_v61 = vrot.slane %v2961_v41, 5 }
 0x178   : > { %v2967_v59 = vrot.slane %v2965_v20, 4  ;;  %v2892_v17 = vsel %vm14073_vm13, %v15046_v8, %v15031_v15  ;;  %v2902_v18 = vsel %vm14073_vm13, %v2897_v51, %v15049_v31  ;;  %v2978_v36 = vrot.slane %v2976_v60, 4 }
 0x179   : > { %v2981_v47 = vrot.slane %v2979_v57, 5  ;;  %v2916_v13 = vsel %vm14073_vm13, %v2911_v44, %v15034_v40  ;;  %v2926_v15 = vsel %vm14073_vm13, %v2921_v45, %v2925_v3  ;;  %v2945_v31 = vrot.slane %v2944_v22, 4 }
 0x17a   : > { %12589 = vmatmul.mubr.msk.bf16.vlgmr.msra.gmra.mrb[0].mxu0 %vm1388_vm11, %v11447_v28  ;;  %v2934_v28 = vor.u32 %v2933_v54, %v2930_v56  ;;  %v2991_v56 = vrot.slane %v2989_v6, 4  ;;  %v2958_v41 = vor.u32 %v2957_v33, %v2954_v34  ;;  %v2968_v20 = vor.u32 %v2967_v59, %v15074_v61  ;;  %v2747_v34 = vld [vmem:[#allocation2 + $0x9c] sm:$0xf] }
 0x17b   : > { %12621 = vmatpush3.bf16.msra.mxu0 %v3714_v62  ;;  %12592 = vmatprep.mubr.msk.bf16.mxu0 %vm1388_vm11, %v11448_v1  ;;  %v2947_v62 = vshll.u32 %v14803_v39, 16  ;;  %v2741_v1 = vld [vmem:[#allocation2 + $0x84] sm:$0xf]  ;;  %v15085_v39 = vrot.slane %v2985_v21, 5  ;;  %v2971_v51 = vshll.u32 %v15083_v0, 16  ;;  %v2995_v60 = vshll.u32 %v14833_v5, 16 }
 0x17c   : > { %13634 = vmatprep.subr.msk.bf16.mxu0 %vm1437_vm0, %v15062_v29  ;;  %v3000_v54 = vshrl.u32 %v2741_v1, 16  ;;  %v3003_v50 = vshll.u32 %v2741_v1, 16  ;;  %v2935_v8 = vrot.slane %v2934_v28, 4  ;;  %v3009_v57 = vshll.u32 %v14865_v12, 16 }
 0x17d   : > { %v2949_v38 = vrot.slane %v2947_v62, 5  ;;  %v3013_v40 = vshrl.u32 %v14865_v12, 16  ;;  %v2982_v44 = vor.u32 %v2981_v47, %v2978_v36  ;;  %v2992_v3 = vor.u32 %v2991_v56, %v15085_v39  ;;  %v15107_v47 = vld [vmem:[#allocation2 + $0xa0] sm:$0xf] }
 0x17e   : > { %v3002_v21 = vrot.slane %v3000_v54, 4  ;;  %v3005_v6 = vrot.slane %v3003_v50, 5  ;;  %v11451_v45 = vcombine.low %v2892_v17, %v2902_v18  ;;  %v11452_v28 = vcombine.low %v2916_v13, %v2926_v15 }
 0x17f   : > { %v2940_v22 = vsel %vm14073_vm13, %v2935_v8, %v15057_v16  ;;  %v2959_v5 = vrot.slane %v2958_v41, 4  ;;  %v2969_v62 = vrot.slane %v2968_v20, 4  ;;  %v2973_v1 = vrot.slane %v2971_v51, 5 }
 0x180   : > { %v15105_v12 = vrot.slane %v3009_v57, 5  ;;  %v3015_v33 = vrot.slane %v3013_v40, 4  ;;  %v2983_v17 = vrot.slane %v2982_v44, 4  ;;  %v2993_v18 = vrot.slane %v2992_v3, 4 }
 0x181   : > { %v2997_v56 = vrot.slane %v2995_v60, 5  ;;  %v3006_v54 = vor.u32 %v3005_v6, %v3002_v21  ;;  %v3033_v16 = vshll.u32 %v14869_v27, 16  ;;  %v3037_v50 = vshrl.u32 %v14869_v27, 16 }
 0x182   : > { %12593 = vmatmul.mubr.msk.bf16.gmra.mrb[4].mxu0 %vm1388_vm11, %v11449_v14  ;;  %v2744_v14 = vld [vmem:[#allocation2 + $0x90] sm:$0xf]  ;;  %v3048_v13 = vshrl.u32 %v2747_v34, 16  ;;  %v3051_v15 = vshll.u32 %v2747_v34, 16  ;;  %v2964_v8 = vsel %vm14073_vm13, %v2959_v5, %v15074_v61  ;;  %v3061_v41 = vshrl.u32 %v15107_v47, 16 }
 0x183   : > { %12596 = vmatprep.mubr.msk.bf16.mxu0 %vm1388_vm11, %v11450_v10  ;;  %v2950_v10 = vsel %vm14073_vm13, %v2945_v31, %v2949_v38  ;;  %v3024_v59 = vshrl.u32 %v2744_v14, 16  ;;  %v3027_v36 = vshll.u32 %v2744_v14, 16  ;;  %v2974_v38 = vsel %vm14073_vm13, %v2969_v62, %v2973_v1  ;;  %v2750_v62 = vld [vmem:[#allocation2 + $0xa8] sm:$0xf] }
 0x184   : > { %v3057_v31 = vshll.u32 %v15107_v47, 16  ;;  %v3016_v20 = vor.u32 %v3015_v33, %v15105_v12  ;;  %v3019_v27 = vshll.u32 %v14867_v55, 16  ;;  %v2988_v57 = vsel %vm14073_vm13, %v2983_v17, %v15085_v39 }
 0x185   : > { %v3026_v51 = vrot.slane %v3024_v59, 4  ;;  %v3029_v60 = vrot.slane %v3027_v36, 5  ;;  %v2998_v61 = vsel %vm14073_vm13, %v2993_v18, %v2997_v56  ;;  %v3007_v40 = vrot.slane %v3006_v54, 4  ;;  %v2753_v54 = vld [vmem:[#allocation2 + $0xb4] sm:$0xf] }
 0x186   : > { %v15127_v44 = vrot.slane %v3033_v16, 5  ;;  %v3039_v3 = vrot.slane %v3037_v50, 4  ;;  %v3050_v21 = vrot.slane %v3048_v13, 4  ;;  %v3053_v6 = vrot.slane %v3051_v15, 5 }
 0x187   : > { %v11453_v14 = vcombine.low %v2940_v22, %v2950_v10  ;;  %v3059_v55 = vrot.slane %v3057_v31, 5  ;;  %v3063_v5 = vrot.slane %v3061_v41, 4  ;;  %v3017_v1 = vrot.slane %v3016_v20, 4 }
 0x188   : > { %v3021_v34 = vrot.slane %v3019_v27, 5  ;;  %v3030_v33 = vor.u32 %v3029_v60, %v3026_v51  ;;  %v3043_v39 = vshll.u32 %v14872_v35, 16  ;;  %v11455_v59 = vcombine.low %v2988_v57, %v2998_v61 }
 0x189   : > { %v3040_v36 = vor.u32 %v3039_v3, %v15127_v44  ;;  %v3054_v17 = vor.u32 %v3053_v6, %v3050_v21  ;;  %v3072_v56 = vshrl.u32 %v2750_v62, 16  ;;  %v3064_v22 = vor.u32 %v3063_v5, %v3059_v55  ;;  %v2756_v5 = vld [vmem:[#allocation2 + $0xc0] sm:$0xf] }
 0x18a   : > { %12597 = vmatmul.mubr.msk.bf16.gmra.mrb[8].mxu0 %vm1388_vm11, %v11451_v45  ;;  %v11454_v45 = vcombine.low %v2964_v8, %v2974_v38  ;;  %v3075_v10 = vshll.u32 %v2750_v62, 16  ;;  %v3081_v16 = vshll.u32 %v14928_v26, 16  ;;  %v3085_v50 = vshrl.u32 %v14928_v26, 16 }
 0x18b   : > { %12600 = vmatprep.mubr.msk.bf16.mxu0 %vm1388_vm11, %v11452_v28  ;;  %v15129_v28 = vld [vmem:[#allocation2 + $0xa4] sm:$0x1]  ;;  %v3012_v35 = vsel %vm14073_vm13, %v3007_v40, %v15105_v12  ;;  %v3022_v13 = vsel %vm14073_vm13, %v3017_v1, %v3021_v34  ;;  %v3031_v15 = vrot.slane %v3030_v33, 4  ;;  %v3045_v8 = vrot.slane %v3043_v39, 5 }
 0x18c   : > { %v3067_v18 = vshll.u32 %v15129_v28, 16  ;;  %v3096_v38 = vshrl.u32 %v2753_v54, 16  ;;  %v3099_v31 = vshll.u32 %v2753_v54, 16  ;;  %v3105_v41 = vshll.u32 %v14964_v48, 16 }
 0x18d   : > { %v3109_v20 = vshrl.u32 %v14964_v48, 16  ;;  %v3041_v27 = vrot.slane %v3040_v36, 4  ;;  %v3055_v51 = vrot.slane %v3054_v17, 4  ;;  %v3074_v60 = vrot.slane %v3072_v56, 4 }
 0x18e   : > { %v3069_v26 = vrot.slane %v3067_v18, 5  ;;  %v3065_v57 = vrot.slane %v3064_v22, 4  ;;  %v3077_v61 = vrot.slane %v3075_v10, 5  ;;  %v3083_v3 = vrot.slane %v3081_v16, 5 }
 0x18f   : > { %v3087_v21 = vrot.slane %v3085_v50, 4  ;;  %v11456_v12 = vcombine.low %v3012_v35, %v3022_v13  ;;  %v3098_v40 = vrot.slane %v3096_v38, 4  ;;  %v3101_v6 = vrot.slane %v3099_v31, 5 }
 0x190   : > { %v3036_v62 = vsel %vm14073_vm13, %v3031_v15, %v15127_v44  ;;  %v3046_v48 = vsel %vm14073_vm13, %v3041_v27, %v3045_v8  ;;  %v3091_v1 = vshll.u32 %v14930_v4, 16  ;;  %v3060_v34 = vsel %vm14073_vm13, %v3055_v51, %v3059_v55 }
 0x191   : > { %v3070_v33 = vsel %vm14073_vm13, %v3065_v57, %v3069_v26  ;;  %v3078_v39 = vor.u32 %v3077_v61, %v3074_v60  ;;  %v3088_v36 = vor.u32 %v3087_v21, %v3083_v3  ;;  %v3120_v17 = vshrl.u32 %v2756_v5, 16  ;;  %v3436_v61 = vld [vmem:[#allocation2 + $0xc] sm:$0xe] }
 0x192   : > { %12601 = vmatmul.mubr.msk.bf16.gmra.mrb[12].mxu0 %vm1388_vm11, %v11453_v14  ;;  %v3107_v14 = vrot.slane %v3105_v41, 5  ;;  %v3123_v18 = vshll.u32 %v2756_v5, 16  ;;  %v3129_v44 = vshll.u32 %v14968_v24, 16  ;;  %v3133_v56 = vshrl.u32 %v14968_v24, 16 }
 0x193   : > { %12604 = vmatprep.mubr.msk.bf16.mxu0 %vm1388_vm11, %v11454_v45  ;;  %v3111_v45 = vrot.slane %v3109_v20, 4  ;;  %v3102_v54 = vor.u32 %v3101_v6, %v3098_v40  ;;  %v11457_v22 = vcombine.low %v3036_v62, %v3046_v48  ;;  %v11458_v10 = vcombine.low %v3060_v34, %v3070_v33  ;;  %v3437_v34 = vld [vmem:[#allocation2 + $0x18] sm:$0xe]  ;;  %v3438_v33 = vld [vmem:[#allocation2 + $0x24] sm:$0xe] }
 0x194   : > { %v3079_v55 = vrot.slane %v3078_v39, 4  ;;  %v3089_v16 = vrot.slane %v3088_v36, 4  ;;  %v3093_v50 = vrot.slane %v3091_v1, 5  ;;  %v3122_v35 = vrot.slane %v3120_v17, 4 }
 0x195   : > { %v3112_v4 = vor.u32 %v3111_v45, %v3107_v14  ;;  %v3125_v13 = vrot.slane %v3123_v18, 5  ;;  %v3131_v15 = vrot.slane %v3129_v44, 5  ;;  %v3135_v8 = vrot.slane %v3133_v56, 4 }
 0x196   : > { %v3103_v38 = vrot.slane %v3102_v54, 4  ;;  %v3084_v24 = vsel %vm14073_vm13, %v3079_v55, %v3083_v3  ;;  %v3139_v51 = vshll.u32 %v14975_v2, 16  ;;  %v3502_v57 = vrot.slane %v14790_v58, 5 }
 0x197   : > { %v3113_v31 = vrot.slane %v3112_v4, 4  ;;  %v3126_v20 = vor.u32 %v3125_v13, %v3122_v35  ;;  %v3136_v27 = vor.u32 %v3135_v8, %v3131_v15  ;;  %v11478_v45 = vrot.slane %v3436_v61, 9 }
 0x198   : > { %v3108_v26 = vsel %vm14073_vm13, %v3103_v38, %v3107_v14  ;;  %v3141_v6 = vrot.slane %v3139_v51, 5  ;;  %v3504_v5 = vrot.slane %v3502_v57, 4  ;;  %v3505_v62 = vrot.slane %v14810_v43, 5 }
 0x199   : > { %v3137_v40 = vrot.slane %v3136_v27, 4  ;;  %v3509_v14 = vrot.slane %v14808_v37, 5  ;;  %v3503_v48 = vsel %vm14509_vm8, %v11478_v45, %v3502_v57  ;;  %v3516_v43 = vrot.slane %v14838_v32, 5  ;;  %v17900_v27 = vld [vmem:[#allocation9_spill] sm:$0xff]  ;;  %v3444_v57 = vld [vmem:[#allocation2 + $0x6c] sm:$0xe] }
 0x19a   : > { %12605 = vmatmul.mubr.msk.bf16.gmra.mrb[16].mxu0 %vm1388_vm11, %v11455_v59  ;;  %v3115_v59 = vshll.u32 %v14966_v23, 16  ;;  %v3094_v23 = vsel %vm14073_vm13, %v3089_v16, %v3093_v50  ;;  %v3506_v1 = vsel %vm14509_vm8, %v3504_v5, %v3505_v62  ;;  %v11479_v17 = vrot.slane %v3437_v34, 9  ;;  %v17905_v62 = vld [vmem:[#allocation12_spill] sm:$0xff] }
 0x19b   : > { %12608 = vmatprep.mubr.msk.bf16.mxu0 %vm1388_vm11, %v11456_v12  ;;  %v11459_v21 = vcombine.low %v3084_v24, %v3094_v23  ;;  %v3127_v12 = vrot.slane %v3126_v20, 4  ;;  %v3142_v58 = vsel %vm14073_vm13, %v3137_v40, %v3141_v6  ;;  %v11494_v36 = vcombine.low %v3503_v48, %v3506_v1  ;;  %v17899_v20 = vld [vmem:[#allocation8_spill] sm:$0xff]  ;;  %v17903_v40 = vld [vmem:[#allocation11_spill] sm:$0xff] }
 0x19c   : > { %v3117_v41 = vrot.slane %v3115_v59, 5  ;;  %v3511_v18 = vrot.slane %v3509_v14, 4  ;;  %v3512_v44 = vrot.slane %v14825_v42, 5  ;;  %v11480_v56 = vrot.slane %v3438_v33, 9  ;;  %v17909_v33 = vld [vmem:[#allocation15_spill] sm:$0xff] }
 0x19d   : > { %v3132_v2 = vsel %vm14073_vm13, %v3127_v12, %v3131_v15  ;;  %v3518_v54 = vrot.slane %v3516_v43, 4  ;;  %v3519_v37 = vrot.slane %v14885_v9, 5  ;;  %v3510_v4 = vsel %vm14509_vm8, %v11479_v17, %v3509_v14  ;;  %v13700_v9 = vld [vmem:[%s17758_s1 + $0xc] ss:$0 sps:$4 sm:$0xcc]   ;;  %v17912_v17 = vld [vmem:[#allocation17_spill] sm:$0xff] }
 0x19e   : > { %v3118_v60 = vsel %vm14073_vm13, %v3113_v31, %v3117_v41  ;;  %v11461_v39 = vcombine.low %v3132_v2, %v3142_v58  ;;  %v3513_v32 = vsel %vm14509_vm8, %v3511_v18, %v3512_v44  ;;  %v3517_v59 = vsel %vm14509_vm8, %v11480_v56, %v3516_v43  ;;  %v17902_v12 = vld [vmem:[#allocation10_spill] sm:$0xff]  ;;  %v17906_v2 = vld [vmem:[#allocation13_spill] sm:$0xff]  ;;  %v3448_v14 = vld [vmem:[#allocation2 + $0x9c] sm:$0xe] }
 0x19f   : > { %v11460_v3 = vcombine.low %v3108_v26, %v3118_v60  ;;  %v3520_v42 = vsel %vm14509_vm8, %v3518_v54, %v3519_v37  ;;  %v11495_v55 = vcombine.low %v3510_v4, %v3513_v32  ;;  %v4072_v16 = vsel %vm1437_vm0, %v15062_v29, 0  ;;  %v3442_v29 = vld [vmem:[#allocation2 + $0x54] sm:$0xe]  ;;  %v17908_v43 = vld [vmem:[#allocation14_spill] sm:$0xff]  ;;  %v17917_v4 = vld [vmem:[#allocation20_spill] sm:$0xff] }
 0x1a0   : > { %v11496_v50 = vcombine.low %v3517_v59, %v3520_v42  ;;  %v3533_v15 = vrot.slane %v14958_v25, 5  ;;  %v4751_v8 = vrot.slane %v13700_v9, 2  ;;  %v3544_v31 = vrot.slane %v14983_v52, 5  ;;  %v17914_v54 = vld [vmem:[#allocation18_spill] sm:$0xff]  ;;  %v17915_v37 = vld [vmem:[#allocation19_spill] sm:$0xff]  ;;  %v17918_v32 = vld [vmem:[#allocation21_spill] sm:$0xff] }
 0x1a1   : > { %v11484_v24 = vrot.slane %v3442_v29, 9  ;;  %v3547_v23 = vrot.slane %v15036_v63, 5  ;;  %v17901_v51 = vcombine.low %v17899_v20, %v17900_v27  ;;  %v3558_v60 = vrot.slane %v15051_v19, 5  ;;  %v17921_v9 = vld [vmem:[#allocation22_spill] sm:$0xff]  ;;  %v13705_v29 = vld [vmem:[#allocation2 + $0x54] sm:$0xff]  }
 0x1a2   : > { %12609 = vmatmul.mubr.msk.bf16.gmra.mrb[20].mxu0 %vm1388_vm11, %v11457_v22  ;;  %v3530_v22 = vrot.slane %v14919_v7, 5  ;;  %v3546_v25 = vrot.slane %v3544_v31, 4  ;;  %v3561_v63 = vrot.slane %v15083_v0, 5  ;;  %v17904_v6 = vcombine.low %v17902_v12, %v17903_v40  ;;  %v15299_v20 = vld [vmem:[#allocation2 + $0x70] sm:$0xf] }
 0x1a3   : > { %12612 = vmatprep.mubr.msk.bf16.mxu0 %vm1388_vm11, %v11458_v10  ;;  %v3440_v10 = vld [vmem:[#allocation2 + $0x3c] sm:$0xe]  ;;  %v3545_v26 = vsel %vm14509_vm8, %v11484_v24, %v3544_v31  ;;  %v17907_v58 = vcombine.low %v17905_v62, %v17906_v2  ;;  %v3586_v0 = vrot.slane %v15107_v47, 5  ;;  %v11490_v48 = vrot.slane %v3448_v14, 9  ;;  %v13706_v24 = vld [vmem:[#allocation2 + $0x60] sm:$0xff]  }
 0x1a4   : > { %v11482_v35 = vrot.slane %v3440_v10, 9  ;;  %v3532_v13 = vrot.slane %v3530_v22, 4  ;;  %v3548_v52 = vsel %vm14509_vm8, %v3546_v25, %v3547_v23  ;;  %v3589_v34 = vrot.slane %v15129_v28, 5  ;;  %v15301_v27 = vld [vmem:[#allocation2 + $0x74] sm:$0x1] }
 0x1a5   : > { %v11500_v61 = vcombine.low %v3545_v26, %v3548_v52  ;;  %v3588_v1 = vrot.slane %v3586_v0, 4  ;;  %v3587_v44 = vsel %vm14509_vm8, %v11490_v48, %v3586_v0  ;;  %v17916_v28 = vcombine.low %v17914_v54, %v17915_v37  ;;  %v15310_v12 = vld [vmem:[#allocation2 + $0x1c] sm:$0xf]  ;;  %v15323_v0 = vld [vmem:[#allocation2 + $0x8c] sm:$0x1] }
 0x1a6   : > { %v3531_v7 = vsel %vm14509_vm8, %v11482_v35, %v3530_v22  ;;  %v3534_v38 = vsel %vm14509_vm8, %v3532_v13, %v3533_v15  ;;  %v17919_v59 = vcombine.low %v17917_v4, %v17918_v32  ;;  %v17920_v42 = vcombine.low %v14987_v30, %v14993_v53  ;;  %v13699_v22 = vld [vmem:[#allocation2 + $0x18] sm:$0xff]   ;;  %v15274_v35 = vld [vmem:[%s17758_s1 + $0x10] sm:$0x3]  ;;  %v13704_v53 = vld [vmem:[#allocation2 + $0x48] sm:$0xff]  }
 0x1a7   : > { %v11498_v41 = vcombine.low %v3531_v7, %v3534_v38  ;;  %v3590_v47 = vsel %vm14509_vm8, %v3588_v1, %v3589_v34  ;;  %v17922_v10 = vcombine.low %v14997_v46, %v17921_v9  ;;  %v13703_v30 = vld [vmem:[#allocation2 + $0x3c] sm:$0xff]   ;;  %v15281_v46 = vld [vmem:[#allocation2 + $0x58] sm:$0xf]  ;;  %v5001_v15 = vld [vmem:[#allocation2 + $0x54] sm:$0xe]  ;;  %v5111_v26 = vrot.slane %v15299_v20, 5 }
 0x1a8   : > { %v11506_v56 = vcombine.low %v3587_v44, %v3590_v47  ;;  %v15283_v13 = vld [vmem:[#allocation2 + $0x5c] sm:$0x1]  ;;  %v11597_v38 = vrot.slane %v5001_v15, 9  ;;  %v5114_v52 = vrot.slane %v15301_v27, 5  ;;  %v4325_v62 = vshll.u32 %v15310_v12, 16 }
 0x1a9   : > { %v5100_v7 = vrot.slane %v15283_v13, 5  ;;  %v4329_v2 = vshrl.u32 %v15310_v12, 16  ;;  %v5005_v1 = vld [vmem:[#allocation2 + $0x84] sm:$0xe]  ;;  %v15330_v44 = vld [vmem:[#allocation2 + $0x20] sm:$0x1] }
 0x1aa   : > { %12613 = vmatmul.mubr.msk.bf16.gmra.mrb[24].mxu0 %vm1388_vm11, %v11459_v21  ;;  %v11486_v21 = vrot.slane %v3444_v57, 9  ;;  %v5113_v57 = vrot.slane %v5111_v26, 4  ;;  %v15353_v15 = vld [vmem:[#allocation2 + $0xa0] sm:$0xf]  ;;  %v15436_v9 = vld [vmem:[#allocation2 + $0xd4] sm:$0x1] }
 0x1ab   : > { %12616 = vmatprep.mubr.msk.bf16.mxu0 %vm1388_vm11, %v11460_v3  ;;  %v3560_v3 = vrot.slane %v3558_v60, 4  ;;  %v4331_v54 = vrot.slane %v4329_v2, 4 }
 0x1ac   : > { %v3559_v45 = vsel %vm14509_vm8, %v11486_v21, %v3558_v60  ;;  %v4267_v21 = vld [vmem:[#allocation2 + $0x18] sm:$0xf]  ;;  %v15314_v40 = vsel %vm14509_vm8, %v5113_v57, %v5114_v52  ;;  %v13711_v57 = vld [vmem:[#allocation2 + $0x9c] sm:$0xff]  }
 0x1ad   : > { %v3562_v5 = vsel %vm14509_vm8, %v3560_v3, %v3561_v63  ;;  %v13708_v63 = vld [vmem:[#allocation2 + $0x78] sm:$0xff]   ;;  %17923 = vst [vmem:[#allocation8_spill] sm:$0xff] %v15314_v40 }
 0x1ae   : > { %v11502_v19 = vcombine.low %v3559_v45, %v3562_v5  ;;  %v4316_v5 = vshrl.u32 %v4267_v21, 16  ;;  %v13715_v45 = vld [vmem:[#allocation2 + $0xcc] sm:$0xff]  }
 0x1b2   : > { %12617 = vmatmul.mubr.msk.bf16.gmra.mrb[28].mxu0 %vm1388_vm11, %v11461_v39  ;;  %v17910_v39 = vcombine.low %v17908_v43, %v17909_v33  ;;  %v5128_v43 = vrot.slane %v15323_v0, 5  ;;  %v15328_v33 = vld [vmem:[#allocation2 + $0x28] sm:$0xf] }
 0x1b3   : > { %12622 = vmatprep.mubr.msk.bf16.mxu0 %vm1388_vm11, %v11494_v36  ;;  %v17911_v36 = vld [vmem:[#allocation16_spill] sm:$0xff] }
 0x1b4   : > { %v17913_v18 = vcombine.low %v17911_v36, %v17912_v17  ;;  %v4318_v36 = vrot.slane %v4316_v5, 4 }
 0x1ba   : > { %12623 = vmatmul.mubr.msk.bf16.vlgmr.msra.gmra.mrb[0].mxu0 %vm1388_vm11, %v11495_v55  ;;  %v13701_v55 = vld [vmem:[#allocation2 + $0x24] sm:$0xff]  }
 0x1bb   : > { %12655 = vmatpush3.bf16.msra.mxu0 %v4072_v16  ;;  %12626 = vmatprep.mubr.msk.bf16.mxu0 %vm1388_vm11, %v11496_v50  ;;  %v13702_v16 = vld [vmem:[#allocation2 + $0x30] sm:$0xff]   ;;  %v4801_v50 = vsel %vm1437_vm0, %v4751_v8, 0 }
 0x1bc   : > { %13635 = vmatprep.subr.msk.bf16.mxu0 %vm1437_vm0, %v4751_v8  ;;  %v5097_v8 = vrot.slane %v15281_v46, 5 }
 0x1be   : > { %v5099_v31 = vrot.slane %v5097_v8, 4 }
 0x1c0   : > { %v15294_v25 = vsel %vm14509_vm8, %v5099_v31, %v5100_v7  ;;  %v5007_v31 = vld [vmem:[#allocation2 + $0x9c] sm:$0xe] }
 0x1c2   : > { %12627 = vmatmul.mubr.msk.bf16.gmra.mrb[4].mxu0 %vm1388_vm11, %v17901_v51  ;;  %v5003_v51 = vld [vmem:[#allocation2 + $0x6c] sm:$0xe] }
 0x1c3   : > { %12630 = vmatprep.mubr.msk.bf16.mxu0 %vm1388_vm11, %v11498_v41  ;;  %v15290_v41 = vsel %vm14509_vm8, %v11597_v38, %v5097_v8  ;;  %v11599_v60 = vrot.slane %v5003_v51, 9  ;;  %v15355_v8 = vld [vmem:[#allocation2 + $0xa4] sm:$0x1] }
 0x1c5   : > { %v15308_v3 = vsel %vm14509_vm8, %v11599_v60, %v5111_v26  ;;  %v11603_v60 = vrot.slane %v5007_v31, 9 }
 0x1ca   : > { %12631 = vmatmul.mubr.msk.bf16.gmra.mrb[8].mxu0 %vm1388_vm11, %v17904_v6  ;;  %v4270_v6 = vld [vmem:[#allocation2 + $0x24] sm:$0xf] }
 0x1cb   : > { %12634 = vmatprep.mubr.msk.bf16.mxu0 %vm1388_vm11, %v11500_v61  ;;  %v13707_v61 = vld [vmem:[#allocation2 + $0x6c] sm:$0xff]   ;;  %v4340_v14 = vshrl.u32 %v4270_v6, 16  ;;  %v4343_v48 = vshll.u32 %v4270_v6, 16 }
 0x1cd   : > { %v4342_v4 = vrot.slane %v4340_v14, 4  ;;  %v4345_v32 = vrot.slane %v4343_v48, 5  ;;  %v13712_v14 = vld [vmem:[#allocation2 + $0xa8] sm:$0xff]  }
 0x1cf   : > { %v4346_v7 = vor.u32 %v4345_v32, %v4342_v4 }
 0x1d2   : > { %12635 = vmatmul.mubr.msk.bf16.gmra.mrb[12].mxu0 %vm1388_vm11, %v17907_v58  ;;  %v15321_v58 = vld [vmem:[#allocation2 + $0x88] sm:$0xf] }
 0x1d3   : > { %12638 = vmatprep.mubr.msk.bf16.mxu0 %vm1388_vm11, %v11502_v19  ;;  %v4319_v19 = vshll.u32 %v4267_v21, 16  ;;  %v5125_v34 = vrot.slane %v15321_v58, 5 }
 0x1d5   : > { %v5127_v17 = vrot.slane %v5125_v34, 4  ;;  %v4321_v47 = vrot.slane %v4319_v19, 5  ;;  %v4276_v19 = vld [vmem:[#allocation2 + $0x3c] sm:$0xf] }
 0x1d6   : > { %v4391_v4 = vshll.u32 %v4276_v19, 16 }
 0x1da   : > { %12639 = vmatmul.mubr.msk.bf16.gmra.mrb[16].mxu0 %vm1388_vm11, %v17910_v39  ;;  %v11601_v39 = vrot.slane %v5005_v1, 9 }
 0x1db   : > { %12642 = vmatprep.mubr.msk.bf16.mxu0 %vm1388_vm11, %v17913_v18  ;;  %v13709_v18 = vld [vmem:[#allocation2 + $0x84] sm:$0xff]  }
 0x1dc   : > { %v15336_v37 = vsel %vm14509_vm8, %v11601_v39, %v5125_v34  ;;  %v15371_v34 = vrot.slane %v4346_v7, 4  ;;  %v5009_v7 = vld [vmem:[#allocation2 + $0xb4] sm:$0xe] }
 0x1dd   : > { %17924 = vst [vmem:[#allocation9_spill] sm:$0xff] %v15336_v37 }
 0x1e2   : > { %12643 = vmatmul.mubr.msk.bf16.gmra.mrb[20].mxu0 %vm1388_vm11, %v17916_v28  ;;  %v13710_v28 = vld [vmem:[#allocation2 + $0x90] sm:$0xff]  }
 0x1e3   : > { %12646 = vmatprep.mubr.msk.bf16.mxu0 %vm1388_vm11, %v11506_v56  ;;  %v15332_v56 = vrot.slane %v4325_v62, 5  ;;  %v15365_v62 = vld [vmem:[#allocation2 + $0x40] sm:$0xf] }
 0x1e4   : > { %v4397_v32 = vshll.u32 %v15365_v62, 16 }
 0x1ea   : > { %12647 = vmatmul.mubr.msk.bf16.gmra.mrb[24].mxu0 %vm1388_vm11, %v17919_v59  ;;  %v4349_v59 = vshll.u32 %v15328_v33, 16 }
 0x1eb   : > { %12650 = vmatprep.mubr.msk.bf16.mxu0 %vm1388_vm11, %v17920_v42  ;;  %v15341_v42 = vsel %vm14509_vm8, %v5127_v17, %v5128_v43 }
 0x1ec   : > { %17925 = vst [vmem:[#allocation10_spill] sm:$0xff] %v15341_v42  ;;  %v15358_v38 = vrot.slane %v4349_v59, 5 }
 0x1f2   : > { %12651 = vmatmul.mubr.msk.bf16.gmra.mrb[28].mxu0 %vm1388_vm11, %v17922_v10  ;;  %v4335_v10 = vshll.u32 %v15330_v44, 16 }
 0x1f3   : > { %12656 = vmatprep.mubr.msk.bf16.mxu0 %vm1388_vm11, %v13699_v22  ;;  %v4353_v22 = vshrl.u32 %v15328_v33, 16 }
 0x1f4   : > { %v4337_v1 = vrot.slane %v4335_v10, 5  ;;  %v15387_v10 = vld [vmem:[#allocation2 + $0xb8] sm:$0xf] }
 0x1f5   : > { %v4355_v51 = vrot.slane %v4353_v22, 4  ;;  %v4401_v22 = vshrl.u32 %v15365_v62, 16  ;;  %v5153_v31 = vrot.slane %v15387_v10, 5 }
 0x1f7   : > { %v4356_v39 = vor.u32 %v4355_v51, %v15358_v38 }
 0x1f9   : > { %v15401_v51 = vrot.slane %v4356_v39, 4  ;;  %v13714_v39 = vld [vmem:[#allocation2 + $0xc0] sm:$0xff]  }
 0x1fa   : > { %12657 = vmatmul.mubr.msk.bf16.vlgmr.msra.gmra.mrb[0].mxu0 %vm1388_vm11, %v13701_v55  ;;  %v15347_v55 = vld [vmem:[#allocation2 + $0x2c] sm:$0x1] }
 0x1fb   : > { %12689 = vmatpush3.bf16.msra.mxu0 %v4801_v50  ;;  %12660 = vmatprep.mubr.msk.bf16.mxu0 %vm1388_vm11, %v13702_v16  ;;  %v4273_v16 = vld [vmem:[#allocation2 + $0x30] sm:$0xf]  ;;  %v4322_v50 = vor.u32 %v4321_v47, %v4318_v36  ;;  %v15380_v47 = vld [vmem:[#allocation2 + $0x38] sm:$0x1] }
 0x1fc   : > { %13636 = vmatprep.subr.msk.bf16.mxu0 %vm1437_vm0, %v15274_v35  ;;  %v4364_v26 = vshrl.u32 %v4273_v16, 16  ;;  %v4367_v52 = vshll.u32 %v4273_v16, 16  ;;  %v15389_v16 = vld [vmem:[#allocation2 + $0xbc] sm:$0x1] }
 0x1fd   : > { %v4323_v6 = vrot.slane %v4322_v50, 4 }
 0x1fe   : > { %v4366_v36 = vrot.slane %v4364_v26, 4  ;;  %v4369_v17 = vrot.slane %v4367_v52, 5  ;;  %v4279_v52 = vld [vmem:[#allocation2 + $0x48] sm:$0xf] }
 0x1ff   : > { %v4328_v50 = vsel %vm14073_vm13, %v4323_v6, %v15332_v56  ;;  %v13713_v6 = vld [vmem:[#allocation2 + $0xb4] sm:$0xff]  }
 0x200   : > { %v4370_v26 = vor.u32 %v4369_v17, %v4366_v36  ;;  %v4412_v17 = vshrl.u32 %v4279_v52, 16 }
 0x202   : > { %12661 = vmatmul.mubr.msk.bf16.gmra.mrb[4].mxu0 %vm1388_vm11, %v13703_v30  ;;  %v4332_v30 = vor.u32 %v4331_v54, %v15332_v56  ;;  %v15404_v56 = vld [vmem:[#allocation2 + $0x4c] sm:$0xf] }
 0x203   : > { %12664 = vmatprep.mubr.msk.bf16.mxu0 %vm1388_vm11, %v13704_v53  ;;  %v15351_v53 = vld [vmem:[#allocation2 + $0x34] sm:$0xf] }
 0x204   : > { %v4373_v21 = vshll.u32 %v15351_v53, 16  ;;  %v4377_v5 = vshrl.u32 %v15351_v53, 16  ;;  %v4333_v48 = vrot.slane %v4332_v30, 4 }
 0x206   : > { %v15382_v54 = vrot.slane %v4373_v21, 5  ;;  %v4379_v59 = vrot.slane %v4377_v5, 4 }
 0x208   : > { %v4380_v5 = vor.u32 %v4379_v59, %v15382_v54  ;;  %v4421_v59 = vshll.u32 %v15404_v56, 16 }
 0x20a   : > { %12665 = vmatmul.mubr.msk.bf16.gmra.mrb[8].mxu0 %vm1388_vm11, %v13705_v29  ;;  %v5139_v29 = vrot.slane %v15353_v15, 5 }
 0x20b   : > { %12668 = vmatprep.mubr.msk.bf16.mxu0 %vm1388_vm11, %v13706_v24  ;;  %v5142_v24 = vrot.slane %v15355_v8, 5 }
 0x20c   : > { %v15369_v2 = vsel %vm14509_vm8, %v11603_v60, %v5139_v29  ;;  %v11605_v60 = vrot.slane %v5009_v7, 9 }
 0x20d   : > { %17926 = vst [vmem:[#allocation11_spill] sm:$0xff] %v15369_v2 }
 0x212   : > { %12669 = vmatmul.mubr.msk.bf16.gmra.mrb[12].mxu0 %vm1388_vm11, %v13707_v61  ;;  %v4359_v61 = vshll.u32 %v15347_v55, 16 }
 0x213   : > { %12672 = vmatprep.mubr.msk.bf16.mxu0 %vm1388_vm11, %v13708_v63  ;;  %v5141_v63 = vrot.slane %v5139_v29, 4  ;;  %v5156_v29 = vrot.slane %v15389_v16, 5 }
 0x214   : > { %v15395_v30 = vrot.slane %v4359_v61, 5  ;;  %v5155_v61 = vrot.slane %v5153_v31, 4 }
 0x215   : > { %v15375_v43 = vsel %vm14509_vm8, %v5141_v63, %v5142_v24  ;;  %v4338_v24 = vsel %vm14073_vm13, %v4333_v48, %v4337_v1  ;;  %v4393_v63 = vrot.slane %v4391_v4, 5  ;;  %v4403_v48 = vrot.slane %v4401_v22, 4  ;;  %v4282_v4 = vld [vmem:[#allocation2 + $0x54] sm:$0xf] }
 0x216   : > { %17927 = vst [vmem:[#allocation12_spill] sm:$0xff] %v15375_v43  ;;  %v15413_v1 = vsel %vm14509_vm8, %v11605_v60, %v5153_v31  ;;  %v11559_v36 = vcombine.low %v4328_v50, %v4338_v24  ;;  %v15417_v7 = vsel %vm14509_vm8, %v5155_v61, %v5156_v29  ;;  %v4425_v22 = vshrl.u32 %v15404_v56, 16  ;;  %v15441_v31 = vld [vmem:[#allocation2 + $0x50] sm:$0x1] }
 0x217   : > { %17928 = vst [vmem:[#allocation13_spill] sm:$0xff] %v15413_v1  ;;  %17929 = vst [vmem:[#allocation14_spill] sm:$0xff] %v15417_v7  ;;  %v4371_v50 = vrot.slane %v4370_v26, 4  ;;  %v4362_v29 = vsel %vm14073_vm13, %v15401_v51, %v15395_v30  ;;  %v4436_v61 = vshrl.u32 %v4282_v4, 16  ;;  %v4414_v26 = vrot.slane %v4412_v17, 4 }
 0x218   : > { %v15443_v30 = vrot.slane %v4421_v59, 5  ;;  %v4427_v51 = vrot.slane %v4425_v22, 4  ;;  %v4445_v1 = vshll.u32 %v15281_v46, 16  ;;  %v4449_v59 = vshrl.u32 %v15281_v46, 16  ;;  %v4285_v22 = vld [vmem:[#allocation2 + $0x60] sm:$0xf] }
 0x219   : > { %v4376_v23 = vsel %vm14073_vm13, %v4371_v50, %v15382_v54  ;;  %v4460_v2 = vshrl.u32 %v4285_v22, 16  ;;  %v4463_v42 = vshll.u32 %v4285_v22, 16 }
 0x21a   : > { %12673 = vmatmul.mubr.msk.bf16.gmra.mrb[16].mxu0 %vm1388_vm11, %v13709_v18  ;;  %v15434_v18 = vld [vmem:[#allocation2 + $0xd0] sm:$0xf] }
 0x21b   : > { %12676 = vmatprep.mubr.msk.bf16.mxu0 %vm1388_vm11, %v13710_v28  ;;  %v4388_v28 = vshrl.u32 %v4276_v19, 16  ;;  %v15407_v19 = vld [vmem:[#allocation2 + $0x44] sm:$0x1] }
 0x21c   : > { %v4407_v60 = vshll.u32 %v15407_v19, 16 }
 0x21d   : > { %v4390_v21 = vrot.slane %v4388_v28, 4  ;;  %v4415_v28 = vshll.u32 %v4279_v52, 16 }
 0x21e   : > { %v15450_v17 = vrot.slane %v4407_v60, 5 }
 0x21f   : > { %v4394_v52 = vor.u32 %v4393_v63, %v4390_v21  ;;  %v5011_v21 = vld [vmem:[#allocation2 + $0xcc] sm:$0xe]  ;;  %v5167_v63 = vrot.slane %v15434_v18, 5 }
 0x222   : > { %12677 = vmatmul.mubr.msk.bf16.gmra.mrb[20].mxu0 %vm1388_vm11, %v13711_v57  ;;  %v4383_v57 = vshll.u32 %v15380_v47, 16 }
 0x223   : > { %12680 = vmatprep.mubr.msk.bf16.mxu0 %vm1388_vm11, %v13712_v14  ;;  %v15409_v14 = vrot.slane %v4397_v32, 5  ;;  %v4352_v32 = vsel %vm14073_vm13, %v15371_v34, %v15358_v38  ;;  %v4381_v38 = vrot.slane %v4380_v5, 4  ;;  %v4439_v5 = vshll.u32 %v4282_v4, 16  ;;  %v15456_v4 = vld [vmem:[#allocation2 + $0x64] sm:$0xf] }
 0x224   : > { %v4385_v24 = vrot.slane %v4383_v57, 5  ;;  %v4417_v57 = vrot.slane %v4415_v28, 5  ;;  %v5169_v28 = vrot.slane %v5167_v63, 4 }
 0x225   : > { %v4404_v34 = vor.u32 %v4403_v48, %v15409_v14  ;;  %v11607_v48 = vrot.slane %v5011_v21, 9  ;;  %v4441_v46 = vrot.slane %v4439_v5, 5 }
 0x226   : > { %v4386_v7 = vsel %vm14073_vm13, %v4381_v38, %v4385_v24  ;;  %v4418_v50 = vor.u32 %v4417_v57, %v4414_v26  ;;  %v4428_v24 = vor.u32 %v4427_v51, %v15443_v30  ;;  %v4438_v38 = vrot.slane %v4436_v61, 4 }
 0x227   : > { %v15460_v21 = vsel %vm14509_vm8, %v11607_v48, %v5167_v63  ;;  %v15462_v54 = vrot.slane %v4404_v34, 4  ;;  %v4469_v63 = vshll.u32 %v15456_v4, 16  ;;  %v4473_v34 = vshrl.u32 %v15456_v4, 16 }
 0x228   : > { %17930 = vst [vmem:[#allocation15_spill] sm:$0xff] %v15460_v21  ;;  %v11560_v26 = vcombine.low %v4352_v32, %v4362_v29  ;;  %v5270_v57 = vsel %vm1437_vm0, %v15274_v35, 0  ;;  %v4451_v51 = vrot.slane %v4449_v59, 4  ;;  %v11561_v61 = vcombine.low %v4376_v23, %v4386_v7  ;;  %v15488_v29 = vld [vmem:[#allocation2 + $0x68] sm:$0x1] }
 0x229   : > { %v4288_v35 = vld [vmem:[#allocation2 + $0x6c] sm:$0xf]  ;;  %v4429_v48 = vrot.slane %v4428_v24, 4  ;;  %v4291_v23 = vld [vmem:[#allocation2 + $0x78] sm:$0xf]  ;;  %v4462_v7 = vrot.slane %v4460_v2, 4 }
 0x22a   : > { %12681 = vmatmul.mubr.msk.bf16.gmra.mrb[24].mxu0 %vm1388_vm11, %v13713_v6  ;;  %v5170_v6 = vrot.slane %v15436_v9, 5  ;;  %v4465_v59 = vrot.slane %v4463_v42, 5  ;;  %v15491_v22 = vrot.slane %v4469_v63, 5  ;;  %v4497_v24 = vshrl.u32 %v15299_v20, 16  ;;  %v4294_v21 = vld [vmem:[#allocation2 + $0x84] sm:$0xf] }
 0x22b   : > { %12684 = vmatprep.mubr.msk.bf16.mxu0 %vm1388_vm11, %v13714_v39  ;;  %v15448_v39 = vrot.slane %v4394_v52, 4  ;;  %v4431_v52 = vshll.u32 %v15441_v31, 16  ;;  %vm5571_vm0 = vcmask 516096  }
 0x22c   : > { %v15467_v60 = vsel %vm14509_vm8, %v5169_v28, %v5170_v6  ;;  %v15477_v6 = vrot.slane %v4445_v1, 5  ;;  %v4419_v1 = vrot.slane %v4418_v50, 4  ;;  %v4442_v28 = vor.u32 %v4441_v46, %v4438_v38  ;;  %vm15720_vm1 = vmand %vm5571_vm0, %vm267_vm3 }
 0x22d   : > { %17931 = vst [vmem:[#allocation16_spill] sm:$0xff] %v15467_v60  ;;  %v4400_v5 = vsel %vm14073_vm13, %v15448_v39, %v15409_v14  ;;  %v4433_v32 = vrot.slane %v4431_v52, 5  ;;  %v4475_v14 = vrot.slane %v4473_v34, 4  ;;  %v15493_v39 = vld [vmem:[#allocation2 + $0x7c] sm:$0xf]  ;;  %v4487_v52 = vshll.u32 %v4288_v35, 16  ;;  %vm15731_vm4 = vmand %vm5571_vm0, %vm317_vm5 }
 0x22e   : > { %v4452_v43 = vor.u32 %v4451_v51, %v15477_v6  ;;  %v4493_v50 = vshll.u32 %v15299_v20, 16  ;;  %v4508_v38 = vshrl.u32 %v4291_v23, 16  ;;  %v4424_v42 = vsel %vm14073_vm13, %v4419_v1, %v15443_v30 }
 0x22f   : > { %v4434_v2 = vsel %vm14073_vm13, %v4429_v48, %v4433_v32  ;;  %v4517_v46 = vshll.u32 %v15493_v39, 16  ;;  %v4521_v63 = vshrl.u32 %v15493_v39, 16  ;;  %v4443_v34 = vrot.slane %v4442_v28, 4  ;;  %v15511_v28 = vld [vmem:[#allocation2 + $0x80] sm:$0x1] }
 0x230   : > { %v4476_v60 = vor.u32 %v4475_v14, %v15491_v22  ;;  %v4453_v20 = vrot.slane %v4452_v43, 4  ;;  %v4489_v40 = vrot.slane %v4487_v52, 5  ;;  %v15509_v30 = vrot.slane %v4493_v50, 5 }
 0x231   : > { %v4499_v32 = vrot.slane %v4497_v24, 4  ;;  %v4510_v1 = vrot.slane %v4508_v38, 4  ;;  %v4535_v14 = vshll.u32 %v4294_v21, 16  ;;  %v4448_v52 = vsel %vm14073_vm13, %v4443_v34, %v15477_v6 }
 0x232   : > { %12685 = vmatmul.mubr.msk.bf16.gmra.mrb[28].mxu0 %vm1388_vm11, %v13715_v45  ;;  %v4410_v45 = vsel %vm14073_vm13, %v15462_v54, %v15450_v17  ;;  %v4479_v17 = vshll.u32 %v15488_v29, 16  ;;  %v4484_v54 = vshrl.u32 %v4288_v35, 16  ;;  %v4466_v35 = vor.u32 %v4465_v59, %v4462_v7 }
 0x233   : > { %12690 = vmatprep.mubr.msk.bf16.mxu0 %vm1388_vm11, %v11559_v36  ;;  %v4455_v36 = vshll.u32 %v15283_v13, 16  ;;  %v4511_v13 = vshll.u32 %v4291_v23, 16  ;;  %v4523_v7 = vrot.slane %v4521_v63, 4  ;;  %v4532_v59 = vshrl.u32 %v4294_v21, 16 }
 0x234   : > { %v4481_v23 = vrot.slane %v4479_v17, 5  ;;  %v4486_v37 = vrot.slane %v4484_v54, 4  ;;  %v4477_v43 = vrot.slane %v4476_v60, 4  ;;  %v4541_v17 = vshll.u32 %v15321_v58, 16 }
 0x235   : > { %v4457_v51 = vrot.slane %v4455_v36, 5  ;;  %v4513_v48 = vrot.slane %v4511_v13, 5  ;;  %v15513_v36 = vrot.slane %v4517_v46, 5  ;;  %v11562_v54 = vcombine.low %v4400_v5, %v4410_v45  ;;  %v4297_v13 = vld [vmem:[#allocation2 + $0x90] sm:$0xf] }
 0x236   : > { %v4490_v24 = vor.u32 %v4489_v40, %v4486_v37  ;;  %v4500_v38 = vor.u32 %v4499_v32, %v15509_v30  ;;  %v4503_v21 = vshll.u32 %v15301_v27, 16  ;;  %v4527_v60 = vshll.u32 %v15511_v28, 16  ;;  %v15525_v46 = vld [vmem:[#allocation2 + $0x94] sm:$0xf] }
 0x237   : > { %v4458_v50 = vsel %vm14073_vm13, %v4453_v20, %v4457_v51  ;;  %v4524_v5 = vor.u32 %v4523_v7, %v15513_v36  ;;  %v4534_v45 = vrot.slane %v4532_v59, 4  ;;  %v4482_v40 = vsel %vm14073_vm13, %v4477_v43, %v4481_v23  ;;  %v4300_v59 = vld [vmem:[#allocation2 + $0x9c] sm:$0xf] }
 0x238   : > { %v15533_v37 = vrot.slane %v4541_v17, 5  ;;  %v4559_v63 = vshll.u32 %v4297_v13, 16  ;;  %v4565_v34 = vshll.u32 %v15525_v46, 16  ;;  %v4569_v51 = vshrl.u32 %v15525_v46, 16  ;;  %v15541_v17 = vld [vmem:[#allocation2 + $0x98] sm:$0x1] }
 0x239   : > { %v4501_v20 = vrot.slane %v4500_v38, 4  ;;  %v4505_v32 = vrot.slane %v4503_v21, 5  ;;  %v4551_v7 = vshll.u32 %v15323_v0, 16  ;;  %v4580_v0 = vshrl.u32 %v4300_v59, 16 }
 0x23a   : > { %12691 = vmatmul.mubr.msk.bf16.vlgmr.msra.gmra.mrb[0].mxu0 %vm1388_vm11, %v11560_v26  ;;  %v4467_v26 = vrot.slane %v4466_v35, 4  ;;  %v4491_v35 = vrot.slane %v4490_v24, 4  ;;  %v4583_v21 = vshll.u32 %v4300_v59, 16  ;;  %v15572_v59 = vld [vmem:[#allocation2 + $0xb0] sm:$0x1]  ;;  %vm6727_vm3 = vcmask 523264  }
 0x23b   : > { %12723 = vmatpush3.bf16.msra.mxu0 %v5270_v57  ;;  %12694 = vmatprep.mubr.msk.bf16.mxu0 %vm1388_vm11, %v11561_v61  ;;  %v4545_v57 = vshrl.u32 %v15321_v58, 16  ;;  %v11563_v61 = vcombine.low %v4424_v42, %v4434_v2  ;;  %v4514_v58 = vor.u32 %v4513_v48, %v4510_v1  ;;  %v4537_v42 = vrot.slane %v4535_v14, 5 }
 0x23c   : > { %v4472_v6 = vsel %vm14073_vm13, %v4467_v26, %v15491_v22  ;;  %v4556_v2 = vshrl.u32 %v4297_v13, 16  ;;  %v4529_v22 = vrot.slane %v4527_v60, 5  ;;  %v4525_v48 = vrot.slane %v4524_v5, 4 }
 0x23d   : > { %v4547_v27 = vrot.slane %v4545_v57, 4  ;;  %v4515_v1 = vrot.slane %v4514_v58, 4  ;;  %v4538_v23 = vor.u32 %v4537_v42, %v4534_v45  ;;  %v11564_v14 = vcombine.low %v4448_v52, %v4458_v50  ;;  %v4303_v52 = vld [vmem:[#allocation2 + $0xa8] sm:$0xf]  ;;  %v15550_v50 = vld [vmem:[#allocation2 + $0xac] sm:$0xf] }
 0x23e   : > { %v11565_v26 = vcombine.low %v4472_v6, %v4482_v40  ;;  %v4558_v57 = vrot.slane %v4556_v2, 4  ;;  %v15543_v13 = vrot.slane %v4565_v34, 5  ;;  %v4496_v24 = vsel %vm14073_vm13, %v4491_v35, %v15509_v30 }
 0x23f   : > { %v4548_v43 = vor.u32 %v4547_v27, %v15533_v37  ;;  %v4506_v38 = vsel %vm14073_vm13, %v4501_v20, %v4505_v32  ;;  %v4520_v60 = vsel %vm14073_vm13, %v4515_v1, %v15513_v36  ;;  %v4530_v58 = vsel %vm14073_vm13, %v4525_v48, %v4529_v22 }
 0x240   : > { %v4539_v5 = vrot.slane %v4538_v23, 4  ;;  %v4553_v45 = vrot.slane %v4551_v7, 5  ;;  %v4575_v30 = vshll.u32 %v15541_v17, 16  ;;  %v4589_v6 = vshll.u32 %v15353_v15, 16 }
 0x241   : > { %v4549_v42 = vrot.slane %v4548_v43, 4  ;;  %v4593_v40 = vshrl.u32 %v15353_v15, 16  ;;  %v4604_v27 = vshrl.u32 %v4303_v52, 16  ;;  %v4607_v2 = vshll.u32 %v4303_v52, 16 }
 0x242   : > { %12695 = vmatmul.mubr.msk.bf16.gmra.mrb[4].mxu0 %vm1388_vm11, %v11562_v54  ;;  %v4561_v54 = vrot.slane %v4559_v63, 5  ;;  %v4613_v63 = vshll.u32 %v15550_v50, 16  ;;  %v4617_v36 = vshrl.u32 %v15550_v50, 16  ;;  %v4582_v35 = vrot.slane %v4580_v0, 4 }
 0x243   : > { %12698 = vmatprep.mubr.msk.bf16.mxu0 %vm1388_vm11, %v11563_v61  ;;  %v4571_v61 = vrot.slane %v4569_v51, 4  ;;  %v4585_v20 = vrot.slane %v4583_v21, 5  ;;  %v11566_v32 = vcombine.low %v4496_v24, %v4506_v38  ;;  %v11567_v22 = vcombine.low %v4520_v60, %v4530_v58 }
 0x244   : > { %v4562_v34 = vor.u32 %v4561_v54, %v4558_v57  ;;  %v4544_v15 = vsel %vm14073_vm13, %v4539_v5, %v15533_v37  ;;  %v4554_v1 = vsel %vm14073_vm13, %v4549_v42, %v4553_v45  ;;  %v4577_v48 = vrot.slane %v4575_v30, 5  ;;  %v4306_v54 = vld [vmem:[#allocation2 + $0xb4] sm:$0xf]  ;;  %v4309_v5 = vld [vmem:[#allocation2 + $0xc0] sm:$0xf] }
 0x245   : > { %v4572_v51 = vor.u32 %v4571_v61, %v15543_v13  ;;  %v15570_v23 = vrot.slane %v4589_v6, 5  ;;  %v4595_v7 = vrot.slane %v4593_v40, 4  ;;  %v4615_v43 = vrot.slane %v4613_v63, 5  ;;  %v15577_v45 = vld [vmem:[#allocation2 + $0xc4] sm:$0xf] }
 0x246   : > { %v4619_v57 = vrot.slane %v4617_v36, 4  ;;  %v4563_v61 = vrot.slane %v4562_v34, 4  ;;  %v4586_v38 = vor.u32 %v4585_v20, %v4582_v35  ;;  %v4599_v0 = vshll.u32 %v15355_v8, 16 }
 0x247   : > { %v4573_v24 = vrot.slane %v4572_v51, 4  ;;  %v4623_v37 = vshll.u32 %v15572_v59, 16  ;;  %v11568_v21 = vcombine.low %v4544_v15, %v4554_v1  ;;  %v4596_v52 = vor.u32 %v4595_v7, %v15570_v23 }
 0x248   : > { %v4628_v60 = vshrl.u32 %v4306_v54, 16  ;;  %v4631_v58 = vshll.u32 %v4306_v54, 16  ;;  %v4620_v30 = vor.u32 %v4619_v57, %v4615_v43  ;;  %v4637_v6 = vshll.u32 %v15387_v10, 16 }
 0x249   : > { %v4641_v40 = vshrl.u32 %v15387_v10, 16  ;;  %v4568_v8 = vsel %vm14073_vm13, %v4563_v61, %v15543_v13  ;;  %v4601_v63 = vrot.slane %v4599_v0, 5  ;;  %v4652_v36 = vshrl.u32 %v4309_v5, 16  ;;  %v4312_v61 = vld [vmem:[#allocation2 + $0xcc] sm:$0xf] }
 0x24a   : > { %12699 = vmatmul.mubr.msk.bf16.gmra.mrb[8].mxu0 %vm1388_vm11, %v11564_v14  ;;  %v4606_v14 = vrot.slane %v4604_v27, 4  ;;  %v4578_v27 = vsel %vm14073_vm13, %v4573_v24, %v4577_v48  ;;  %v4655_v34 = vshll.u32 %v4309_v5, 16  ;;  %v4661_v51 = vshll.u32 %v15577_v45, 16 }
 0x24b   : > { %12702 = vmatprep.mubr.msk.bf16.mxu0 %vm1388_vm11, %v11565_v26  ;;  %v4609_v26 = vrot.slane %v4607_v2, 5  ;;  %v4587_v2 = vrot.slane %v4586_v38, 4  ;;  %v4665_v35 = vshrl.u32 %v15577_v45, 16  ;;  %v4597_v20 = vrot.slane %v4596_v52, 4 }
 0x24c   : > { %v4630_v10 = vrot.slane %v4628_v60, 4  ;;  %v4633_v15 = vrot.slane %v4631_v58, 5  ;;  %v4621_v1 = vrot.slane %v4620_v30, 4  ;;  %v4639_v7 = vrot.slane %v4637_v6, 5 }
 0x24d   : > { %v4610_v42 = vor.u32 %v4609_v26, %v4606_v14  ;;  %v4643_v14 = vrot.slane %v4641_v40, 4  ;;  %v11569_v13 = vcombine.low %v4568_v8, %v4578_v27  ;;  %v4654_v26 = vrot.slane %v4652_v36, 4 }
 0x24e   : > { %v4657_v57 = vrot.slane %v4655_v34, 5  ;;  %v4663_v48 = vrot.slane %v4661_v51, 5  ;;  %v4667_v54 = vrot.slane %v4665_v35, 4  ;;  %v4592_v24 = vsel %vm14073_vm13, %v4587_v2, %v15570_v23 }
 0x24f   : > { %v4602_v38 = vsel %vm14073_vm13, %v4597_v20, %v4601_v63  ;;  %v4634_v0 = vor.u32 %v4633_v15, %v4630_v10  ;;  %v4644_v58 = vor.u32 %v4643_v14, %v4639_v7  ;;  %v4647_v5 = vshll.u32 %v15389_v16, 16 }
 0x250   : > { %v4676_v23 = vshrl.u32 %v4312_v61, 16  ;;  %v4685_v30 = vshll.u32 %v15434_v18, 16  ;;  %v4689_v6 = vshrl.u32 %v15434_v18, 16  ;;  %v4658_v40 = vor.u32 %v4657_v57, %v4654_v26 }
 0x251   : > { %v4668_v8 = vor.u32 %v4667_v54, %v4663_v48  ;;  %v11570_v27 = vcombine.low %v4592_v24, %v4602_v38  ;;  %v4635_v2 = vrot.slane %v4634_v0, 4  ;;  %v4645_v63 = vrot.slane %v4644_v58, 4  ;;  %v4996_v54 = vld [vmem:[#allocation2 + $0x18] sm:$0xe] }
 0x252   : > { %12703 = vmatmul.mubr.msk.bf16.gmra.mrb[12].mxu0 %vm1388_vm11, %v11566_v32  ;;  %v4625_v32 = vrot.slane %v4623_v37, 5  ;;  %v15595_v37 = vld [vmem:[#allocation2 + $0xc8] sm:$0x1]  ;;  %v4649_v36 = vrot.slane %v4647_v5, 5  ;;  %v4678_v34 = vrot.slane %v4676_v23, 4  ;;  %v4687_v16 = vrot.slane %v4685_v30, 5 }
 0x253   : > { %12706 = vmatprep.mubr.msk.bf16.mxu0 %vm1388_vm11, %v11567_v22  ;;  %v4611_v22 = vrot.slane %v4610_v42, 4  ;;  %v4679_v42 = vshll.u32 %v4312_v61, 16  ;;  %v4691_v35 = vrot.slane %v4689_v6, 4  ;;  %v4659_v20 = vrot.slane %v4658_v40, 4  ;;  %v4998_v30 = vld [vmem:[#allocation2 + $0x30] sm:$0xe] }
 0x254   : > { %v4626_v60 = vsel %vm14073_vm13, %v4621_v1, %v4625_v32  ;;  %v4669_v32 = vrot.slane %v4668_v8, 4  ;;  %v4640_v18 = vsel %vm14073_vm13, %v4635_v2, %v4639_v7  ;;  %v4650_v15 = vsel %vm14073_vm13, %v4645_v63, %v4649_v36 }
 0x255   : > { %v4616_v52 = vsel %vm14073_vm13, %v4611_v22, %v4615_v43  ;;  %v4681_v51 = vrot.slane %v4679_v42, 5  ;;  %v4692_v1 = vor.u32 %v4691_v35, %v4687_v16  ;;  %v4695_v14 = vshll.u32 %v15436_v9, 16  ;;  %v4997_v42 = vld [vmem:[#allocation2 + $0x24] sm:$0xe] }
 0x256   : > { %v11571_v43 = vcombine.low %v4616_v52, %v4626_v60  ;;  %v5062_v57 = vrot.slane %v15310_v12, 5  ;;  %v11572_v61 = vcombine.low %v4640_v18, %v4650_v15  ;;  %v11592_v52 = vrot.slane %v4996_v54, 9 }
 0x257   : > { %v4682_v22 = vor.u32 %v4681_v51, %v4678_v34  ;;  %v4693_v38 = vrot.slane %v4692_v1, 4  ;;  %v4697_v0 = vrot.slane %v4695_v14, 5  ;;  %v5065_v58 = vrot.slane %v15330_v44, 5  ;;  %v4999_v51 = vld [vmem:[#allocation2 + $0x3c] sm:$0xe] }
 0x258   : > { %v5064_v60 = vrot.slane %v5062_v57, 4  ;;  %v5063_v5 = vsel %vm14509_vm8, %v11592_v52, %v5062_v57  ;;  %v5076_v44 = vrot.slane %v15351_v53, 5  ;;  %v11593_v8 = vrot.slane %v4997_v42, 9 }
 0x259   : > { %v4683_v24 = vrot.slane %v4682_v22, 4  ;;  %v4698_v12 = vsel %vm14073_vm13, %v4693_v38, %v4697_v0  ;;  %v5083_v36 = vrot.slane %v15365_v62, 5  ;;  %v5086_v18 = vrot.slane %v15407_v19, 5 }
 0x25a   : > { %12707 = vmatmul.mubr.msk.bf16.gmra.mrb[16].mxu0 %vm1388_vm11, %v11568_v21  ;;  %v4671_v21 = vshll.u32 %v15595_v37, 16  ;;  %v5066_v23 = vsel %vm14509_vm8, %v5064_v60, %v5065_v58  ;;  %v5078_v2 = vrot.slane %v5076_v44, 4  ;;  %v5093_v62 = vrot.slane %v15441_v31, 5 }
 0x25b   : > { %12710 = vmatprep.mubr.msk.bf16.mxu0 %vm1388_vm11, %v11569_v13  ;;  %v4664_v13 = vsel %vm14073_vm13, %v4659_v20, %v4663_v48  ;;  %v4688_v9 = vsel %vm14073_vm13, %v4683_v24, %v4687_v16  ;;  %v5069_v48 = vrot.slane %v15328_v33, 5  ;;  %v11608_v40 = vcombine.low %v5063_v5, %v5066_v23  ;;  %v5000_v16 = vld [vmem:[#allocation2 + $0x48] sm:$0xe]  ;;  %v5006_v5 = vld [vmem:[#allocation2 + $0x90] sm:$0xe] }
 0x25c   : > { %v4673_v10 = vrot.slane %v4671_v21, 5  ;;  %v11574_v6 = vcombine.low %v4688_v9, %v4698_v12  ;;  %v5079_v33 = vrot.slane %v15380_v47, 5  ;;  %v5090_v47 = vrot.slane %v15404_v56, 5 }
 0x25d   : > { %v5071_v21 = vrot.slane %v5069_v48, 4  ;;  %v5070_v63 = vsel %vm14509_vm8, %v11593_v8, %v5069_v48  ;;  %v11596_v15 = vrot.slane %v5000_v16, 9  ;;  %v5118_v0 = vrot.slane %v15493_v39, 5 }
 0x25e   : > { %v4674_v26 = vsel %vm14073_vm13, %v4669_v32, %v4673_v10  ;;  %v11595_v32 = vrot.slane %v4999_v51, 9  ;;  %v5085_v10 = vrot.slane %v5083_v36, 4  ;;  %v5092_v22 = vrot.slane %v5090_v47, 4  ;;  %v17938_v51 = vld [vmem:[#allocation11_spill] sm:$0xff] }
 0x25f   : > { %v11573_v7 = vcombine.low %v4664_v13, %v4674_v26  ;;  %v5091_v14 = vsel %vm14509_vm8, %v11596_v15, %v5090_v47  ;;  %v5104_v13 = vrot.slane %v15456_v4, 5  ;;  %v5002_v26 = vld [vmem:[#allocation2 + $0x60] sm:$0xe]  ;;  %v5004_v4 = vld [vmem:[#allocation2 + $0x78] sm:$0xe]  ;;  %v5120_v58 = vrot.slane %v5118_v0, 4 }
 0x260   : > { %v5084_v1 = vsel %vm14509_vm8, %v11595_v32, %v5083_v36  ;;  %v5087_v56 = vsel %vm14509_vm8, %v5085_v10, %v5086_v18  ;;  %v5094_v19 = vsel %vm14509_vm8, %v5092_v22, %v5093_v62  ;;  %v11598_v54 = vrot.slane %v5002_v26, 9  ;;  %v17939_v47 = vld [vmem:[#allocation12_spill] sm:$0xff]  ;;  %v17941_v32 = vld [vmem:[#allocation13_spill] sm:$0xff]  ;;  %v17942_v10 = vld [vmem:[#allocation14_spill] sm:$0xff] }
 0x261   : > { %v11611_v31 = vcombine.low %v5084_v1, %v5087_v56  ;;  %v11612_v57 = vcombine.low %v5091_v14, %v5094_v19  ;;  %v11600_v60 = vrot.slane %v5004_v4, 9  ;;  %v5121_v9 = vrot.slane %v15511_v28, 5  ;;  %v17945_v15 = vld [vmem:[#allocation16_spill] sm:$0xff]  ;;  %v5583_v1 = vld [vmem:[#allocation3 + $0x18] sm:$0x1] }
 0x262   : > { %12711 = vmatmul.mubr.msk.bf16.gmra.mrb[20].mxu0 %vm1388_vm11, %v11570_v27  ;;  %v5072_v27 = vrot.slane %v15347_v55, 5  ;;  %v5080_v55 = vsel %vm14509_vm8, %v5078_v2, %v5079_v33  ;;  %v5105_v24 = vsel %vm14509_vm8, %v11598_v54, %v5104_v13  ;;  %v5132_v39 = vrot.slane %v15525_v46, 5  ;;  %v5580_v19 = vld [vmem:[#allocation3 + $0xc] sm:$0x1]  ;;  %v5629_v54 = vld [vmem:[#allocation3 + $0x14] sm:$0x1] }
 0x263   : > { %12714 = vmatprep.mubr.msk.bf16.mxu0 %vm1388_vm11, %v11571_v43  ;;  %v11594_v43 = vrot.slane %v4998_v30, 9  ;;  %v5119_v12 = vsel %vm14509_vm8, %v11600_v60, %v5118_v0  ;;  %v5122_v48 = vsel %vm14509_vm8, %v5120_v58, %v5121_v9  ;;  %v11602_v42 = vrot.slane %v5006_v5, 9  ;;  %v5638_v4 = vld [vmem:[#allocation3 + $0x38] sm:$0x1]  ;;  %v5635_v60 = vld [vmem:[#allocation3 + $0x2c] sm:$0x1] }
 0x264   : > { %v5073_v53 = vsel %vm14509_vm8, %v5071_v21, %v5072_v27  ;;  %v11616_v23 = vcombine.low %v5119_v12, %v5122_v48  ;;  %v5135_v28 = vrot.slane %v15541_v17, 5  ;;  %v5146_v46 = vrot.slane %v15550_v50, 5  ;;  %v13716_v9 = vld [vmem:[%s17760_s3 + $0x20] sm:$0xff]   ;;  %v5592_v48 = vld [vmem:[#allocation3 + $0x3c] sm:$0x1] }
 0x265   : > { %v5077_v34 = vsel %vm14509_vm8, %v11594_v43, %v5076_v44  ;;  %v11609_v35 = vcombine.low %v5070_v63, %v5073_v53  ;;  %v5134_v44 = vrot.slane %v5132_v39, 4  ;;  %v5133_v30 = vsel %vm14509_vm8, %v11602_v42, %v5132_v39  ;;  %v17935_v43 = vld [vmem:[#allocation9_spill] sm:$0xff]  ;;  %12756 = vmatprep.subr.bf16.mxu1 %v13716_v9  ;;  %v5644_v5 = vld [vmem:[#allocation3 + $0x50] sm:$0x1]  ;;  %v5641_v42 = vld [vmem:[#allocation3 + $0x44] sm:$0x1] }
 0x266   : > { %v11610_v20 = vcombine.low %v5077_v34, %v5080_v55  ;;  %v5148_v27 = vrot.slane %v5146_v46, 4  ;;  %v5149_v17 = vrot.slane %v15572_v59, 5  ;;  %v5160_v50 = vrot.slane %v15577_v45, 5  ;;  %v5010_v53 = vld [vmem:[#allocation2 + $0xc0] sm:$0xe]  ;;  %12757 = vmatpush3.bf16.msra.mxu1 %v13716_v9 }
 0x267   : > { %v11606_v34 = vrot.slane %v5010_v53, 9  ;;  %v5163_v59 = vrot.slane %v15595_v37, 5  ;;  %v17940_v16 = vcombine.low %v17938_v51, %v17939_v47  ;;  %v17943_v18 = vcombine.low %v17941_v32, %v17942_v10  ;;  %v17944_v37 = vld [vmem:[#allocation15_spill] sm:$0xff]  ;;  %v5604_v10 = vld [vmem:[#allocation3 + $0x6c] sm:$0x1] }
 0x268   : > { %v5150_v63 = vsel %vm14509_vm8, %v5148_v27, %v5149_v17  ;;  %v5162_v55 = vrot.slane %v5160_v50, 4  ;;  %v17946_v22 = vcombine.low %v17944_v37, %v17945_v15  ;;  %v17949_v56 = vmov 0   ;;  %v5650_v17 = vld [vmem:[#allocation3 + $0x68] sm:$0x1] }
 0x269   : > { %5572 = vst.msk [vmem:[#allocation3 + $0x8] sm:$0x1] %vm5571_vm0, %v17949_v56  ;;  %5576 = vst.msk [vmem:[#allocation3 + $0xd4] sm:$0x1] %vm5571_vm0, %v17949_v56  ;;  %v5584_v14 = vsel %vm15720_vm1, 0, %v5583_v1  ;;  %v5636_v58 = vsel %vm15731_vm4, 0, %v5635_v60 }
 0x26a   : > { %12715 = vmatmul.mubr.msk.bf16.gmra.mrb[24].mxu0 %vm1388_vm11, %v11572_v61  ;;  %v5106_v61 = vrot.slane %v5104_v13, 4  ;;  %5585 = vst [vmem:[#allocation3 + $0x18] sm:$0x1] %v5584_v14  ;;  %v5581_v13 = vsel %vm15720_vm1, 0, %v5580_v19  ;;  %5637 = vst [vmem:[#allocation3 + $0x2c] sm:$0x1] %v5636_v58 }
 0x26b   : > { %12718 = vmatprep.mubr.msk.bf16.mxu0 %vm1388_vm11, %v11573_v7  ;;  %v5107_v7 = vrot.slane %v15488_v29, 5  ;;  %v17932_v29 = vcombine.low %v15290_v41, %v15294_v25  ;;  %v17933_v41 = vld [vmem:[#allocation8_spill] sm:$0xff]  ;;  %5582 = vst [vmem:[#allocation3 + $0xc] sm:$0x1] %v5581_v13  ;;  %v5593_v39 = vsel %vm15720_vm1, 0, %v5592_v48  ;;  %v5605_v37 = vsel %vm15720_vm1, 0, %v5604_v10 }
 0x26c   : > { %v17934_v25 = vcombine.low %v15308_v3, %v17933_v41  ;;  %v17936_v3 = vld [vmem:[#allocation10_spill] sm:$0xff]  ;;  %5594 = vst [vmem:[#allocation3 + $0x3c] sm:$0x1] %v5593_v39  ;;  %v5601_v41 = vld [vmem:[#allocation3 + $0x60] sm:$0x1] }
 0x26d   : > { %v5108_v38 = vsel %vm14509_vm8, %v5106_v61, %v5107_v7  ;;  %v17937_v2 = vcombine.low %v17935_v43, %v17936_v3  ;;  %v5630_v61 = vsel %vm15731_vm4, 0, %v5629_v54  ;;  %v5589_v7 = vld [vmem:[#allocation3 + $0x30] sm:$0x1]  ;;  %5606 = vst [vmem:[#allocation3 + $0x6c] sm:$0x1] %v5605_v37 }
 0x26e   : > { %v11614_v52 = vcombine.low %v5105_v24, %v5108_v38  ;;  %5631 = vst [vmem:[#allocation3 + $0x14] sm:$0x1] %v5630_v61  ;;  %v5590_v24 = vsel %vm15720_vm1, 0, %v5589_v7  ;;  %v5586_v38 = vld [vmem:[#allocation3 + $0x24] sm:$0x1] }
 0x26f   : > { %5591 = vst [vmem:[#allocation3 + $0x30] sm:$0x1] %v5590_v24  ;;  %v5587_v0 = vsel %vm15720_vm1, 0, %v5586_v38  ;;  %v5653_v19 = vld [vmem:[#allocation3 + $0x74] sm:$0x1] }
 0x270   : > { %5588 = vst [vmem:[#allocation3 + $0x24] sm:$0x1] %v5587_v0  ;;  %v5654_v13 = vsel %vm15731_vm4, 0, %v5653_v19  ;;  %v5610_v61 = vld [vmem:[#allocation3 + $0x84] sm:$0x1] }
 0x271   : > { %5655 = vst [vmem:[#allocation3 + $0x74] sm:$0x1] %v5654_v13  ;;  %v5611_v7 = vsel %vm15720_vm1, 0, %v5610_v61  ;;  %v5662_v24 = vld [vmem:[#allocation3 + $0x98] sm:$0x1] }
 0x272   : > { %12719 = vmatmul.mubr.msk.bf16.gmra.mrb[28].mxu0 %vm1388_vm11, %v11574_v6  ;;  %v5136_v6 = vsel %vm14509_vm8, %v5134_v44, %v5135_v28  ;;  %v13717_v44 = vld [vmem:[%s17760_s3 + $0x28] sm:$0xff]   ;;  %v5642_v28 = vsel %vm15731_vm4, 0, %v5641_v42  ;;  %v5659_v38 = vld [vmem:[#allocation3 + $0x8c] sm:$0x1]  ;;  %5612 = vst [vmem:[#allocation3 + $0x84] sm:$0x1] %v5611_v7 }
 0x273   : > { %12724 = vmatprep.mubr.msk.bf16.mxu0 %vm1388_vm11, %v11608_v40  ;;  %v5008_v40 = vld [vmem:[#allocation2 + $0xa8] sm:$0xe]  ;;  %v11618_v8 = vcombine.low %v5133_v30, %v5136_v6  ;;  %5643 = vst [vmem:[#allocation3 + $0x44] sm:$0x1] %v5642_v28  ;;  %12758 = vmatprep.subr.bf16.mxu1 %v13717_v44  ;;  %v5598_v30 = vld [vmem:[#allocation3 + $0x54] sm:$0x1] }
 0x274   : > { %v11604_v21 = vrot.slane %v5008_v40, 9  ;;  %12759 = vmatpush3.bf16.msra.mxu1 %v13717_v44  ;;  %v13718_v6 = vld [vmem:[%s17760_s3 + $0x30] sm:$0xff]   ;;  %v6207_v40 = vld [vmem:[#allocation3] sm:$0xf]  ;;  %v5663_v0 = vsel %vm15731_vm4, 0, %v5662_v24 }
 0x275   : > { %12760 = vmatprep.subr.bf16.mxu1 %v13718_v6  ;;  %v6267_v27 = vshll.u32 %v6207_v40, 16  ;;  %5664 = vst [vmem:[#allocation3 + $0x98] sm:$0x1] %v5663_v0  ;;  %v5616_v58 = vld [vmem:[#allocation3 + $0x9c] sm:$0x1] }
 0x276   : > { %v5147_v33 = vsel %vm14509_vm8, %v11604_v21, %v5146_v46  ;;  %v5599_v46 = vsel %vm15720_vm1, 0, %v5598_v30  ;;  %v6264_v21 = vshrl.u32 %v6207_v40, 16  ;;  %v5617_v9 = vsel %vm15720_vm1, 0, %v5616_v58  ;;  %v5665_v48 = vld [vmem:[#allocation3 + $0xa4] sm:$0x1] }
 0x277   : > { %v11620_v36 = vcombine.low %v5147_v33, %v5150_v63  ;;  %5600 = vst [vmem:[#allocation3 + $0x54] sm:$0x1] %v5599_v46  ;;  %v5647_v33 = vld [vmem:[#allocation3 + $0x5c] sm:$0x1]  ;;  %v13719_v63 = vld [vmem:[%s17760_s3 + $0x38] sm:$0xff]   ;;  %v5666_v39 = vsel %vm15731_vm4, 0, %v5665_v48 }
 0x278   : > { %12761 = vmatpush3.bf16.msra.mxu1 %v13718_v6  ;;  %v5648_v53 = vsel %vm15731_vm4, 0, %v5647_v33  ;;  %5618 = vst [vmem:[#allocation3 + $0x9c] sm:$0x1] %v5617_v9  ;;  %5667 = vst [vmem:[#allocation3 + $0xa4] sm:$0x1] %v5666_v39 }
 0x279   : > { %5649 = vst [vmem:[#allocation3 + $0x5c] sm:$0x1] %v5648_v53  ;;  %12762 = vmatprep.subr.bf16.mxu1 %v13719_v63  ;;  %v5622_v42 = vld [vmem:[#allocation3 + $0xb4] sm:$0x1]  ;;  %v5674_v28 = vld [vmem:[#allocation3 + $0xc8] sm:$0x1] }
 0x27a   : > { %12725 = vmatmul.mubr.msk.bf16.vlgmr.msra.gmra.mrb[0].mxu0 %vm1388_vm11, %v11609_v35  ;;  %v5161_v35 = vsel %vm14509_vm8, %v11606_v34, %v5160_v50  ;;  %v6247_v50 = vld [vmem:[#allocation3 + $0x8] sm:$0x1]  ;;  %v6269_v34 = vrot.slane %v6267_v27, 5  ;;  %v5623_v44 = vsel %vm15720_vm1, 0, %v5622_v42  ;;  %v6099_v42 = vld [vmem:[#allocation3 + $0x14] sm:$0x1] }
 0x27b   : > { %12728 = vmatprep.mubr.msk.bf16.mxu0 %vm1388_vm11, %v11610_v20  ;;  %v5164_v20 = vsel %vm14509_vm8, %v5162_v55, %v5163_v59  ;;  %v6283_v51 = vshll.u32 %v6247_v50, 16  ;;  %5624 = vst [vmem:[#allocation3 + $0xb4] sm:$0x1] %v5623_v44  ;;  %v15821_v6 = vld [vmem:[%s17759_s2] ss:$0 sm:$0xff] }
 0x27c   : > { %v11622_v45 = vcombine.low %v5161_v35, %v5164_v20  ;;  %12763 = vmatpush3.bf16.msra.mxu1 %v13719_v63  ;;  %v5607_v20 = vld [vmem:[#allocation3 + $0x78] sm:$0x1] }
 0x27d   : > { %v6285_v35 = vrot.slane %v6283_v51, 5  ;;  %v5608_v32 = vsel %vm15720_vm1, 0, %v5607_v20 }
 0x27e   : > { %5609 = vst [vmem:[#allocation3 + $0x78] sm:$0x1] %v5608_v32  ;;  %v6102_v32 = vld [vmem:[#allocation3 + $0x18] sm:$0xf] }
 0x282   : > { %12729 = vmatmul.mubr.msk.bf16.gmra.mrb[4].mxu0 %vm1388_vm11, %v11611_v31  ;;  %v5632_v31 = vld [vmem:[#allocation3 + $0x20] sm:$0x1] }
 0x283   : > { %12732 = vmatprep.mubr.msk.bf16.mxu0 %vm1388_vm11, %v11612_v57  ;;  %v5633_v57 = vsel %vm15731_vm4, 0, %v5632_v31  ;;  %v15791_v31 = vld [vmem:[%s17760_s3] sm:$0xff]  }
 0x284   : > { %5634 = vst [vmem:[#allocation3 + $0x20] sm:$0x1] %v5633_v57  ;;  %12796 = vmatprep.subr.bf16.mxu1 %v15791_v31  ;;  %v5613_v57 = vld [vmem:[#allocation3 + $0x90] sm:$0x1] }
 0x285   : > { %v5614_v54 = vsel %vm15720_vm1, 0, %v5613_v57 }
 0x286   : > { %5615 = vst [vmem:[#allocation3 + $0x90] sm:$0x1] %v5614_v54 }
 0x28a   : > { %12733 = vmatmul.mubr.msk.bf16.gmra.mrb[8].mxu0 %vm1388_vm11, %v17932_v29  ;;  %v5595_v29 = vld [vmem:[#allocation3 + $0x48] sm:$0x1] }
 0x28b   : > { %12736 = vmatprep.mubr.msk.bf16.mxu0 %vm1388_vm11, %v11614_v52  ;;  %v5639_v52 = vsel %vm15731_vm4, 0, %v5638_v4  ;;  %v5596_v12 = vsel %vm15720_vm1, 0, %v5595_v29  ;;  %v5660_v4 = vsel %vm15731_vm4, 0, %v5659_v38  ;;  %v5668_v29 = vld [vmem:[#allocation3 + $0xb0] sm:$0x1] }
 0x28c   : > { %5640 = vst [vmem:[#allocation3 + $0x38] sm:$0x1] %v5639_v52  ;;  %5597 = vst [vmem:[#allocation3 + $0x48] sm:$0x1] %v5596_v12  ;;  %v5619_v52 = vld [vmem:[#allocation3 + $0xa8] sm:$0x1] }
 0x28d   : > { %5661 = vst [vmem:[#allocation3 + $0x8c] sm:$0x1] %v5660_v4  ;;  %v5620_v60 = vsel %vm15720_vm1, 0, %v5619_v52  ;;  %v5669_v12 = vsel %vm15731_vm4, 0, %v5668_v29  ;;  %v6095_v4 = vld [vmem:[#allocation3 + $0xc] sm:$0xf] }
 0x28e   : > { %5621 = vst [vmem:[#allocation3 + $0xa8] sm:$0x1] %v5620_v60  ;;  %5670 = vst [vmem:[#allocation3 + $0xb0] sm:$0x1] %v5669_v12  ;;  %v6106_v29 = vld [vmem:[#allocation3 + $0x20] sm:$0x1] }
 0x292   : > { %12737 = vmatmul.mubr.msk.bf16.gmra.mrb[12].mxu0 %vm1388_vm11, %v17934_v25  ;;  %v5602_v25 = vsel %vm15720_vm1, 0, %v5601_v41  ;;  %v5671_v41 = vld [vmem:[#allocation3 + $0xbc] sm:$0x1] }
 0x293   : > { %12740 = vmatprep.mubr.msk.bf16.mxu0 %vm1388_vm11, %v11616_v23  ;;  %v5645_v23 = vsel %vm15731_vm4, 0, %v5644_v5  ;;  %5603 = vst [vmem:[#allocation3 + $0x60] sm:$0x1] %v5602_v25  ;;  %v5625_v5 = vld [vmem:[#allocation3 + $0xc0] sm:$0x1]  ;;  %v5675_v25 = vsel %vm15731_vm4, 0, %v5674_v28 }
 0x294   : > { %5646 = vst [vmem:[#allocation3 + $0x50] sm:$0x1] %v5645_v23  ;;  %v5626_v23 = vsel %vm15720_vm1, 0, %v5625_v5  ;;  %v5672_v30 = vsel %vm15731_vm4, 0, %v5671_v41  ;;  %5676 = vst [vmem:[#allocation3 + $0xc8] sm:$0x1] %v5675_v25 }
 0x295   : > { %5627 = vst [vmem:[#allocation3 + $0xc0] sm:$0x1] %v5626_v23  ;;  %5673 = vst [vmem:[#allocation3 + $0xbc] sm:$0x1] %v5672_v30 }
 0x29a   : > { %12741 = vmatmul.mubr.msk.bf16.gmra.mrb[16].mxu0 %vm1388_vm11, %v17937_v2  ;;  %v5651_v2 = vsel %vm15731_vm4, 0, %v5650_v17 }
 0x29b   : > { %12744 = vmatprep.mubr.msk.bf16.mxu0 %vm1388_vm11, %v11618_v8  ;;  %v6208_v8 = vld [vmem:[#allocation3 + $0x4] sm:$0xf]  ;;  %5652 = vst [vmem:[#allocation3 + $0x68] sm:$0x1] %v5651_v2 }
 0x29c   : > { %v6273_v43 = vshll.u32 %v6208_v8, 16  ;;  %v6277_v3 = vshrl.u32 %v6208_v8, 16 }
 0x29e   : > { %v6275_v55 = vrot.slane %v6273_v43, 5  ;;  %v6279_v59 = vrot.slane %v6277_v3, 4 }
 0x2a2   : > { %12745 = vmatmul.mubr.msk.bf16.gmra.mrb[20].mxu0 %vm1388_vm11, %v17940_v16  ;;  %v6280_v16 = vor.u32 %v6279_v59, %v6275_v55 }
 0x2a3   : > { %12748 = vmatprep.mubr.msk.bf16.mxu0 %vm1388_vm11, %v11620_v36  ;;  %v6266_v36 = vrot.slane %v6264_v21, 4 }
 0x2a5   : > { %v6270_v47 = vor.u32 %v6269_v34, %v6266_v36 }
 0x2aa   : > { %12749 = vmatmul.mubr.msk.bf16.gmra.mrb[24].mxu0 %vm1388_vm11, %v17943_v18  ;;  %v6281_v18 = vrot.slane %v6280_v16, 4 }
 0x2ab   : > { %12752 = vmatprep.mubr.msk.bf16.mxu0 %vm1388_vm11, %v11622_v45  ;;  %v6271_v45 = vrot.slane %v6270_v47, 4 }
 0x2ac   : > { %v6286_v1 = vsel %vm14073_vm13, %v6281_v18, %v6285_v35 }
 0x2ad   : > { %v6276_v15 = vsel %vm14073_vm13, %v6271_v45, %v6275_v55 }
 0x2ae   : > { %v11673_v14 = vcombine.low %v6276_v15, %v6286_v1 }
 0x2b0   : > { %12764 = vmatprep.mubr.msk.bf16.mxu1 %vm6727_vm3, %v11673_v14 }
 0x2b2   : > { %12753 = vmatmul.mubr.msk.bf16.gmra.mrb[28].mxu0 %vm1388_vm11, %v17946_v22  ;;  %v5656_v22 = vld [vmem:[#allocation3 + $0x80] sm:$0x1] }
 0x2b3   : > { %v5657_v56 = vsel %vm15731_vm4, 0, %v5656_v22 }
 0x2b4   : > { %5658 = vst [vmem:[#allocation3 + $0x80] sm:$0x1] %v5657_v56 }
 0x34d   : > { %v12726_v46 = vpop.f32.mrb[0].mxu0 }
 0x34e   : > { %v5474_v40 = vadd.f32 %v12726_v46, %v15821_v6  ;;  %v5306_v8 = vpop.f32.mrb[1].mxu0 }
 0x34f   : > { %v5472_v21 = vadd.f32 %v15821_v6, %v5306_v8  ;;  %v12727_v27 = vpop.f32.mrb[2].mxu0 }
 0x350   : > { %v5506_v17 = vmul.f32 0.2, %v5474_v40  ;;  %v5475_v43 = vadd.f32 %v12727_v27, %v15821_v6  ;;  %v5309_v3 = vpop.f32.mrb[3].mxu0 }
 0x351   : > { %v5504_v26 = vmul.f32 0.2, %v5472_v21  ;;  %v5473_v2 = vadd.f32 %v15821_v6, %v5309_v3 }
 0x352   : > { %v5538_v33 = vmax.f32 %v5474_v40, %v5506_v17  ;;  %v5507_v63 = vmul.f32 0.2, %v5475_v43 }
 0x353   : > { %v5536_v50 = vmax.f32 %v5472_v21, %v5504_v26  ;;  %v5505_v53 = vmul.f32 0.2, %v5473_v2 }
 0x354   : > { %v12086_v36 = vpack.c.bf16 %v5538_v33, %v5538_v33  ;;  %v5539_v34 = vmax.f32 %v5475_v43, %v5507_v63 }
 0x355   : > { %v12084_v55 = vpack.c.bf16 %v5536_v50, %v5536_v50  ;;  %v5537_v59 = vmax.f32 %v5473_v2, %v5505_v53  ;;  %v12730_v51 = vpop.f32.mrb[4].mxu0 }
 0x356   : > { %v5791_v47 = vshrl.u32 %v12086_v36, 16  ;;  %v5794_v16 = vshll.u32 %v12086_v36, 16  ;;  %v12087_v35 = vpack.c.bf16 %v5539_v34, %v5539_v34  ;;  %v5478_v20 = vadd.f32 %v12730_v51, %v15821_v6  ;;  %v5322_v45 = vpop.f32.mrb[5].mxu0 }
 0x357   : > { %v5774_v10 = vshrl.u32 %v12084_v55, 16  ;;  %v5777_v18 = vshll.u32 %v12084_v55, 16  ;;  %v12085_v37 = vpack.c.bf16 %v5537_v59, %v5537_v59  ;;  %v5476_v15 = vadd.f32 %v15821_v6, %v5322_v45  ;;  %v12731_v22 = vpop.f32.mrb[6].mxu0  ;;  %v6116_v59 = vld [vmem:[#allocation3 + $0x30] sm:$0xf] }
 0x358   : > { %v5793_v1 = vrot.slane %v5791_v47, 7  ;;  %v5799_v56 = vshrl.u32 %v12087_v35, 16  ;;  %v5802_v14 = vshll.u32 %v12087_v35, 16  ;;  %v5510_v19 = vmul.f32 0.2, %v5478_v20  ;;  %v5325_v13 = vpop.f32.mrb[7].mxu0 }
 0x359   : > { %v5776_v54 = vrot.slane %v5774_v10, 7  ;;  %v5782_v61 = vshrl.u32 %v12085_v37, 16  ;;  %v5785_v7 = vshll.u32 %v12085_v37, 16  ;;  %v5508_v24 = vmul.f32 0.2, %v5476_v15 }
 0x35a   : > { %v5796_v38 = vor.u32 %v5794_v16, %v5793_v1  ;;  %v5797_v0 = vrot.slane %v5793_v1, 4  ;;  %v5801_v52 = vrot.slane %v5799_v56, 7  ;;  %v5542_v60 = vmax.f32 %v5478_v20, %v5510_v19  ;;  %v6109_v47 = vld [vmem:[#allocation3 + $0x24] sm:$0xf] }
 0x35b   : > { %v5779_v58 = vor.u32 %v5777_v18, %v5776_v54  ;;  %v5780_v9 = vrot.slane %v5776_v54, 4  ;;  %v5784_v12 = vrot.slane %v5782_v61, 7  ;;  %v5540_v48 = vmax.f32 %v5476_v15, %v5508_v24 }
 0x35c   : > { %v6103_v39 = vsel %vm15831_vm6, %v5796_v38, %v6102_v32  ;;  %v5804_v5 = vor.u32 %v5802_v14, %v5801_v52  ;;  %v5806_v23 = vrot.slane %v5801_v52, 4  ;;  %v12090_v44 = vpack.c.bf16 %v5542_v60, %v5542_v60 }
 0x35d   : > { %6104 = vst [vmem:[#allocation3 + $0x18] sm:$0xf] %v6103_v39  ;;  %v6096_v28 = vsel %vm15831_vm6, %v5779_v58, %v6095_v4  ;;  %v5787_v41 = vor.u32 %v5785_v7, %v5784_v12  ;;  %v5789_v25 = vrot.slane %v5784_v12, 4  ;;  %v12088_v30 = vpack.c.bf16 %v5540_v48, %v5540_v48  ;;  %v12734_v46 = vpop.f32.mrb[8].mxu0 }
 0x35e   : > { %6097 = vst [vmem:[#allocation3 + $0xc] sm:$0xf] %v6096_v28  ;;  %v5805_v8 = vsel %vm14079_vm14, %v5797_v0, %v5804_v5  ;;  %v6107_v21 = vsel %vm15720_vm1, %v5806_v23, %v6106_v29  ;;  %v5825_v27 = vshrl.u32 %v12090_v44, 16  ;;  %v5828_v17 = vshll.u32 %v12090_v44, 16  ;;  %v5338_v43 = vpop.f32.mrb[9].mxu0 }
 0x35f   : > { %6105 = vst.msk [vmem:[#allocation3 + $0x1c] sm:$0xf] %vm5568_vm7, %v5805_v8  ;;  %6108 = vst [vmem:[#allocation3 + $0x20] sm:$0x1] %v6107_v21  ;;  %v5788_v3 = vsel %vm14079_vm14, %v5780_v9, %v5787_v41  ;;  %v6100_v26 = vsel %vm15720_vm1, %v5789_v25, %v6099_v42  ;;  %v5808_v2 = vshrl.u32 %v12088_v30, 16  ;;  %v5811_v33 = vshll.u32 %v12088_v30, 16 }
 0x360   : > { %v12735_v63 = vpop.f32.mrb[10].mxu0  ;;  %6098 = vst.msk [vmem:[#allocation3 + $0x10] sm:$0xf] %vm5568_vm7, %v5788_v3  ;;  %6101 = vst [vmem:[#allocation3 + $0x14] sm:$0x1] %v6100_v26  ;;  %v15849_v50 = vrot.slane %v5825_v27, 7  ;;  %v5479_v53 = vadd.f32 %v12731_v22, %v15821_v6  ;;  %v5477_v36 = vadd.f32 %v15821_v6, %v5325_v13  ;;  %v5482_v34 = vadd.f32 %v12734_v46, %v15821_v6 }
 0x361   : > { %v5341_v55 = vpop.f32.mrb[11].mxu0  ;;  %v15854_v51 = vrot.slane %v5808_v2, 7  ;;  %v5480_v16 = vadd.f32 %v15821_v6, %v5338_v43  ;;  %v5483_v35 = vadd.f32 %v12735_v63, %v15821_v6  ;;  %v6120_v41 = vld [vmem:[#allocation3 + $0x38] sm:$0x1]  ;;  %v6113_v25 = vld [vmem:[#allocation3 + $0x2c] sm:$0x1] }
 0x362   : > { %v5481_v20 = vadd.f32 %v15821_v6, %v5341_v55  ;;  %v5830_v45 = vor.u32 %v5828_v17, %v15849_v50  ;;  %v5831_v32 = vrot.slane %v15849_v50, 4  ;;  %v5511_v10 = vmul.f32 0.2, %v5479_v53  ;;  %v6130_v43 = vld [vmem:[#allocation3 + $0x48] sm:$0xf] }
 0x363   : > { %v5509_v18 = vmul.f32 0.2, %v5477_v36  ;;  %v5813_v37 = vor.u32 %v5811_v33, %v15854_v51  ;;  %v5814_v15 = vrot.slane %v15854_v51, 4  ;;  %v5514_v22 = vmul.f32 0.2, %v5482_v34 }
 0x364   : > { %v5512_v1 = vmul.f32 0.2, %v5480_v16  ;;  %v6117_v56 = vsel %vm15831_vm6, %v5830_v45, %v6116_v59  ;;  %v5543_v14 = vmax.f32 %v5479_v53, %v5511_v10  ;;  %v5515_v13 = vmul.f32 0.2, %v5483_v35  ;;  %v6123_v59 = vld [vmem:[#allocation3 + $0x3c] sm:$0xf] }
 0x365   : > { %v5541_v19 = vmax.f32 %v5477_v36, %v5509_v18  ;;  %6118 = vst [vmem:[#allocation3 + $0x30] sm:$0xf] %v6117_v56  ;;  %v6110_v54 = vsel %vm15831_vm6, %v5813_v37, %v6109_v47  ;;  %v5546_v61 = vmax.f32 %v5482_v34, %v5514_v22  ;;  %v5513_v24 = vmul.f32 0.2, %v5481_v20  ;;  %v12738_v38 = vpop.f32.mrb[12].mxu0 }
 0x366   : > { %v5544_v7 = vmax.f32 %v5480_v16, %v5512_v1  ;;  %6111 = vst [vmem:[#allocation3 + $0x24] sm:$0xf] %v6110_v54  ;;  %v12091_v0 = vpack.c.bf16 %v5543_v14, %v5543_v14  ;;  %v5547_v52 = vmax.f32 %v5483_v35, %v5515_v13  ;;  %v5486_v60 = vadd.f32 %v12738_v38, %v15821_v6  ;;  %v5354_v58 = vpop.f32.mrb[13].mxu0 }
 0x367   : > { %v12089_v4 = vpack.c.bf16 %v5541_v19, %v5541_v19  ;;  %v12094_v9 = vpack.c.bf16 %v5546_v61, %v5546_v61  ;;  %v5545_v12 = vmax.f32 %v5481_v20, %v5513_v24  ;;  %v5484_v48 = vadd.f32 %v15821_v6, %v5354_v58  ;;  %v12739_v39 = vpop.f32.mrb[14].mxu0 }
 0x368   : > { %v12092_v29 = vpack.c.bf16 %v5544_v7, %v5544_v7  ;;  %v5833_v5 = vshrl.u32 %v12091_v0, 16  ;;  %v5836_v23 = vshll.u32 %v12091_v0, 16  ;;  %v5357_v28 = vpop.f32.mrb[15].mxu0  ;;  %v12095_v3 = vpack.c.bf16 %v5547_v52, %v5547_v52  ;;  %v6134_v52 = vld [vmem:[#allocation3 + $0x50] sm:$0x1] }
 0x369   : > { %v5816_v42 = vshrl.u32 %v12089_v4, 16  ;;  %v5819_v44 = vshll.u32 %v12089_v4, 16  ;;  %v5859_v30 = vshrl.u32 %v12094_v9, 16  ;;  %v5862_v46 = vshll.u32 %v12094_v9, 16  ;;  %v6127_v9 = vld [vmem:[#allocation3 + $0x44] sm:$0x1] }
 0x36a   : > { %v5842_v8 = vshrl.u32 %v12092_v29, 16  ;;  %v5845_v21 = vshll.u32 %v12092_v29, 16  ;;  %v5835_v27 = vrot.slane %v5833_v5, 7  ;;  %v12093_v26 = vpack.c.bf16 %v5545_v12, %v5545_v12 }
 0x36b   : > { %v5818_v17 = vrot.slane %v5816_v42, 7  ;;  %v5861_v2 = vrot.slane %v5859_v30, 7  ;;  %v5518_v63 = vmul.f32 0.2, %v5486_v60  ;;  %v5516_v50 = vmul.f32 0.2, %v5484_v48 }
 0x36c   : > { %v5844_v33 = vrot.slane %v5842_v8, 7  ;;  %v5838_v53 = vor.u32 %v5836_v23, %v5835_v27  ;;  %v5840_v36 = vrot.slane %v5835_v27, 4  ;;  %v5867_v56 = vshrl.u32 %v12095_v3, 16 }
 0x36d   : > { %v5821_v34 = vor.u32 %v5819_v44, %v5818_v17  ;;  %v5823_v55 = vrot.slane %v5818_v17, 4  ;;  %v5864_v51 = vor.u32 %v5862_v46, %v5861_v2  ;;  %v5865_v47 = vrot.slane %v5861_v2, 4  ;;  %v12742_v20 = vpop.f32.mrb[16].mxu0 }
 0x36e   : > { %v5847_v16 = vor.u32 %v5845_v21, %v5844_v33  ;;  %v5848_v35 = vrot.slane %v5844_v33, 4  ;;  %v5839_v45 = vsel %vm14079_vm14, %v5831_v32, %v5838_v53  ;;  %v6121_v10 = vsel %vm15720_vm1, %v5840_v36, %v6120_v41  ;;  %v5370_v22 = vpop.f32.mrb[17].mxu0 }
 0x36f   : > { %v5822_v18 = vsel %vm14079_vm14, %v5814_v15, %v5821_v34  ;;  %v6114_v37 = vsel %vm15720_vm1, %v5823_v55, %v6113_v25  ;;  %6119 = vst.msk [vmem:[#allocation3 + $0x34] sm:$0xf] %vm5568_vm7, %v5839_v45  ;;  %6122 = vst [vmem:[#allocation3 + $0x38] sm:$0x1] %v6121_v10  ;;  %v6131_v1 = vsel %vm15831_vm6, %v5864_v51, %v6130_v43  ;;  %v5870_v14 = vshll.u32 %v12095_v3, 16  ;;  %v12743_v19 = vpop.f32.mrb[18].mxu0 }
 0x370   : > { %6112 = vst.msk [vmem:[#allocation3 + $0x28] sm:$0xf] %vm5568_vm7, %v5822_v18  ;;  %6115 = vst [vmem:[#allocation3 + $0x2c] sm:$0x1] %v6114_v37  ;;  %v6124_v32 = vsel %vm15831_vm6, %v5847_v16, %v6123_v59  ;;  %v5850_v15 = vshrl.u32 %v12093_v26, 16  ;;  %v5853_v13 = vshll.u32 %v12093_v26, 16  ;;  %v5550_v54 = vmax.f32 %v5486_v60, %v5518_v63 }
 0x371   : > { %6132 = vst [vmem:[#allocation3 + $0x48] sm:$0xf] %v6131_v1  ;;  %6125 = vst [vmem:[#allocation3 + $0x3c] sm:$0xf] %v6124_v32  ;;  %v5548_v61 = vmax.f32 %v5484_v48, %v5516_v50  ;;  %v15883_v7 = vpop.f32.mrb[19].mxu0  ;;  %v5869_v24 = vrot.slane %v5867_v56, 7  ;;  %v5487_v38 = vadd.f32 %v12739_v39, %v15821_v6  ;;  %v5485_v0 = vadd.f32 %v15821_v6, %v5357_v28 }
 0x372   : > { %v5490_v4 = vadd.f32 %v12742_v20, %v15821_v6  ;;  %v5852_v58 = vrot.slane %v5850_v15, 7  ;;  %v12098_v29 = vpack.c.bf16 %v5550_v54, %v5550_v54  ;;  %v5488_v5 = vadd.f32 %v15821_v6, %v5370_v22  ;;  %v6144_v3 = vld [vmem:[#allocation3 + $0x60] sm:$0xf]  ;;  %v6137_v59 = vld [vmem:[#allocation3 + $0x54] sm:$0xf] }
 0x373   : > { %v12096_v12 = vpack.c.bf16 %v5548_v61, %v5548_v61  ;;  %v5872_v23 = vor.u32 %v5870_v14, %v5869_v24  ;;  %v5874_v42 = vrot.slane %v5869_v24, 4  ;;  %v5519_v60 = vmul.f32 0.2, %v5487_v38  ;;  %v6209_v32 = vld [vmem:[#allocation3 + $0xc] sm:$0xf] }
 0x374   : > { %v5517_v48 = vmul.f32 0.2, %v5485_v0  ;;  %v5855_v44 = vor.u32 %v5853_v13, %v5852_v58  ;;  %v5857_v41 = vrot.slane %v5852_v58, 4  ;;  %v5893_v25 = vshrl.u32 %v12098_v29, 16  ;;  %v6148_v14 = vld [vmem:[#allocation3 + $0x68] sm:$0x1] }
 0x375   : > { %v5896_v30 = vshll.u32 %v12098_v29, 16  ;;  %v5873_v39 = vsel %vm14079_vm14, %v5865_v47, %v5872_v23  ;;  %v6135_v28 = vsel %vm15720_vm1, %v5874_v42, %v6134_v52  ;;  %v5876_v46 = vshrl.u32 %v12096_v12, 16  ;;  %v15893_v21 = vpop.f32.mrb[20].mxu0 }
 0x376   : > { %v5879_v8 = vshll.u32 %v12096_v12, 16  ;;  %6133 = vst.msk [vmem:[#allocation3 + $0x4c] sm:$0xf] %vm5568_vm7, %v5873_v39  ;;  %6136 = vst [vmem:[#allocation3 + $0x50] sm:$0x1] %v6135_v28  ;;  %v5856_v27 = vsel %vm14079_vm14, %v5848_v35, %v5855_v44  ;;  %v6128_v17 = vsel %vm15720_vm1, %v5857_v41, %v6127_v9  ;;  %v5895_v43 = vrot.slane %v5893_v25, 7 }
 0x377   : > { %v5551_v26 = vmax.f32 %v5487_v38, %v5519_v60  ;;  %v15900_v2 = vpop.f32.mrb[21].mxu0  ;;  %6126 = vst.msk [vmem:[#allocation3 + $0x40] sm:$0xf] %vm5568_vm7, %v5856_v27  ;;  %6129 = vst [vmem:[#allocation3 + $0x44] sm:$0x1] %v6128_v17  ;;  %v5878_v33 = vrot.slane %v5876_v46, 7  ;;  %v5549_v63 = vmax.f32 %v5485_v0, %v5517_v48  ;;  %v5491_v47 = vadd.f32 %v12743_v19, %v15821_v6 }
 0x378   : > { %v5522_v50 = vmul.f32 0.2, %v5490_v4  ;;  %v5520_v53 = vmul.f32 0.2, %v5488_v5  ;;  %v15903_v36 = vpop.f32.mrb[22].mxu0  ;;  %v5898_v34 = vor.u32 %v5896_v30, %v5895_v43  ;;  %v5899_v55 = vrot.slane %v5895_v43, 4 }
 0x379   : > { %v12099_v51 = vpack.c.bf16 %v5551_v26, %v5551_v26  ;;  %v15906_v16 = vpop.f32.mrb[23].mxu0  ;;  %v5881_v35 = vor.u32 %v5879_v8, %v5878_v33  ;;  %v5882_v20 = vrot.slane %v5878_v33, 4  ;;  %v12097_v45 = vpack.c.bf16 %v5549_v63, %v5549_v63  ;;  %v6158_v25 = vld [vmem:[#allocation3 + $0x78] sm:$0xf]  ;;  %v6210_v27 = vld [vmem:[#allocation3 + $0x10] sm:$0xf] }
 0x37a   : > { %v5554_v10 = vmax.f32 %v5490_v4, %v5522_v50  ;;  %v6145_v18 = vsel %vm15831_vm6, %v5898_v34, %v6144_v3  ;;  %v5552_v1 = vmax.f32 %v5488_v5, %v5520_v53  ;;  %v5523_v24 = vmul.f32 0.2, %v5491_v47  ;;  %v6141_v5 = vld [vmem:[#allocation3 + $0x5c] sm:$0x1]  ;;  %v6151_v33 = vld [vmem:[#allocation3 + $0x6c] sm:$0xf] }
 0x37b   : > { %v5901_v37 = vshrl.u32 %v12099_v51, 16  ;;  %v5904_v22 = vshll.u32 %v12099_v51, 16  ;;  %6146 = vst [vmem:[#allocation3 + $0x60] sm:$0xf] %v6145_v18  ;;  %v6138_v56 = vsel %vm15831_vm6, %v5881_v35, %v6137_v59  ;;  %v5884_v15 = vshrl.u32 %v12097_v45, 16 }
 0x37c   : > { %v5887_v19 = vshll.u32 %v12097_v45, 16  ;;  %v12102_v13 = vpack.c.bf16 %v5554_v10, %v5554_v10  ;;  %6139 = vst [vmem:[#allocation3 + $0x54] sm:$0xf] %v6138_v56  ;;  %v12100_v61 = vpack.c.bf16 %v5552_v1, %v5552_v1  ;;  %v5489_v38 = vadd.f32 %v15821_v6, %v15883_v7  ;;  %v6248_v34 = vld [vmem:[#allocation3 + $0x14] sm:$0x1] }
 0x37d   : > { %v5903_v54 = vrot.slane %v5901_v37, 7  ;;  %v5886_v0 = vrot.slane %v5884_v15, 7  ;;  %v6288_v58 = vshrl.u32 %v6209_v32, 16  ;;  %v15914_v9 = vpop.f32.mrb[24].mxu0  ;;  %v5555_v30 = vmax.f32 %v5491_v47, %v5523_v24  ;;  %v6211_v35 = vld [vmem:[#allocation3 + $0x18] sm:$0xf] }
 0x37e   : > { %v5927_v4 = vshrl.u32 %v12102_v13, 16  ;;  %v5930_v52 = vshll.u32 %v12102_v13, 16  ;;  %v5910_v23 = vshrl.u32 %v12100_v61, 16  ;;  %v5913_v42 = vshll.u32 %v12100_v61, 16  ;;  %v15916_v60 = vpop.f32.mrb[25].mxu0 }
 0x37f   : > { %v5906_v29 = vor.u32 %v5904_v22, %v5903_v54  ;;  %v5908_v12 = vrot.slane %v5903_v54, 4  ;;  %v5889_v48 = vor.u32 %v5887_v19, %v5886_v0  ;;  %v5891_v44 = vrot.slane %v5886_v0, 4  ;;  %v15918_v39 = vpop.f32.mrb[26].mxu0  ;;  %v6212_v37 = vld [vmem:[#allocation3 + $0x1c] sm:$0xf] }
 0x380   : > { %v5929_v41 = vrot.slane %v5927_v4, 7  ;;  %v15924_v46 = vrot.slane %v5910_v23, 7  ;;  %v5521_v8 = vmul.f32 0.2, %v5489_v38  ;;  %v15926_v17 = vpop.f32.mrb[27].mxu0  ;;  %v12103_v50 = vpack.c.bf16 %v5555_v30, %v5555_v30 }
 0x381   : > { %v5907_v7 = vsel %vm14079_vm14, %v5899_v55, %v5906_v29  ;;  %v6149_v28 = vsel %vm15720_vm1, %v5908_v12, %v6148_v14  ;;  %v5890_v43 = vsel %vm14079_vm14, %v5882_v20, %v5889_v48  ;;  %v6142_v3 = vsel %vm15720_vm1, %v5891_v44, %v6141_v5  ;;  %v6162_v22 = vld [vmem:[#allocation3 + $0x80] sm:$0x1]  ;;  %v6155_v48 = vld [vmem:[#allocation3 + $0x74] sm:$0x1] }
 0x382   : > { %6147 = vst.msk [vmem:[#allocation3 + $0x64] sm:$0xf] %vm5568_vm7, %v5907_v7  ;;  %6150 = vst [vmem:[#allocation3 + $0x68] sm:$0x1] %v6149_v28  ;;  %v5932_v26 = vor.u32 %v5930_v52, %v5929_v41  ;;  %v5915_v63 = vor.u32 %v5913_v42, %v15924_v46  ;;  %v5553_v53 = vmax.f32 %v5489_v38, %v5521_v8  ;;  %v6290_v59 = vrot.slane %v6288_v58, 4 }
 0x383   : > { %6140 = vst.msk [vmem:[#allocation3 + $0x58] sm:$0xf] %vm5568_vm7, %v5890_v43  ;;  %6143 = vst [vmem:[#allocation3 + $0x5c] sm:$0x1] %v6142_v3  ;;  %v6291_v51 = vshll.u32 %v6209_v32, 16  ;;  %v6297_v47 = vshll.u32 %v6210_v27, 16 }
 0x384   : > { %v6159_v55 = vsel %vm15831_vm6, %v5932_v26, %v6158_v25  ;;  %v5933_v20 = vrot.slane %v5929_v41, 4  ;;  %v6152_v45 = vsel %vm15831_vm6, %v5915_v63, %v6151_v33  ;;  %v5935_v10 = vshrl.u32 %v12103_v50, 16 }
 0x385   : > { %6160 = vst [vmem:[#allocation3 + $0x78] sm:$0xf] %v6159_v55  ;;  %v12101_v18 = vpack.c.bf16 %v5553_v53, %v5553_v53  ;;  %6153 = vst [vmem:[#allocation3 + $0x6c] sm:$0xf] %v6152_v45  ;;  %v6293_v1 = vrot.slane %v6291_v51, 5  ;;  %v6299_v56 = vrot.slane %v6297_v47, 5  ;;  %v5494_v47 = vadd.f32 %v15893_v21, %v15821_v6 }
 0x386   : > { %v6301_v14 = vshrl.u32 %v6210_v27, 16  ;;  %v6307_v15 = vshll.u32 %v6248_v34, 16  ;;  %v15939_v19 = vpop.f32.mrb[28].mxu0  ;;  %v5916_v32 = vrot.slane %v15924_v46, 4  ;;  %v5937_v13 = vrot.slane %v5935_v10, 7 }
 0x387   : > { %v5938_v54 = vshll.u32 %v12103_v50, 16  ;;  %v5918_v61 = vshrl.u32 %v12101_v18, 16  ;;  %v15942_v24 = vpop.f32.mrb[29].mxu0  ;;  %v5921_v38 = vshll.u32 %v12101_v18, 16  ;;  %v6294_v0 = vor.u32 %v6293_v1, %v6290_v59  ;;  %v6249_v27 = vld [vmem:[#allocation3 + $0x20] sm:$0x1] }
 0x388   : > { %v6303_v4 = vrot.slane %v6301_v14, 4  ;;  %v6309_v52 = vrot.slane %v6307_v15, 5  ;;  %v15944_v58 = vpop.f32.mrb[30].mxu0  ;;  %v5942_v12 = vrot.slane %v5937_v13, 4  ;;  %v6312_v23 = vshrl.u32 %v6211_v35, 16 }
 0x389   : > { %v5940_v29 = vor.u32 %v5938_v54, %v5937_v13  ;;  %v5920_v5 = vrot.slane %v5918_v61, 7  ;;  %v15946_v42 = vpop.f32.mrb[31].mxu0  ;;  %v6295_v44 = vrot.slane %v6294_v0, 4  ;;  %v6315_v25 = vshll.u32 %v6211_v35, 16  ;;  %v6213_v35 = vld [vmem:[#allocation3 + $0x24] sm:$0xf] }
 0x38a   : > { %v6304_v41 = vor.u32 %v6303_v4, %v6299_v56  ;;  %v6321_v30 = vshll.u32 %v6212_v37, 16  ;;  %v6163_v28 = vsel %vm15720_vm1, %v5942_v12, %v6162_v22  ;;  %v6314_v26 = vrot.slane %v6312_v23, 4  ;;  %v13721_v22 = vld [vmem:[%s17760_s3 + $0x8] sm:$0xff]  }
 0x38b   : > { %v5941_v7 = vsel %vm14079_vm14, %v5933_v20, %v5940_v29  ;;  %v5923_v46 = vor.u32 %v5921_v38, %v5920_v5  ;;  %v5925_v8 = vrot.slane %v5920_v5, 4  ;;  %6164 = vst [vmem:[#allocation3 + $0x80] sm:$0x1] %v6163_v28  ;;  %v6300_v43 = vsel %vm14073_vm13, %v6295_v44, %v6299_v56 }
 0x38c   : > { %6161 = vst.msk [vmem:[#allocation3 + $0x7c] sm:$0xf] %vm5568_vm7, %v5941_v7  ;;  %v6305_v3 = vrot.slane %v6304_v41, 4  ;;  %v6317_v33 = vrot.slane %v6315_v25, 5  ;;  %v6323_v53 = vrot.slane %v6321_v30, 5  ;;  %v6325_v34 = vshrl.u32 %v6212_v37, 16 }
 0x38d   : > { %v5924_v63 = vsel %vm14079_vm14, %v5916_v32, %v5923_v46  ;;  %v6156_v50 = vsel %vm15720_vm1, %v5925_v8, %v6155_v48  ;;  %v6331_v51 = vshll.u32 %v6249_v27, 16  ;;  %v5492_v10 = vadd.f32 %v15821_v6, %v15900_v2  ;;  %v6214_v37 = vld [vmem:[#allocation3 + $0x28] sm:$0xf]  ;;  %v6172_v8 = vld [vmem:[#allocation3 + $0x90] sm:$0xf] }
 0x38e   : > { %6154 = vst.msk [vmem:[#allocation3 + $0x70] sm:$0xf] %vm5568_vm7, %v5924_v63  ;;  %6157 = vst [vmem:[#allocation3 + $0x74] sm:$0x1] %v6156_v50  ;;  %v6310_v55 = vsel %vm14073_vm13, %v6305_v3, %v6309_v52  ;;  %v6318_v59 = vor.u32 %v6317_v33, %v6314_v26  ;;  %v6327_v45 = vrot.slane %v6325_v34, 4  ;;  %v5495_v18 = vadd.f32 %v15903_v36, %v15821_v6  ;;  %v13723_v33 = vld [vmem:[%s17760_s3 + $0x18] sm:$0xff]  }
 0x38f   : > { %v11674_v20 = vcombine.low %v6300_v43, %v6310_v55  ;;  %v6333_v56 = vrot.slane %v6331_v51, 5  ;;  %v5526_v14 = vmul.f32 0.2, %v5494_v47  ;;  %v5493_v21 = vadd.f32 %v15821_v6, %v15906_v16  ;;  %v13722_v16 = vld [vmem:[%s17760_s3 + $0x10] sm:$0xff]   ;;  %v6165_v50 = vld [vmem:[#allocation3 + $0x84] sm:$0xf] }
 0x390   : > { %v6319_v1 = vrot.slane %v6318_v59, 4  ;;  %v6328_v15 = vor.u32 %v6327_v45, %v6323_v53  ;;  %v5524_v32 = vmul.f32 0.2, %v5492_v10  ;;  %v5527_v13 = vmul.f32 0.2, %v5495_v18 }
 0x391   : > { %12765 = vmatmul.mubr.msk.bf16.vlgmr.msra.gmra.mrb[0].mxu1 %vm6727_vm3, %v11674_v20  ;;  %v6336_v2 = vshrl.u32 %v6213_v35, 16  ;;  %v5558_v54 = vmax.f32 %v5494_v47, %v5526_v14  ;;  %v5525_v61 = vmul.f32 0.2, %v5493_v21  ;;  %v6339_v38 = vshll.u32 %v6213_v35, 16  ;;  %v6169_v35 = vld [vmem:[#allocation3 + $0x8c] sm:$0x1] }
 0x392   : > { %12797 = vmatpush3.bf16.msra.mxu1 %v15791_v31  ;;  %v6324_v36 = vsel %vm14073_vm13, %v6319_v1, %v6323_v53  ;;  %v6329_v0 = vrot.slane %v6328_v15, 4  ;;  %v5556_v4 = vmax.f32 %v5492_v10, %v5524_v32  ;;  %v5559_v52 = vmax.f32 %v5495_v18, %v5527_v13  ;;  %v6176_v53 = vld [vmem:[#allocation3 + $0x98] sm:$0x1]  ;;  %v15986_v1 = vld [vmem:[#allocation3 + $0x30] sm:$0xf]  ;;  %v15991_v13 = vld [vmem:[%s17760_s3 + $0x40] sm:$0xff]  }
 0x393   : > { %v6338_v29 = vrot.slane %v6336_v2, 4  ;;  %12798 = vmatprep.subr.bf16.mxu1 %v13721_v22  ;;  %v12106_v12 = vpack.c.bf16 %v5558_v54, %v5558_v54  ;;  %v5557_v5 = vmax.f32 %v5493_v21, %v5525_v61  ;;  %v6341_v23 = vrot.slane %v6339_v38, 5  ;;  %v6250_v32 = vld [vmem:[#allocation3 + $0x2c] sm:$0x1]  ;;  %v15997_v38 = vld [vmem:[#allocation3 + $0x34] sm:$0xf] }
 0x394   : > { %v6345_v48 = vshll.u32 %v6214_v37, 16  ;;  %v6334_v31 = vsel %vm14073_vm13, %v6329_v0, %v6333_v56  ;;  %v12104_v44 = vpack.c.bf16 %v5556_v4, %v5556_v4  ;;  %v12107_v41 = vpack.c.bf16 %v5559_v52, %v5559_v52 }
 0x395   : > { %v6349_v25 = vshrl.u32 %v6214_v37, 16  ;;  %v11675_v30 = vcombine.low %v6324_v36, %v6334_v31  ;;  %v5961_v7 = vshrl.u32 %v12106_v12, 16  ;;  %v5964_v28 = vshll.u32 %v12106_v12, 16 }
 0x396   : > { %v12105_v46 = vpack.c.bf16 %v5557_v5, %v5557_v5  ;;  %12799 = vmatpush3.bf16.msra.mxu1 %v13721_v22  ;;  %v5944_v27 = vshrl.u32 %v12104_v44, 16  ;;  %v5947_v43 = vshll.u32 %v12104_v44, 16  ;;  %v5969_v3 = vshrl.u32 %v12107_v41, 16 }
 0x397   : > { %v5972_v26 = vshll.u32 %v12107_v41, 16  ;;  %12800 = vmatprep.subr.bf16.mxu1 %v13722_v16  ;;  %12768 = vmatprep.mubr.msk.bf16.mxu1 %vm6727_vm3, %v11675_v30  ;;  %v5963_v63 = vrot.slane %v5961_v7, 7  ;;  %v6342_v59 = vor.u32 %v6341_v23, %v6338_v29  ;;  %v6347_v20 = vrot.slane %v6345_v48, 5 }
 0x398   : > { %v5952_v34 = vshrl.u32 %v12105_v46, 16  ;;  %v5955_v55 = vshll.u32 %v12105_v46, 16  ;;  %v5946_v51 = vrot.slane %v5944_v27, 7  ;;  %v5971_v47 = vrot.slane %v5969_v3, 7 }
 0x399   : > { %v6351_v45 = vrot.slane %v6349_v25, 4  ;;  %v5966_v10 = vor.u32 %v5964_v28, %v5963_v63  ;;  %v5967_v18 = vrot.slane %v5963_v63, 4  ;;  %v6343_v22 = vrot.slane %v6342_v59, 4 }
 0x39a   : > { %v5954_v37 = vrot.slane %v5952_v34, 7  ;;  %12801 = vmatpush3.bf16.msra.mxu1 %v13722_v16  ;;  %v5949_v56 = vor.u32 %v5947_v43, %v5946_v51  ;;  %v5950_v14 = vrot.slane %v5946_v51, 4  ;;  %v5974_v21 = vor.u32 %v5972_v26, %v5971_v47  ;;  %v6251_v16 = vld [vmem:[#allocation3 + $0x38] sm:$0x1]  ;;  %v16020_v26 = vld [vmem:[#allocation3 + $0x3c] sm:$0xf] }
 0x39b   : > { %v5976_v15 = vrot.slane %v5971_v47, 4  ;;  %12802 = vmatprep.subr.bf16.mxu1 %v13723_v33  ;;  %v6173_v2 = vsel %vm15831_vm6, %v5966_v10, %v6172_v8  ;;  %v6348_v61 = vsel %vm14073_vm13, %v6343_v22, %v6347_v20  ;;  %v6352_v29 = vor.u32 %v6351_v45, %v6347_v20 }
 0x39c   : > { %v5957_v36 = vor.u32 %v5955_v55, %v5954_v37  ;;  %v5959_v54 = vrot.slane %v5954_v37, 4  ;;  %6174 = vst [vmem:[#allocation3 + $0x90] sm:$0xf] %v6173_v2  ;;  %v6166_v0 = vsel %vm15831_vm6, %v5949_v56, %v6165_v50  ;;  %v5975_v4 = vsel %vm14079_vm14, %v5967_v18, %v5974_v21 }
 0x39d   : > { %v6177_v52 = vsel %vm15720_vm1, %v5976_v15, %v6176_v53  ;;  %6167 = vst [vmem:[#allocation3 + $0x84] sm:$0xf] %v6166_v0  ;;  %6175 = vst.msk [vmem:[#allocation3 + $0x94] sm:$0xf] %vm5568_vm7, %v5975_v4  ;;  %v6355_v23 = vshll.u32 %v6250_v32, 16  ;;  %v6360_v48 = vshrl.u32 %v15986_v1, 16  ;;  %v5498_v46 = vadd.f32 %v15914_v9, %v15821_v6 }
 0x39e   : > { %6178 = vst [vmem:[#allocation3 + $0x98] sm:$0x1] %v6177_v52  ;;  %v5958_v12 = vsel %vm14079_vm14, %v5950_v14, %v5957_v36  ;;  %v6170_v5 = vsel %vm15720_vm1, %v5959_v54, %v6169_v35  ;;  %12803 = vmatpush3.bf16.msra.mxu1 %v13723_v33  ;;  %v6353_v31 = vrot.slane %v6352_v29, 4  ;;  %v6363_v44 = vshll.u32 %v15986_v1, 16 }
 0x39f   : > { %6168 = vst.msk [vmem:[#allocation3 + $0x88] sm:$0xf] %vm5568_vm7, %v5958_v12  ;;  %6171 = vst [vmem:[#allocation3 + $0x8c] sm:$0x1] %v6170_v5  ;;  %v6369_v41 = vshll.u32 %v15997_v38, 16  ;;  %v6373_v25 = vshrl.u32 %v15997_v38, 16  ;;  %12836 = vmatprep.subr.bf16.mxu1 %v15991_v13  ;;  %v5496_v3 = vadd.f32 %v15821_v6, %v15916_v60  ;;  %v5499_v53 = vadd.f32 %v15918_v39, %v15821_v6 }
 0x3a0   : > { %v6357_v30 = vrot.slane %v6355_v23, 5  ;;  %v6362_v7 = vrot.slane %v6360_v48, 4  ;;  %v6379_v28 = vshll.u32 %v6251_v16, 16  ;;  %v6365_v8 = vrot.slane %v6363_v44, 5  ;;  %v6179_v12 = vld [vmem:[#allocation3 + $0x9c] sm:$0xf] }
 0x3a1   : > { %v6371_v27 = vrot.slane %v6369_v41, 5  ;;  %v6375_v43 = vrot.slane %v6373_v25, 4  ;;  %v5530_v50 = vmul.f32 0.2, %v5498_v46  ;;  %v5528_v9 = vmul.f32 0.2, %v5496_v3 }
 0x3a2   : > { %v6358_v33 = vsel %vm14073_vm13, %v6353_v31, %v6357_v30  ;;  %v6381_v63 = vrot.slane %v6379_v28, 5  ;;  %v6366_v55 = vor.u32 %v6365_v8, %v6362_v7  ;;  %v5531_v47 = vmul.f32 0.2, %v5499_v53  ;;  %v6252_v48 = vld [vmem:[#allocation3 + $0x44] sm:$0x1] }
 0x3a3   : > { %v11676_v34 = vcombine.low %v6348_v61, %v6358_v33  ;;  %v6376_v59 = vor.u32 %v6375_v43, %v6371_v27  ;;  %v5562_v51 = vmax.f32 %v5498_v46, %v5530_v50  ;;  %v5497_v35 = vadd.f32 %v15821_v6, %v15926_v17  ;;  %v16035_v17 = vld [vmem:[#allocation3 + $0x40] sm:$0xf]  ;;  %v6186_v61 = vld [vmem:[#allocation3 + $0xa8] sm:$0xf]  ;;  %v6190_v41 = vld [vmem:[#allocation3 + $0xb0] sm:$0x1] }
 0x3a4   : > { %v6384_v60 = vshrl.u32 %v16020_v26, 16  ;;  %v6367_v20 = vrot.slane %v6366_v55, 4  ;;  %v5560_v10 = vmax.f32 %v5496_v3, %v5528_v9  ;;  %v6387_v18 = vshll.u32 %v16020_v26, 16  ;;  %v16040_v50 = vld [vmem:[#allocation3 + $0x48] sm:$0xf] }
 0x3a5   : > { %12769 = vmatmul.mubr.msk.bf16.gmra.mrb[4].mxu1 %vm6727_vm3, %v11676_v34  ;;  %v6377_v45 = vrot.slane %v6376_v59, 4  ;;  %v12110_v37 = vpack.c.bf16 %v5562_v51, %v5562_v51  ;;  %v5563_v39 = vmax.f32 %v5499_v53, %v5531_v47  ;;  %v5529_v22 = vmul.f32 0.2, %v5497_v35 }
 0x3a6   : > { %v6386_v56 = vrot.slane %v6384_v60, 4  ;;  %v6372_v14 = vsel %vm14073_vm13, %v6367_v20, %v6371_v27  ;;  %v12108_v6 = vpack.c.bf16 %v5560_v10, %v5560_v10  ;;  %v6389_v15 = vrot.slane %v6387_v18, 5  ;;  %v16048_v60 = vld [vmem:[#allocation3 + $0x4c] sm:$0xf]  ;;  %v6183_v10 = vld [vmem:[#allocation3 + $0xa4] sm:$0x1] }
 0x3a7   : > { %v6382_v21 = vsel %vm14073_vm13, %v6377_v45, %v6381_v63  ;;  %v5995_v2 = vshrl.u32 %v12110_v37, 16  ;;  %v5998_v36 = vshll.u32 %v12110_v37, 16  ;;  %v12111_v54 = vpack.c.bf16 %v5563_v39, %v5563_v39  ;;  %v16054_v18 = vld [vmem:[#allocation3 + $0x50] sm:$0x1] }
 0x3a8   : > { %v11677_v32 = vcombine.low %v6372_v14, %v6382_v21  ;;  %v5978_v0 = vshrl.u32 %v12108_v6, 16  ;;  %v5981_v4 = vshll.u32 %v12108_v6, 16  ;;  %v5561_v52 = vmax.f32 %v5497_v35, %v5529_v22 }
 0x3a9   : > { %v6390_v29 = vor.u32 %v6389_v15, %v6386_v56  ;;  %v5997_v16 = vrot.slane %v5995_v2, 7  ;;  %v6003_v5 = vshrl.u32 %v12111_v54, 16  ;;  %v6006_v23 = vshll.u32 %v12111_v54, 16 }
 0x3aa   : > { %12772 = vmatprep.mubr.msk.bf16.mxu1 %vm6727_vm3, %v11677_v32  ;;  %v6393_v31 = vshll.u32 %v16035_v17, 16  ;;  %v5980_v44 = vrot.slane %v5978_v0, 7  ;;  %v12109_v25 = vpack.c.bf16 %v5561_v52, %v5561_v52  ;;  %v6397_v7 = vshrl.u32 %v16035_v17, 16 }
 0x3ab   : > { %v6391_v30 = vrot.slane %v6390_v29, 4  ;;  %v6000_v28 = vor.u32 %v5998_v36, %v5997_v16  ;;  %v6001_v46 = vrot.slane %v5997_v16, 4  ;;  %v6005_v8 = vrot.slane %v6003_v5, 7  ;;  %v13823_v16 = vld [vmem:[%s17759_s2] ss:$0 sm:$0xff] }
 0x3ac   : > { %v6395_v27 = vrot.slane %v6393_v31, 5  ;;  %v5983_v43 = vor.u32 %v5981_v4, %v5980_v44  ;;  %v5984_v3 = vrot.slane %v5980_v44, 4  ;;  %v5986_v33 = vshrl.u32 %v12109_v25, 16  ;;  %v16071_v5 = vld [vmem:[#allocation3 + $0x54] sm:$0xf] }
 0x3ad   : > { %v5989_v63 = vshll.u32 %v12109_v25, 16  ;;  %v6187_v53 = vsel %vm15831_vm6, %v6000_v28, %v6186_v61  ;;  %v6008_v34 = vor.u32 %v6006_v23, %v6005_v8  ;;  %v6010_v55 = vrot.slane %v6005_v8, 4  ;;  %v16077_v28 = vld [vmem:[#allocation3 + $0x58] sm:$0xf] }
 0x3ae   : > { %v6396_v59 = vsel %vm14073_vm13, %v6391_v30, %v6395_v27  ;;  %6188 = vst [vmem:[#allocation3 + $0xa8] sm:$0xf] %v6187_v53  ;;  %v6180_v9 = vsel %vm15831_vm6, %v5983_v43, %v6179_v12  ;;  %v5988_v51 = vrot.slane %v5986_v33, 7  ;;  %v6399_v47 = vrot.slane %v6397_v7, 4 }
 0x3af   : > { %v6403_v35 = vshll.u32 %v6252_v48, 16  ;;  %6181 = vst [vmem:[#allocation3 + $0x9c] sm:$0xf] %v6180_v9  ;;  %v6009_v20 = vsel %vm14079_vm14, %v6001_v46, %v6008_v34  ;;  %v6191_v45 = vsel %vm15720_vm1, %v6010_v55, %v6190_v41  ;;  %v6408_v37 = vshrl.u32 %v16040_v50, 16 }
 0x3b0   : > { %v6411_v39 = vshll.u32 %v16040_v50, 16  ;;  %6189 = vst.msk [vmem:[#allocation3 + $0xac] sm:$0xf] %vm5568_vm7, %v6009_v20  ;;  %6192 = vst [vmem:[#allocation3 + $0xb0] sm:$0x1] %v6191_v45  ;;  %v5991_v22 = vor.u32 %v5989_v63, %v5988_v51  ;;  %v5993_v56 = vrot.slane %v5988_v51, 4  ;;  %v6400_v14 = vor.u32 %v6399_v47, %v6395_v27 }
 0x3b1   : > { %v6405_v21 = vrot.slane %v6403_v35, 5  ;;  %v6410_v6 = vrot.slane %v6408_v37, 4  ;;  %v6417_v32 = vshll.u32 %v16048_v60, 16  ;;  %v6421_v2 = vshrl.u32 %v16048_v60, 16  ;;  %v16088_v45 = vld [vmem:[#allocation3 + $0x5c] sm:$0x1] }
 0x3b2   : > { %v6413_v15 = vrot.slane %v6411_v39, 5  ;;  %v5992_v36 = vsel %vm14079_vm14, %v5984_v3, %v5991_v22  ;;  %v6184_v54 = vsel %vm15720_vm1, %v5993_v56, %v6183_v10  ;;  %v6401_v61 = vrot.slane %v6400_v14, 4  ;;  %v16090_v10 = vld [vmem:[#allocation3 + $0x60] sm:$0xf] }
 0x3b3   : > { %v6427_v0 = vshll.u32 %v16054_v18, 16  ;;  %6182 = vst.msk [vmem:[#allocation3 + $0xa0] sm:$0xf] %vm5568_vm7, %v5992_v36  ;;  %6185 = vst [vmem:[#allocation3 + $0xa4] sm:$0x1] %v6184_v54  ;;  %v6419_v52 = vrot.slane %v6417_v32, 5  ;;  %v5502_v12 = vadd.f32 %v13823_v16, %v15939_v19  ;;  %v5500_v31 = vadd.f32 %v13823_v16, %v15942_v24 }
 0x3b4   : > { %v6414_v4 = vor.u32 %v6413_v15, %v6410_v6  ;;  %v6423_v29 = vrot.slane %v6421_v2, 4  ;;  %v6406_v23 = vsel %vm14073_vm13, %v6401_v61, %v6405_v21  ;;  %v5503_v44 = vadd.f32 %v13823_v16, %v15944_v58  ;;  %v6200_v14 = vld [vmem:[#allocation3 + $0xc0] sm:$0xf] }
 0x3b5   : > { %v6429_v48 = vrot.slane %v6427_v0, 5  ;;  %v11678_v41 = vcombine.low %v6396_v59, %v6406_v23  ;;  %v5534_v7 = vmul.f32 0.2, %v5502_v12  ;;  %v5532_v46 = vmul.f32 0.2, %v5500_v31 }
 0x3b6   : > { %v6415_v25 = vrot.slane %v6414_v4, 4  ;;  %v6424_v30 = vor.u32 %v6423_v29, %v6419_v52  ;;  %v5535_v8 = vmul.f32 0.2, %v5503_v44  ;;  %v5501_v19 = vadd.f32 %v13823_v16, %v15946_v42  ;;  %v6193_v4 = vld [vmem:[#allocation3 + $0xb4] sm:$0xf] }
 0x3b7   : > { %v6432_v27 = vshrl.u32 %v16071_v5, 16  ;;  %12773 = vmatmul.mubr.msk.bf16.gmra.mrb[8].mxu1 %vm6727_vm3, %v11678_v41  ;;  %v5566_v3 = vmax.f32 %v5502_v12, %v5534_v7  ;;  %v6435_v58 = vshll.u32 %v16071_v5, 16  ;;  %v5564_v33 = vmax.f32 %v5500_v31, %v5532_v46 }
 0x3b8   : > { %v6420_v43 = vsel %vm14073_vm13, %v6415_v25, %v6419_v52  ;;  %v6425_v24 = vrot.slane %v6424_v30, 4  ;;  %v5567_v63 = vmax.f32 %v5503_v44, %v5535_v8  ;;  %v5533_v53 = vmul.f32 0.2, %v5501_v19 }
 0x3b9   : > { %v6434_v34 = vrot.slane %v6432_v27, 4  ;;  %v12114_v59 = vpack.c.bf16 %v5566_v3, %v5566_v3  ;;  %v6437_v42 = vrot.slane %v6435_v58, 5  ;;  %v6441_v9 = vshll.u32 %v16077_v28, 16 }
 0x3ba   : > { %v6430_v55 = vsel %vm14073_vm13, %v6425_v24, %v6429_v48  ;;  %v12112_v47 = vpack.c.bf16 %v5564_v33, %v5564_v33  ;;  %v12115_v35 = vpack.c.bf16 %v5567_v63, %v5567_v63  ;;  %v5565_v20 = vmax.f32 %v5501_v19, %v5533_v53  ;;  %v6204_v48 = vld [vmem:[#allocation3 + $0xc8] sm:$0x1]  ;;  %v6197_v63 = vld [vmem:[#allocation3 + $0xbc] sm:$0x1] }
 0x3bb   : > { %v11679_v51 = vcombine.low %v6420_v43, %v6430_v55  ;;  %v6029_v37 = vshrl.u32 %v12114_v59, 16  ;;  %v6032_v39 = vshll.u32 %v12114_v59, 16  ;;  %v6438_v22 = vor.u32 %v6437_v42, %v6434_v34  ;;  %v16103_v43 = vld [vmem:[#allocation3 + $0x64] sm:$0xf]  ;;  %v16105_v24 = vld [vmem:[#allocation3 + $0x68] sm:$0x1] }
 0x3bc   : > { %v16092_v56 = vrot.slane %v6441_v9, 5  ;;  %v6012_v21 = vshrl.u32 %v12112_v47, 16  ;;  %v6015_v6 = vshll.u32 %v12112_v47, 16  ;;  %v6037_v15 = vshrl.u32 %v12115_v35, 16  ;;  %v16113_v34 = vld [vmem:[#allocation3 + $0x6c] sm:$0xf] }
 0x3bd   : > { %12776 = vmatprep.mubr.msk.bf16.mxu1 %vm6727_vm3, %v11679_v51  ;;  %v6040_v32 = vshll.u32 %v12115_v35, 16  ;;  %v6031_v2 = vrot.slane %v6029_v37, 7  ;;  %v12113_v36 = vpack.c.bf16 %v5565_v20, %v5565_v20  ;;  %v6439_v54 = vrot.slane %v6438_v22, 4  ;;  %v16117_v9 = vld [vmem:[#allocation3 + $0x70] sm:$0xf] }
 0x3be   : > { %v6445_v61 = vshrl.u32 %v16077_v28, 16  ;;  %v6014_v0 = vrot.slane %v6012_v21, 7  ;;  %v6039_v52 = vrot.slane %v6037_v15, 7  ;;  %v6451_v29 = vshll.u32 %v16088_v45, 16  ;;  %v16123_v37 = vld [vmem:[#allocation3 + $0x78] sm:$0xf] }
 0x3bf   : > { %v6456_v16 = vshrl.u32 %v16090_v10, 16  ;;  %v6034_v12 = vor.u32 %v6032_v39, %v6031_v2  ;;  %v6035_v23 = vrot.slane %v6031_v2, 4  ;;  %v6020_v31 = vshrl.u32 %v12113_v36, 16 }
 0x3c0   : > { %v6023_v44 = vshll.u32 %v12113_v36, 16  ;;  %v6017_v41 = vor.u32 %v6015_v6, %v6014_v0  ;;  %v6018_v25 = vrot.slane %v6014_v0, 4  ;;  %v6042_v30 = vor.u32 %v6040_v32, %v6039_v52  ;;  %v16133_v36 = vld [vmem:[#allocation3 + $0x7c] sm:$0xf] }
 0x3c1   : > { %v6044_v7 = vrot.slane %v6039_v52, 4  ;;  %v6201_v46 = vsel %vm15831_vm6, %v6034_v12, %v6200_v14  ;;  %v6022_v8 = vrot.slane %v6020_v31, 7  ;;  %v6444_v19 = vsel %vm14073_vm13, %v6439_v54, %v16092_v56  ;;  %v16129_v14 = vld [vmem:[#allocation3 + $0x74] sm:$0x1] }
 0x3c2   : > { %v6447_v27 = vrot.slane %v6445_v61, 4  ;;  %6202 = vst [vmem:[#allocation3 + $0xc0] sm:$0xf] %v6201_v46  ;;  %v6194_v3 = vsel %vm15831_vm6, %v6017_v41, %v6193_v4  ;;  %v6043_v58 = vsel %vm14079_vm14, %v6035_v23, %v6042_v30  ;;  %v6453_v53 = vrot.slane %v6451_v29, 5 }
 0x3c3   : > { %v6205_v33 = vsel %vm15720_vm1, %v6044_v7, %v6204_v48  ;;  %6195 = vst [vmem:[#allocation3 + $0xb4] sm:$0xf] %v6194_v3  ;;  %6203 = vst.msk [vmem:[#allocation3 + $0xc4] sm:$0xf] %vm5568_vm7, %v6043_v58  ;;  %v6025_v55 = vor.u32 %v6023_v44, %v6022_v8  ;;  %v6027_v59 = vrot.slane %v6022_v8, 4  ;;  %v6458_v57 = vrot.slane %v6456_v16, 4 }
 0x3c4   : > { %6206 = vst [vmem:[#allocation3 + $0xc8] sm:$0x1] %v6205_v33  ;;  %v6448_v42 = vor.u32 %v6447_v27, %v16092_v56  ;;  %v6459_v51 = vshll.u32 %v16090_v10, 16  ;;  %v6465_v47 = vshll.u32 %v16103_v43, 16  ;;  %v6469_v35 = vshrl.u32 %v16103_v43, 16 }
 0x3c5   : > { %v6475_v20 = vshll.u32 %v16105_v24, 16  ;;  %v6026_v39 = vsel %vm14079_vm14, %v6018_v25, %v6025_v55  ;;  %v6198_v22 = vsel %vm15720_vm1, %v6027_v59, %v6197_v63  ;;  %v6480_v21 = vshrl.u32 %v16113_v34, 16  ;;  %v16141_v48 = vld [vmem:[#allocation3 + $0x80] sm:$0x1]  ;;  %v16146_v7 = vld [vmem:[#allocation3 + $0x84] sm:$0xf] }
 0x3c6   : > { %v6449_v56 = vrot.slane %v6448_v42, 4  ;;  %6196 = vst.msk [vmem:[#allocation3 + $0xb8] sm:$0xf] %vm5568_vm7, %v6026_v39  ;;  %6199 = vst [vmem:[#allocation3 + $0xbc] sm:$0x1] %v6198_v22  ;;  %v6461_v6 = vrot.slane %v6459_v51, 5 }
 0x3c7   : > { %v6467_v15 = vrot.slane %v6465_v47, 5  ;;  %v6471_v32 = vrot.slane %v6469_v35, 4  ;;  %v6477_v2 = vrot.slane %v6475_v20, 5  ;;  %v6482_v54 = vrot.slane %v6480_v21, 4  ;;  %v16149_v3 = vld [vmem:[#allocation3 + $0x88] sm:$0xf] }
 0x3c8   : > { %v6454_v40 = vsel %vm14073_vm13, %v6449_v56, %v6453_v53  ;;  %v6483_v62 = vshll.u32 %v16113_v34, 16  ;;  %v6489_v61 = vshll.u32 %v16117_v9, 16  ;;  %v6462_v4 = vor.u32 %v6461_v6, %v6458_v57  ;;  %v16156_v51 = vld [vmem:[#allocation3 + $0x90] sm:$0xf]  ;;  %v16159_v39 = vld [vmem:[#allocation3 + $0x8c] sm:$0x1] }
 0x3c9   : > { %v11680_v0 = vcombine.low %v6444_v19, %v6454_v40  ;;  %v6472_v52 = vor.u32 %v6471_v32, %v6467_v15  ;;  %v6493_v29 = vshrl.u32 %v16117_v9, 16  ;;  %v6499_v23 = vshll.u32 %v16129_v14, 16 }
 0x3ca   : > { %v6485_v16 = vrot.slane %v6483_v62, 5  ;;  %v6491_v12 = vrot.slane %v6489_v61, 5  ;;  %v6504_v31 = vshrl.u32 %v16123_v37, 16  ;;  %v6463_v44 = vrot.slane %v6462_v4, 4  ;;  %v16169_v62 = vld [vmem:[#allocation3 + $0x94] sm:$0xf] }
 0x3cb   : > { %12777 = vmatmul.mubr.msk.bf16.gmra.mrb[12].mxu1 %vm6727_vm3, %v11680_v0  ;;  %v6473_v41 = vrot.slane %v6472_v52, 4  ;;  %v6495_v25 = vrot.slane %v6493_v29, 4  ;;  %v6507_v30 = vshll.u32 %v16123_v37, 16  ;;  %v6501_v8 = vrot.slane %v6499_v23, 5 }
 0x3cc   : > { %v6486_v46 = vor.u32 %v6485_v16, %v6482_v54  ;;  %v6506_v19 = vrot.slane %v6504_v31, 4  ;;  %v6513_v27 = vshll.u32 %v16133_v36, 16  ;;  %v6468_v58 = vsel %vm14073_vm13, %v6463_v44, %v6467_v15 }
 0x3cd   : > { %v6478_v33 = vsel %vm14073_vm13, %v6473_v41, %v6477_v2  ;;  %v6496_v63 = vor.u32 %v6495_v25, %v6491_v12  ;;  %v6509_v53 = vrot.slane %v6507_v30, 5  ;;  %v6517_v57 = vshrl.u32 %v16133_v36, 16  ;;  %v16177_v41 = vld [vmem:[#allocation3 + $0x98] sm:$0x1] }
 0x3ce   : > { %v11681_v55 = vcombine.low %v6468_v58, %v6478_v33  ;;  %v6487_v59 = vrot.slane %v6486_v46, 4  ;;  %v6515_v42 = vrot.slane %v6513_v27, 5  ;;  %v6523_v20 = vshll.u32 %v16141_v48, 16  ;;  %v16182_v58 = vld [vmem:[#allocation3 + $0x9c] sm:$0xf] }
 0x3cf   : > { %v6497_v47 = vrot.slane %v6496_v63, 4  ;;  %v6510_v35 = vor.u32 %v6509_v53, %v6506_v19  ;;  %v6528_v22 = vshrl.u32 %v16146_v7, 16  ;;  %v6519_v21 = vrot.slane %v6517_v57, 4 }
 0x3d0   : > { %12780 = vmatprep.mubr.msk.bf16.mxu1 %vm6727_vm3, %v11681_v55  ;;  %v6492_v56 = vsel %vm14073_vm13, %v6487_v59, %v6491_v12  ;;  %v6531_v6 = vshll.u32 %v16146_v7, 16  ;;  %v6537_v15 = vshll.u32 %v16149_v3, 16  ;;  %v6525_v40 = vrot.slane %v6523_v20, 5  ;;  %v16186_v59 = vld [vmem:[#allocation3 + $0xa0] sm:$0xf] }
 0x3d1   : > { %v6502_v32 = vsel %vm14073_vm13, %v6497_v47, %v6501_v8  ;;  %v6511_v2 = vrot.slane %v6510_v35, 4  ;;  %v6530_v54 = vrot.slane %v6528_v22, 4  ;;  %v6520_v0 = vor.u32 %v6519_v21, %v6515_v42 }
 0x3d2   : > { %v11682_v61 = vcombine.low %v6492_v56, %v6502_v32  ;;  %v6533_v4 = vrot.slane %v6531_v6, 5  ;;  %v6539_v52 = vrot.slane %v6537_v15, 5  ;;  %v6541_v16 = vshrl.u32 %v16149_v3, 16  ;;  %v16191_v56 = vld [vmem:[#allocation3 + $0xa4] sm:$0x1] }
 0x3d3   : > { %v6516_v29 = vsel %vm14073_vm13, %v6511_v2, %v6515_v42  ;;  %v6547_v12 = vshll.u32 %v16159_v39, 16  ;;  %v6552_v23 = vshrl.u32 %v16156_v51, 16  ;;  %v6521_v31 = vrot.slane %v6520_v0, 4 }
 0x3d4   : > { %12781 = vmatmul.mubr.msk.bf16.gmra.mrb[16].mxu1 %vm6727_vm3, %v11682_v61  ;;  %v6534_v44 = vor.u32 %v6533_v4, %v6530_v54  ;;  %v6555_v25 = vshll.u32 %v16156_v51, 16  ;;  %v6561_v30 = vshll.u32 %v16169_v62, 16  ;;  %v6543_v46 = vrot.slane %v6541_v16, 4  ;;  %v16197_v54 = vld [vmem:[#allocation3 + $0xa8] sm:$0xf] }
 0x3d5   : > { %v6549_v8 = vrot.slane %v6547_v12, 5  ;;  %v6554_v19 = vrot.slane %v6552_v23, 4  ;;  %v6565_v27 = vshrl.u32 %v16169_v62, 16  ;;  %v6526_v33 = vsel %vm14073_vm13, %v6521_v31, %v6525_v40 }
 0x3d6   : > { %v6535_v63 = vrot.slane %v6534_v44, 4  ;;  %v6557_v53 = vrot.slane %v6555_v25, 5  ;;  %v6563_v55 = vrot.slane %v6561_v30, 5  ;;  %v11683_v42 = vcombine.low %v6516_v29, %v6526_v33  ;;  %v16200_v29 = vld [vmem:[#allocation3 + $0xac] sm:$0xf] }
 0x3d7   : > { %v6544_v57 = vor.u32 %v6543_v46, %v6539_v52  ;;  %v6567_v47 = vrot.slane %v6565_v27, 4  ;;  %v6571_v35 = vshll.u32 %v16177_v41, 16  ;;  %v6576_v21 = vshrl.u32 %v16182_v58, 16  ;;  %v16205_v44 = vld [vmem:[#allocation3 + $0xb0] sm:$0x1] }
 0x3d8   : > { %v6540_v20 = vsel %vm14073_vm13, %v6535_v63, %v6539_v52  ;;  %v6558_v22 = vor.u32 %v6557_v53, %v6554_v19  ;;  %v6579_v6 = vshll.u32 %v16182_v58, 16  ;;  %12784 = vmatprep.mubr.msk.bf16.mxu1 %vm6727_vm3, %v11683_v42  ;;  %v6585_v40 = vshll.u32 %v16186_v59, 16 }
 0x3d9   : > { %v6545_v15 = vrot.slane %v6544_v57, 4  ;;  %v6568_v32 = vor.u32 %v6567_v47, %v6563_v55  ;;  %v6573_v2 = vrot.slane %v6571_v35, 5  ;;  %v6578_v0 = vrot.slane %v6576_v21, 4  ;;  %v16218_v21 = vld [vmem:[#allocation3 + $0xb8] sm:$0xf] }
 0x3da   : > { %v6559_v61 = vrot.slane %v6558_v22, 4  ;;  %v6581_v4 = vrot.slane %v6579_v6, 5  ;;  %v6589_v52 = vshrl.u32 %v16186_v59, 16  ;;  %v6587_v23 = vrot.slane %v6585_v40, 5 }
 0x3db   : > { %v6550_v16 = vsel %vm14073_vm13, %v6545_v15, %v6549_v8  ;;  %v6569_v12 = vrot.slane %v6568_v32, 4  ;;  %v6595_v31 = vshll.u32 %v16191_v56, 16  ;;  %v6600_v33 = vshrl.u32 %v16197_v54, 16  ;;  %v16213_v8 = vld [vmem:[#allocation3 + $0xb4] sm:$0xf] }
 0x3dc   : > { %v11684_v25 = vcombine.low %v6540_v20, %v6550_v16  ;;  %v6582_v30 = vor.u32 %v6581_v4, %v6578_v0  ;;  %v6591_v46 = vrot.slane %v6589_v52, 4  ;;  %v6564_v19 = vsel %vm14073_vm13, %v6559_v61, %v6563_v55  ;;  %v16225_v4 = vld [vmem:[#allocation3 + $0xbc] sm:$0x1] }
 0x3dd   : > { %v6574_v27 = vsel %vm14073_vm13, %v6569_v12, %v6573_v2  ;;  %v6603_v63 = vshll.u32 %v16197_v54, 16  ;;  %v6609_v47 = vshll.u32 %v16200_v29, 16  ;;  %v6597_v35 = vrot.slane %v6595_v31, 5 }
 0x3de   : > { %12785 = vmatmul.mubr.msk.bf16.gmra.mrb[20].mxu1 %vm6727_vm3, %v11684_v25  ;;  %v11685_v53 = vcombine.low %v6564_v19, %v6574_v27  ;;  %v6583_v42 = vrot.slane %v6582_v30, 4  ;;  %v6592_v57 = vor.u32 %v6591_v46, %v6587_v23  ;;  %v6602_v20 = vrot.slane %v6600_v33, 4 }
 0x3df   : > { %v6605_v22 = vrot.slane %v6603_v63, 5  ;;  %v6613_v55 = vshrl.u32 %v16200_v29, 16  ;;  %v6611_v15 = vrot.slane %v6609_v47, 5  ;;  %v6619_v32 = vshll.u32 %v16205_v44, 16 }
 0x3e0   : > { %12788 = vmatprep.mubr.msk.bf16.mxu1 %vm6727_vm3, %v11685_v53  ;;  %v6593_v6 = vrot.slane %v6592_v57, 4  ;;  %v6624_v2 = vshrl.u32 %v16213_v8, 16  ;;  %v6588_v40 = vsel %vm14073_vm13, %v6583_v42, %v6587_v23  ;;  %v6627_v52 = vshll.u32 %v16213_v8, 16 }
 0x3e1   : > { %v6606_v61 = vor.u32 %v6605_v22, %v6602_v20  ;;  %v6615_v0 = vrot.slane %v6613_v55, 4  ;;  %v6633_v31 = vshll.u32 %v16218_v21, 16  ;;  %v6637_v25 = vshrl.u32 %v16218_v21, 16 }
 0x3e2   : > { %v6598_v16 = vsel %vm14073_vm13, %v6593_v6, %v6597_v35  ;;  %v6626_v12 = vrot.slane %v6624_v2, 4  ;;  %v6629_v27 = vrot.slane %v6627_v52, 5  ;;  %v6643_v63 = vshll.u32 %v16225_v4, 16 }
 0x3e3   : > { %v11686_v30 = vcombine.low %v6588_v40, %v6598_v16  ;;  %v6607_v46 = vrot.slane %v6606_v61, 4  ;;  %v6616_v19 = vor.u32 %v6615_v0, %v6611_v15  ;;  %v6635_v33 = vrot.slane %v6633_v31, 5  ;;  %v7262_v16 = vld [vmem:[#allocation3 + $0x90] sm:$0xe] }
 0x3e4   : > { %v6639_v23 = vrot.slane %v6637_v25, 4  ;;  %v6621_v42 = vrot.slane %v6619_v32, 5  ;;  %v6630_v57 = vor.u32 %v6629_v27, %v6626_v12  ;;  %v6645_v2 = vrot.slane %v6643_v63, 5  ;;  %v16266_v63 = vld [vmem:[#allocation3 + $0x10] sm:$0xf] }
 0x3e5   : > { %v6617_v53 = vrot.slane %v6616_v19, 4  ;;  %v6612_v35 = vsel %vm14073_vm13, %v6607_v46, %v6611_v15  ;;  %v11716_v40 = vcombine.low %v16071_v5, %v16077_v28  ;;  %v11717_v61 = vcombine.low %v16090_v10, %v16103_v43  ;;  %v16257_v46 = vld [vmem:[#allocation3 + $0x4] sm:$0xf]  ;;  %v7263_v15 = vld [vmem:[#allocation3 + $0x9c] sm:$0xe] }
 0x3e6   : > { %12789 = vmatmul.mubr.msk.bf16.gmra.mrb[24].mxu1 %vm6727_vm3, %v11686_v30  ;;  %v6640_v47 = vor.u32 %v6639_v23, %v6635_v33  ;;  %v6631_v22 = vrot.slane %v6630_v57, 4  ;;  %v11718_v0 = vcombine.low %v16113_v34, %v16117_v9  ;;  %v13824_v30 = vld [vmem:[#allocation3] sm:$0xf]  ;;  %v13826_v23 = vld [vmem:[#allocation3 + $0xc] sm:$0xf]  ;;  %v7359_v31 = vrot.slane %v16105_v24, 5 }
 0x3e7   : > { %v6622_v20 = vsel %vm14073_vm13, %v6617_v53, %v6621_v42  ;;  %v11709_v19 = vcombine.low %v13824_v30, %v16257_v46  ;;  %v11710_v53 = vcombine.low %v13826_v23, %v16266_v63  ;;  %v13725_v42 = vld [vmem:[%s17760_s3 + $0x48] sm:$0xff]   ;;  %v11713_v23 = vcombine.low %v15986_v1, %v15997_v38  ;;  %v13832_v34 = vld [vmem:[#allocation3 + $0x8] sm:$0x1] }
 0x3e8   : > { %v11687_v55 = vcombine.low %v6612_v35, %v6622_v20  ;;  %v6641_v6 = vrot.slane %v6640_v47, 4  ;;  %v6636_v32 = vsel %vm14073_vm13, %v6631_v22, %v6635_v33  ;;  %v7257_v57 = vld [vmem:[#allocation3 + $0x54] sm:$0xe]  ;;  %v13828_v47 = vld [vmem:[#allocation3 + $0x18] sm:$0xf]  ;;  %v7349_v22 = vrot.slane %v16077_v28, 5 }
 0x3e9   : > { %v16272_v35 = vld [vmem:[#allocation3 + $0x1c] sm:$0xf]  ;;  %v7363_v38 = vrot.slane %v16117_v9, 5  ;;  %v17956_v5 = vcombine.low %v16146_v7, %v16149_v3  ;;  %v17957_v28 = vcombine.low %v16156_v51, %v16169_v62  ;;  %v7300_v10 = vrot.slane %v16257_v46, 5 }
 0x3ea   : > { %12792 = vmatprep.mubr.msk.bf16.mxu1 %vm6727_vm3, %v11687_v55  ;;  %v6646_v52 = vsel %vm14073_vm13, %v6641_v6, %v6645_v2  ;;  %v11711_v20 = vcombine.low %v13828_v47, %v16272_v35  ;;  %v7258_v55 = vld [vmem:[#allocation3 + $0x60] sm:$0xe]  ;;  %v7259_v6 = vld [vmem:[#allocation3 + $0x6c] sm:$0xe]  ;;  %v13830_v2 = vld [vmem:[#allocation3 + $0x24] sm:$0xf] }
 0x3eb   : > { %v11688_v25 = vcombine.low %v6636_v32, %v6646_v52  ;;  %v16279_v32 = vld [vmem:[#allocation3 + $0x28] sm:$0xf]  ;;  %v7351_v30 = vrot.slane %v7349_v22, 4  ;;  %v11753_v47 = vrot.slane %v7258_v55, 9  ;;  %v11754_v1 = vrot.slane %v7259_v6, 9 }
 0x3ec   : > { %v11712_v52 = vcombine.low %v13830_v2, %v16279_v32  ;;  %v7260_v2 = vld [vmem:[#allocation3 + $0x78] sm:$0xe]  ;;  %v7365_v6 = vrot.slane %v7363_v38, 4  ;;  %v7303_v9 = vrot.slane %v13832_v34, 5  ;;  %v7307_v51 = vrot.slane %v16266_v63, 5 }
 0x3ed   : > { %v11755_v24 = vrot.slane %v7260_v2, 9  ;;  %v7380_v2 = vrot.slane %v16159_v39, 5  ;;  %v16351_v39 = vld [vmem:[%s17760_s3 + $0x60] sm:$0xff]   ;;  %v7254_v34 = vld [vmem:[#allocation3 + $0x30] sm:$0xe] }
 0x3ee   : > { %12793 = vmatmul.mubr.msk.bf16.gmra.mrb[28].mxu1 %vm6727_vm3, %v11688_v25  ;;  %v11752_v25 = vrot.slane %v7257_v57, 9  ;;  %v7309_v46 = vrot.slane %v7307_v51, 4 }
 0x3ef   : > { %12804 = vmatprep.mubr.msk.bf16.mxu1 %vm6727_vm3, %v11709_v19  ;;  %v7352_v19 = vrot.slane %v16088_v45, 5 }
 0x3f0   : > { %v16293_v57 = vsel %vm14509_vm8, %v11752_v25, %v7349_v22  ;;  %v7261_v22 = vld [vmem:[#allocation3 + $0x84] sm:$0xe]  ;;  %v16309_v25 = vsel %vm14509_vm8, %v11754_v1, %v7363_v38  ;;  %v7377_v1 = vrot.slane %v16149_v3, 5  ;;  %v7394_v38 = vrot.slane %v16191_v56, 5 }
 0x3f1   : > { %v16297_v45 = vsel %vm14509_vm8, %v7351_v30, %v7352_v19  ;;  %v7366_v30 = vrot.slane %v16129_v14, 5  ;;  %v7370_v19 = vrot.slane %v16133_v36, 5  ;;  %v11756_v12 = vrot.slane %v7261_v22, 9 }
 0x3f2   : > { %v7384_v22 = vrot.slane %v16169_v62, 5  ;;  %v7314_v62 = vrot.slane %v16272_v35, 5  ;;  %v7321_v35 = vrot.slane %v16279_v32, 5  ;;  %v7253_v32 = vld [vmem:[#allocation3 + $0x24] sm:$0xe] }
 0x3f3   : > { %v16326_v14 = vsel %vm14509_vm8, %v7365_v6, %v7366_v30  ;;  %v7372_v33 = vrot.slane %v7370_v19, 4  ;;  %v16337_v6 = vsel %vm14509_vm8, %v11755_v24, %v7370_v19  ;;  %v7391_v30 = vrot.slane %v16186_v59, 5 }
 0x3f4   : > { %v7386_v24 = vrot.slane %v7384_v22, 4 }
 0x3f6   : > { %12805 = vmatmul.mubr.msk.bf16.vlgmr.msra.gmra.mrb[0].mxu1 %vm6727_vm3, %v11710_v53  ;;  %v11714_v53 = vcombine.low %v16020_v26, %v16035_v17 }
 0x3f7   : > { %12837 = vmatpush3.bf16.msra.mxu1 %v15991_v13  ;;  %12808 = vmatprep.mubr.msk.bf16.mxu1 %vm6727_vm3, %v11711_v20  ;;  %v13728_v13 = vld [vmem:[%s17760_s3 + $0x50] sm:$0xff]   ;;  %v7356_v20 = vrot.slane %v16103_v43, 5  ;;  %v7250_v43 = vld [vmem:[#allocation3] sm:$0xe] }
 0x3f8   : > { %12838 = vmatprep.subr.bf16.mxu1 %v13725_v42 }
 0x3f9   : > { %v16304_v55 = vsel %vm14509_vm8, %v11753_v47, %v7356_v20  ;;  %v7358_v27 = vrot.slane %v7356_v20, 4  ;;  %v13733_v47 = vld [vmem:[%s17760_s3 + $0x58] sm:$0xff]  }
 0x3fb   : > { %12839 = vmatpush3.bf16.msra.mxu1 %v13725_v42  ;;  %v16318_v20 = vsel %vm14509_vm8, %v7358_v27, %v7359_v31  ;;  %v7373_v42 = vrot.slane %v16141_v48, 5  ;;  %v11715_v31 = vcombine.low %v16040_v50, %v16048_v60  ;;  %v7379_v27 = vrot.slane %v7377_v1, 4 }
 0x3fc   : > { %12840 = vmatprep.subr.bf16.mxu1 %v13728_v13  ;;  %v16345_v50 = vsel %vm14509_vm8, %v11756_v12, %v7377_v1  ;;  %v7264_v12 = vld [vmem:[#allocation3 + $0xa8] sm:$0xe]  ;;  %v11758_v1 = vrot.slane %v7263_v15, 9  ;;  %v7405_v15 = vrot.slane %v16218_v21, 5 }
 0x3fe   : > { %12809 = vmatmul.mubr.msk.bf16.gmra.mrb[4].mxu1 %vm6727_vm3, %v11712_v52  ;;  %v16341_v52 = vsel %vm14509_vm8, %v7372_v33, %v7373_v42  ;;  %v11757_v33 = vrot.slane %v7262_v16, 9  ;;  %v7387_v42 = vrot.slane %v16177_v41, 5  ;;  %v7265_v16 = vld [vmem:[#allocation3 + $0xb4] sm:$0xe]  ;;  %v16375_v19 = vsel %vm14509_vm8, %v11758_v1, %v7391_v30 }
 0x3ff   : > { %12812 = vmatprep.mubr.msk.bf16.mxu1 %vm6727_vm3, %v11713_v23  ;;  %12841 = vmatpush3.bf16.msra.mxu1 %v13728_v13  ;;  %v16357_v13 = vsel %vm14509_vm8, %v7379_v27, %v7380_v2  ;;  %v7393_v23 = vrot.slane %v7391_v30, 4  ;;  %v7398_v27 = vrot.slane %v16200_v29, 5  ;;  %v11759_v41 = vrot.slane %v7264_v12, 9 }
 0x400   : > { %12842 = vmatprep.subr.bf16.mxu1 %v13733_v47  ;;  %v16365_v48 = vsel %vm14509_vm8, %v11757_v33, %v7384_v22  ;;  %v16371_v2 = vsel %vm14509_vm8, %v7386_v24, %v7387_v42  ;;  %v7401_v33 = vrot.slane %v16205_v44, 5  ;;  %v11760_v30 = vrot.slane %v7265_v16, 9  ;;  %v16656_v24 = vld [vmem:[#allocation3 + $0xac] sm:$0xf] }
 0x401   : > { %v16383_v22 = vsel %vm14509_vm8, %v7393_v23, %v7394_v38  ;;  %v7407_v42 = vrot.slane %v7405_v15, 4  ;;  %v7408_v12 = vrot.slane %v16225_v4, 5  ;;  %v16395_v1 = vsel %vm14509_vm8, %v11759_v41, %v7398_v27  ;;  %v7252_v23 = vld [vmem:[#allocation3 + $0x18] sm:$0xe] }
 0x402   : > { %v16406_v4 = vsel %vm14509_vm8, %v11760_v30, %v7405_v15  ;;  %v11747_v15 = vrot.slane %v7252_v23, 9 }
 0x403   : > { %12843 = vmatpush3.bf16.msra.mxu1 %v13733_v47  ;;  %v7400_v47 = vrot.slane %v7398_v27, 4  ;;  %v16410_v26 = vsel %vm14509_vm8, %v7407_v42, %v7408_v12  ;;  %v13834_v27 = vld [vmem:[#allocation3 + $0x20] sm:$0x1]  ;;  %v13738_v12 = vld [vmem:[%s17760_s3 + $0x68] sm:$0xff]  }
 0x404   : > { %12876 = vmatprep.subr.bf16.mxu1 %v16351_v39  ;;  %v7317_v16 = vrot.slane %v13834_v27, 5  ;;  %v7315_v42 = vsel %vm14509_vm8, %v11747_v15, %v7314_v62 }
 0x405   : > { %v16399_v38 = vsel %vm14509_vm8, %v7400_v47, %v7401_v33 }
 0x406   : > { %12813 = vmatmul.mubr.msk.bf16.gmra.mrb[8].mxu1 %vm6727_vm3, %v11714_v53  ;;  %v17955_v53 = vcombine.low %v16123_v37, %v16133_v36  ;;  %v17958_v37 = vcombine.low %v16182_v58, %v16186_v59  ;;  %v17959_v36 = vcombine.low %v16197_v54, %v16200_v29  ;;  %v17960_v58 = vcombine.low %v16213_v8, %v16218_v21  ;;  %v7251_v59 = vld [vmem:[#allocation3 + $0xc] sm:$0xe]  ;;  %v13833_v29 = vld [vmem:[#allocation3 + $0x14] sm:$0x1] }
 0x407   : > { %12816 = vmatprep.mubr.msk.bf16.mxu1 %vm6727_vm3, %v11715_v31  ;;  %v7316_v54 = vrot.slane %v7314_v62, 4  ;;  %v7310_v31 = vrot.slane %v13833_v29, 5  ;;  %v11746_v41 = vrot.slane %v7251_v59, 9  ;;  %v13835_v21 = vld [vmem:[#allocation3 + $0x34] sm:$0xf]  ;;  %v7342_v62 = vrot.slane %v16048_v60, 5 }
 0x408   : > { %v7328_v47 = vrot.slane %v13835_v21, 5  ;;  %v13740_v59 = vld [vmem:[%s17760_s3 + $0x78] sm:$0xff]  }
 0x409   : > { %v7311_v63 = vsel %vm14509_vm8, %v7309_v46, %v7310_v31  ;;  %v7318_v8 = vsel %vm14509_vm8, %v7316_v54, %v7317_v16  ;;  %v7308_v33 = vsel %vm14509_vm8, %v11746_v41, %v7307_v51  ;;  %v11749_v51 = vrot.slane %v7254_v34, 9  ;;  %v7255_v31 = vld [vmem:[#allocation3 + $0x3c] sm:$0xe]  ;;  %v13839_v60 = vld [vmem:[#allocation3 + $0x44] sm:$0x1] }
 0x40a   : > { %v11762_v30 = vcombine.low %v7308_v33, %v7311_v63  ;;  %v7344_v23 = vrot.slane %v7342_v62, 4  ;;  %v7338_v27 = vrot.slane %v13839_v60, 5  ;;  %v7256_v16 = vld [vmem:[#allocation3 + $0x48] sm:$0xe]  ;;  %v7345_v41 = vrot.slane %v16054_v18, 5 }
 0x40b   : > { %v16494_v63 = vld [vmem:[%s17760_s3 + $0x80] sm:$0xff]   ;;  %v17961_v34 = vcombine.low %v16293_v57, %v16297_v45  ;;  %v16532_v57 = vld [vmem:[#allocation3 + $0x50] sm:$0x1] }
 0x40c   : > { %v7346_v21 = vsel %vm14509_vm8, %v7344_v23, %v7345_v41  ;;  %v8875_v41 = vld [vmem:[#allocation3 + $0x54] sm:$0xe] }
 0x40e   : > { %12817 = vmatmul.mubr.msk.bf16.gmra.mrb[12].mxu1 %vm6727_vm3, %v11716_v40  ;;  %v11745_v40 = vrot.slane %v7250_v43, 9 }
 0x40f   : > { %12820 = vmatprep.mubr.msk.bf16.mxu1 %vm6727_vm3, %v11717_v61  ;;  %v7302_v61 = vrot.slane %v7300_v10, 4 }
 0x410   : > { %v7301_v7 = vsel %vm14509_vm8, %v11745_v40, %v7300_v10  ;;  %v13836_v10 = vld [vmem:[#allocation3 + $0x2c] sm:$0x1] }
 0x411   : > { %v7304_v3 = vsel %vm14509_vm8, %v7302_v61, %v7303_v9  ;;  %v7324_v43 = vrot.slane %v13836_v10, 5  ;;  %v13837_v9 = vld [vmem:[#allocation3 + $0x38] sm:$0x1]  ;;  %v16515_v10 = vld [vmem:[#allocation3 + $0x40] sm:$0xf] }
 0x412   : > { %v7331_v40 = vrot.slane %v13837_v9, 5  ;;  %v13739_v61 = vld [vmem:[%s17760_s3 + $0x70] sm:$0xff]   ;;  %v16522_v9 = vld [vmem:[#allocation3 + $0x4c] sm:$0xf] }
 0x416   : > { %12821 = vmatmul.mubr.msk.bf16.gmra.mrb[16].mxu1 %vm6727_vm3, %v11718_v0  ;;  %v11761_v0 = vcombine.low %v7301_v7, %v7304_v3  ;;  %v13838_v7 = vld [vmem:[#allocation3 + $0x40] sm:$0xf] }
 0x417   : > { %12824 = vmatprep.mubr.msk.bf16.mxu1 %vm6727_vm3, %v17955_v53  ;;  %v11763_v53 = vcombine.low %v7315_v42, %v7318_v8  ;;  %v7335_v3 = vrot.slane %v13838_v7, 5  ;;  %v11751_v8 = vrot.slane %v7256_v16, 9  ;;  %v16507_v42 = vld [vmem:[#allocation3 + $0x28] sm:$0xf]  ;;  %v8970_v16 = vrot.slane %v16522_v9, 5 }
 0x419   : > { %v7337_v29 = vrot.slane %v7335_v3, 4  ;;  %v7343_v18 = vsel %vm14509_vm8, %v11751_v8, %v7342_v62  ;;  %v16530_v62 = vld [vmem:[#allocation3 + $0x44] sm:$0x1] }
 0x41b   : > { %v7339_v15 = vsel %vm14509_vm8, %v7337_v29, %v7338_v27  ;;  %v8963_v29 = vrot.slane %v16515_v10, 5 }
 0x41e   : > { %12825 = vmatmul.mubr.msk.bf16.gmra.mrb[20].mxu1 %vm6727_vm3, %v17956_v5  ;;  %v7323_v5 = vrot.slane %v7321_v35, 4 }
 0x41f   : > { %12828 = vmatprep.mubr.msk.bf16.mxu1 %vm6727_vm3, %v17957_v28  ;;  %v7330_v28 = vrot.slane %v7328_v47, 4 }
 0x426   : > { %12829 = vmatmul.mubr.msk.bf16.gmra.mrb[24].mxu1 %vm6727_vm3, %v17958_v37  ;;  %v11748_v37 = vrot.slane %v7253_v32, 9  ;;  %v8872_v32 = vld [vmem:[#allocation3 + $0x30] sm:$0xe] }
 0x427   : > { %12832 = vmatprep.mubr.msk.bf16.mxu1 %vm6727_vm3, %v17959_v36  ;;  %v7325_v36 = vsel %vm14509_vm8, %v7323_v5, %v7324_v43  ;;  %v16511_v5 = vld [vmem:[#allocation3 + $0x2c] sm:$0x1]  ;;  %v8949_v43 = vrot.slane %v16507_v42, 5 }
 0x429   : > { %v8951_v7 = vrot.slane %v8949_v43, 4 }
 0x42e   : > { %12833 = vmatmul.mubr.msk.bf16.gmra.mrb[28].mxu1 %vm6727_vm3, %v17960_v58  ;;  %v7329_v58 = vsel %vm14509_vm8, %v11749_v51, %v7328_v47  ;;  %v11872_v51 = vrot.slane %v8872_v32, 9  ;;  %v8973_v32 = vrot.slane %v16532_v57, 5 }
 0x42f   : > { %12844 = vmatprep.mubr.msk.bf16.mxu1 %vm6727_vm3, %v11761_v0  ;;  %v7322_v0 = vsel %vm14509_vm8, %v11748_v37, %v7321_v35  ;;  %v11750_v35 = vrot.slane %v7255_v31, 9  ;;  %v8873_v37 = vld [vmem:[#allocation3 + $0x3c] sm:$0xe]  ;;  %v16552_v31 = vld [vmem:[#allocation3 + $0x64] sm:$0xf] }
 0x430   : > { %v11764_v46 = vcombine.low %v7322_v0, %v7325_v36  ;;  %v17962_v36 = vcombine.low %v16304_v55, %v16318_v20  ;;  %v16541_v55 = vld [vmem:[#allocation3 + $0x5c] sm:$0x1] }
 0x431   : > { %v7336_v47 = vsel %vm14509_vm8, %v11750_v35, %v7335_v3  ;;  %v8952_v3 = vrot.slane %v16511_v5, 5  ;;  %v16561_v35 = vld [vmem:[#allocation3 + $0x68] sm:$0x1] }
 0x432   : > { %v11766_v33 = vcombine.low %v7336_v47, %v7339_v15  ;;  %v8966_v47 = vrot.slane %v16530_v62, 5  ;;  %v16640_v15 = vld [vmem:[#allocation3 + $0xa0] sm:$0xf] }
 0x433   : > { %v16545_v20 = vsel %vm14509_vm8, %v8951_v7, %v8952_v3  ;;  %v17970_v7 = vcombine.low %v16309_v25, %v16326_v14  ;;  %v16588_v3 = vld [vmem:[#allocation3 + $0x7c] sm:$0xf]  ;;  %v16600_v25 = vld [vmem:[#allocation3 + $0x74] sm:$0x1]  ;;  %v16602_v14 = vld [vmem:[#allocation3 + $0x80] sm:$0x1] }
 0x434   : > { %17964 = vst [vmem:[#allocation18_spill] sm:$0xff] %v16545_v20  ;;  %v13760_v20 = vld [vmem:[#allocation3 + $0xc0] sm:$0xff]  }
 0x436   : > { %12845 = vmatmul.mubr.msk.bf16.vlgmr.msra.gmra.mrb[0].mxu1 %vm6727_vm3, %v11762_v30  ;;  %v11767_v30 = vcombine.low %v7343_v18, %v7346_v21  ;;  %v8965_v21 = vrot.slane %v8963_v29, 4  ;;  %v16570_v18 = vld [vmem:[#allocation3 + $0x70] sm:$0xf] }
 0x437   : > { %12877 = vmatpush3.bf16.msra.mxu1 %v16351_v39  ;;  %12848 = vmatprep.mubr.msk.bf16.mxu1 %vm6727_vm3, %v11763_v53  ;;  %v7332_v39 = vsel %vm14509_vm8, %v7330_v28, %v7331_v40  ;;  %v8871_v53 = vld [vmem:[#allocation3 + $0x24] sm:$0xe]  ;;  %v16513_v28 = vld [vmem:[#allocation3 + $0x38] sm:$0x1] }
 0x438   : > { %12878 = vmatprep.subr.bf16.mxu1 %v13738_v12  ;;  %v11765_v54 = vcombine.low %v7329_v58, %v7332_v39  ;;  %v11871_v40 = vrot.slane %v8871_v53, 9  ;;  %v8874_v39 = vld [vmem:[#allocation3 + $0x48] sm:$0xe]  ;;  %v16539_v58 = vld [vmem:[#allocation3 + $0x58] sm:$0xf]  ;;  %v8972_v53 = vrot.slane %v8970_v16, 4 }
 0x439   : > { %v11874_v27 = vrot.slane %v8874_v39, 9 }
 0x43a   : > { %v16536_v45 = vsel %vm14509_vm8, %v11871_v40, %v8949_v43  ;;  %v8977_v43 = vrot.slane %v16539_v58, 5  ;;  %v11875_v40 = vrot.slane %v8875_v41, 9  ;;  %v16594_v39 = vsel %vm14509_vm8, %v8972_v53, %v8973_v32 }
 0x43b   : > { %12879 = vmatpush3.bf16.msra.mxu1 %v13738_v12  ;;  %v16509_v12 = vld [vmem:[#allocation3 + $0x34] sm:$0xf]  ;;  %17963 = vst [vmem:[#allocation17_spill] sm:$0xff] %v16536_v45  ;;  %17971 = vst [vmem:[#allocation9_spill] sm:$0xff] %v16594_v39  ;;  %v8991_v32 = vrot.slane %v16570_v18, 5 }
 0x43c   : > { %12880 = vmatprep.subr.bf16.mxu1 %v13739_v61  ;;  %v8882_v39 = vld [vmem:[#allocation3 + $0xa8] sm:$0xe]  ;;  %v10514_v45 = vld [vmem:[#allocation3 + $0x84] sm:$0xe] }
 0x43e   : > { %12849 = vmatmul.mubr.msk.bf16.gmra.mrb[4].mxu1 %vm6727_vm3, %v11764_v46  ;;  %v8959_v46 = vrot.slane %v16513_v28, 5 }
 0x43f   : > { %12852 = vmatprep.mubr.msk.bf16.mxu1 %vm6727_vm3, %v11765_v54  ;;  %12881 = vmatpush3.bf16.msra.mxu1 %v13739_v61  ;;  %v8956_v61 = vrot.slane %v16509_v12, 5  ;;  %v11873_v54 = vrot.slane %v8873_v37, 9  ;;  %v8984_v37 = vrot.slane %v16552_v31, 5 }
 0x440   : > { %12882 = vmatprep.subr.bf16.mxu1 %v13740_v59 }
 0x441   : > { %v8958_v0 = vrot.slane %v8956_v61, 4  ;;  %v16567_v8 = vsel %vm14509_vm8, %v11873_v54, %v8963_v29  ;;  %v8878_v54 = vld [vmem:[#allocation3 + $0x78] sm:$0xe]  ;;  %v17972_v29 = vcombine.low %v16337_v6, %v16341_v52  ;;  %v8986_v41 = vrot.slane %v8984_v37, 4 }
 0x442   : > { %17967 = vst [vmem:[#allocation21_spill] sm:$0xff] %v16567_v8 }
 0x443   : > { %12883 = vmatpush3.bf16.msra.mxu1 %v13740_v59  ;;  %v16549_v59 = vsel %vm14509_vm8, %v11872_v51, %v8956_v61  ;;  %v16558_v60 = vsel %vm14509_vm8, %v8958_v0, %v8959_v46  ;;  %v8980_v61 = vrot.slane %v16541_v55, 5  ;;  %v8979_v0 = vrot.slane %v8977_v43, 4 }
 0x444   : > { %12916 = vmatprep.subr.bf16.mxu1 %v16494_v63  ;;  %17965 = vst [vmem:[#allocation19_spill] sm:$0xff] %v16549_v59  ;;  %17966 = vst [vmem:[#allocation20_spill] sm:$0xff] %v16558_v60  ;;  %v8994_v51 = vrot.slane %v16600_v25, 5 }
 0x445   : > { %v16617_v6 = vsel %vm14509_vm8, %v8979_v0, %v8980_v61  ;;  %v8998_v61 = vrot.slane %v16588_v3, 5  ;;  %v8879_v0 = vld [vmem:[#allocation3 + $0x84] sm:$0xe] }
 0x446   : > { %12853 = vmatmul.mubr.msk.bf16.gmra.mrb[8].mxu1 %vm6727_vm3, %v11766_v33  ;;  %v8876_v33 = vld [vmem:[#allocation3 + $0x60] sm:$0xe]  ;;  %17974 = vst [vmem:[#allocation11_spill] sm:$0xff] %v16617_v6 }
 0x447   : > { %12856 = vmatprep.mubr.msk.bf16.mxu1 %vm6727_vm3, %v11767_v30  ;;  %v16574_v30 = vsel %vm14509_vm8, %v11874_v27, %v8970_v16  ;;  %v11876_v46 = vrot.slane %v8876_v33, 9  ;;  %v16608_v16 = vsel %vm14509_vm8, %v11875_v40, %v8977_v43  ;;  %v16613_v33 = vld [vmem:[#allocation3 + $0x94] sm:$0xf]  ;;  %v16624_v43 = vld [vmem:[#allocation3 + $0x8c] sm:$0x1] }
 0x448   : > { %17968 = vst [vmem:[#allocation22_spill] sm:$0xff] %v16574_v30  ;;  %17973 = vst [vmem:[#allocation10_spill] sm:$0xff] %v16608_v16  ;;  %v8151_v27 = vld [vmem:[#allocation3 + $0x98] sm:$0x1]  ;;  %v8880_v40 = vld [vmem:[#allocation3 + $0x90] sm:$0xe] }
 0x449   : > { %v16621_v52 = vsel %vm14509_vm8, %v11876_v46, %v8984_v37  ;;  %v8993_v46 = vrot.slane %v8991_v32, 4  ;;  %v16648_v37 = vld [vmem:[#allocation3 + $0xa4] sm:$0x1]  ;;  %v9008_v17 = vrot.slane %v16624_v43, 5  ;;  %v9012_v44 = vrot.slane %v16613_v33, 5 }
 0x44a   : > { %17975 = vst [vmem:[#allocation12_spill] sm:$0xff] %v16621_v52  ;;  %v8881_v52 = vld [vmem:[#allocation3 + $0x9c] sm:$0xe]  ;;  %v9015_v16 = vrot.slane %v8151_v27, 5 }
 0x44b   : > { %v9014_v6 = vrot.slane %v9012_v44, 4 }
 0x44e   : > { %12857 = vmatmul.mubr.msk.bf16.gmra.mrb[12].mxu1 %vm6727_vm3, %v17961_v34  ;;  %v16580_v34 = vsel %vm14509_vm8, %v8965_v21, %v8966_v47  ;;  %v8987_v21 = vrot.slane %v16561_v35, 5  ;;  %v16611_v47 = vld [vmem:[#allocation3 + $0x88] sm:$0xf] }
 0x44f   : > { %12860 = vmatprep.mubr.msk.bf16.mxu1 %vm6727_vm3, %v17962_v36  ;;  %17969 = vst [vmem:[#allocation8_spill] sm:$0xff] %v16580_v34  ;;  %v8877_v36 = vld [vmem:[#allocation3 + $0x6c] sm:$0xe]  ;;  %v9005_v23 = vrot.slane %v16611_v47, 5 }
 0x450   : > { %v11877_v53 = vrot.slane %v8877_v36, 9 }
 0x451   : > { %v9007_v56 = vrot.slane %v9005_v23, 4 }
 0x452   : > { %v16637_v36 = vsel %vm14509_vm8, %v11877_v53, %v8991_v32  ;;  %v16652_v53 = vsel %vm14509_vm8, %v8993_v46, %v8994_v51  ;;  %v11879_v32 = vrot.slane %v8879_v0, 9  ;;  %v17981_v51 = vcombine.low %v16345_v50, %v16357_v13  ;;  %v8157_v0 = vld [vmem:[#allocation3 + $0xb0] sm:$0x1] }
 0x453   : > { %17977 = vst [vmem:[#allocation14_spill] sm:$0xff] %v16637_v36  ;;  %17979 = vst [vmem:[#allocation16_spill] sm:$0xff] %v16652_v53  ;;  %v16682_v13 = vsel %vm14509_vm8, %v9007_v56, %v9008_v17  ;;  %v8883_v56 = vld [vmem:[#allocation3 + $0xb4] sm:$0xe]  ;;  %v8163_v17 = vld [vmem:[#allocation3 + $0xc8] sm:$0x1] }
 0x454   : > { %v16678_v50 = vsel %vm14509_vm8, %v11879_v32, %v9005_v23  ;;  %17984 = vst [vmem:[#allocation24_spill] sm:$0xff] %v16682_v13  ;;  %v11881_v23 = vrot.slane %v8881_v52, 9  ;;  %v9026_v32 = vrot.slane %v16656_v24, 5  ;;  %v11882_v46 = vrot.slane %v8882_v39, 9  ;;  %v13751_v53 = vld [vmem:[#allocation3 + $0x6c] sm:$0xff]  }
 0x455   : > { %17983 = vst [vmem:[#allocation23_spill] sm:$0xff] %v16678_v50  ;;  %v9029_v13 = vrot.slane %v8157_v0, 5  ;;  %v8250_v36 = vshrl.u32 %v16509_v12, 16 }
 0x456   : > { %12861 = vmatmul.mubr.msk.bf16.gmra.mrb[16].mxu1 %vm6727_vm3, %v17970_v7  ;;  %v16630_v7 = vsel %vm14509_vm8, %v8986_v41, %v8987_v21  ;;  %v9000_v41 = vrot.slane %v8998_v61, 4  ;;  %v9001_v21 = vrot.slane %v16602_v14, 5 }
 0x457   : > { %12864 = vmatprep.mubr.msk.bf16.mxu1 %vm6727_vm3, %v17972_v29  ;;  %17976 = vst [vmem:[#allocation13_spill] sm:$0xff] %v16630_v7  ;;  %v11878_v29 = vrot.slane %v8878_v54, 9  ;;  %v11880_v7 = vrot.slane %v8880_v40, 9  ;;  %v8160_v40 = vld [vmem:[#allocation3 + $0xbc] sm:$0x1] }
 0x459   : > { %v16644_v54 = vsel %vm14509_vm8, %v11878_v29, %v8998_v61  ;;  %v16662_v61 = vsel %vm14509_vm8, %v9000_v41, %v9001_v21  ;;  %v17982_v29 = vcombine.low %v16365_v48, %v16371_v2  ;;  %v16674_v41 = vld [vmem:[#allocation3 + $0xb8] sm:$0xf]  ;;  %v16686_v27 = vsel %vm14509_vm8, %v11880_v7, %v9012_v44  ;;  %v16689_v48 = vld [vmem:[#allocation3 + $0xc4] sm:$0xf] }
 0x45a   : > { %17978 = vst [vmem:[#allocation15_spill] sm:$0xff] %v16644_v54  ;;  %17980 = vst [vmem:[#allocation7_spill] sm:$0xff] %v16662_v61  ;;  %v9019_v21 = vrot.slane %v16640_v15, 5  ;;  %v9028_v2 = vrot.slane %v9026_v32, 4  ;;  %v16712_v44 = vsel %vm14509_vm8, %v11882_v46, %v9026_v32  ;;  %v9040_v39 = vrot.slane %v16689_v48, 5 }
 0x45b   : > { %17985 = vst [vmem:[#allocation25_spill] sm:$0xff] %v16686_v27  ;;  %17989 = vst [vmem:[#allocation29_spill] sm:$0xff] %v16712_v44  ;;  %v9036_v27 = vrot.slane %v8160_v40, 5  ;;  %v9043_v54 = vrot.slane %v8163_v17, 5  ;;  %v17991_v46 = vcombine.low %v16375_v19, %v16383_v22  ;;  %v17994_v40 = vcombine.low %v16395_v1, %v16399_v38  ;;  %v13743_v38 = vld [vmem:[#allocation3 + $0x18] sm:$0xff]   ;;  %v13744_v17 = vld [vmem:[#allocation3 + $0x24] sm:$0xff]  }
 0x45c   : > { %v9021_v7 = vrot.slane %v9019_v21, 4  ;;  %v16703_v61 = vsel %vm14509_vm8, %v11881_v23, %v9019_v21  ;;  %v16719_v0 = vsel %vm14509_vm8, %v9028_v2, %v9029_v13  ;;  %v9042_v50 = vrot.slane %v9040_v39, 4  ;;  %v13748_v21 = vld [vmem:[#allocation3 + $0x48] sm:$0xff]  }
 0x45d   : > { %17987 = vst [vmem:[#allocation27_spill] sm:$0xff] %v16703_v61  ;;  %17990 = vst [vmem:[#allocation30_spill] sm:$0xff] %v16719_v0  ;;  %v17997_v1 = vcombine.low %v16406_v4, %v16410_v26  ;;  %v13752_v4 = vld [vmem:[%s17760_s3 + $0x90] sm:$0xff]   ;;  %v16765_v26 = vld [vmem:[#allocation3 + $0x10] sm:$0xf] }
 0x45e   : > { %12865 = vmatmul.mubr.msk.bf16.gmra.mrb[20].mxu1 %vm6727_vm3, %v17981_v51  ;;  %v9022_v51 = vrot.slane %v16648_v37, 5  ;;  %v16747_v22 = vsel %vm14509_vm8, %v9042_v50, %v9043_v54  ;;  %v8116_v54 = vld [vmem:[#allocation3 + $0xc] sm:$0xf]  ;;  %v8125_v61 = vld [vmem:[#allocation3 + $0x30] sm:$0xf] }
 0x45f   : > { %12868 = vmatprep.mubr.msk.bf16.mxu1 %vm6727_vm3, %v17982_v29  ;;  %v16695_v29 = vsel %vm14509_vm8, %v9014_v6, %v9015_v16  ;;  %v9033_v16 = vrot.slane %v16674_v41, 5  ;;  %v8884_v6 = vld [vmem:[#allocation3 + $0xc0] sm:$0xe]  ;;  %17996 = vst [vmem:[#allocation34_spill] sm:$0xff] %v16747_v22  ;;  %v8165_v50 = vshrl.u32 %v8116_v54, 16 }
 0x460   : > { %17986 = vst [vmem:[#allocation26_spill] sm:$0xff] %v16695_v29  ;;  %v16708_v52 = vsel %vm14509_vm8, %v9021_v7, %v9022_v51  ;;  %v11883_v29 = vrot.slane %v8883_v56, 9  ;;  %v11884_v51 = vrot.slane %v8884_v6, 9  ;;  %v13747_v56 = vld [vmem:[%s17760_s3 + $0x88] sm:$0xff]   ;;  %v8174_v6 = vshll.u32 %v16765_v26, 16  ;;  %v16781_v7 = vld [vmem:[%s17760_s3 + $0xa0] sm:$0xff]  }
 0x461   : > { %17988 = vst [vmem:[#allocation28_spill] sm:$0xff] %v16708_v52  ;;  %v9035_v23 = vrot.slane %v9033_v16, 4  ;;  %v16788_v22 = vld [vmem:[#allocation3 + $0x20] sm:$0x1] }
 0x462   : > { %v16729_v32 = vsel %vm14509_vm8, %v11883_v29, %v9033_v16  ;;  %v16743_v19 = vsel %vm14509_vm8, %v11884_v51, %v9040_v39  ;;  %v13741_v29 = vld [vmem:[#allocation3 + $0xc] sm:$0xff]   ;;  %v8168_v16 = vshll.u32 %v8116_v54, 16  ;;  %v8178_v39 = vshrl.u32 %v16765_v26, 16 }
 0x463   : > { %17992 = vst [vmem:[#allocation31_spill] sm:$0xff] %v16729_v32  ;;  %v16733_v13 = vsel %vm14509_vm8, %v9035_v23, %v9036_v27  ;;  %17995 = vst [vmem:[#allocation33_spill] sm:$0xff] %v16743_v19  ;;  %v8119_v23 = vld [vmem:[#allocation3 + $0x18] sm:$0xf]  ;;  %v13745_v51 = vld [vmem:[#allocation3 + $0x30] sm:$0xff]  }
 0x464   : > { %17993 = vst [vmem:[#allocation32_spill] sm:$0xff] %v16733_v13  ;;  %v8180_v54 = vrot.slane %v8178_v39, 4  ;;  %v13749_v32 = vld [vmem:[#allocation3 + $0x54] sm:$0xff]  }
 0x466   : > { %12869 = vmatmul.mubr.msk.bf16.gmra.mrb[24].mxu1 %vm6727_vm3, %v17991_v46  ;;  %v16772_v46 = vld [vmem:[#allocation3 + $0x1c] sm:$0xf] }
 0x467   : > { %12872 = vmatprep.mubr.msk.bf16.mxu1 %vm6727_vm3, %v17994_v40  ;;  %v13746_v40 = vld [vmem:[#allocation3 + $0x3c] sm:$0xff]   ;;  %v8198_v27 = vshll.u32 %v16772_v46, 16  ;;  %v8202_v2 = vshrl.u32 %v16772_v46, 16 }
 0x469   : > { %v8204_v39 = vrot.slane %v8202_v2, 4  ;;  %v8208_v2 = vshll.u32 %v16788_v22, 16 }
 0x46e   : > { %12873 = vmatmul.mubr.msk.bf16.gmra.mrb[28].mxu1 %vm6727_vm3, %v17997_v1  ;;  %v8170_v1 = vrot.slane %v8168_v16, 5 }
 0x46f   : > { %12884 = vmatprep.mubr.msk.bf16.mxu1 %vm6727_vm3, %v13741_v29  ;;  %v8167_v29 = vrot.slane %v8165_v50, 4  ;;  %v16783_v50 = vld [vmem:[#allocation3 + $0x14] sm:$0x1] }
 0x470   : > { %v8184_v0 = vshll.u32 %v16783_v50, 16 }
 0x472   : > { %v8186_v44 = vrot.slane %v8184_v0, 5  ;;  %v8240_v0 = vshll.u32 %v8125_v61, 16 }
 0x476   : > { %12885 = vmatmul.mubr.msk.bf16.vlgmr.msra.gmra.mrb[0].mxu1 %vm6727_vm3, %v13743_v38  ;;  %v8189_v38 = vshrl.u32 %v8119_v23, 16 }
 0x477   : > { %12917 = vmatpush3.bf16.msra.mxu1 %v16494_v63  ;;  %12888 = vmatprep.mubr.msk.bf16.mxu1 %vm6727_vm3, %v13744_v17  ;;  %v13757_v63 = vld [vmem:[%s17760_s3 + $0x98] sm:$0xff]   ;;  %v8176_v17 = vrot.slane %v8174_v6, 5  ;;  %v16785_v6 = vrot.slane %v8198_v27, 5 }
 0x478   : > { %12918 = vmatprep.subr.bf16.mxu1 %v13747_v56  ;;  %v8191_v16 = vrot.slane %v8189_v38, 4 }
 0x479   : > { %v8205_v27 = vor.u32 %v8204_v39, %v16785_v6 }
 0x47b   : > { %12919 = vmatpush3.bf16.msra.mxu1 %v13747_v56  ;;  %v8192_v56 = vshll.u32 %v8119_v23, 16 }
 0x47c   : > { %12920 = vmatprep.subr.bf16.mxu1 %v13752_v4 }
 0x47d   : > { %v8194_v23 = vrot.slane %v8192_v56, 5 }
 0x47e   : > { %12889 = vmatmul.mubr.msk.bf16.gmra.mrb[4].mxu1 %vm6727_vm3, %v13745_v51  ;;  %v8122_v51 = vld [vmem:[#allocation3 + $0x24] sm:$0xf] }
 0x47f   : > { %12892 = vmatprep.mubr.msk.bf16.mxu1 %vm6727_vm3, %v13746_v40  ;;  %12921 = vmatpush3.bf16.msra.mxu1 %v13752_v4  ;;  %v8171_v40 = vor.u32 %v8170_v1, %v8167_v29  ;;  %v8181_v4 = vor.u32 %v8180_v54, %v8176_v17  ;;  %v8213_v19 = vshrl.u32 %v8122_v51, 16  ;;  %v8216_v13 = vshll.u32 %v8122_v51, 16 }
 0x480   : > { %12922 = vmatprep.subr.bf16.mxu1 %v13757_v63  ;;  %v8195_v38 = vor.u32 %v8194_v23, %v8191_v16  ;;  %v8222_v54 = vshll.u32 %v16507_v42, 16  ;;  %v8226_v51 = vshrl.u32 %v16507_v42, 16  ;;  %v8206_v16 = vrot.slane %v8205_v27, 4  ;;  %v8131_v27 = vld [vmem:[#allocation3 + $0x48] sm:$0xf] }
 0x481   : > { %v8182_v29 = vrot.slane %v8181_v4, 4  ;;  %v8215_v1 = vrot.slane %v8213_v19, 4  ;;  %v8218_v56 = vrot.slane %v8216_v13, 5  ;;  %v8232_v23 = vshll.u32 %v16511_v5, 16 }
 0x482   : > { %v8196_v52 = vrot.slane %v8195_v38, 4  ;;  %v16802_v13 = vrot.slane %v8222_v54, 5  ;;  %v8228_v39 = vrot.slane %v8226_v51, 4  ;;  %v8237_v42 = vshrl.u32 %v8125_v61, 16 }
 0x483   : > { %12923 = vmatpush3.bf16.msra.mxu1 %v13757_v63  ;;  %v8172_v63 = vrot.slane %v8171_v40, 4  ;;  %v13750_v40 = vld [vmem:[#allocation3 + $0x60] sm:$0xff]   ;;  %v8219_v19 = vor.u32 %v8218_v56, %v8215_v1  ;;  %v8246_v38 = vshll.u32 %v16509_v12, 16  ;;  %v8270_v61 = vshll.u32 %v16515_v10, 16 }
 0x484   : > { %12956 = vmatprep.subr.bf16.mxu1 %v16781_v7  ;;  %v8201_v5 = vsel %vm14073_vm13, %v8196_v52, %v16785_v6  ;;  %v8274_v12 = vshrl.u32 %v16515_v10, 16  ;;  %v8229_v1 = vor.u32 %v8228_v39, %v16802_v13  ;;  %v8294_v56 = vshll.u32 %v16522_v9, 16  ;;  %v8134_v6 = vld [vmem:[#allocation3 + $0x54] sm:$0xf]  ;;  %v13753_v39 = vld [vmem:[#allocation3 + $0x78] sm:$0xff]  }
 0x485   : > { %v8177_v4 = vsel %vm14073_vm13, %v8172_v63, %v8176_v17  ;;  %v8128_v17 = vld [vmem:[#allocation3 + $0x3c] sm:$0xf]  ;;  %v8298_v52 = vshrl.u32 %v16522_v9, 16  ;;  %v8239_v54 = vrot.slane %v8237_v42, 4  ;;  %v16822_v51 = vrot.slane %v8246_v38, 5 }
 0x486   : > { %12893 = vmatmul.mubr.msk.bf16.gmra.mrb[8].mxu1 %vm6727_vm3, %v13748_v21  ;;  %v8187_v21 = vsel %vm14073_vm13, %v8182_v29, %v8186_v44  ;;  %v16815_v29 = vrot.slane %v8232_v23, 5  ;;  %v8285_v23 = vshrl.u32 %v8131_v27, 16  ;;  %v8276_v10 = vrot.slane %v8274_v12, 4 }
 0x487   : > { %12896 = vmatprep.mubr.msk.bf16.mxu1 %vm6727_vm3, %v13749_v32  ;;  %v8210_v32 = vrot.slane %v8208_v2, 5  ;;  %v16807_v44 = vcombine.low %v8177_v4, %v8187_v21  ;;  %v8220_v2 = vrot.slane %v8219_v19, 4  ;;  %v8252_v21 = vrot.slane %v8250_v36, 4 }
 0x488   : > { %v16824_v4 = vrot.slane %v8270_v61, 5  ;;  %v8309_v19 = vshrl.u32 %v8134_v6, 16  ;;  %v8312_v30 = vshll.u32 %v8134_v6, 16  ;;  %v16826_v34 = vrot.slane %v8294_v56, 5 }
 0x489   : > { %v8211_v63 = vsel %vm14073_vm13, %v8206_v16, %v8210_v32  ;;  %v8261_v16 = vshrl.u32 %v8128_v17, 16  ;;  %v8264_v32 = vshll.u32 %v8128_v17, 16  ;;  %v8300_v8 = vrot.slane %v8298_v52, 4 }
 0x48a   : > { %v8318_v9 = vshll.u32 %v16539_v58, 16  ;;  %v8322_v42 = vshrl.u32 %v16539_v58, 16  ;;  %v8230_v38 = vrot.slane %v8229_v1, 4  ;;  %v8253_v17 = vor.u32 %v8252_v21, %v16822_v51  ;;  %v8137_v21 = vld [vmem:[#allocation3 + $0x60] sm:$0xf] }
 0x48b   : > { %v8263_v61 = vrot.slane %v8261_v16, 4  ;;  %v8266_v12 = vrot.slane %v8264_v32, 5  ;;  %v8287_v6 = vrot.slane %v8285_v23, 4  ;;  %v16834_v56 = vcombine.low %v8201_v5, %v8211_v63 }
 0x48c   : > { %v8277_v52 = vor.u32 %v8276_v10, %v16824_v4  ;;  %v8311_v58 = vrot.slane %v8309_v19, 4  ;;  %v8314_v59 = vrot.slane %v8312_v30, 5  ;;  %v8225_v1 = vsel %vm14073_vm13, %v8220_v2, %v16802_v13 }
 0x48d   : > { %v8235_v16 = vsel %vm14073_vm13, %v8230_v38, %v16815_v29  ;;  %v8254_v63 = vrot.slane %v8253_v17, 4  ;;  %v8280_v32 = vshll.u32 %v16530_v62, 16  ;;  %v8267_v30 = vor.u32 %v8266_v12, %v8263_v61  ;;  %v13756_v38 = vld [vmem:[#allocation3 + $0x9c] sm:$0xff]   ;;  %v8140_v12 = vld [vmem:[#allocation3 + $0x6c] sm:$0xf] }
 0x48e   : > { %12897 = vmatmul.mubr.msk.bf16.gmra.mrb[12].mxu1 %vm6727_vm3, %v13750_v40  ;;  %v8288_v40 = vshll.u32 %v8131_v27, 16  ;;  %v8256_v27 = vshll.u32 %v16513_v28, 16  ;;  %v8301_v28 = vor.u32 %v8300_v8, %v16826_v34  ;;  %v8304_v10 = vshll.u32 %v16532_v57, 16 }
 0x48f   : > { %12900 = vmatprep.mubr.msk.bf16.mxu1 %vm6727_vm3, %v13751_v53  ;;  %v8242_v53 = vrot.slane %v8240_v0, 5  ;;  %v13754_v0 = vld [vmem:[#allocation3 + $0x84] sm:$0xff]   ;;  %v8278_v13 = vrot.slane %v8277_v52, 4  ;;  %v8315_v2 = vor.u32 %v8314_v59, %v8311_v58  ;;  %v8333_v8 = vshrl.u32 %v8137_v21, 16 }
 0x490   : > { %v8290_v60 = vrot.slane %v8288_v40, 5  ;;  %v8258_v23 = vrot.slane %v8256_v27, 5  ;;  %v8336_v19 = vshll.u32 %v8137_v21, 16  ;;  %v8346_v29 = vshrl.u32 %v16552_v31, 16 }
 0x491   : > { %v8243_v36 = vor.u32 %v8242_v53, %v8239_v54  ;;  %v16841_v54 = vrot.slane %v8318_v9, 5  ;;  %v8324_v53 = vrot.slane %v8322_v42, 4  ;;  %v8302_v9 = vrot.slane %v8301_v28, 4 }
 0x492   : > { %v8291_v40 = vor.u32 %v8290_v60, %v8287_v6  ;;  %v8259_v57 = vsel %vm14073_vm13, %v8254_v63, %v8258_v23  ;;  %v8282_v59 = vrot.slane %v8280_v32, 5  ;;  %v8268_v60 = vrot.slane %v8267_v30, 4  ;;  %v16879_v63 = vld [vmem:[#allocation3 + $0x1c] sm:$0xf]  ;;  %v13758_v32 = vld [vmem:[#allocation3 + $0xa8] sm:$0xff]  }
 0x493   : > { %v8244_v5 = vrot.slane %v8243_v36, 4  ;;  %v8325_v42 = vor.u32 %v8324_v53, %v16841_v54  ;;  %v16851_v36 = vcombine.low %v8225_v1, %v8235_v16  ;;  %v8306_v27 = vrot.slane %v8304_v10, 5  ;;  %17998 = vst [vmem:[#allocation35_spill] sm:$0xff] %v16879_v63 }
 0x494   : > { %v8292_v17 = vrot.slane %v8291_v40, 4  ;;  %v8328_v61 = vshll.u32 %v16541_v55, 16  ;;  %v16863_v6 = vrot.slane %v8315_v2, 4  ;;  %v16867_v52 = vrot.slane %v8336_v19, 5  ;;  %v13759_v2 = vld [vmem:[#allocation3 + $0xb4] sm:$0xff]  }
 0x495   : > { %v8249_v62 = vsel %vm14073_vm13, %v8244_v5, %v16822_v51  ;;  %v16865_v51 = vrot.slane %v8333_v8, 4  ;;  %v8307_v58 = vsel %vm14073_vm13, %v8302_v9, %v8306_v27  ;;  %v16871_v1 = vrot.slane %v8325_v42, 4  ;;  %v10505_v9 = vld [vmem:[#allocation3 + $0x18] sm:$0xe]  ;;  %v16938_v19 = vld [vmem:[#allocation3 + $0x4c] sm:$0xf] }
 0x496   : > { %12901 = vmatmul.mubr.msk.bf16.gmra.mrb[16].mxu1 %vm6727_vm3, %v13753_v39  ;;  %v13755_v39 = vld [vmem:[#allocation3 + $0x90] sm:$0xff]   ;;  %v16875_v55 = vrot.slane %v8346_v29, 4  ;;  %v8357_v53 = vshrl.u32 %v8140_v12, 16  ;;  %v8360_v21 = vshll.u32 %v8140_v12, 16  ;;  %v8366_v16 = vshll.u32 %v16570_v18, 16  ;;  %18005 = vst [vmem:[#allocation42_spill] sm:$0xff] %v16938_v19 }
 0x497   : > { %12904 = vmatprep.mubr.msk.bf16.mxu1 %vm6727_vm3, %v13754_v0  ;;  %v8342_v0 = vshll.u32 %v16552_v31, 16  ;;  %v8283_v31 = vsel %vm14073_vm13, %v8278_v13, %v8282_v59  ;;  %v8370_v5 = vshrl.u32 %v16570_v18, 16  ;;  %v16881_v23 = vcombine.low %v8249_v62, %v8259_v57  ;;  %v16891_v13 = vld [vmem:[#allocation3 + $0x78] sm:$0xf]  ;;  %v10506_v57 = vld [vmem:[#allocation3 + $0x24] sm:$0xe] }
 0x498   : > { %v8273_v30 = vsel %vm14073_vm13, %v8268_v60, %v16824_v4  ;;  %v8297_v40 = vsel %vm14073_vm13, %v8292_v17, %v16826_v34  ;;  %v16889_v10 = vrot.slane %v8328_v61, 5  ;;  %v16905_v34 = vld [vmem:[#allocation3 + $0x28] sm:$0xf]  ;;  %v10571_v62 = vrot.slane %v16879_v63, 5  ;;  %v16925_v61 = vld [vmem:[#allocation3 + $0x2c] sm:$0x1] }
 0x499   : > { %v16873_v28 = vrot.slane %v8342_v0, 5  ;;  %v16893_v8 = vcombine.low %v8273_v30, %v8283_v31  ;;  %v16895_v18 = vcombine.low %v8297_v40, %v8307_v58  ;;  %18000 = vst [vmem:[#allocation37_spill] sm:$0xff] %v16905_v34  ;;  %v16917_v59 = vrot.slane %v8357_v53, 4  ;;  %18002 = vst [vmem:[#allocation39_spill] sm:$0xff] %v16925_v61  ;;  %v16928_v12 = vld [vmem:[#allocation3 + $0x38] sm:$0x1] }
 0x49a   : > { %v16919_v60 = vrot.slane %v8360_v21, 5  ;;  %v16921_v17 = vrot.slane %v8366_v16, 5  ;;  %v16923_v27 = vrot.slane %v8370_v5, 4  ;;  %18003 = vst [vmem:[#allocation40_spill] sm:$0xff] %v16928_v12  ;;  %v16930_v31 = vld [vmem:[#allocation3 + $0x40] sm:$0xf] }
 0x49b   : > { %18004 = vst [vmem:[#allocation41_spill] sm:$0xff] %v16930_v31  ;;  %v11993_v58 = vrot.slane %v10505_v9, 9  ;;  %v10573_v30 = vrot.slane %v10571_v62, 4  ;;  %v10578_v53 = vrot.slane %v16905_v34, 5  ;;  %v8390_v5 = vshll.u32 %v16588_v3, 16 }
 0x49c   : > { %v11994_v29 = vrot.slane %v10506_v57, 9  ;;  %v10508_v21 = vld [vmem:[#allocation3 + $0x3c] sm:$0xe]  ;;  %v16953_v4 = vld [vmem:[#allocation3 + $0x44] sm:$0x1] }
 0x49d   : > { %v16942_v9 = vsel %vm14509_vm8, %v11993_v58, %v10571_v62  ;;  %v10580_v0 = vrot.slane %v10578_v53, 4  ;;  %18008 = vst [vmem:[#allocation45_spill] sm:$0xff] %v16953_v4  ;;  %v10509_v34 = vld [vmem:[#allocation3 + $0x48] sm:$0xe]  ;;  %v16971_v63 = vld [vmem:[#allocation3 + $0x5c] sm:$0x1] }
 0x49e   : > { %12905 = vmatmul.mubr.msk.bf16.gmra.mrb[20].mxu1 %vm6727_vm3, %v13755_v39  ;;  %v16903_v39 = vld [vmem:[#allocation3 + $0x20] sm:$0x1]  ;;  %18006 = vst [vmem:[#allocation43_spill] sm:$0xff] %v16942_v9  ;;  %18013 = vst [vmem:[#allocation50_spill] sm:$0xff] %v16971_v63  ;;  %v10588_v9 = vrot.slane %v16928_v12, 5 }
 0x49f   : > { %12908 = vmatprep.mubr.msk.bf16.mxu1 %vm6727_vm3, %v13756_v38  ;;  %17999 = vst [vmem:[#allocation36_spill] sm:$0xff] %v16903_v39  ;;  %v16914_v38 = vld [vmem:[#allocation3 + $0x34] sm:$0xf]  ;;  %v10574_v40 = vrot.slane %v16903_v39, 5  ;;  %v16955_v39 = vld [vmem:[#allocation3 + $0x50] sm:$0x1] }
 0x4a0   : > { %18001 = vst [vmem:[#allocation38_spill] sm:$0xff] %v16914_v38  ;;  %18009 = vst [vmem:[#allocation46_spill] sm:$0xff] %v16955_v39  ;;  %v10585_v58 = vrot.slane %v16914_v38, 5  ;;  %v11996_v38 = vrot.slane %v10508_v21, 9 }
 0x4a1   : > { %v16946_v42 = vsel %vm14509_vm8, %v10573_v30, %v10574_v40  ;;  %v16960_v30 = vld [vmem:[#allocation3 + $0x58] sm:$0xf]  ;;  %v16964_v40 = vsel %vm14509_vm8, %v11994_v29, %v10578_v53  ;;  %v16976_v29 = vrot.slane %v8390_v5, 5  ;;  %v11997_v5 = vrot.slane %v10509_v34, 9 }
 0x4a2   : > { %18007 = vst [vmem:[#allocation44_spill] sm:$0xff] %v16946_v42  ;;  %18010 = vst [vmem:[#allocation47_spill] sm:$0xff] %v16960_v30  ;;  %v10587_v42 = vrot.slane %v10585_v58, 4  ;;  %v10606_v34 = vrot.slane %v16960_v30, 5  ;;  %v9778_v30 = vld [vmem:[#allocation3 + $0x80] sm:$0x1] }
 0x4a3   : > { %18011 = vst [vmem:[#allocation48_spill] sm:$0xff] %v16964_v40  ;;  %v10511_v40 = vld [vmem:[#allocation3 + $0x60] sm:$0xe] }
 0x4a4   : > { %v16987_v62 = vsel %vm14509_vm8, %v10587_v42, %v10588_v9 }
 0x4a5   : > { %18016 = vst [vmem:[#allocation53_spill] sm:$0xff] %v16987_v62  ;;  %v10512_v62 = vld [vmem:[#allocation3 + $0x6c] sm:$0xe] }
 0x4a6   : > { %12909 = vmatmul.mubr.msk.bf16.gmra.mrb[24].mxu1 %vm6727_vm3, %v13758_v32  ;;  %v10507_v32 = vld [vmem:[#allocation3 + $0x30] sm:$0xe] }
 0x4a7   : > { %12912 = vmatprep.mubr.msk.bf16.mxu1 %vm6727_vm3, %v13759_v2  ;;  %v10581_v2 = vrot.slane %v16925_v61, 5  ;;  %v11995_v57 = vrot.slane %v10507_v32, 9  ;;  %v10592_v61 = vrot.slane %v16930_v31, 5  ;;  %v10595_v32 = vrot.slane %v16953_v4, 5  ;;  %v16983_v31 = vld [vmem:[#allocation3 + $0x64] sm:$0xf] }
 0x4a8   : > { %18015 = vst [vmem:[#allocation52_spill] sm:$0xff] %v16983_v31  ;;  %v10609_v4 = vrot.slane %v16971_v63, 5  ;;  %v12000_v63 = vrot.slane %v10512_v62, 9 }
 0x4a9   : > { %v16968_v16 = vsel %vm14509_vm8, %v10580_v0, %v10581_v2  ;;  %v16980_v0 = vsel %vm14509_vm8, %v11995_v57, %v10585_v58  ;;  %v10594_v53 = vrot.slane %v10592_v61, 4  ;;  %v10510_v2 = vld [vmem:[#allocation3 + $0x54] sm:$0xe]  ;;  %v16991_v21 = vsel %vm14509_vm8, %v11996_v38, %v10592_v61  ;;  %v16995_v57 = vld [vmem:[#allocation3 + $0x68] sm:$0x1] }
 0x4aa   : > { %18012 = vst [vmem:[#allocation49_spill] sm:$0xff] %v16968_v16  ;;  %18014 = vst [vmem:[#allocation51_spill] sm:$0xff] %v16980_v0  ;;  %v10599_v16 = vrot.slane %v16938_v19, 5  ;;  %v16997_v58 = vld [vmem:[#allocation3 + $0x70] sm:$0xf]  ;;  %v10602_v38 = vrot.slane %v16955_v39, 5 }
 0x4ab   : > { %18017 = vst [vmem:[#allocation54_spill] sm:$0xff] %v16991_v21  ;;  %18018 = vst [vmem:[#allocation55_spill] sm:$0xff] %v16995_v57  ;;  %v17003_v42 = vsel %vm14509_vm8, %v10594_v53, %v10595_v32  ;;  %v17009_v61 = vld [vmem:[#allocation3 + $0x7c] sm:$0xf]  ;;  %v11998_v19 = vrot.slane %v10510_v2, 9  ;;  %v10608_v32 = vrot.slane %v10606_v34, 4 }
 0x4ac   : > { %18019 = vst [vmem:[#allocation56_spill] sm:$0xff] %v16997_v58  ;;  %18020 = vst [vmem:[#allocation57_spill] sm:$0xff] %v17003_v42  ;;  %v10601_v9 = vrot.slane %v10599_v16, 4  ;;  %v17014_v0 = vld [vmem:[#allocation3 + $0x74] sm:$0x1]  ;;  %v17018_v53 = vsel %vm14509_vm8, %v11997_v5, %v10599_v16  ;;  %v11999_v39 = vrot.slane %v10511_v40, 9 }
 0x4ad   : > { %18021 = vst [vmem:[#allocation58_spill] sm:$0xff] %v17009_v61  ;;  %18022 = vst [vmem:[#allocation59_spill] sm:$0xff] %v17014_v0  ;;  %v17027_v2 = vsel %vm14509_vm8, %v11998_v19, %v10606_v34  ;;  %v10620_v42 = vrot.slane %v16997_v58, 5  ;;  %v10513_v21 = vld [vmem:[#allocation3 + $0x78] sm:$0xe]  ;;  %v13762_v40 = vld [vmem:[%s17760_s3 + $0xa8] sm:$0xff]  }
 0x4ae   : > { %12913 = vmatmul.mubr.msk.bf16.gmra.mrb[28].mxu1 %vm6727_vm3, %v13760_v20  ;;  %18023 = vst [vmem:[#allocation60_spill] sm:$0xff] %v17018_v53  ;;  %v17023_v12 = vsel %vm14509_vm8, %v10601_v9, %v10602_v38  ;;  %18025 = vst [vmem:[#allocation62_spill] sm:$0xff] %v17027_v2  ;;  %v10616_v20 = vrot.slane %v16995_v57, 5  ;;  %v17031_v16 = vld [vmem:[#allocation3 + $0x88] sm:$0xf]  ;;  %v17039_v38 = vsel %vm14509_vm8, %v10608_v32, %v10609_v4  ;;  %v12001_v32 = vrot.slane %v10513_v21, 9 }
 0x4af   : > { %12924 = vmatprep.mubr.msk.bf16.mxu1 %vm6727_vm3, %v16807_v44  ;;  %v10613_v44 = vrot.slane %v16983_v31, 5  ;;  %18024 = vst [vmem:[#allocation61_spill] sm:$0xff] %v17023_v12  ;;  %v17033_v5 = vld [vmem:[#allocation3 + $0x94] sm:$0xf]  ;;  %18027 = vst [vmem:[#allocation64_spill] sm:$0xff] %v17039_v38  ;;  %v10622_v58 = vrot.slane %v10620_v42, 4  ;;  %v17057_v62 = vsel %vm14509_vm8, %v12000_v63, %v10620_v42 }
 0x4b0   : > { %18026 = vst [vmem:[#allocation63_spill] sm:$0xff] %v17033_v5  ;;  %v9781_v19 = vld [vmem:[#allocation3 + $0x8c] sm:$0x1]  ;;  %v10623_v31 = vrot.slane %v17014_v0, 5  ;;  %18030 = vst [vmem:[#allocation67_spill] sm:$0xff] %v17057_v62  ;;  %v10630_v53 = vrot.slane %v9778_v30, 5 }
 0x4b1   : > { %v10615_v9 = vrot.slane %v10613_v44, 4  ;;  %v17045_v57 = vsel %vm14509_vm8, %v11999_v39, %v10613_v44  ;;  %v10627_v39 = vrot.slane %v17009_v61, 5  ;;  %v10515_v44 = vld [vmem:[#allocation3 + $0x90] sm:$0xe]  ;;  %v9784_v34 = vld [vmem:[#allocation3 + $0x98] sm:$0x1] }
 0x4b2   : > { %18028 = vst [vmem:[#allocation65_spill] sm:$0xff] %v17045_v57  ;;  %v9786_v38 = vld [vmem:[#allocation3 + $0xa0] sm:$0xf]  ;;  %v17064_v12 = vsel %vm14509_vm8, %v10622_v58, %v10623_v31  ;;  %v9789_v63 = vld [vmem:[#allocation3 + $0xac] sm:$0xf]  ;;  %v10637_v0 = vrot.slane %v9781_v19, 5 }
 0x4b3   : > { %v17053_v4 = vsel %vm14509_vm8, %v10615_v9, %v10616_v20  ;;  %18031 = vst [vmem:[#allocation68_spill] sm:$0xff] %v17064_v12  ;;  %v10634_v20 = vrot.slane %v17031_v16, 5  ;;  %v10629_v42 = vrot.slane %v10627_v39, 4  ;;  %v12002_v9 = vrot.slane %v10514_v45, 9  ;;  %v10516_v61 = vld [vmem:[#allocation3 + $0x9c] sm:$0xe] }
 0x4b4   : > { %18029 = vst [vmem:[#allocation66_spill] sm:$0xff] %v17053_v4  ;;  %v9787_v31 = vld [vmem:[#allocation3 + $0xa4] sm:$0x1]  ;;  %v17076_v30 = vsel %vm14509_vm8, %v12001_v32, %v10627_v39  ;;  %v10641_v2 = vrot.slane %v17033_v5, 5  ;;  %v13763_v45 = vld [vmem:[%s17760_s3 + $0xb0] sm:$0xff]   ;;  %v10644_v32 = vrot.slane %v9784_v34, 5 }
 0x4b5   : > { %v10636_v58 = vrot.slane %v10634_v20, 4  ;;  %v9790_v19 = vld [vmem:[#allocation3 + $0xb0] sm:$0x1]  ;;  %v10648_v39 = vrot.slane %v9786_v38, 5  ;;  %v9792_v21 = vld [vmem:[#allocation3 + $0xb8] sm:$0xf] }
 0x4b6   : > { %12925 = vmatmul.mubr.msk.bf16.vlgmr.msra.gmra.mrb[0].mxu1 %vm6727_vm3, %v16834_v56  ;;  %v12003_v56 = vrot.slane %v10515_v44, 9  ;;  %v10643_v62 = vrot.slane %v10641_v2, 4  ;;  %v12004_v4 = vrot.slane %v10516_v61, 9  ;;  %v10517_v57 = vld [vmem:[#allocation3 + $0xa8] sm:$0xe]  ;;  %v10655_v61 = vrot.slane %v9789_v63, 5 }
 0x4b7   : > { %12957 = vmatpush3.bf16.msra.mxu1 %v16781_v7  ;;  %12928 = vmatprep.mubr.msk.bf16.mxu1 %vm6727_vm3, %v16851_v36  ;;  %v17084_v7 = vsel %vm14509_vm8, %v10629_v42, %v10630_v53  ;;  %v17088_v36 = vsel %vm14509_vm8, %v12002_v9, %v10634_v20  ;;  %v17094_v12 = vsel %vm14509_vm8, %v10636_v58, %v10637_v0  ;;  %v8394_v53 = vshrl.u32 %v16588_v3, 16  ;;  %v10518_v34 = vld [vmem:[#allocation3 + $0xb4] sm:$0xe]  ;;  %v9793_v38 = vld [vmem:[#allocation3 + $0xbc] sm:$0x1] }
 0x4b8   : > { %12958 = vmatprep.subr.bf16.mxu1 %v13762_v40  ;;  %18032 = vst [vmem:[#allocation69_spill] sm:$0xff] %v17088_v36  ;;  %18033 = vst [vmem:[#allocation70_spill] sm:$0xff] %v17094_v12  ;;  %v10650_v20 = vrot.slane %v10648_v39, 4  ;;  %v10651_v9 = vrot.slane %v9787_v31, 5  ;;  %v9795_v5 = vld [vmem:[#allocation3 + $0xc4] sm:$0xf]  ;;  %v17101_v44 = vsel %vm14509_vm8, %v12003_v56, %v10641_v2  ;;  %v17105_v0 = vsel %vm14509_vm8, %v10643_v62, %v10644_v32 }
 0x4b9   : > { %18034 = vst [vmem:[#allocation71_spill] sm:$0xff] %v17105_v0  ;;  %v17109_v3 = vsel %vm14509_vm8, %v12004_v4, %v10648_v39  ;;  %v12005_v58 = vrot.slane %v10517_v57, 9  ;;  %v10662_v62 = vrot.slane %v9792_v21, 5  ;;  %v10519_v56 = vld [vmem:[#allocation3 + $0xc0] sm:$0xe]  ;;  %v10657_v63 = vrot.slane %v10655_v61, 4 }
 0x4ba   : > { %v17118_v2 = vsel %vm14509_vm8, %v10650_v20, %v10651_v9  ;;  %v9796_v32 = vld [vmem:[#allocation3 + $0xc8] sm:$0x1]  ;;  %v10658_v39 = vrot.slane %v9790_v19, 5  ;;  %v12006_v42 = vrot.slane %v10518_v34, 9  ;;  %v8396_v12 = vrot.slane %v8394_v53, 4  ;;  %v18113_v49 = vld [vmem:[#allocation54_spill] sm:$0xff] }
 0x4bb   : > { %12959 = vmatpush3.bf16.msra.mxu1 %v13762_v40  ;;  %v13764_v40 = vld [vmem:[%s17760_s3 + $0xb8] sm:$0xff]   ;;  %v12020_v4 = vcombine.low %v17109_v3, %v17118_v2  ;;  %v10664_v36 = vrot.slane %v10662_v62, 4  ;;  %v10665_v31 = vrot.slane %v9793_v38, 5  ;;  %v10669_v0 = vrot.slane %v9795_v5, 5 }
 0x4bc   : > { %12960 = vmatprep.subr.bf16.mxu1 %v13763_v45  ;;  %v17128_v57 = vsel %vm14509_vm8, %v12005_v58, %v10655_v61  ;;  %v17132_v21 = vsel %vm14509_vm8, %v10657_v63, %v10658_v39  ;;  %v17136_v19 = vsel %vm14509_vm8, %v12006_v42, %v10662_v62  ;;  %v8146_v53 = vld [vmem:[#allocation3 + $0x84] sm:$0xf]  ;;  %v10672_v9 = vrot.slane %v9796_v32, 5 }
 0x4bd   : > { %v12021_v5 = vcombine.low %v17128_v57, %v17132_v21  ;;  %v10671_v20 = vrot.slane %v10669_v0, 4  ;;  %v18035_v42 = vor.u32 %v16867_v52, %v16865_v51  ;;  %v8376_v38 = vshll.u32 %v16600_v25, 16 }
 0x4be   : > { %12929 = vmatmul.mubr.msk.bf16.gmra.mrb[4].mxu1 %vm6727_vm3, %v16881_v23  ;;  %v12007_v23 = vrot.slane %v10519_v56, 9  ;;  %v18036_v61 = vshrl.u32 %v16891_v13, 16  ;;  %v8414_v56 = vshll.u32 %v16611_v47, 16  ;;  %v8418_v63 = vshrl.u32 %v16611_v47, 16 }
 0x4bf   : > { %12932 = vmatprep.mubr.msk.bf16.mxu1 %vm6727_vm3, %v16893_v8  ;;  %12961 = vmatpush3.bf16.msra.mxu1 %v13763_v45  ;;  %v17141_v8 = vld [vmem:[%s17760_s3 + $0xc0] sm:$0xff]   ;;  %v17147_v45 = vsel %vm14509_vm8, %v10664_v36, %v10665_v31  ;;  %v8340_v34 = vrot.slane %v18035_v42, 4  ;;  %v17165_v51 = vsel %vm14509_vm8, %v10671_v20, %v10672_v9  ;;  %v18037_v25 = vshll.u32 %v16891_v13, 16 }
 0x4c0   : > { %12962 = vmatprep.subr.bf16.mxu1 %v13764_v40  ;;  %v8383_v58 = vrot.slane %v18036_v61, 4  ;;  %v12022_v62 = vcombine.low %v17136_v19, %v17147_v45  ;;  %v17161_v36 = vsel %vm14509_vm8, %v12007_v23, %v10669_v0  ;;  %v8405_v31 = vshrl.u32 %v8146_v53, 16 }
 0x4c1   : > { %v8386_v52 = vrot.slane %v18037_v25, 5  ;;  %v8408_v32 = vshll.u32 %v8146_v53, 16  ;;  %v12023_v39 = vcombine.low %v17161_v36, %v17165_v51  ;;  %v18038_v47 = vor.u32 %v16875_v55, %v16873_v28 }
 0x4c2   : > { %v18039_v0 = vor.u32 %v16919_v60, %v16917_v59  ;;  %v18040_v20 = vor.u32 %v16923_v27, %v16921_v17  ;;  %v8397_v13 = vor.u32 %v8396_v12, %v16976_v29  ;;  %v18042_v55 = vsel %vm14073_vm13, %v16863_v6, %v16841_v54 }
 0x4c3   : > { %12963 = vmatpush3.bf16.msra.mxu1 %v13764_v40  ;;  %v8350_v42 = vrot.slane %v18038_v47, 4  ;;  %v18041_v40 = vsel %vm14073_vm13, %v16871_v1, %v16889_v10  ;;  %v18043_v60 = vshll.u32 %v16561_v35, 16  ;;  %v8378_v27 = vrot.slane %v8376_v38, 5  ;;  %v8149_v47 = vld [vmem:[#allocation3 + $0x90] sm:$0xf] }
 0x4c4   : > { %v8364_v23 = vrot.slane %v18039_v0, 4  ;;  %v8374_v9 = vrot.slane %v18040_v20, 4  ;;  %12996 = vmatprep.subr.bf16.mxu1 %v17141_v8  ;;  %v11839_v59 = vcombine.low %v18042_v55, %v18041_v40  ;;  %v8400_v12 = vshll.u32 %v16602_v14, 16 }
 0x4c5   : > { %v8354_v53 = vrot.slane %v18043_v60, 5  ;;  %v17197_v61 = vrot.slane %v8414_v56, 5  ;;  %v8420_v25 = vrot.slane %v8418_v63, 4  ;;  %v8345_v54 = vsel %vm14073_vm13, %v8340_v34, %v16873_v28  ;;  %v8152_v34 = vld [vmem:[#allocation3 + $0x9c] sm:$0xf] }
 0x4c6   : > { %12933 = vmatmul.mubr.msk.bf16.gmra.mrb[8].mxu1 %vm6727_vm3, %v16895_v18  ;;  %v8387_v6 = vor.u32 %v8386_v52, %v8383_v58  ;;  %v8407_v1 = vrot.slane %v8405_v31, 4  ;;  %v8410_v35 = vrot.slane %v8408_v32, 5  ;;  %v8369_v14 = vsel %vm14073_vm13, %v8364_v23, %v16921_v17 }
 0x4c7   : > { %12936 = vmatprep.mubr.msk.bf16.mxu1 %vm6727_vm3, %v11839_v59  ;;  %v8355_v10 = vsel %vm14073_vm13, %v8350_v42, %v8354_v53  ;;  %v8379_v18 = vsel %vm14073_vm13, %v8374_v9, %v8378_v27  ;;  %v8398_v38 = vrot.slane %v8397_v13, 4  ;;  %v8429_v56 = vshrl.u32 %v8149_v47, 16 }
 0x4c8   : > { %v8432_v63 = vshll.u32 %v8149_v47, 16  ;;  %v8438_v0 = vshll.u32 %v16613_v33, 16  ;;  %v8442_v28 = vshrl.u32 %v16613_v33, 16  ;;  %v8402_v58 = vrot.slane %v8400_v12, 5 }
 0x4c9   : > { %v8421_v52 = vor.u32 %v8420_v25, %v17197_v61  ;;  %v8462_v31 = vshll.u32 %v16640_v15, 16  ;;  %v8466_v32 = vshrl.u32 %v16640_v15, 16  ;;  %v11840_v42 = vcombine.low %v8345_v54, %v8355_v10 }
 0x4ca   : > { %v11841_v17 = vcombine.low %v8369_v14, %v8379_v18  ;;  %v8388_v23 = vrot.slane %v8387_v6, 4  ;;  %v8411_v20 = vor.u32 %v8410_v35, %v8407_v1  ;;  %v8403_v9 = vsel %vm14073_vm13, %v8398_v38, %v8402_v58  ;;  %v8155_v35 = vld [vmem:[#allocation3 + $0xa8] sm:$0xf]  ;;  %v13840_v58 = vld [vmem:[#allocation3 + $0x98] sm:$0x1] }
 0x4cb   : > { %v8424_v13 = vshll.u32 %v16624_v43, 16  ;;  %v8453_v40 = vshrl.u32 %v8152_v34, 16  ;;  %v8456_v55 = vshll.u32 %v8152_v34, 16  ;;  %v8431_v33 = vrot.slane %v8429_v56, 4  ;;  %v8158_v56 = vld [vmem:[#allocation3 + $0xb4] sm:$0xf] }
 0x4cc   : > { %v8434_v59 = vrot.slane %v8432_v63, 5  ;;  %v17218_v60 = vrot.slane %v8438_v0, 5  ;;  %v8444_v53 = vrot.slane %v8442_v28, 4  ;;  %v8422_v27 = vrot.slane %v8421_v52, 4 }
 0x4cd   : > { %v17221_v15 = vrot.slane %v8462_v31, 5  ;;  %v8468_v12 = vrot.slane %v8466_v32, 4  ;;  %v8393_v25 = vsel %vm14073_vm13, %v8388_v23, %v16976_v29  ;;  %v8412_v43 = vrot.slane %v8411_v20, 4 }
 0x4ce   : > { %12937 = vmatmul.mubr.msk.bf16.gmra.mrb[12].mxu1 %vm6727_vm3, %v11840_v42  ;;  %v11842_v47 = vcombine.low %v8393_v25, %v8403_v9  ;;  %v8426_v54 = vrot.slane %v8424_v13, 5  ;;  %v8455_v6 = vrot.slane %v8453_v40, 4  ;;  %v8458_v1 = vrot.slane %v8456_v55, 5 }
 0x4cf   : > { %12940 = vmatprep.mubr.msk.bf16.mxu1 %vm6727_vm3, %v11841_v17  ;;  %v8435_v10 = vor.u32 %v8434_v59, %v8431_v33  ;;  %v8445_v14 = vor.u32 %v8444_v53, %v17218_v60  ;;  %v8486_v18 = vshll.u32 %v16656_v24, 16  ;;  %v8490_v38 = vshrl.u32 %v16656_v24, 16 }
 0x4d0   : > { %v8427_v63 = vsel %vm14073_vm13, %v8422_v27, %v8426_v54  ;;  %v8469_v0 = vor.u32 %v8468_v12, %v17221_v15  ;;  %v8510_v29 = vshll.u32 %v16674_v41, 16  ;;  %v8514_v28 = vshrl.u32 %v16674_v41, 16  ;;  %v8161_v54 = vld [vmem:[#allocation3 + $0xc0] sm:$0xf] }
 0x4d1   : > { %v8417_v34 = vsel %vm14073_vm13, %v8412_v43, %v17197_v61  ;;  %v8448_v52 = vshll.u32 %v13840_v58, 16  ;;  %v8477_v31 = vshrl.u32 %v8155_v35, 16  ;;  %v8480_v32 = vshll.u32 %v8155_v35, 16 }
 0x4d2   : > { %v8459_v42 = vor.u32 %v8458_v1, %v8455_v6  ;;  %v8472_v24 = vshll.u32 %v16648_v37, 16  ;;  %v8501_v17 = vshrl.u32 %v8158_v56, 16  ;;  %v8504_v23 = vshll.u32 %v8158_v56, 16  ;;  %v13841_v56 = vld [vmem:[#allocation3 + $0xb0] sm:$0x1] }
 0x4d3   : > { %v11843_v20 = vcombine.low %v8417_v34, %v8427_v63  ;;  %v8446_v9 = vrot.slane %v8445_v14, 4  ;;  %v8488_v13 = vrot.slane %v8486_v18, 5  ;;  %v8492_v40 = vrot.slane %v8490_v38, 4 }
 0x4d4   : > { %v8436_v41 = vrot.slane %v8435_v10, 4  ;;  %v8470_v55 = vrot.slane %v8469_v0, 4  ;;  %v8512_v33 = vrot.slane %v8510_v29, 5  ;;  %v8516_v59 = vrot.slane %v8514_v28, 4 }
 0x4d5   : > { %v8450_v61 = vrot.slane %v8448_v52, 5  ;;  %v8479_v53 = vrot.slane %v8477_v31, 4  ;;  %v8482_v27 = vrot.slane %v8480_v32, 5  ;;  %v8460_v12 = vrot.slane %v8459_v42, 4 }
 0x4d6   : > { %12941 = vmatmul.mubr.msk.bf16.gmra.mrb[16].mxu1 %vm6727_vm3, %v11842_v47  ;;  %v8474_v25 = vrot.slane %v8472_v24, 5  ;;  %v8503_v37 = vrot.slane %v8501_v17, 4  ;;  %v8506_v43 = vrot.slane %v8504_v23, 5  ;;  %v8493_v1 = vor.u32 %v8492_v40, %v8488_v13 }
 0x4d7   : > { %12944 = vmatprep.mubr.msk.bf16.mxu1 %vm6727_vm3, %v11843_v20  ;;  %v8451_v6 = vsel %vm14073_vm13, %v8446_v9, %v8450_v61  ;;  %v8534_v47 = vshll.u32 %v16689_v48, 16  ;;  %v8538_v35 = vshrl.u32 %v16689_v48, 16  ;;  %v8441_v10 = vsel %vm14073_vm13, %v8436_v41, %v17218_v60  ;;  %v13842_v48 = vld [vmem:[#allocation3 + $0xbc] sm:$0x1] }
 0x4d8   : > { %v8475_v14 = vsel %vm14073_vm13, %v8470_v55, %v8474_v25  ;;  %v8517_v18 = vor.u32 %v8516_v59, %v8512_v33  ;;  %v8483_v38 = vor.u32 %v8482_v27, %v8479_v53  ;;  %v8496_v63 = vshll.u32 %v13841_v56, 16 }
 0x4d9   : > { %v8525_v0 = vshrl.u32 %v8161_v54, 16  ;;  %v8528_v29 = vshll.u32 %v8161_v54, 16  ;;  %v11844_v28 = vcombine.low %v8441_v10, %v8451_v6  ;;  %v8465_v34 = vsel %vm14073_vm13, %v8460_v12, %v17221_v15  ;;  %v13843_v12 = vld [vmem:[#allocation3 + $0xc8] sm:$0x1] }
 0x4da   : > { %v8507_v58 = vor.u32 %v8506_v43, %v8503_v37  ;;  %v8520_v52 = vshll.u32 %v13842_v48, 16  ;;  %v11845_v31 = vcombine.low %v8465_v34, %v8475_v14  ;;  %v8494_v32 = vrot.slane %v8493_v1, 4 }
 0x4db   : > { %v8536_v60 = vrot.slane %v8534_v47, 5  ;;  %v8540_v42 = vrot.slane %v8538_v35, 4  ;;  %v8518_v24 = vrot.slane %v8517_v18, 4  ;;  %v8484_v17 = vrot.slane %v8483_v38, 4 }
 0x4dc   : > { %v8498_v23 = vrot.slane %v8496_v63, 5  ;;  %v8527_v20 = vrot.slane %v8525_v0, 4  ;;  %v8530_v9 = vrot.slane %v8528_v29, 5  ;;  %v8508_v40 = vrot.slane %v8507_v58, 4 }
 0x4dd   : > { %v8522_v41 = vrot.slane %v8520_v52, 5  ;;  %v8541_v55 = vor.u32 %v8540_v42, %v8536_v60  ;;  %v8935_v61 = vrot.slane %v16765_v26, 5  ;;  %v8489_v53 = vsel %vm14073_vm13, %v8484_v17, %v8488_v13  ;;  %v8869_v26 = vld [vmem:[#allocation3 + $0xc] sm:$0xe]  ;;  %v13766_v52 = vld [vmem:[%s17760_s3 + $0xc8] sm:$0xff]   ;;  %v13768_v42 = vld [vmem:[%s17760_s3 + $0xd8] sm:$0xff]  }
 0x4de   : > { %12945 = vmatmul.mubr.msk.bf16.gmra.mrb[20].mxu1 %vm6727_vm3, %v11844_v28  ;;  %v8499_v15 = vsel %vm14073_vm13, %v8494_v32, %v8498_v23  ;;  %v8531_v27 = vor.u32 %v8530_v9, %v8527_v20  ;;  %v8544_v25 = vshll.u32 %v13843_v12, 16  ;;  %v8513_v43 = vsel %vm14073_vm13, %v8508_v40, %v8512_v33  ;;  %v18045_v32 = vld [vmem:[#allocation18_spill] sm:$0xff]  ;;  %v18048_v17 = vld [vmem:[#allocation20_spill] sm:$0xff]  ;;  %v13770_v40 = vld [vmem:[%s17760_s3 + $0xe0] sm:$0xff]  }
 0x4df   : > { %12948 = vmatprep.mubr.msk.bf16.mxu1 %vm6727_vm3, %v11845_v31  ;;  %v8523_v59 = vsel %vm14073_vm13, %v8518_v24, %v8522_v41  ;;  %v11846_v37 = vcombine.low %v8489_v53, %v8499_v15  ;;  %v8542_v6 = vrot.slane %v8541_v55, 4  ;;  %v8937_v1 = vrot.slane %v8935_v61, 4  ;;  %v18044_v31 = vld [vmem:[#allocation17_spill] sm:$0xff]  ;;  %v18047_v24 = vld [vmem:[#allocation19_spill] sm:$0xff]  ;;  %v18051_v20 = vld [vmem:[#allocation8_spill] sm:$0xff] }
 0x4e0   : > { %v11847_v54 = vcombine.low %v8513_v43, %v8523_v59  ;;  %v8532_v47 = vrot.slane %v8531_v27, 4  ;;  %v8546_v35 = vrot.slane %v8544_v25, 5  ;;  %v8938_v10 = vrot.slane %v16783_v50, 5  ;;  %v8870_v50 = vld [vmem:[#allocation3 + $0x18] sm:$0xe]  ;;  %v18053_v41 = vld [vmem:[#allocation22_spill] sm:$0xff] }
 0x4e1   : > { %v8942_v14 = vrot.slane %v16772_v46, 5  ;;  %v11869_v18 = vrot.slane %v8869_v26, 9  ;;  %v8945_v46 = vrot.slane %v16788_v22, 5  ;;  %v11870_v28 = vrot.slane %v8870_v50, 9  ;;  %v13767_v22 = vld [vmem:[%s17760_s3 + $0xd0] sm:$0xff]   ;;  %v18054_v15 = vld [vmem:[#allocation9_spill] sm:$0xff] }
 0x4e2   : > { %v8547_v13 = vsel %vm14073_vm13, %v8542_v6, %v8546_v35  ;;  %v8939_v33 = vsel %vm14509_vm8, %v8937_v1, %v8938_v10  ;;  %v8537_v38 = vsel %vm14073_vm13, %v8532_v47, %v8536_v60  ;;  %v18046_v60 = vcombine.low %v18044_v31, %v18045_v32  ;;  %v18056_v59 = vld [vmem:[#allocation10_spill] sm:$0xff]  ;;  %v18059_v27 = vld [vmem:[#allocation12_spill] sm:$0xff]  ;;  %v18060_v12 = vld [vmem:[#allocation13_spill] sm:$0xff] }
 0x4e3   : > { %v11848_v56 = vcombine.low %v8537_v38, %v8547_v13  ;;  %v8936_v63 = vsel %vm14509_vm8, %v11869_v18, %v8935_v61  ;;  %v8944_v29 = vrot.slane %v8942_v14, 4  ;;  %v8943_v58 = vsel %vm14509_vm8, %v11870_v28, %v8942_v14  ;;  %v18057_v61 = vld [vmem:[#allocation11_spill] sm:$0xff]  ;;  %v18063_v43 = vld [vmem:[#allocation16_spill] sm:$0xff]  ;;  %v18071_v13 = vld [vmem:[#allocation25_spill] sm:$0xff] }
 0x4e4   : > { %v11885_v0 = vcombine.low %v8936_v63, %v8939_v33  ;;  %v18049_v23 = vcombine.low %v18047_v24, %v18048_v17  ;;  %v18055_v55 = vcombine.low %v18053_v41, %v18054_v15  ;;  %v18058_v53 = vcombine.low %v18056_v59, %v18057_v61  ;;  %v18065_v6 = vld [vmem:[#allocation15_spill] sm:$0xff]  ;;  %v18069_v26 = vld [vmem:[#allocation24_spill] sm:$0xff]  ;;  %v18072_v14 = vld [vmem:[#allocation26_spill] sm:$0xff] }
 0x4e5   : > { %v8946_v34 = vsel %vm14509_vm8, %v8944_v29, %v8945_v46  ;;  %v18061_v25 = vcombine.low %v18059_v27, %v18060_v12  ;;  %v18066_v1 = vld [vmem:[#allocation7_spill] sm:$0xff]  ;;  %v18073_v18 = vcombine.low %v18071_v13, %v18072_v14  ;;  %v18075_v38 = vld [vmem:[#allocation28_spill] sm:$0xff]  ;;  %v18077_v63 = vld [vmem:[#allocation29_spill] sm:$0xff] }
 0x4e6   : > { %12949 = vmatmul.mubr.msk.bf16.gmra.mrb[24].mxu1 %vm6727_vm3, %v11846_v37  ;;  %v11886_v48 = vcombine.low %v8943_v58, %v8946_v34  ;;  %v18062_v37 = vld [vmem:[#allocation14_spill] sm:$0xff]  ;;  %v18067_v47 = vcombine.low %v18065_v6, %v18066_v1  ;;  %v18068_v35 = vld [vmem:[#allocation23_spill] sm:$0xff]  ;;  %v18081_v46 = vld [vmem:[#allocation32_spill] sm:$0xff] }
 0x4e7   : > { %12952 = vmatprep.mubr.msk.bf16.mxu1 %vm6727_vm3, %v11847_v54  ;;  %v18064_v54 = vcombine.low %v18062_v37, %v18063_v43  ;;  %v18070_v10 = vcombine.low %v18068_v35, %v18069_v26  ;;  %v18074_v33 = vld [vmem:[#allocation27_spill] sm:$0xff]  ;;  %v18083_v58 = vld [vmem:[#allocation33_spill] sm:$0xff]  ;;  %v13775_v32 = vld [vmem:[%s17760_s3 + $0xe8] sm:$0xff]  }
 0x4e8   : > { %v18080_v50 = vld [vmem:[#allocation31_spill] sm:$0xff]  ;;  %v13771_v31 = vld [vmem:[#allocation3 + $0x24] sm:$0xff]  }
 0x4e9   : > { %v18082_v28 = vcombine.low %v18080_v50, %v18081_v46  ;;  %v13769_v34 = vld [vmem:[#allocation3 + $0x18] sm:$0xff]   ;;  %v13785_v24 = vld [vmem:[%s17760_s3 + $0xf8] sm:$0xff]   ;;  %v13774_v17 = vld [vmem:[#allocation3 + $0x48] sm:$0xff]  }
 0x4ea   : > { %v9752_v41 = vld [vmem:[#allocation3 + $0x18] sm:$0xf]  ;;  %v9755_v61 = vld [vmem:[#allocation3 + $0x24] sm:$0xf]  ;;  %v18087_v35 = vld [vmem:[#allocation37_spill] sm:$0xff] }
 0x4eb   : > { %v18086_v15 = vld [vmem:[#allocation35_spill] sm:$0xff]  ;;  %v9801_v27 = vshrl.u32 %v9752_v41, 16  ;;  %v9804_v12 = vshll.u32 %v9752_v41, 16  ;;  %v9828_v6 = vshll.u32 %v9755_v61, 16  ;;  %v9834_v26 = vshll.u32 %v18087_v35, 16 }
 0x4ec   : > { %v9814_v59 = vshrl.u32 %v18086_v15, 16 }
 0x4ed   : > { %v9803_v1 = vrot.slane %v9801_v27, 4  ;;  %v9830_v14 = vrot.slane %v9828_v6, 5  ;;  %v17384_v50 = vrot.slane %v9834_v26, 5  ;;  %v18091_v27 = vld [vmem:[#allocation40_spill] sm:$0xff]  ;;  %v9764_v26 = vld [vmem:[#allocation3 + $0x48] sm:$0xf] }
 0x4ee   : > { %12953 = vmatmul.mubr.msk.bf16.gmra.mrb[28].mxu1 %vm6727_vm3, %v11848_v56  ;;  %v18076_v56 = vcombine.low %v18074_v33, %v18075_v38  ;;  %v9816_v43 = vrot.slane %v9814_v59, 4  ;;  %v9758_v33 = vld [vmem:[#allocation3 + $0x30] sm:$0xf]  ;;  %v13783_v38 = vld [vmem:[#allocation3 + $0x9c] sm:$0xff]   ;;  %v13786_v59 = vld [vmem:[#allocation3 + $0xb4] sm:$0xff]  }
 0x4ef   : > { %12964 = vmatprep.mubr.msk.bf16.mxu1 %vm6727_vm3, %v11885_v0  ;;  %v18078_v0 = vld [vmem:[#allocation30_spill] sm:$0xff]  ;;  %v9849_v46 = vshrl.u32 %v9758_v33, 16 }
 0x4f0   : > { %v18079_v29 = vcombine.low %v18077_v63, %v18078_v0  ;;  %v18088_v63 = vld [vmem:[#allocation36_spill] sm:$0xff] }
 0x4f1   : > { %v9820_v0 = vshll.u32 %v18088_v63, 16 }
 0x4f6   : > { %12965 = vmatmul.mubr.msk.bf16.vlgmr.msra.gmra.mrb[0].mxu1 %vm6727_vm3, %v11886_v48  ;;  %v18084_v48 = vld [vmem:[#allocation34_spill] sm:$0xff] }
 0x4f7   : > { %12997 = vmatpush3.bf16.msra.mxu1 %v17141_v8  ;;  %12968 = vmatprep.mubr.msk.bf16.mxu1 %vm6727_vm3, %v18046_v60  ;;  %v18050_v8 = vld [vmem:[#allocation21_spill] sm:$0xff]  ;;  %v13772_v60 = vld [vmem:[#allocation3 + $0x30] sm:$0xff]  }
 0x4f8   : > { %12998 = vmatprep.subr.bf16.mxu1 %v13766_v52  ;;  %v18052_v9 = vcombine.low %v18050_v8, %v18051_v20  ;;  %v13776_v8 = vld [vmem:[#allocation3 + $0x54] sm:$0xff]   ;;  %v13777_v20 = vld [vmem:[#allocation3 + $0x60] sm:$0xff]  }
 0x4fb   : > { %12999 = vmatpush3.bf16.msra.mxu1 %v13766_v52  ;;  %v18085_v52 = vcombine.low %v18083_v58, %v18084_v48  ;;  %v9852_v48 = vshll.u32 %v9758_v33, 16  ;;  %v17411_v33 = vld [vmem:[#allocation3 + $0xd0] sm:$0xf] }
 0x4fc   : > { %13000 = vmatprep.subr.bf16.mxu1 %v13767_v22 }
 0x4fd   : > { %v9854_v41 = vrot.slane %v9852_v48, 5 }
 0x4fe   : > { %12969 = vmatmul.mubr.msk.bf16.gmra.mrb[4].mxu1 %vm6727_vm3, %v18049_v23  ;;  %v17370_v23 = vld [vmem:[%s17760_s3 + $0x100] sm:$0xff]  }
 0x4ff   : > { %12972 = vmatprep.mubr.msk.bf16.mxu1 %vm6727_vm3, %v18052_v9  ;;  %13001 = vmatpush3.bf16.msra.mxu1 %v13767_v22  ;;  %v13780_v22 = vld [vmem:[%s17760_s3 + $0xf0] sm:$0xff]   ;;  %v13778_v9 = vld [vmem:[#allocation3 + $0x6c] sm:$0xff]  }
 0x500   : > { %13002 = vmatprep.subr.bf16.mxu1 %v13768_v42 }
 0x503   : > { %13003 = vmatpush3.bf16.msra.mxu1 %v13768_v42  ;;  %v13773_v42 = vld [vmem:[#allocation3 + $0x3c] sm:$0xff]  }
 0x504   : > { %13036 = vmatprep.subr.bf16.mxu1 %v13770_v40 }
 0x506   : > { %12973 = vmatmul.mubr.msk.bf16.gmra.mrb[8].mxu1 %vm6727_vm3, %v18055_v55  ;;  %v9810_v55 = vshll.u32 %v18086_v15, 16 }
 0x507   : > { %12976 = vmatprep.mubr.msk.bf16.mxu1 %vm6727_vm3, %v18058_v53  ;;  %v13781_v53 = vld [vmem:[#allocation3 + $0x84] sm:$0xff]  }
 0x508   : > { %v9812_v37 = vrot.slane %v9810_v55, 5 }
 0x50e   : > { %12977 = vmatmul.mubr.msk.bf16.gmra.mrb[12].mxu1 %vm6727_vm3, %v18061_v25  ;;  %v13782_v25 = vld [vmem:[#allocation3 + $0x90] sm:$0xff]  }
 0x50f   : > { %12980 = vmatprep.mubr.msk.bf16.mxu1 %vm6727_vm3, %v18064_v54  ;;  %v9825_v54 = vshrl.u32 %v9755_v61, 16 }
 0x511   : > { %v9827_v13 = vrot.slane %v9825_v54, 4 }
 0x516   : > { %12981 = vmatmul.mubr.msk.bf16.gmra.mrb[16].mxu1 %vm6727_vm3, %v18067_v47  ;;  %v9806_v47 = vrot.slane %v9804_v12, 5  ;;  %v9868_v12 = vshll.u32 %v18091_v27, 16 }
 0x517   : > { %12984 = vmatprep.mubr.msk.bf16.mxu1 %vm6727_vm3, %v18070_v10  ;;  %v9817_v10 = vor.u32 %v9816_v43, %v9812_v37  ;;  %v13787_v43 = vld [vmem:[#allocation3 + $0xc0] sm:$0xff]  }
 0x51e   : > { %12985 = vmatmul.mubr.msk.bf16.gmra.mrb[20].mxu1 %vm6727_vm3, %v18073_v18  ;;  %v9838_v18 = vshrl.u32 %v18087_v35, 16 }
 0x51f   : > { %12988 = vmatprep.mubr.msk.bf16.mxu1 %vm6727_vm3, %v18076_v56  ;;  %v9807_v56 = vor.u32 %v9806_v47, %v9803_v1  ;;  %v18092_v1 = vld [vmem:[#allocation41_spill] sm:$0xff] }
 0x520   : > { %v9840_v58 = vrot.slane %v9838_v18, 4  ;;  %v9882_v47 = vshll.u32 %v18092_v1, 16  ;;  %v9886_v35 = vshrl.u32 %v18092_v1, 16 }
 0x526   : > { %12989 = vmatmul.mubr.msk.bf16.gmra.mrb[24].mxu1 %vm6727_vm3, %v18079_v29  ;;  %v13784_v29 = vld [vmem:[#allocation3 + $0xa8] sm:$0xff]  }
 0x527   : > { %12992 = vmatprep.mubr.msk.bf16.mxu1 %vm6727_vm3, %v18082_v28  ;;  %v9818_v28 = vrot.slane %v9817_v10, 4 }
 0x52e   : > { %12993 = vmatmul.mubr.msk.bf16.gmra.mrb[28].mxu1 %vm6727_vm3, %v18085_v52  ;;  %v18089_v52 = vld [vmem:[#allocation38_spill] sm:$0xff] }
 0x52f   : > { %13004 = vmatprep.mubr.msk.bf16.mxu1 %vm6727_vm3, %v13769_v34  ;;  %v9831_v34 = vor.u32 %v9830_v14, %v9827_v13  ;;  %v18093_v14 = vld [vmem:[#allocation42_spill] sm:$0xff] }
 0x530   : > { %v9906_v18 = vshll.u32 %v18093_v14, 16  ;;  %v9910_v63 = vshrl.u32 %v18093_v14, 16 }
 0x536   : > { %13005 = vmatmul.mubr.msk.bf16.vlgmr.msra.gmra.mrb[0].mxu1 %vm6727_vm3, %v13771_v31  ;;  %v9858_v31 = vshll.u32 %v18089_v52, 16 }
 0x537   : > { %13037 = vmatpush3.bf16.msra.mxu1 %v13770_v40  ;;  %13008 = vmatprep.mubr.msk.bf16.mxu1 %vm6727_vm3, %v13772_v60  ;;  %v13779_v40 = vld [vmem:[#allocation3 + $0x78] sm:$0xff]   ;;  %v9808_v60 = vrot.slane %v9807_v56, 4 }
 0x538   : > { %13038 = vmatprep.subr.bf16.mxu1 %v13775_v32  ;;  %v17396_v15 = vrot.slane %v9858_v31, 5 }
 0x539   : > { %v9813_v61 = vsel %vm14073_vm13, %v9808_v60, %v9812_v37  ;;  %v9888_v60 = vrot.slane %v9886_v35, 4  ;;  %v18095_v35 = vld [vmem:[#allocation45_spill] sm:$0xff] }
 0x53b   : > { %13039 = vmatpush3.bf16.msra.mxu1 %v13775_v32  ;;  %v9862_v32 = vshrl.u32 %v18089_v52, 16 }
 0x53c   : > { %13040 = vmatprep.subr.bf16.mxu1 %v13780_v22 }
 0x53d   : > { %v9864_v55 = vrot.slane %v9862_v32, 4  ;;  %v17422_v32 = vrot.slane %v9882_v47, 5 }
 0x53e   : > { %13009 = vmatmul.mubr.msk.bf16.gmra.mrb[4].mxu1 %vm6727_vm3, %v13773_v42  ;;  %v18090_v42 = vld [vmem:[#allocation39_spill] sm:$0xff] }
 0x53f   : > { %13012 = vmatprep.mubr.msk.bf16.mxu1 %vm6727_vm3, %v13774_v17  ;;  %13041 = vmatpush3.bf16.msra.mxu1 %v13780_v22  ;;  %v9822_v22 = vrot.slane %v9820_v0, 5  ;;  %v9851_v17 = vrot.slane %v9849_v46, 4  ;;  %v9865_v56 = vor.u32 %v9864_v55, %v17396_v15  ;;  %v10520_v0 = vld [vmem:[#allocation3 + $0xcc] sm:$0xe] }
 0x540   : > { %13042 = vmatprep.subr.bf16.mxu1 %v13785_v24  ;;  %v12008_v52 = vrot.slane %v10520_v0, 9 }
 0x541   : > { %v9855_v13 = vor.u32 %v9854_v41, %v9851_v17  ;;  %v9900_v17 = vshll.u32 %v9764_v26, 16  ;;  %v9866_v47 = vrot.slane %v9865_v56, 4 }
 0x543   : > { %13043 = vmatpush3.bf16.msra.mxu1 %v13785_v24  ;;  %v9844_v24 = vshll.u32 %v18090_v42, 16  ;;  %v13788_v42 = vld [vmem:[#allocation3 + $0xcc] sm:$0xff]   ;;  %v9856_v1 = vrot.slane %v9855_v13, 4  ;;  %v18096_v13 = vld [vmem:[#allocation52_spill] sm:$0xff] }
 0x544   : > { %13076 = vmatprep.subr.bf16.mxu1 %v17370_v23  ;;  %v9954_v56 = vshll.u32 %v18096_v13, 16 }
 0x546   : > { %13013 = vmatmul.mubr.msk.bf16.gmra.mrb[8].mxu1 %vm6727_vm3, %v13776_v8  ;;  %v9761_v8 = vld [vmem:[#allocation3 + $0x3c] sm:$0xf] }
 0x547   : > { %13016 = vmatprep.mubr.msk.bf16.mxu1 %vm6727_vm3, %v13777_v20  ;;  %v9823_v20 = vsel %vm14073_vm13, %v9818_v28, %v9822_v22  ;;  %v9876_v6 = vshll.u32 %v9761_v8, 16  ;;  %v9767_v28 = vld [vmem:[#allocation3 + $0x54] sm:$0xf] }
 0x548   : > { %v11957_v54 = vcombine.low %v9813_v61, %v9823_v20  ;;  %v9924_v41 = vshll.u32 %v9767_v28, 16 }
 0x549   : > { %v9878_v31 = vrot.slane %v9876_v6, 5 }
 0x54e   : > { %13017 = vmatmul.mubr.msk.bf16.gmra.mrb[12].mxu1 %vm6727_vm3, %v13778_v9  ;;  %v17393_v9 = vrot.slane %v9831_v34, 4  ;;  %v18094_v34 = vld [vmem:[#allocation47_spill] sm:$0xff] }
 0x54f   : > { %13020 = vmatprep.mubr.msk.bf16.mxu1 %vm6727_vm3, %v13779_v40  ;;  %v9841_v40 = vor.u32 %v9840_v58, %v17384_v50  ;;  %v9930_v58 = vshll.u32 %v18094_v34, 16  ;;  %v9934_v48 = vshrl.u32 %v18094_v34, 16 }
 0x550   : > { %v9837_v37 = vsel %vm14073_vm13, %v17393_v9, %v17384_v50  ;;  %v9912_v9 = vrot.slane %v9910_v63, 4 }
 0x551   : > { %v9842_v10 = vrot.slane %v9841_v40, 4  ;;  %v9921_v40 = vshrl.u32 %v9767_v28, 16  ;;  %v17434_v61 = vrot.slane %v9930_v58, 5  ;;  %v9936_v27 = vrot.slane %v9934_v48, 4  ;;  %v18097_v58 = vld [vmem:[#allocation46_spill] sm:$0xff] }
 0x552   : > { %v9958_v28 = vshrl.u32 %v18096_v13, 16  ;;  %v9916_v48 = vshll.u32 %v18097_v58, 16 }
 0x553   : > { %v9923_v0 = vrot.slane %v9921_v40, 4 }
 0x556   : > { %13021 = vmatmul.mubr.msk.bf16.gmra.mrb[16].mxu1 %vm6727_vm3, %v13781_v53  ;;  %v17400_v53 = vrot.slane %v9844_v24, 5  ;;  %v9897_v24 = vshrl.u32 %v9764_v26, 16  ;;  %v9892_v26 = vshll.u32 %v18095_v35, 16 }
 0x557   : > { %13024 = vmatprep.mubr.msk.bf16.mxu1 %vm6727_vm3, %v13782_v25  ;;  %v9873_v25 = vshrl.u32 %v9761_v8, 16  ;;  %v17424_v8 = vrot.slane %v9906_v18, 5  ;;  %v9902_v18 = vrot.slane %v9900_v17, 5 }
 0x558   : > { %v9847_v6 = vsel %vm14073_vm13, %v9842_v10, %v17400_v53  ;;  %v9899_v14 = vrot.slane %v9897_v24, 4  ;;  %v9937_v53 = vor.u32 %v9936_v27, %v17434_v61 }
 0x559   : > { %v9875_v50 = vrot.slane %v9873_v25, 4  ;;  %v9770_v25 = vld [vmem:[#allocation3 + $0x60] sm:$0xf]  ;;  %v9913_v63 = vor.u32 %v9912_v9, %v17424_v8  ;;  %v11958_v34 = vcombine.low %v9837_v37, %v9847_v6  ;;  %v13790_v37 = vld [vmem:[%s17760_s3 + $0x108] sm:$0xff]  }
 0x55a   : > { %v9948_v10 = vshll.u32 %v9770_v25, 16  ;;  %v9903_v24 = vor.u32 %v9902_v18, %v9899_v14 }
 0x55b   : > { %v9879_v11 = vor.u32 %v9878_v31, %v9875_v50  ;;  %v9861_v50 = vsel %vm14073_vm13, %v9856_v1, %v17396_v15  ;;  %v9914_v17 = vrot.slane %v9913_v63, 4  ;;  %v9938_v15 = vrot.slane %v9937_v53, 4  ;;  %v9776_v63 = vld [vmem:[#allocation3 + $0x78] sm:$0xf] }
 0x55c   : > { %v9950_v27 = vrot.slane %v9948_v10, 5  ;;  %v9918_v1 = vrot.slane %v9916_v48, 5  ;;  %v9996_v58 = vshll.u32 %v9776_v63, 16 }
 0x55e   : > { %13025 = vmatmul.mubr.msk.bf16.gmra.mrb[20].mxu1 %vm6727_vm3, %v13783_v38  ;;  %v17413_v38 = vld [vmem:[#allocation3 + $0xd4] sm:$0x1] }
 0x55f   : > { %13028 = vmatprep.mubr.msk.bf16.mxu1 %vm6727_vm3, %v13784_v29  ;;  %v10676_v29 = vrot.slane %v17411_v33, 5  ;;  %v10679_v46 = vrot.slane %v17413_v38, 5 }
 0x561   : > { %v10678_v22 = vrot.slane %v10676_v29, 4  ;;  %v17428_v20 = vsel %vm14509_vm8, %v12008_v52, %v10676_v29  ;;  %v9926_v29 = vrot.slane %v9924_v41, 5  ;;  %v9880_v52 = vrot.slane %v9879_v11, 4  ;;  %v9773_v41 = vld [vmem:[#allocation3 + $0x6c] sm:$0xf] }
 0x562   : > { %v9969_v14 = vshrl.u32 %v9773_v41, 16  ;;  %v9972_v18 = vshll.u32 %v9773_v41, 16 }
 0x563   : > { %v17432_v55 = vsel %vm14509_vm8, %v10678_v22, %v10679_v46  ;;  %v9945_v46 = vshrl.u32 %v9770_v25, 16  ;;  %v18098_v22 = vld [vmem:[#allocation50_spill] sm:$0xff]  ;;  %v9927_v9 = vor.u32 %v9926_v29, %v9923_v0  ;;  %v17459_v25 = vrot.slane %v9954_v56, 5  ;;  %v18100_v56 = vld [vmem:[#allocation55_spill] sm:$0xff] }
 0x564   : > { %v9885_v11 = vsel %vm14073_vm13, %v9880_v52, %v17422_v32  ;;  %v9904_v29 = vrot.slane %v9903_v24, 4  ;;  %v9971_v48 = vrot.slane %v9969_v14, 4  ;;  %v9974_v52 = vrot.slane %v9972_v18, 5 }
 0x565   : > { %v9947_v40 = vrot.slane %v9945_v46, 4  ;;  %v9919_v46 = vsel %vm14073_vm13, %v9914_v17, %v9918_v1  ;;  %v9928_v53 = vrot.slane %v9927_v9, 4 }
 0x566   : > { %13029 = vmatmul.mubr.msk.bf16.gmra.mrb[24].mxu1 %vm6727_vm3, %v13786_v59  ;;  %v9870_v59 = vrot.slane %v9868_v12, 5  ;;  %v9889_v12 = vor.u32 %v9888_v60, %v17422_v32  ;;  %v9894_v60 = vrot.slane %v9892_v26, 5  ;;  %v9909_v24 = vsel %vm14073_vm13, %v9904_v29, %v17424_v8 }
 0x567   : > { %13032 = vmatprep.mubr.msk.bf16.mxu1 %vm6727_vm3, %v13787_v43  ;;  %v12024_v43 = vcombine.low %v17428_v20, %v17432_v55  ;;  %v9951_v10 = vor.u32 %v9950_v27, %v9947_v40  ;;  %v9933_v17 = vsel %vm14073_vm13, %v9928_v53, %v17434_v61  ;;  %v11961_v9 = vcombine.low %v9909_v24, %v9919_v46  ;;  %v9779_v27 = vld [vmem:[#allocation3 + $0x84] sm:$0xf]  ;;  %v18103_v53 = vld [vmem:[#allocation63_spill] sm:$0xff] }
 0x568   : > { %v9890_v31 = vrot.slane %v9889_v12, 4  ;;  %v9998_v8 = vrot.slane %v9996_v58, 5  ;;  %v9975_v61 = vor.u32 %v9974_v52, %v9971_v48  ;;  %v10017_v14 = vshrl.u32 %v9779_v27, 16 }
 0x569   : > { %v9952_v41 = vrot.slane %v9951_v10, 4  ;;  %v10020_v18 = vshll.u32 %v9779_v27, 16  ;;  %v10054_v10 = vshrl.u32 %v18103_v53, 16 }
 0x56a   : > { %v9895_v0 = vsel %vm14073_vm13, %v9890_v31, %v9894_v60  ;;  %v18101_v31 = vld [vmem:[#allocation58_spill] sm:$0xff]  ;;  %v10019_v52 = vrot.slane %v10017_v14, 4  ;;  %v13845_v14 = vld [vmem:[#allocation3 + $0x8c] sm:$0x1] }
 0x56b   : > { %v10002_v60 = vshll.u32 %v18101_v31, 16 }
 0x56e   : > { %13033 = vmatmul.mubr.msk.bf16.gmra.mrb[28].mxu1 %vm6727_vm3, %v13788_v42  ;;  %v9940_v42 = vshll.u32 %v18098_v22, 16  ;;  %v10006_v22 = vshrl.u32 %v18101_v31, 16  ;;  %v10022_v31 = vrot.slane %v10020_v18, 5  ;;  %v10036_v18 = vshll.u32 %v13845_v14, 16  ;;  %v9794_v14 = vld [vmem:[#allocation3 + $0xc0] sm:$0xf] }
 0x56f   : > { %13044 = vmatprep.mubr.msk.bf16.mxu1 %vm6727_vm3, %v11957_v54  ;;  %v9871_v54 = vsel %vm14073_vm13, %v9866_v47, %v9870_v59  ;;  %v9960_v59 = vrot.slane %v9958_v28, 4  ;;  %v18099_v47 = vld [vmem:[#allocation56_spill] sm:$0xff]  ;;  %v9964_v28 = vshll.u32 %v18100_v56, 16 }
 0x570   : > { %v11959_v6 = vcombine.low %v9861_v50, %v9871_v54  ;;  %v9978_v35 = vshll.u32 %v18099_v47, 16  ;;  %v9982_v26 = vshrl.u32 %v18099_v47, 16  ;;  %v9942_v12 = vrot.slane %v9940_v42, 5 }
 0x571   : > { %v9961_v13 = vor.u32 %v9960_v59, %v17459_v25  ;;  %v9993_v54 = vshrl.u32 %v9776_v63, 16  ;;  %v11960_v42 = vcombine.low %v9885_v11, %v9895_v0  ;;  %v13792_v59 = vld [vmem:[%s17760_s3 + $0x118] sm:$0xff]   ;;  %v17496_v11 = vrot.slane %v10002_v60, 5 }
 0x572   : > { %v9943_v32 = vsel %vm14073_vm13, %v9938_v15, %v9942_v12  ;;  %v9984_v50 = vrot.slane %v9982_v26, 4  ;;  %v9966_v15 = vrot.slane %v9964_v28, 5  ;;  %v10008_v12 = vrot.slane %v10006_v22, 4 }
 0x573   : > { %v11962_v40 = vcombine.low %v9933_v17, %v9943_v32  ;;  %v9995_v47 = vrot.slane %v9993_v54, 4  ;;  %v10026_v63 = vshll.u32 %v17031_v16, 16  ;;  %v10030_v0 = vshrl.u32 %v17031_v16, 16 }
 0x574   : > { %v10050_v32 = vshll.u32 %v18103_v53, 16  ;;  %v9976_v54 = vrot.slane %v9975_v61, 4  ;;  %v10009_v16 = vor.u32 %v10008_v12, %v17496_v11  ;;  %v10056_v17 = vrot.slane %v10054_v10, 4  ;;  %v13847_v53 = vld [vmem:[#allocation3 + $0x98] sm:$0x1] }
 0x575   : > { %v17509_v60 = vrot.slane %v10026_v63, 5  ;;  %v10032_v22 = vrot.slane %v10030_v0, 4  ;;  %v13848_v10 = vld [vmem:[#allocation3 + $0xac] sm:$0xf] }
 0x576   : > { %13045 = vmatmul.mubr.msk.bf16.vlgmr.msra.gmra.mrb[0].mxu1 %vm6727_vm3, %v11958_v34  ;;  %v17480_v34 = vrot.slane %v9978_v35, 5  ;;  %v9782_v35 = vld [vmem:[#allocation3 + $0x90] sm:$0xf] }
 0x577   : > { %13077 = vmatpush3.bf16.msra.mxu1 %v17370_v23  ;;  %13048 = vmatprep.mubr.msk.bf16.mxu1 %vm6727_vm3, %v11959_v6  ;;  %v13791_v23 = vld [vmem:[%s17760_s3 + $0x110] sm:$0xff]   ;;  %v9962_v6 = vrot.slane %v9961_v13, 4  ;;  %v10041_v29 = vshrl.u32 %v9782_v35, 16  ;;  %v10044_v46 = vshll.u32 %v9782_v35, 16  ;;  %v9957_v13 = vsel %vm14073_vm13, %v9952_v41, %v17459_v25 }
 0x578   : > { %13078 = vmatprep.subr.bf16.mxu1 %v13790_v37  ;;  %v9985_v1 = vor.u32 %v9984_v50, %v17480_v34  ;;  %v9999_v50 = vor.u32 %v9998_v8, %v9995_v47  ;;  %v17511_v25 = vrot.slane %v10050_v32, 5  ;;  %v10033_v47 = vor.u32 %v10032_v22, %v17509_v60 }
 0x579   : > { %v9967_v56 = vsel %vm14073_vm13, %v9962_v6, %v9966_v15  ;;  %v10046_v24 = vrot.slane %v10044_v46, 5  ;;  %v9981_v6 = vsel %vm14073_vm13, %v9976_v54, %v17480_v34  ;;  %v13846_v34 = vld [vmem:[#allocation3 + $0xa0] sm:$0xf]  ;;  %v10060_v32 = vshll.u32 %v13847_v53, 16 }
 0x57a   : > { %v9986_v28 = vrot.slane %v9985_v1, 4  ;;  %v11963_v41 = vcombine.low %v9957_v13, %v9967_v56  ;;  %v10000_v27 = vrot.slane %v9999_v50, 4  ;;  %v10010_v1 = vrot.slane %v10009_v16, 4 }
 0x57b   : > { %13079 = vmatpush3.bf16.msra.mxu1 %v13790_v37  ;;  %v18102_v37 = vld [vmem:[#allocation59_spill] sm:$0xff]  ;;  %v10057_v12 = vor.u32 %v10056_v17, %v17511_v25  ;;  %v10074_v63 = vshll.u32 %v13846_v34, 16  ;;  %v10078_v0 = vshrl.u32 %v13846_v34, 16  ;;  %v10098_v13 = vshll.u32 %v13848_v10, 16 }
 0x57c   : > { %13080 = vmatprep.subr.bf16.mxu1 %v13791_v23  ;;  %v9988_v26 = vshll.u32 %v18102_v37, 16  ;;  %v10102_v56 = vshrl.u32 %v13848_v10, 16  ;;  %v10034_v50 = vrot.slane %v10033_v47, 4 }
 0x57d   : > { %v17527_v22 = vrot.slane %v10074_v63, 5  ;;  %v17530_v17 = vrot.slane %v10098_v13, 5  ;;  %v13851_v63 = vld [vmem:[#allocation3 + $0xc4] sm:$0xf]  ;;  %v13852_v13 = vld [vmem:[#allocation3 + $0xb0] sm:$0x1] }
 0x57e   : > { %13049 = vmatmul.mubr.msk.bf16.gmra.mrb[4].mxu1 %vm6727_vm3, %v11960_v42  ;;  %v9990_v58 = vrot.slane %v9988_v26, 5  ;;  %v10043_v42 = vrot.slane %v10041_v29, 4  ;;  %v9788_v29 = vld [vmem:[#allocation3 + $0xa8] sm:$0xf] }
 0x57f   : > { %13052 = vmatprep.mubr.msk.bf16.mxu1 %vm6727_vm3, %v11961_v9  ;;  %13081 = vmatpush3.bf16.msra.mxu1 %v13791_v23  ;;  %v13844_v23 = vld [vmem:[#allocation3 + $0x80] sm:$0x1]  ;;  %v9785_v9 = vld [vmem:[#allocation3 + $0x9c] sm:$0xf] }
 0x580   : > { %13082 = vmatprep.subr.bf16.mxu1 %v13792_v59  ;;  %v10012_v48 = vshll.u32 %v13844_v23, 16  ;;  %v9991_v15 = vsel %vm14073_vm13, %v9986_v28, %v9990_v58  ;;  %v10065_v8 = vshrl.u32 %v9785_v9, 16  ;;  %v10068_v35 = vshll.u32 %v9785_v9, 16 }
 0x581   : > { %v11964_v61 = vcombine.low %v9981_v6, %v9991_v15  ;;  %v10047_v26 = vor.u32 %v10046_v24, %v10043_v42  ;;  %v10089_v23 = vshrl.u32 %v9788_v29, 16  ;;  %v10080_v42 = vrot.slane %v10078_v0, 4 }
 0x582   : > { %v10014_v37 = vrot.slane %v10012_v48, 5  ;;  %v10067_v54 = vrot.slane %v10065_v8, 4  ;;  %v10070_v58 = vrot.slane %v10068_v35, 5  ;;  %v10092_v48 = vshll.u32 %v9788_v29, 16 }
 0x583   : > { %13083 = vmatpush3.bf16.msra.mxu1 %v13792_v59  ;;  %v10023_v59 = vor.u32 %v10022_v31, %v10019_v52  ;;  %v10048_v16 = vrot.slane %v10047_v26, 4  ;;  %v10038_v31 = vrot.slane %v10036_v18, 5  ;;  %v10062_v24 = vrot.slane %v10060_v32, 5 }
 0x584   : > { %v10015_v46 = vsel %vm14073_vm13, %v10010_v1, %v10014_v37  ;;  %v10104_v9 = vrot.slane %v10102_v56, 4  ;;  %v10071_v6 = vor.u32 %v10070_v58, %v10067_v54  ;;  %v13849_v1 = vld [vmem:[#allocation3 + $0xa4] sm:$0x1]  ;;  %v10091_v35 = vrot.slane %v10089_v23, 4  ;;  %v9797_v54 = vld [vmem:[#allocation3 + $0xcc] sm:$0xf] }
 0x585   : > { %v10024_v28 = vrot.slane %v10023_v59, 4  ;;  %v10084_v59 = vshll.u32 %v13849_v1, 16  ;;  %v10053_v47 = vsel %vm14073_vm13, %v10048_v16, %v17511_v25  ;;  %v10081_v37 = vor.u32 %v10080_v42, %v17527_v22 }
 0x586   : > { %13053 = vmatmul.mubr.msk.bf16.gmra.mrb[8].mxu1 %vm6727_vm3, %v11962_v40  ;;  %v10005_v40 = vsel %vm14073_vm13, %v10000_v27, %v17496_v11  ;;  %v10058_v11 = vrot.slane %v10057_v12, 4  ;;  %v10039_v27 = vsel %vm14073_vm13, %v10034_v50, %v10038_v31  ;;  %v13850_v12 = vld [vmem:[#allocation3 + $0xb8] sm:$0xf]  ;;  %v10105_v18 = vor.u32 %v10104_v9, %v17530_v17 }
 0x587   : > { %13056 = vmatprep.mubr.msk.bf16.mxu1 %vm6727_vm3, %v11963_v41  ;;  %v11965_v52 = vcombine.low %v10005_v40, %v10015_v46  ;;  %v9791_v41 = vld [vmem:[#allocation3 + $0xb4] sm:$0xf]  ;;  %v10029_v15 = vsel %vm14073_vm13, %v10024_v28, %v17509_v60  ;;  %v10122_v60 = vshll.u32 %v13850_v12, 16  ;;  %v10126_v40 = vshrl.u32 %v13850_v12, 16 }
 0x588   : > { %v10063_v8 = vsel %vm14073_vm13, %v10058_v11, %v10062_v24  ;;  %v10113_v26 = vshrl.u32 %v9791_v41, 16  ;;  %v10116_v34 = vshll.u32 %v9791_v41, 16  ;;  %v10146_v0 = vshll.u32 %v13851_v63, 16 }
 0x589   : > { %v10150_v29 = vshrl.u32 %v13851_v63, 16  ;;  %v11966_v46 = vcombine.low %v10029_v15, %v10039_v27  ;;  %v11967_v25 = vcombine.low %v10053_v47, %v10063_v8  ;;  %v10072_v53 = vrot.slane %v10071_v6, 4 }
 0x58a   : > { %v10086_v32 = vrot.slane %v10084_v59, 5  ;;  %v10108_v56 = vshll.u32 %v13852_v13, 16  ;;  %v10137_v28 = vshrl.u32 %v9794_v14, 16  ;;  %v10140_v50 = vshll.u32 %v9794_v14, 16 }
 0x58b   : > { %v10082_v58 = vrot.slane %v10081_v37, 4  ;;  %v10115_v16 = vrot.slane %v10113_v26, 4  ;;  %v10124_v11 = vrot.slane %v10122_v60, 5  ;;  %v10128_v23 = vrot.slane %v10126_v40, 4  ;;  %v13853_v26 = vld [vmem:[#allocation3 + $0xbc] sm:$0x1] }
 0x58c   : > { %v10148_v31 = vrot.slane %v10146_v0, 5  ;;  %v10152_v42 = vrot.slane %v10150_v29, 4  ;;  %v10161_v24 = vshrl.u32 %v9797_v54, 16  ;;  %v10164_v9 = vshll.u32 %v9797_v54, 16  ;;  %v13854_v0 = vld [vmem:[#allocation3 + $0xc8] sm:$0x1] }
 0x58d   : > { %v10170_v41 = vshll.u32 %v17411_v33, 16  ;;  %v10174_v15 = vshrl.u32 %v17411_v33, 16  ;;  %v10110_v6 = vrot.slane %v10108_v56, 5  ;;  %v10139_v1 = vrot.slane %v10137_v28, 4 }
 0x58e   : > { %13057 = vmatmul.mubr.msk.bf16.gmra.mrb[12].mxu1 %vm6727_vm3, %v11964_v61  ;;  %v10094_v61 = vrot.slane %v10092_v48, 5  ;;  %v10106_v48 = vrot.slane %v10105_v18, 4  ;;  %v10142_v59 = vrot.slane %v10140_v50, 5  ;;  %v10077_v47 = vsel %vm14073_vm13, %v10072_v53, %v17527_v22 }
 0x58f   : > { %13060 = vmatprep.mubr.msk.bf16.mxu1 %vm6727_vm3, %v11965_v52  ;;  %v10118_v52 = vrot.slane %v10116_v34, 5  ;;  %v10087_v8 = vsel %vm14073_vm13, %v10082_v58, %v10086_v32  ;;  %v10132_v12 = vshll.u32 %v13853_v26, 16  ;;  %v10153_v60 = vor.u32 %v10152_v42, %v10148_v31  ;;  %v18116_v26 = vld [vmem:[#allocation60_spill] sm:$0xff] }
 0x590   : > { %v10095_v10 = vor.u32 %v10094_v61, %v10091_v35  ;;  %v10129_v35 = vor.u32 %v10128_v23, %v10124_v11  ;;  %v10111_v61 = vsel %vm14073_vm13, %v10106_v48, %v10110_v6  ;;  %v10163_v33 = vrot.slane %v10161_v24, 4 }
 0x591   : > { %v10119_v37 = vor.u32 %v10118_v52, %v10115_v16  ;;  %v10166_v40 = vrot.slane %v10164_v9, 5  ;;  %v10172_v14 = vrot.slane %v10170_v41, 5  ;;  %v10176_v18 = vrot.slane %v10174_v15, 4 }
 0x592   : > { %v10096_v27 = vrot.slane %v10095_v10, 4  ;;  %v11968_v34 = vcombine.low %v10077_v47, %v10087_v8  ;;  %v10143_v63 = vor.u32 %v10142_v59, %v10139_v1  ;;  %v10156_v29 = vshll.u32 %v13854_v0, 16  ;;  %v18108_v1 = vld [vmem:[#allocation49_spill] sm:$0xff]  ;;  %v18110_v47 = vld [vmem:[#allocation51_spill] sm:$0xff]  ;;  %v18126_v0 = vld [vmem:[#allocation68_spill] sm:$0xff] }
 0x593   : > { %v10134_v53 = vrot.slane %v10132_v12, 5  ;;  %v10154_v32 = vrot.slane %v10153_v60, 4  ;;  %v10120_v10 = vrot.slane %v10119_v37, 4  ;;  %v10167_v13 = vor.u32 %v10166_v40, %v10163_v33  ;;  %v18111_v8 = vld [vmem:[#allocation53_spill] sm:$0xff]  ;;  %v18119_v33 = vld [vmem:[#allocation62_spill] sm:$0xff]  ;;  %v18120_v40 = vld [vmem:[#allocation64_spill] sm:$0xff] }
 0x594   : > { %v10101_v22 = vsel %vm14073_vm13, %v10096_v27, %v17530_v17  ;;  %v10177_v56 = vor.u32 %v10176_v18, %v10172_v14  ;;  %v10180_v28 = vshll.u32 %v17413_v38, 16  ;;  %v10144_v50 = vrot.slane %v10143_v63, 4  ;;  %v18105_v27 = vld [vmem:[#allocation44_spill] sm:$0xff]  ;;  %v18117_v12 = vld [vmem:[#allocation61_spill] sm:$0xff]  ;;  %v18125_v63 = vld [vmem:[#allocation67_spill] sm:$0xff] }
 0x595   : > { %v10158_v54 = vrot.slane %v10156_v29, 5  ;;  %v10125_v16 = vsel %vm14073_vm13, %v10120_v10, %v10124_v11  ;;  %v10168_v23 = vrot.slane %v10167_v13, 4  ;;  %v18104_v11 = vld [vmem:[#allocation43_spill] sm:$0xff]  ;;  %v18118_v60 = vcombine.low %v18116_v26, %v18117_v12  ;;  %v18122_v18 = vld [vmem:[#allocation65_spill] sm:$0xff] }
 0x596   : > { %13061 = vmatmul.mubr.msk.bf16.gmra.mrb[16].mxu1 %vm6727_vm3, %v11966_v46  ;;  %v11969_v46 = vcombine.low %v10101_v22, %v10111_v61  ;;  %v10178_v48 = vrot.slane %v10177_v56, 4  ;;  %v10182_v52 = vrot.slane %v10180_v28, 5  ;;  %v10149_v24 = vsel %vm14073_vm13, %v10144_v50, %v10148_v31  ;;  %v18107_v31 = vld [vmem:[#allocation48_spill] sm:$0xff]  ;;  %v18114_v61 = vld [vmem:[#allocation57_spill] sm:$0xff]  ;;  %v18132_v10 = vld [vmem:[#allocation71_spill] sm:$0xff] }
 0x597   : > { %13064 = vmatprep.mubr.msk.bf16.mxu1 %vm6727_vm3, %v11967_v25  ;;  %v10130_v25 = vrot.slane %v10129_v35, 4  ;;  %v10159_v58 = vsel %vm14073_vm13, %v10154_v32, %v10158_v54  ;;  %v10173_v38 = vsel %vm14073_vm13, %v10168_v23, %v10172_v14  ;;  %v18106_v6 = vcombine.low %v18104_v11, %v18105_v27 }
 0x598   : > { %v11971_v9 = vcombine.low %v10149_v24, %v10159_v58  ;;  %v10183_v41 = vsel %vm14073_vm13, %v10178_v48, %v10182_v52  ;;  %v18109_v59 = vcombine.low %v18107_v31, %v18108_v1  ;;  %v18112_v35 = vcombine.low %v18110_v47, %v18111_v8 }
 0x599   : > { %v10135_v17 = vsel %vm14073_vm13, %v10130_v25, %v10134_v53  ;;  %v11972_v15 = vcombine.low %v10173_v38, %v10183_v41  ;;  %v18115_v37 = vcombine.low %v18113_v49, %v18114_v61  ;;  %v18121_v14 = vcombine.low %v18119_v33, %v18120_v40  ;;  %v18129_v25 = vld [vmem:[#allocation69_spill] sm:$0xff]  ;;  %v18130_v53 = vld [vmem:[#allocation70_spill] sm:$0xff] }
 0x59a   : > { %v11970_v42 = vcombine.low %v10125_v16, %v10135_v17  ;;  %v18127_v29 = vcombine.low %v18125_v63, %v18126_v0  ;;  %v18131_v32 = vcombine.low %v18129_v25, %v18130_v53  ;;  %v18133_v13 = vcombine.low %v17101_v44, %v18132_v10 }
 0x59e   : > { %13065 = vmatmul.mubr.msk.bf16.gmra.mrb[20].mxu1 %vm6727_vm3, %v11968_v34  ;;  %v18123_v34 = vld [vmem:[#allocation66_spill] sm:$0xff] }
 0x59f   : > { %13068 = vmatprep.mubr.msk.bf16.mxu1 %vm6727_vm3, %v11969_v46  ;;  %v18124_v22 = vcombine.low %v18122_v18, %v18123_v34  ;;  %v18128_v46 = vcombine.low %v17076_v30, %v17084_v7  ;;  %v17644_v30 = vld [vmem:[%s17761_s4] ss:$0 sm:$0xff] }
 0x5a6   : > { %13069 = vmatmul.mubr.msk.bf16.gmra.mrb[24].mxu1 %vm6727_vm3, %v11970_v42 }
 0x5a7   : > { %13072 = vmatprep.mubr.msk.bf16.mxu1 %vm6727_vm3, %v11971_v9 }
 0x5ae   : > { %13073 = vmatmul.mubr.msk.bf16.gmra.mrb[28].mxu1 %vm6727_vm3, %v11972_v15 }
 0x5af   : > { %13084 = vmatprep.mubr.msk.bf16.mxu1 %vm6727_vm3, %v18106_v6 }
 0x5b6   : > { %13085 = vmatmul.mubr.msk.bf16.vlgmr.msra.gmra.mrb[0].mxu1 %vm6727_vm3, %v18109_v59 }
 0x5b7   : > { %13088 = vmatprep.mubr.msk.bf16.mxu1 %vm6727_vm3, %v18112_v35 }
 0x5be   : > { %13089 = vmatmul.mubr.msk.bf16.gmra.mrb[4].mxu1 %vm6727_vm3, %v18115_v37 }
 0x5bf   : > { %13092 = vmatprep.mubr.msk.bf16.mxu1 %vm6727_vm3, %v18118_v60 }
 0x5c6   : > { %13093 = vmatmul.mubr.msk.bf16.gmra.mrb[8].mxu1 %vm6727_vm3, %v18121_v14 }
 0x5c7   : > { %13096 = vmatprep.mubr.msk.bf16.mxu1 %vm6727_vm3, %v18124_v22 }
 0x5ce   : > { %13097 = vmatmul.mubr.msk.bf16.gmra.mrb[12].mxu1 %vm6727_vm3, %v18127_v29 }
 0x5cf   : > { %13100 = vmatprep.mubr.msk.bf16.mxu1 %vm6727_vm3, %v18128_v46 }
 0x5d6   : > { %13101 = vmatmul.mubr.msk.bf16.gmra.mrb[16].mxu1 %vm6727_vm3, %v18131_v32 }
 0x5d7   : > { %13104 = vmatprep.mubr.msk.bf16.mxu1 %vm6727_vm3, %v18133_v13 }
 0x5de   : > { %13105 = vmatmul.mubr.msk.bf16.gmra.mrb[20].mxu1 %vm6727_vm3, %v12020_v4 }
 0x5df   : > { %13108 = vmatprep.mubr.msk.bf16.mxu1 %vm6727_vm3, %v12021_v5 }
 0x5e6   : > { %13109 = vmatmul.mubr.msk.bf16.gmra.mrb[24].mxu1 %vm6727_vm3, %v12022_v62 }
 0x5e7   : > { %13112 = vmatprep.mubr.msk.bf16.mxu1 %vm6727_vm3, %v12023_v39 }
 0x5ee   : > { %13113 = vmatmul.mubr.msk.bf16.gmra.mrb[28].mxu1 %vm6727_vm3, %v12024_v43 }
 0x689   : > { %v13086_v7 = vpop.f32.mrb[0].mxu1 }
 0x68a   : > { %v10843_v44 = vpop.f32.mrb[1].mxu1  ;;  %v11011_v19 = vadd.f32 %v13086_v7, %v17644_v30 }
 0x68b   : > { %v11009_v3 = vadd.f32 %v17644_v30, %v10843_v44  ;;  %v13087_v2 = vpop.f32.mrb[2].mxu1 }
 0x68c   : > { %v10846_v4 = vpop.f32.mrb[3].mxu1  ;;  %v11043_v51 = vmul.f32 0.2, %v11011_v19  ;;  %v11012_v39 = vadd.f32 %v13087_v2, %v17644_v30 }
 0x68d   : > { %v11010_v57 = vadd.f32 %v17644_v30, %v10846_v4  ;;  %v11041_v21 = vmul.f32 0.2, %v11009_v3 }
 0x68e   : > { %v11044_v56 = vmul.f32 0.2, %v11012_v39  ;;  %v11075_v50 = vmax.f32 %v11011_v19, %v11043_v51 }
 0x68f   : > { %v11042_v5 = vmul.f32 0.2, %v11010_v57  ;;  %v11073_v45 = vmax.f32 %v11009_v3, %v11041_v21 }
 0x690   : > { %v11076_v48 = vmax.f32 %v11012_v39, %v11044_v56 }
 0x691   : > { %11105 = vxpose.xlu0.b32.start [1/16] (narrow) %v11073_v45, 64  ;;  %v13090_v62 = vpop.f32.mrb[4].mxu1  ;;  %v11074_v55 = vmax.f32 %v11010_v57, %v11042_v5 }
 0x692   : > { %v10859_v36 = vpop.f32.mrb[5].mxu1  ;;  %v11015_v42 = vadd.f32 %v13090_v62, %v17644_v30 }
 0x693   : > { %v13091_v20 = vpop.f32.mrb[6].mxu1  ;;  %v11013_v28 = vadd.f32 %v17644_v30, %v10859_v36 }
 0x694   : > { %v10862_v43 = vpop.f32.mrb[7].mxu1  ;;  %v11047_v15 = vmul.f32 0.2, %v11015_v42  ;;  %v11016_v11 = vadd.f32 %v13091_v20, %v17644_v30 }
 0x695   : > { %11106 = vxpose.xlu0.b32.cont [2/16] (narrow) %v11074_v55, 64  ;;  %v11045_v58 = vmul.f32 0.2, %v11013_v28  ;;  %v11014_v16 = vadd.f32 %v17644_v30, %v10862_v43 }
 0x696   : > { %v11048_v1 = vmul.f32 0.2, %v11016_v11  ;;  %v11079_v47 = vmax.f32 %v11015_v42, %v11047_v15 }
 0x697   : > { %v11046_v24 = vmul.f32 0.2, %v11014_v16  ;;  %v11077_v9 = vmax.f32 %v11013_v28, %v11045_v58 }
 0x698   : > { %v11080_v12 = vmax.f32 %v11016_v11, %v11048_v1 }
 0x699   : > { %11107 = vxpose.xlu0.b32.cont [3/16] (narrow) %v11075_v50, 64  ;;  %v13094_v54 = vpop.f32.mrb[8].mxu1  ;;  %v11078_v6 = vmax.f32 %v11014_v16, %v11046_v24 }
 0x69a   : > { %v10875_v17 = vpop.f32.mrb[9].mxu1  ;;  %v11019_v14 = vadd.f32 %v13094_v54, %v17644_v30 }
 0x69b   : > { %v13095_v23 = vpop.f32.mrb[10].mxu1  ;;  %v11017_v59 = vadd.f32 %v17644_v30, %v10875_v17 }
 0x69c   : > { %v10878_v52 = vpop.f32.mrb[11].mxu1  ;;  %v11051_v46 = vmul.f32 0.2, %v11019_v14  ;;  %v11020_v25 = vadd.f32 %v13095_v23, %v17644_v30 }
 0x69d   : > { %11108 = vxpose.xlu0.b32.cont [4/16] (narrow) %v11076_v48, 64  ;;  %v11018_v35 = vadd.f32 %v17644_v30, %v10878_v52  ;;  %v11049_v61 = vmul.f32 0.2, %v11017_v59 }
 0x69e   : > { %v11052_v2 = vmul.f32 0.2, %v11020_v25  ;;  %v11083_v19 = vmax.f32 %v11019_v14, %v11051_v46 }
 0x69f   : > { %v11050_v18 = vmul.f32 0.2, %v11018_v35  ;;  %v11081_v63 = vmax.f32 %v11017_v59, %v11049_v61 }
 0x6a0   : > { %v11084_v20 = vmax.f32 %v11020_v25, %v11052_v2 }
 0x6a1   : > { %11109 = vxpose.xlu0.b32.cont [5/16] (narrow) %v11077_v9, 64  ;;  %v17653_v38 = vpop.f32.mrb[12].mxu1  ;;  %v11082_v7 = vmax.f32 %v11018_v35, %v11050_v18 }
 0x6a2   : > { %v10891_v41 = vpop.f32.mrb[13].mxu1  ;;  %v11023_v16 = vadd.f32 %v17653_v38, %v17644_v30 }
 0x6a3   : > { %v17656_v27 = vpop.f32.mrb[14].mxu1  ;;  %v11021_v4 = vadd.f32 %v17644_v30, %v10891_v41 }
 0x6a4   : > { %v10894_v31 = vpop.f32.mrb[15].mxu1  ;;  %v11055_v41 = vmul.f32 0.2, %v11023_v16  ;;  %v11024_v15 = vadd.f32 %v17656_v27, %v17644_v30 }
 0x6a5   : > { %11110 = vxpose.xlu0.b32.cont [6/16] (narrow) %v11078_v6, 64  ;;  %v11053_v62 = vmul.f32 0.2, %v11021_v4  ;;  %v11022_v36 = vadd.f32 %v17644_v30, %v10894_v31 }
 0x6a7   : > { %v11054_v23 = vmul.f32 0.2, %v11022_v36  ;;  %v11085_v42 = vmax.f32 %v11021_v4, %v11053_v62 }
 0x6a9   : > { %11111 = vxpose.xlu0.b32.cont [7/16] (narrow) %v11079_v47, 64  ;;  %v13102_v8 = vpop.f32.mrb[16].mxu1  ;;  %v11086_v31 = vmax.f32 %v11022_v36, %v11054_v23 }
 0x6aa   : > { %v10907_v49 = vpop.f32.mrb[17].mxu1  ;;  %v11027_v34 = vadd.f32 %v13102_v8, %v17644_v30 }
 0x6ab   : > { %v11025_v37 = vadd.f32 %v17644_v30, %v10907_v49  ;;  %v13103_v26 = vpop.f32.mrb[18].mxu1 }
 0x6ac   : > { %v10910_v60 = vpop.f32.mrb[19].mxu1  ;;  %v11059_v32 = vmul.f32 0.2, %v11027_v34  ;;  %v11028_v10 = vadd.f32 %v13103_v26, %v17644_v30  ;;  %v11087_v26 = vmax.f32 %v11023_v16, %v11055_v41 }
 0x6ad   : > { %v11026_v33 = vadd.f32 %v17644_v30, %v10910_v60  ;;  %11112 = vxpose.xlu0.b32.cont [8/16] (narrow) %v11080_v12, 64  ;;  %v11057_v40 = vmul.f32 0.2, %v11025_v37 }
 0x6ae   : > { %v11060_v57 = vmul.f32 0.2, %v11028_v10  ;;  %v11091_v5 = vmax.f32 %v11027_v34, %v11059_v32 }
 0x6af   : > { %v11058_v22 = vmul.f32 0.2, %v11026_v33  ;;  %v11089_v0 = vmax.f32 %v11025_v37, %v11057_v40  ;;  %v11056_v37 = vmul.f32 0.2, %v11024_v15 }
 0x6b0   : > { %v11092_v50 = vmax.f32 %v11028_v10, %v11060_v57 }
 0x6b1   : > { %11113 = vxpose.xlu0.b32.cont [9/16] (narrow) %v11081_v63, 64  ;;  %11137 = vxpose.xlu1.b32.start [1/16] (narrow) %v11089_v0, 64  ;;  %v13106_v29 = vpop.f32.mrb[20].mxu1  ;;  %v11090_v44 = vmax.f32 %v11026_v33, %v11058_v22  ;;  %v11088_v33 = vmax.f32 %v11024_v15, %v11056_v37 }
 0x6b2   : > { %v10923_v53 = vpop.f32.mrb[21].mxu1  ;;  %v11031_v48 = vadd.f32 %v13106_v29, %v17644_v30 }
 0x6b3   : > { %v13107_v13 = vpop.f32.mrb[22].mxu1  ;;  %v11029_v21 = vadd.f32 %v17644_v30, %v10923_v53 }
 0x6b4   : > { %v10926_v3 = vpop.f32.mrb[23].mxu1  ;;  %v11063_v1 = vmul.f32 0.2, %v11031_v48  ;;  %v11032_v38 = vadd.f32 %v13107_v13, %v17644_v30 }
 0x6b5   : > { %11114 = vxpose.xlu0.b32.cont [10/16] (narrow) %v11082_v7, 64  ;;  %11138 = vxpose.xlu1.b32.cont [2/16] (narrow) %v11090_v44, 64  ;;  %v11061_v55 = vmul.f32 0.2, %v11029_v21  ;;  %v11030_v43 = vadd.f32 %v17644_v30, %v10926_v3 }
 0x6b6   : > { %v11064_v27 = vmul.f32 0.2, %v11032_v38  ;;  %v11095_v12 = vmax.f32 %v11031_v48, %v11063_v1 }
 0x6b7   : > { %v11062_v52 = vmul.f32 0.2, %v11030_v43  ;;  %v11093_v24 = vmax.f32 %v11029_v21, %v11061_v55 }
 0x6b8   : > { %v11096_v40 = vmax.f32 %v11032_v38, %v11064_v27 }
 0x6b9   : > { %11115 = vxpose.xlu0.b32.cont [11/16] (narrow) %v11083_v19, 64  ;;  %11139 = vxpose.xlu1.b32.cont [3/16] (narrow) %v11091_v5, 64  ;;  %v13110_v45 = vpop.f32.mrb[24].mxu1  ;;  %v11094_v8 = vmax.f32 %v11030_v43, %v11062_v52 }
 0x6ba   : > { %v11035_v51 = vadd.f32 %v13110_v45, %v17644_v30  ;;  %v10939_v39 = vpop.f32.mrb[25].mxu1 }
 0x6bb   : > { %v11033_v56 = vadd.f32 %v17644_v30, %v10939_v39  ;;  %v13111_v28 = vpop.f32.mrb[26].mxu1 }
 0x6bc   : > { %v11036_v54 = vadd.f32 %v13111_v28, %v17644_v30  ;;  %v10942_v17 = vpop.f32.mrb[27].mxu1  ;;  %v11067_v34 = vmul.f32 0.2, %v11035_v51 }
 0x6bd   : > { %v11034_v58 = vadd.f32 %v17644_v30, %v10942_v17  ;;  %11116 = vxpose.xlu0.b32.cont [12/16] (narrow) %v11084_v20, 64  ;;  %11140 = vxpose.xlu1.b32.cont [4/16] (narrow) %v11092_v50, 64  ;;  %v11065_v60 = vmul.f32 0.2, %v11033_v56 }
 0x6be   : > { %v11099_v63 = vmax.f32 %v11035_v51, %v11067_v34 }
 0x6bf   : > { %v11066_v14 = vmul.f32 0.2, %v11034_v58  ;;  %v11097_v18 = vmax.f32 %v11033_v56, %v11065_v60 }
 0x6c1   : > { %11117 = vxpose.xlu0.b32.cont [13/16] (narrow) %v11085_v42, 64  ;;  %11141 = vxpose.xlu1.b32.cont [5/16] (narrow) %v11093_v24, 64  ;;  %v13114_v9 = vpop.f32.mrb[28].mxu1  ;;  %v11098_v22 = vmax.f32 %v11034_v58, %v11066_v14 }
 0x6c2   : > { %v11039_v11 = vadd.f32 %v13114_v9, %v17644_v30  ;;  %v10955_v6 = vpop.f32.mrb[29].mxu1 }
 0x6c3   : > { %v11037_v59 = vadd.f32 %v17644_v30, %v10955_v6  ;;  %v13115_v47 = vpop.f32.mrb[30].mxu1 }
 0x6c4   : > { %v11040_v35 = vadd.f32 %v13115_v47, %v17644_v30  ;;  %v10958_v49 = vpop.f32.mrb[31].mxu1  ;;  %v11071_v53 = vmul.f32 0.2, %v11039_v11 }
 0x6c5   : > { %v11038_v61 = vadd.f32 %v17644_v30, %v10958_v49  ;;  %11118 = vxpose.xlu0.b32.cont [14/16] (narrow) %v11086_v31, 64  ;;  %11142 = vxpose.xlu1.b32.cont [6/16] (narrow) %v11094_v8, 64  ;;  %v11068_v30 = vmul.f32 0.2, %v11036_v54  ;;  %v11069_v0 = vmul.f32 0.2, %v11037_v59 }
 0x6c6   : > { %v11072_v10 = vmul.f32 0.2, %v11040_v35  ;;  %v11103_v13 = vmax.f32 %v11039_v11, %v11071_v53 }
 0x6c7   : > { %v11100_v29 = vmax.f32 %v11036_v54, %v11068_v30  ;;  %v11070_v46 = vmul.f32 0.2, %v11038_v61  ;;  %v11101_v25 = vmax.f32 %v11037_v59, %v11069_v0 }
 0x6c8   : > { %v11104_v7 = vmax.f32 %v11040_v35, %v11072_v10 }
 0x6c9   : > { %11119 = vxpose.xlu0.b32.cont [15/16] (narrow) %v11087_v26, 64  ;;  %11143 = vxpose.xlu1.b32.cont [7/16] (narrow) %v11095_v12, 64  ;;  %v11102_v32 = vmax.f32 %v11038_v61, %v11070_v46 }
 0x6cd   : > { %11120 = vxpose.xlu0.b32.end [16/16] (narrow) %v11088_v33, 64  ;;  %11144 = vxpose.xlu1.b32.cont [8/16] (narrow) %v11096_v40, 64 }
 0x6d1   : > { %11145 = vxpose.xlu1.b32.cont [9/16] (narrow) %v11097_v18, 64 }
 0x6d5   : > { %11146 = vxpose.xlu1.b32.cont [10/16] (narrow) %v11098_v22, 64 }
 0x6d9   : > { %11147 = vxpose.xlu1.b32.cont [11/16] (narrow) %v11099_v63, 64 }
 0x6dd   : > { %11148 = vxpose.xlu1.b32.cont [12/16] (narrow) %v11100_v29, 64 }
 0x6e1   : > { %11149 = vxpose.xlu1.b32.cont [13/16] (narrow) %v11101_v25, 64 }
 0x6e5   : > { %11150 = vxpose.xlu1.b32.cont [14/16] (narrow) %v11102_v32, 64 }
 0x6e9   : > { %11151 = vxpose.xlu1.b32.cont [15/16] (narrow) %v11103_v13, 64 }
 0x6ed   : > { %11152 = vxpose.xlu1.b32.end [16/16] (narrow) %v11104_v7, 64 }
 0x711   : > { %v11121_v44 = vpop.trf.xlu0 }
 0x712   : > { %11169 = vst [vmem:[%s17687_s14] sm:$0xff] %v11121_v44 }
 0x715   : > { %v11122_v3 = vpop.trf.xlu0 }
 0x716   : > { %11171 = vst [vmem:[%s17687_s14 + $0x10] sm:$0xff] %v11122_v3 }
 0x719   : > { %v11123_v2 = vpop.trf.xlu0 }
 0x71a   : > { %11173 = vst [vmem:[%s17687_s14 + $0x20] sm:$0xff] %v11123_v2 }
 0x71d   : > { %v11124_v4 = vpop.trf.xlu0 }
 0x71e   : > { %11175 = vst [vmem:[%s17687_s14 + $0x30] sm:$0xff] %v11124_v4 }
 0x721   : > { %v11125_v57 = vpop.trf.xlu0 }
 0x722   : > { %11177 = vst [vmem:[%s17687_s14 + $0x40] sm:$0xff] %v11125_v57 }
 0x725   : > { %v11126_v21 = vpop.trf.xlu0 }
 0x726   : > { %11179 = vst [vmem:[%s17687_s14 + $0x50] sm:$0xff] %v11126_v21 }
 0x729   : > { %v11127_v19 = vpop.trf.xlu0 }
 0x72a   : > { %11181 = vst [vmem:[%s17687_s14 + $0x60] sm:$0xff] %v11127_v19 }
 0x72d   : > { %v11128_v5 = vpop.trf.xlu0 }
 0x72e   : > { %11183 = vst [vmem:[%s17687_s14 + $0x70] sm:$0xff] %v11128_v5 }
 0x731   : > { %v11153_v45 = vpop.trf.xlu1 }
 0x732   : > { %11170 = vst [vmem:[%s17687_s14 + $0x8] sm:$0xff] %v11153_v45 }
 0x735   : > { %v11154_v62 = vpop.trf.xlu1 }
 0x736   : > { %11172 = vst [vmem:[%s17687_s14 + $0x18] sm:$0xff] %v11154_v62 }
 0x739   : > { %v11155_v36 = vpop.trf.xlu1 }
 0x73a   : > { %11174 = vst [vmem:[%s17687_s14 + $0x28] sm:$0xff] %v11155_v36 }
 0x73d   : > { %v11156_v51 = vpop.trf.xlu1 }
 0x73e   : > { %11176 = vst [vmem:[%s17687_s14 + $0x38] sm:$0xff] %v11156_v51 }
 0x741   : > { %v11157_v39 = vpop.trf.xlu1 }
 0x742   : > { %11178 = vst [vmem:[%s17687_s14 + $0x48] sm:$0xff] %v11157_v39 }
 0x745   : > { %v11158_v20 = vpop.trf.xlu1 }
 0x746   : > { %11180 = vst [vmem:[%s17687_s14 + $0x58] sm:$0xff] %v11158_v20 }
 0x749   : > { %v11159_v55 = vpop.trf.xlu1 }
 0x74a   : > { %11182 = vst [vmem:[%s17687_s14 + $0x68] sm:$0xff] %v11159_v55 }
 0x74d   : > { %v11160_v43 = vpop.trf.xlu1 }
 0x74e   : > { %11184 = vst [vmem:[%s17687_s14 + $0x78] sm:$0xff] %v11160_v43 }
 0x74f   : > { %13868 = shalt.err (!%p13865_p3)
}
 0x750   : > { %s13869_s8 = scalar_lea.hbm %s17709_s25, 2048  ;;  %s13873_s11 = scalar_lea.hbm %s17762_s5, 4096 }
 0x751   : > { %p13870_p4 = scmp.ne.s32.totalorder %s17709_s25, %s13869_s8  ;;  %p13874_p9 = scmp.lt.u32.totalorder %s17709_s25, %s17762_s5 }
 0x752   : > { %p13875_p10 = scmp.lt.u32.totalorder %s13873_s11, %s13869_s8  ;;  %p13877_p12 = scmp.lt.u32.totalorder %s13869_s8, %s17709_s25 }
 0x753   : > { %p13871_p7 = pnand %p13870_p4, %p13991_p5 }
 0x754   : > { %p13876_p11 = por %p13875_p10, %p13874_p9 }
 0x755   : > { %p13872_p8 = pneg %p13871_p7 }
 0x756   : > { %p13878_p13 = por %p13877_p12, %p13876_p11 }
 0x758   : > { %p13879_p0 = pnand %p13878_p13, %p13872_p8 }
 0x75a   : > { %13882 = shalt.err (!%p13879_p0)
}
 0x75b   : > { %s13921_s14 = smov 256   ;;  %s13922_s15 = smov 16  }
 0x75c   : > { %13637 = dma.vmem_to_hbm [thread:$0]  (%p13991_p5), %s17711_s16, 2048, %s17709_s25, %s17716_s26, %s13921_s14, %s13921_s14, %s13922_s15  }
 0x75d PF: > { %p13643_p1 = scmp.ge.s32.totalorder %s13917_s21, 2  ;;  %s11214_s17 = sand.u32 1, %s13905_s18  }
 0x75e   : > { %s11215_s23 = scalar_lea.sflag [#allocation5], %s11214_s17 }
 0x75f   : > { %p13640_p2 = pnand %p13643_p1, %p13995_p6 }
 0x761   : > { %13900 = dma.done.wait (!%p13640_p2), %s11215_s23, 2048  }
 0x762   : > { %13902 = vsyncadd (!%p13640_p2), %s11215_s23, 4294965248  ;;  %p15_p3 = scmp.ge.s32.totalorder %s13978_s24, 4   ;;  %s18134_s18 = smov %s13909_s19 }
 0x763   : > { %s18135_s19 = smov %s13913_s20  ;;  %s18136_s20 = smov %s13989_s27 }
 0x764   : > { %s18137_s21 = smov %s13978_s24  ;;  %17 = sbr.rel (!%p15_p3) target bundleno = 3 (0x3), region = 81 }
 0x76b   :  { %11220 = vsyncpa [#allocation5], 1 }
 0x76c   :  { %11222 = vsyncpa [#allocation5 + $0x1], 1 }

</bundles_post_ra>
